<compile_context>
chip_gen: v7x
topology: tpu7x:2x2x1
jax: 0.10.0
libtpu: 0.0.40
codegen_flags: <defaults>
</compile_context>

<pallas_src>
import jax
import jax.numpy as jnp
from jax.experimental import pallas as pl
from jax.experimental.pallas import tpu as pltpu

IMAGE_FEATURES = 784
HIDDEN0 = 2048
HIDDEN1 = 512
LATENT = 10
HEAD_PAD = 128          # [mean(10) | log_var(10) | zeros] in one lane register


def _encoder_kernel(x_ref, w1_ref, s1_ref, b1_ref, w2_ref, s2_ref, b2_ref,
                    wh_ref, bh_ref, out_ref):
    # Layer 1: int8 weights dequantized on the fly (per-output-column scale
    # applied after the f32 MXU accumulation), then bias + ReLU.
    w1 = w1_ref[...].astype(jnp.bfloat16)
    h1 = jnp.dot(x_ref[...], w1, preferred_element_type=jnp.float32)
    h1 = jnp.maximum(h1 * s1_ref[...] + b1_ref[...], 0.0)

    # Layer 2: same weight-only int8 scheme.
    w2 = w2_ref[...].astype(jnp.bfloat16)
    h2 = jnp.dot(h1.astype(jnp.bfloat16), w2, preferred_element_type=jnp.float32)
    h2 = jnp.maximum(h2 * s2_ref[...] + b2_ref[...], 0.0)

    # Folded (512 -> [mean | log_var | pad]) head: bf16 weights, f32 accumulate.
    out_ref[...] = (jnp.dot(h2.astype(jnp.bfloat16), wh_ref[...],
                            preferred_element_type=jnp.float32)
                    + bh_ref[...]).astype(out_ref.dtype)


@jax.jit
def encoder_wrapper_forward(x, params):
    """x: (B, C, H, W) with C*H*W == 784. Returns (mean, log_var), each (B, 10)."""
    b = x.shape[0]
    # Same element order as torch x.view(B, -1); bf16 feed, f32 accumulation.
    x2d = x.reshape(b, -1).astype(jnp.bfloat16)

    (w1_q, s1, b1, w2_q, s2, b2, wh, bh) = params

    flops = 2 * b * (IMAGE_FEATURES * HIDDEN0 + HIDDEN0 * HIDDEN1
                     + HIDDEN1 * HEAD_PAD)
    bytes_accessed = (w1_q.size + w2_q.size                       # int8 weights
                      + wh.size * 2                               # bf16 head
                      + (s1.size + b1.size + s2.size + b2.size + bh.size) * 4
                      + x2d.size * 2 + b * HEAD_PAD * 4)

    vmem_spec = pl.BlockSpec(memory_space=pltpu.MemorySpace.VMEM)
    out = pl.pallas_call(
        _encoder_kernel,
        out_shape=jax.ShapeDtypeStruct((b, HEAD_PAD), jnp.float32),
        in_specs=[vmem_spec] * 9,
        out_specs=vmem_spec,
        compiler_params=pltpu.CompilerParams(vmem_limit_bytes=32 << 20),
        cost_estimate=pl.CostEstimate(flops=flops, transcendentals=0,
                                      bytes_accessed=bytes_accessed),
    )(x2d, w1_q, s1, b1, w2_q, s2, b2, wh, bh)

    return out[:, :LATENT], out[:, LATENT:2 * LATENT]


def _quantize_int8_per_col(w):
    """Symmetric per-output-column int8 weight-only quantization."""
    absmax = jnp.max(jnp.abs(w), axis=0, keepdims=True)
    scale = jnp.maximum(absmax, 1e-8) / 127.0
    w_q = jnp.clip(jnp.round(w / scale), -127.0, 127.0).astype(jnp.int8)
    return w_q, scale.astype(jnp.float32)


def init_params(key):
    """Synthetic init mimicking nn.Linear's U(-1/sqrt(fan_in), +1/sqrt(fan_in))."""
    ks = jax.random.split(key, 10)

    def linear(kw, kb, fan_in, fan_out):
        bound = 1.0 / jnp.sqrt(jnp.float32(fan_in))
        w = jax.random.uniform(kw, (fan_in, fan_out), jnp.float32, -bound, bound)
        bvec = jax.random.uniform(kb, (1, fan_out), jnp.float32, -bound, bound)
        return w, bvec

    w1, b1 = linear(ks[0], ks[1], IMAGE_FEATURES, HIDDEN0)
    w2, b2 = linear(ks[2], ks[3], HIDDEN0, HIDDEN1)
    w3, b3 = linear(ks[4], ks[5], HIDDEN1, LATENT)
    wm, bm = linear(ks[6], ks[7], LATENT, LATENT)
    wv, bv = linear(ks[8], ks[9], LATENT, LATENT)

    # Fold head layers into the third linear (exact affine composition, f32):
    #   out[:, :10]   = (h2 @ w3 + b3) @ wm + bm = h2 @ (w3@wm) + (b3@wm + bm)
    #   out[:, 10:20] = (h2 @ w3 + b3) @ wv + bv = h2 @ (w3@wv) + (b3@wv + bv)
    # Columns 20..127 must stay zero (contract for externally supplied params).
    wh = jnp.zeros((HIDDEN1, HEAD_PAD), jnp.float32)
    wh = wh.at[:, :LATENT].set(w3 @ wm)
    wh = wh.at[:, LATENT:2 * LATENT].set(w3 @ wv)
    bh = jnp.zeros((1, HEAD_PAD), jnp.float32)
    bh = bh.at[:, :LATENT].set(b3 @ wm + bm)
    bh = bh.at[:, LATENT:2 * LATENT].set(b3 @ wv + bv)

    w1_q, s1 = _quantize_int8_per_col(w1)
    w2_q, s2 = _quantize_int8_per_col(w2)

    kernel_params = (w1_q, s1, b1, w2_q, s2, b2, wh.astype(jnp.bfloat16), bh)
    raw_params = (w1, b1, w2, b2, w3, b3, wm, bm, wv, bv)
    return kernel_params, raw_params


def reference_forward(x, raw_params):
    """Pure-JAX f32 reference of EncoderWrapper.forward for validation."""
    w1, b1, w2, b2, w3, b3, wm, bm, wv, bv = raw_params
    x2d = x.reshape(x.shape[0], -1).astype(jnp.float32)
    h1 = jnp.maximum(x2d @ w1 + b1, 0.0)
    h2 = jnp.maximum(h1 @ w2 + b2, 0.0)
    lat = h2 @ w3 + b3
    return lat @ wm + bm, lat @ wv + bv


if __name__ == "__main__":
    key = jax.random.PRNGKey(0)
    kx, kp = jax.random.split(key)

    # Batch=8, NCHW with 1x28x28 = 784 features (implied by the encoder's first Linear).
    x = jax.random.normal(kx, (8, 1, 28, 28), dtype=jnp.float32)

    kernel_params, raw_params = init_params(kp)

    mean, log_var = encoder_wrapper_forward(x, kernel_params)
    jax.block_until_ready((mean, log_var))

    mean_ref, log_var_ref = reference_forward(x, raw_params)
    assert mean.shape == (8, LATENT) and log_var.shape == (8, LATENT)
    # Tolerance covers bf16 activations + per-column int8 weight quantization
    # (measured error is ~1e-3, well inside this budget).
    assert jnp.allclose(mean, mean_ref, atol=2e-2, rtol=2e-2)
    assert jnp.allclose(log_var, log_var_ref, atol=2e-2, rtol=2e-2)

    print("KERNEL_OK")
</pallas_src>

<mosaic_0001>
module attributes {stable_mosaic.version = 11 : i64} {
  func.func @_encoder_kernel(%arg0: memref<8x784xbf16, #tpu.memory_space<vmem>>, %arg1: memref<784x2048xi8, #tpu.memory_space<vmem>>, %arg2: memref<1x2048xf32, #tpu.memory_space<vmem>>, %arg3: memref<1x2048xf32, #tpu.memory_space<vmem>>, %arg4: memref<2048x512xi8, #tpu.memory_space<vmem>>, %arg5: memref<1x512xf32, #tpu.memory_space<vmem>>, %arg6: memref<1x512xf32, #tpu.memory_space<vmem>>, %arg7: memref<512x128xbf16, #tpu.memory_space<vmem>>, %arg8: memref<1x128xf32, #tpu.memory_space<vmem>>, %arg9: memref<8x128xf32, #tpu.memory_space<vmem>>) attributes {dimension_semantics = [], scalar_prefetch = 0 : i64, scratch_operands = 0 : i64, tpu.core_type = #tpu.core_type<tc>} {
    %c0 = arith.constant 0 : index
    %c0_0 = arith.constant 0 : index
    %0 = vector.load %arg1[%c0, %c0_0] : memref<784x2048xi8, #tpu.memory_space<vmem>>, vector<784x2048xi8>
    %1 = arith.sitofp %0 : vector<784x2048xi8> to vector<784x2048xbf16>
    %c0_1 = arith.constant 0 : index
    %c0_2 = arith.constant 0 : index
    %2 = vector.load %arg0[%c0_1, %c0_2] : memref<8x784xbf16, #tpu.memory_space<vmem>>, vector<8x784xbf16>
    %cst = arith.constant dense<0.000000e+00> : vector<8x2048xf32>
    %3 = tpu.matmul %2, %1, %cst {dimension_numbers = #tpu.dot_dimension_numbers<[1], [0], [0], [1], [0, 0, 1, 1], [], []>} : vector<8x784xbf16>, vector<784x2048xbf16>, vector<8x2048xf32> -> vector<8x2048xf32>
    %c0_3 = arith.constant 0 : index
    %c0_4 = arith.constant 0 : index
    %4 = vector.load %arg2[%c0_3, %c0_4] : memref<1x2048xf32, #tpu.memory_space<vmem>>, vector<1x2048xf32>
    %5 = vector.broadcast %4 : vector<1x2048xf32> to vector<8x2048xf32>
    %6 = arith.mulf %3, %5 : vector<8x2048xf32>
    %c0_5 = arith.constant 0 : index
    %c0_6 = arith.constant 0 : index
    %7 = vector.load %arg3[%c0_5, %c0_6] : memref<1x2048xf32, #tpu.memory_space<vmem>>, vector<1x2048xf32>
    %8 = vector.broadcast %7 : vector<1x2048xf32> to vector<8x2048xf32>
    %9 = arith.addf %6, %8 : vector<8x2048xf32>
    %cst_7 = arith.constant 0.000000e+00 : f32
    %10 = vector.broadcast %cst_7 : f32 to vector<8x2048xf32>
    %11 = arith.maximumf %9, %10 : vector<8x2048xf32>
    %c0_8 = arith.constant 0 : index
    %c0_9 = arith.constant 0 : index
    %12 = vector.load %arg4[%c0_8, %c0_9] : memref<2048x512xi8, #tpu.memory_space<vmem>>, vector<2048x512xi8>
    %13 = arith.sitofp %12 : vector<2048x512xi8> to vector<2048x512xbf16>
    %14 = arith.truncf %11 : vector<8x2048xf32> to vector<8x2048xbf16>
    %cst_10 = arith.constant dense<0.000000e+00> : vector<8x512xf32>
    %15 = tpu.matmul %14, %13, %cst_10 {dimension_numbers = #tpu.dot_dimension_numbers<[1], [0], [0], [1], [0, 0, 1, 1], [], []>} : vector<8x2048xbf16>, vector<2048x512xbf16>, vector<8x512xf32> -> vector<8x512xf32>
    %c0_11 = arith.constant 0 : index
    %c0_12 = arith.constant 0 : index
    %16 = vector.load %arg5[%c0_11, %c0_12] : memref<1x512xf32, #tpu.memory_space<vmem>>, vector<1x512xf32>
    %17 = vector.broadcast %16 : vector<1x512xf32> to vector<8x512xf32>
    %18 = arith.mulf %15, %17 : vector<8x512xf32>
    %c0_13 = arith.constant 0 : index
    %c0_14 = arith.constant 0 : index
    %19 = vector.load %arg6[%c0_13, %c0_14] : memref<1x512xf32, #tpu.memory_space<vmem>>, vector<1x512xf32>
    %20 = vector.broadcast %19 : vector<1x512xf32> to vector<8x512xf32>
    %21 = arith.addf %18, %20 : vector<8x512xf32>
    %cst_15 = arith.constant 0.000000e+00 : f32
    %22 = vector.broadcast %cst_15 : f32 to vector<8x512xf32>
    %23 = arith.maximumf %21, %22 : vector<8x512xf32>
    %24 = arith.truncf %23 : vector<8x512xf32> to vector<8x512xbf16>
    %c0_16 = arith.constant 0 : index
    %c0_17 = arith.constant 0 : index
    %25 = vector.load %arg7[%c0_16, %c0_17] : memref<512x128xbf16, #tpu.memory_space<vmem>>, vector<512x128xbf16>
    %cst_18 = arith.constant dense<0.000000e+00> : vector<8x128xf32>
    %26 = tpu.matmul %24, %25, %cst_18 {dimension_numbers = #tpu.dot_dimension_numbers<[1], [0], [0], [1], [0, 0, 1, 1], [], []>} : vector<8x512xbf16>, vector<512x128xbf16>, vector<8x128xf32> -> vector<8x128xf32>
    %c0_19 = arith.constant 0 : index
    %c0_20 = arith.constant 0 : index
    %27 = vector.load %arg8[%c0_19, %c0_20] : memref<1x128xf32, #tpu.memory_space<vmem>>, vector<1x128xf32>
    %28 = vector.broadcast %27 : vector<1x128xf32> to vector<8x128xf32>
    %29 = arith.addf %26, %28 : vector<8x128xf32>
    %c0_21 = arith.constant 0 : index
    %c0_22 = arith.constant 0 : index
    %30 = vector.load %arg9[%c0_21, %c0_22] : memref<8x128xf32, #tpu.memory_space<vmem>>, vector<8x128xf32>
    tpu.vector_store %arg9[%c0_21, %c0_22], %29 {strides = array<i32>} : memref<8x128xf32, #tpu.memory_space<vmem>>, vector<8x128xf32>,
    return
  }
}

</mosaic_0001>

<bundles_post_ra>
// kernel: encoder_wrapper_forward.1
= control target key start
LH: loop header
LB: loop body
LE: loop exit
PB: predicated region body
PF: predicated region fallthrough
CT: control target
= control target key end

     0   :  { %14 = vsyncpa [#allocation3], 0  ;;  %s10359_s0 = inlined_call_operand.vmem [shape: bf16[8,784], index: 0, kind: input, shape index: {}]   ;;  %s10360_s1 = inlined_call_operand.hbm [shape: s8[784,2048], index: 1, kind: input, shape index: {}]   ;;  %s10361_s2 = inlined_call_operand.hbm [shape: f32[1,2048], index: 2, kind: input, shape index: {}]   ;;  %s10362_s3 = inlined_call_operand.hbm [shape: f32[1,2048], index: 3, kind: input, shape index: {}]   ;;  %s10363_s4 = inlined_call_operand.hbm [shape: s8[2048,512], index: 4, kind: input, shape index: {}]   ;;  %s10364_s5 = inlined_call_operand.hbm [shape: f32[1,512], index: 5, kind: input, shape index: {}]   ;;  %s10365_s6 = inlined_call_operand.hbm [shape: f32[1,512], index: 6, kind: input, shape index: {}]   ;;  %s10366_s7 = inlined_call_operand.hbm [shape: bf16[512,128], index: 7, kind: input, shape index: {}]   ;;  %s10367_s8 = inlined_call_operand.hbm [shape: f32[1,128], index: 8, kind: input, shape index: {}]   ;;  %s10368_s9 = inlined_call_operand.vmem [shape: f32[8,128], index: 9, kind: output, shape index: {}]  }
   0x1   :  { %15 = vsyncpa [#allocation5], 0 }
   0x2   :  { %16 = vsyncpa [#allocation8], 0 }
   0x3   :  { %17 = vsyncpa [#allocation11], 0 }
   0x4   :  { %18 = vsyncpa [#allocation14], 0  ;;  %s9914_s30 = smov [#allocation4]   ;;  %s9728_s13 = scalar_lea.hbm %s10361_s2, 256 }
   0x5   :  { %s39_s10 = sshll.u32 %s9914_s30, 4  ;;  %p9729_p0 = scmp.ne.s32.totalorder %s10361_s2, %s9728_s13  ;;  %s40_s10 = int_to_ptr.vmem [resolvable:$true] %s39_s10 }
   0x6   :  { %p9732_p1 = scmp.lt.u32.totalorder %s9728_s13, %s10361_s2 }
   0x8   :  { %p9734_p2 = pnand %p9732_p1, %p9729_p0 }
   0xa   :  { %9737 = shalt.err (!%p9734_p2)
}
   0xb   :  { %s9738_s18 = scalar_lea.vmem %s40_s10, 256  ;;  %p9743_p4 = scmp.lt.s32.totalorder %s40_s10, %s40_s10 }
   0xc   :  { %p9739_p3 = scmp.ne.s32.totalorder %s40_s10, %s9738_s18  ;;  %p9744_p5 = scmp.lt.s32.totalorder %s9738_s18, %s9738_s18 }
   0xe   :  { %p9745_p6 = por %p9744_p5, %p9743_p4 }
  0x10   :  { %p9746_p7 = pnand %p9745_p6, %p9739_p3 }
  0x12   :  { %9749 = shalt.err (!%p9746_p7)
}
  0x13   :  { %42 = dma.hbm_to_vmem [thread:$0]  %s10361_s2, 256, %s40_s10, [#allocation5]  }
  0x14   :  { %s9915_s21 = smov [#allocation7]   ;;  %s9916_s23 = smov [#allocation10]  }
  0x15   :  { %s58_s22 = sshll.u32 %s9915_s21, 4  ;;  %s81_s24 = sshll.u32 %s9916_s23, 4  ;;  %s59_s22 = int_to_ptr.vmem [resolvable:$true] %s58_s22  ;;  %s82_s24 = int_to_ptr.vmem [resolvable:$true] %s81_s24 }
  0x16   :  { %s9750_s27 = scalar_lea.hbm %s10363_s4, 32768 }
  0x17   :  { %p9751_p8 = scmp.ne.s32.totalorder %s10363_s4, %s9750_s27  ;;  %p9754_p9 = scmp.lt.u32.totalorder %s9750_s27, %s10363_s4 }
  0x19   :  { %p9756_p10 = pnand %p9754_p9, %p9751_p8 }
  0x1b   :  { %9759 = shalt.err (!%p9756_p10)
}
  0x1c   :  { %s9760_s2 = scalar_lea.vmem %s59_s22, 32768  ;;  %p9765_p12 = scmp.lt.s32.totalorder %s59_s22, %s59_s22 }
  0x1d   :  { %p9761_p11 = scmp.ne.s32.totalorder %s59_s22, %s9760_s2  ;;  %p9766_p13 = scmp.lt.s32.totalorder %s9760_s2, %s9760_s2 }
  0x1f   :  { %p9767_p0 = por %p9766_p13, %p9765_p12 }
  0x21   :  { %p9768_p1 = pnand %p9767_p0, %p9761_p11 }
  0x23   :  { %9771 = shalt.err (!%p9768_p1)
}
  0x24   :  { %s9917_s10 = smov 512   ;;  %s9918_s12 = smov 32  }
  0x25   :  { %64 = dma.hbm_to_vmem [thread:$0]  %s10363_s4, 32768, %s59_s22, [#allocation8], %s9917_s10, %s9917_s10, %s9918_s12  }
  0x26   :  { %s9772_s17 = scalar_lea.hbm %s10365_s6, 64 }
  0x27   :  { %p9773_p2 = scmp.ne.s32.totalorder %s10365_s6, %s9772_s17  ;;  %p9776_p3 = scmp.lt.u32.totalorder %s9772_s17, %s10365_s6 }
  0x29   :  { %p9778_p4 = pnand %p9776_p3, %p9773_p2 }
  0x2b   :  { %9781 = shalt.err (!%p9778_p4)
}
  0x2c   :  { %s9782_s23 = scalar_lea.vmem %s82_s24, 64  ;;  %p9787_p6 = scmp.lt.s32.totalorder %s82_s24, %s82_s24 }
  0x2d   :  { %p9783_p5 = scmp.ne.s32.totalorder %s82_s24, %s9782_s23  ;;  %p9788_p7 = scmp.lt.s32.totalorder %s9782_s23, %s9782_s23 }
  0x2f   :  { %p9789_p8 = por %p9788_p7, %p9787_p6 }
  0x31   :  { %p9790_p9 = pnand %p9789_p8, %p9783_p5 }
  0x33   :  { %9793 = shalt.err (!%p9790_p9)
}
  0x34   :  { %84 = dma.hbm_to_vmem [thread:$0]  %s10365_s6, 64, %s82_s24, [#allocation11]  }
  0x35   :  { %s9919_s25 = smov [#allocation2]   ;;  %s9920_s27 = smov [#allocation6]  }
  0x36   :  { %s26_s26 = sshll.u32 %s9919_s25, 4  ;;  %s49_s28 = sshll.u32 %s9920_s27, 4  ;;  %s27_s26 = int_to_ptr.vmem [resolvable:$true] %s26_s26  ;;  %s50_s28 = int_to_ptr.vmem [resolvable:$true] %s49_s28 }
  0x37   :  { %s9794_s11 = scalar_lea.hbm %s10360_s1, 50176 }
  0x38   :  { %p9795_p10 = scmp.ne.s32.totalorder %s10360_s1, %s9794_s11  ;;  %p9798_p11 = scmp.lt.u32.totalorder %s9794_s11, %s10360_s1 }
  0x3a   :  { %p9800_p12 = pnand %p9798_p11, %p9795_p10 }
  0x3c   :  { %9803 = shalt.err (!%p9800_p12)
}
  0x3d   :  { %s9804_s6 = scalar_lea.vmem %s27_s26, 50176  ;;  %p9809_p0 = scmp.lt.s32.totalorder %s27_s26, %s27_s26 }
  0x3e   :  { %p9805_p13 = scmp.ne.s32.totalorder %s27_s26, %s9804_s6  ;;  %p9810_p1 = scmp.lt.s32.totalorder %s9804_s6, %s9804_s6 }
  0x40   :  { %p9811_p2 = por %p9810_p1, %p9809_p0 }
  0x42   :  { %p9812_p3 = pnand %p9811_p2, %p9805_p13 }
  0x44   :  { %9815 = shalt.err (!%p9812_p3)
}
  0x45   :  { %32 = dma.hbm_to_vmem [thread:$0]  %s10360_s1, 50176, %s27_s26, [#allocation3], %s9917_s10, %s9917_s10, %s9918_s12  }
  0x46   :  { %s9816_s19 = scalar_lea.hbm %s10362_s3, 256 }
  0x47   :  { %p9817_p4 = scmp.ne.s32.totalorder %s10362_s3, %s9816_s19  ;;  %p9820_p5 = scmp.lt.u32.totalorder %s9816_s19, %s10362_s3 }
  0x49   :  { %p9822_p6 = pnand %p9820_p5, %p9817_p4 }
  0x4b   :  { %9825 = shalt.err (!%p9822_p6)
}
  0x4c   :  { %s9826_s22 = scalar_lea.vmem %s50_s28, 256  ;;  %p9831_p8 = scmp.lt.s32.totalorder %s50_s28, %s50_s28 }
  0x4d   :  { %p9827_p7 = scmp.ne.s32.totalorder %s50_s28, %s9826_s22  ;;  %p9832_p9 = scmp.lt.s32.totalorder %s9826_s22, %s9826_s22 }
  0x4f   :  { %p9833_p10 = por %p9832_p9, %p9831_p8 }
  0x51   :  { %p9834_p11 = pnand %p9833_p10, %p9827_p7 }
  0x53   :  { %9837 = shalt.err (!%p9834_p11)
}
  0x54   :  { %52 = dma.hbm_to_vmem [thread:$0]  %s10362_s3, 256, %s50_s28, [#allocation5]  }
  0x55   :  { %s9921_s12 = smov [#allocation9]   ;;  %s9922_s26 = smov [#allocation12]  }
  0x56   :  { %s71_s25 = sshll.u32 %s9921_s12, 4  ;;  %s90_s27 = sshll.u32 %s9922_s26, 4  ;;  %s72_s25 = int_to_ptr.vmem [resolvable:$true] %s71_s25  ;;  %s91_s27 = int_to_ptr.vmem [resolvable:$true] %s90_s27 }
  0x57   :  { %s9838_s11 = scalar_lea.hbm %s10364_s5, 64 }
  0x58   :  { %p9839_p12 = scmp.ne.s32.totalorder %s10364_s5, %s9838_s11  ;;  %p9842_p13 = scmp.lt.u32.totalorder %s9838_s11, %s10364_s5 }
  0x5a   :  { %p9844_p0 = pnand %p9842_p13, %p9839_p12 }
  0x5c   :  { %9847 = shalt.err (!%p9844_p0)
}
  0x5d   :  { %s9848_s3 = scalar_lea.vmem %s72_s25, 64  ;;  %p9853_p2 = scmp.lt.s32.totalorder %s72_s25, %s72_s25 }
  0x5e   :  { %p9849_p1 = scmp.ne.s32.totalorder %s72_s25, %s9848_s3  ;;  %p9854_p3 = scmp.lt.s32.totalorder %s9848_s3, %s9848_s3 }
  0x60   :  { %p9855_p4 = por %p9854_p3, %p9853_p2 }
  0x62   :  { %p9856_p5 = pnand %p9855_p4, %p9849_p1 }
  0x64   :  { %9859 = shalt.err (!%p9856_p5)
}
  0x65   :  { %74 = dma.hbm_to_vmem [thread:$0]  %s10364_s5, 64, %s72_s25, [#allocation8]  }
  0x66   :  { %s9860_s17 = scalar_lea.hbm %s10366_s7, 4096 }
  0x67   :  { %p9861_p6 = scmp.ne.s32.totalorder %s10366_s7, %s9860_s17  ;;  %p9864_p7 = scmp.lt.u32.totalorder %s9860_s17, %s10366_s7 }
  0x69   :  { %p9866_p8 = pnand %p9864_p7, %p9861_p6 }
  0x6b   :  { %9869 = shalt.err (!%p9866_p8)
}
  0x6c   :  { %s9870_s23 = scalar_lea.vmem %s91_s27, 4096  ;;  %p9875_p10 = scmp.lt.s32.totalorder %s91_s27, %s91_s27 }
  0x6d   :  { %p9871_p9 = scmp.ne.s32.totalorder %s91_s27, %s9870_s23  ;;  %p9876_p11 = scmp.lt.s32.totalorder %s9870_s23, %s9870_s23 }
  0x6f   :  { %p9877_p12 = por %p9876_p11, %p9875_p10 }
  0x71   :  { %p9878_p13 = pnand %p9877_p12, %p9871_p9 }
  0x73   :  { %9881 = shalt.err (!%p9878_p13)
}
  0x74   :  { %s9923_s5 = smov 64   ;;  %s9924_s4 = smov 4  }
  0x75   :  { %96 = dma.hbm_to_vmem [thread:$0]  %s10366_s7, 4096, %s91_s27, [#allocation11], %s9923_s5, %s9923_s5, %s9924_s4  }
  0x76   :  { %s9925_s10 = smov [#allocation13]   ;;  %s9882_s29 = scalar_lea.hbm %s10367_s8, 16 }
  0x77   :  { %s103_s12 = sshll.u32 %s9925_s10, 4  ;;  %p9883_p0 = scmp.ne.s32.totalorder %s10367_s8, %s9882_s29  ;;  %s104_s12 = int_to_ptr.vmem [resolvable:$true] %s103_s12 }
  0x78   :  { %p9886_p1 = scmp.lt.u32.totalorder %s9882_s29, %s10367_s8 }
  0x7a   :  { %p9888_p2 = pnand %p9886_p1, %p9883_p0 }
  0x7c   :  { %9891 = shalt.err (!%p9888_p2)
}
  0x7d   :  { %s9892_s14 = scalar_lea.vmem %s104_s12, 16  ;;  %s9896_s7 = scalar_lea.vmem %s104_s12, 32 }
  0x7e   :  { %p9893_p3 = scmp.ne.s32.totalorder %s104_s12, %s9892_s14  ;;  %p9897_p4 = scmp.lt.s32.totalorder %s104_s12, %s104_s12 }
  0x7f   :  { %p9898_p5 = scmp.lt.s32.totalorder %s9896_s7, %s9892_s14 }
  0x81   :  { %p9899_p6 = por %p9898_p5, %p9897_p4 }
  0x83   :  { %p9900_p7 = pnand %p9899_p6, %p9893_p3 }
  0x85   :  { %9903 = shalt.err (!%p9900_p7)
}
  0x86   :  { %106 = dma.hbm_to_vmem [thread:$0]  %s10367_s8, 16, %s104_s12, [#allocation14]  }
  0x87   :  { %9904 = dma.done.wait [#allocation3], 50176  }
  0x88   :  { %9905 = vsyncadd [#allocation3], 4294917120 }
  0x89   :  { %9906 = dma.done.wait [#allocation5], 512  }
  0x8a   :  { %9907 = vsyncadd [#allocation5], 4294966784 }
  0x8b   :  { %9908 = dma.done.wait [#allocation8], 32832  }
  0x8c   :  { %9909 = vsyncadd [#allocation8], 4294934464 }
  0x8d   :  { %9910 = dma.done.wait [#allocation11], 4160  }
  0x8e   :  { %9911 = vsyncadd [#allocation11], 4294963136 }
  0x8f   :  { %9912 = dma.done.wait [#allocation14], 16  }
  0x90   :  { %9913 = vsyncadd [#allocation14], 4294967280  ;;  %v132_v0 = vld [vmem:[#allocation2] sm:$0xff]  ;;  %vm5256_vm0 = vcmask 130048  }
  0x91   :  { %v136_v1 = vld [vmem:[#allocation2 + $0x20] sm:$0xff]  ;;  %v524_v3 = vunpack.c.l.s8.bf16 %v132_v0  ;;  %v525_v5 = vunpack.c.h.s8.bf16 %v132_v0 }
  0x92   :  { %v140_v2 = vld [vmem:[#allocation2 + $0x40] sm:$0xff]  ;;  %v532_v4 = vunpack.c.l.s8.bf16 %v136_v1  ;;  %v533_v6 = vunpack.c.h.s8.bf16 %v136_v1 }
  0x93   :  { %v144_v7 = vld [vmem:[#allocation2 + $0x60] sm:$0xff]  ;;  %v540_v8 = vunpack.c.l.s8.bf16 %v140_v2  ;;  %v541_v10 = vunpack.c.h.s8.bf16 %v140_v2 }
  0x94   :  { %v548_v9 = vunpack.c.l.s8.bf16 %v144_v7  ;;  %v549_v11 = vunpack.c.h.s8.bf16 %v144_v7  ;;  %v148_v12 = vld [vmem:[#allocation2 + $0x80] sm:$0xff]  ;;  %v8649_v14 = vcombine.high %v524_v3, %v532_v4  ;;  %v8651_v15 = vcombine.high %v525_v5, %v533_v6 }
  0x95   :  { %v152_v13 = vld [vmem:[#allocation2 + $0xa0] sm:$0xff]  ;;  %v8648_v16 = vcombine.low %v524_v3, %v532_v4  ;;  %v8650_v17 = vcombine.low %v525_v5, %v533_v6  ;;  %v556_v22 = vunpack.c.l.s8.bf16 %v148_v12  ;;  %v557_v24 = vunpack.c.h.s8.bf16 %v148_v12 }
  0x96   :  { %v156_v18 = vld [vmem:[#allocation2 + $0xc0] sm:$0xff]  ;;  %v8665_v20 = vcombine.high %v540_v8, %v548_v9  ;;  %v8667_v21 = vcombine.high %v541_v10, %v549_v11  ;;  %5260 = vmatprep.subr.bf16.mxu0 %v8649_v14  ;;  %5424 = vmatprep.subr.bf16.mxu1 %v8651_v15  ;;  %v564_v23 = vunpack.c.l.s8.bf16 %v152_v13  ;;  %v565_v25 = vunpack.c.h.s8.bf16 %v152_v13 }
  0x97   :  { %v160_v19 = vld [vmem:[#allocation2 + $0xe0] sm:$0xff]  ;;  %5261 = vmatpush1.bf16.msra.mxu0 %v8648_v16  ;;  %5425 = vmatpush1.bf16.msra.mxu1 %v8650_v17  ;;  %v8664_v26 = vcombine.low %v540_v8, %v548_v9  ;;  %v8666_v27 = vcombine.low %v541_v10, %v549_v11  ;;  %v572_v28 = vunpack.c.l.s8.bf16 %v156_v18  ;;  %v573_v32 = vunpack.c.h.s8.bf16 %v156_v18 }
  0x98   :  { %v580_v29 = vunpack.c.l.s8.bf16 %v160_v19  ;;  %5262 = vmatprep.subr.bf16.mxu0 %v8665_v20  ;;  %5426 = vmatprep.subr.bf16.mxu1 %v8667_v21  ;;  %v8681_v30 = vcombine.high %v556_v22, %v564_v23  ;;  %v8683_v31 = vcombine.high %v557_v24, %v565_v25  ;;  %v581_v33 = vunpack.c.h.s8.bf16 %v160_v19  ;;  %v164_v34 = vld [vmem:[#allocation2 + $0x100] sm:$0xff] }
  0x99   :  { %v168_v35 = vld [vmem:[#allocation2 + $0x120] sm:$0xff]  ;;  %v8680_v36 = vcombine.low %v556_v22, %v564_v23  ;;  %v8682_v37 = vcombine.low %v557_v24, %v565_v25  ;;  %v588_v39 = vunpack.c.l.s8.bf16 %v164_v34  ;;  %v589_v42 = vunpack.c.h.s8.bf16 %v164_v34 }
  0x9a   :  { %v8697_v38 = vcombine.high %v572_v28, %v580_v29  ;;  %v8699_v40 = vcombine.high %v573_v32, %v581_v33  ;;  %v596_v41 = vunpack.c.l.s8.bf16 %v168_v35  ;;  %v597_v43 = vunpack.c.h.s8.bf16 %v168_v35  ;;  %v172_v44 = vld [vmem:[#allocation2 + $0x140] sm:$0xff] }
  0x9b   :  { %5263 = vmatpush1.bf16.msra.mxu0 %v8664_v26  ;;  %5427 = vmatpush1.bf16.msra.mxu1 %v8666_v27  ;;  %v176_v45 = vld [vmem:[#allocation2 + $0x160] sm:$0xff]  ;;  %v8696_v46 = vcombine.low %v572_v28, %v580_v29  ;;  %v8698_v47 = vcombine.low %v573_v32, %v581_v33  ;;  %v604_v48 = vunpack.c.l.s8.bf16 %v172_v44  ;;  %v605_v52 = vunpack.c.h.s8.bf16 %v172_v44 }
  0x9c   :  { %5264 = vmatprep.subr.bf16.mxu0 %v8681_v30  ;;  %5428 = vmatprep.subr.bf16.mxu1 %v8683_v31  ;;  %v612_v49 = vunpack.c.l.s8.bf16 %v176_v45  ;;  %v8713_v50 = vcombine.high %v588_v39, %v596_v41  ;;  %v8715_v51 = vcombine.high %v589_v42, %v597_v43  ;;  %v613_v53 = vunpack.c.h.s8.bf16 %v176_v45  ;;  %v180_v54 = vld [vmem:[#allocation2 + $0x180] sm:$0xff] }
  0x9d   :  { %v184_v55 = vld [vmem:[#allocation2 + $0x1a0] sm:$0xff]  ;;  %v8712_v56 = vcombine.low %v588_v39, %v596_v41  ;;  %v8714_v57 = vcombine.low %v589_v42, %v597_v43  ;;  %v620_v59 = vunpack.c.l.s8.bf16 %v180_v54  ;;  %v621_v62 = vunpack.c.h.s8.bf16 %v180_v54 }
  0x9e   :  { %v8729_v58 = vcombine.high %v604_v48, %v612_v49  ;;  %v8731_v60 = vcombine.high %v605_v52, %v613_v53  ;;  %v628_v61 = vunpack.c.l.s8.bf16 %v184_v55  ;;  %v629_v63 = vunpack.c.h.s8.bf16 %v184_v55  ;;  %v188_v0 = vld [vmem:[#allocation2 + $0x1c0] sm:$0xff] }
  0x9f   :  { %5265 = vmatpush1.bf16.msra.mxu0 %v8680_v36  ;;  %5429 = vmatpush1.bf16.msra.mxu1 %v8682_v37  ;;  %v192_v1 = vld [vmem:[#allocation2 + $0x1e0] sm:$0xff]  ;;  %v8728_v2 = vcombine.low %v604_v48, %v612_v49  ;;  %v8730_v3 = vcombine.low %v605_v52, %v613_v53  ;;  %v636_v4 = vunpack.c.l.s8.bf16 %v188_v0  ;;  %v637_v8 = vunpack.c.h.s8.bf16 %v188_v0 }
  0xa0   :  { %5266 = vmatprep.subr.bf16.mxu0 %v8697_v38  ;;  %5430 = vmatprep.subr.bf16.mxu1 %v8699_v40  ;;  %v644_v5 = vunpack.c.l.s8.bf16 %v192_v1  ;;  %v8745_v6 = vcombine.high %v620_v59, %v628_v61  ;;  %v8747_v7 = vcombine.high %v621_v62, %v629_v63  ;;  %v645_v9 = vunpack.c.h.s8.bf16 %v192_v1  ;;  %v196_v10 = vld [vmem:[#allocation2 + $0x200] sm:$0xff] }
  0xa1   :  { %v200_v11 = vld [vmem:[#allocation2 + $0x220] sm:$0xff]  ;;  %v8744_v12 = vcombine.low %v620_v59, %v628_v61  ;;  %v8746_v13 = vcombine.low %v621_v62, %v629_v63  ;;  %v652_v15 = vunpack.c.l.s8.bf16 %v196_v10  ;;  %v653_v20 = vunpack.c.h.s8.bf16 %v196_v10 }
  0xa2   :  { %v8761_v14 = vcombine.high %v636_v4, %v644_v5  ;;  %v204_v16 = vld [vmem:[#allocation2 + $0x240] sm:$0xff]  ;;  %v8763_v18 = vcombine.high %v637_v8, %v645_v9  ;;  %v660_v19 = vunpack.c.l.s8.bf16 %v200_v11  ;;  %v661_v21 = vunpack.c.h.s8.bf16 %v200_v11 }
  0xa3   :  { %5267 = vmatpush1.bf16.msra.mxu0 %v8696_v46  ;;  %5431 = vmatpush1.bf16.msra.mxu1 %v8698_v47  ;;  %v208_v17 = vld [vmem:[#allocation2 + $0x260] sm:$0xff]  ;;  %v8760_v24 = vcombine.low %v636_v4, %v644_v5  ;;  %v8762_v25 = vcombine.low %v637_v8, %v645_v9  ;;  %v668_v26 = vunpack.c.l.s8.bf16 %v204_v16  ;;  %v669_v30 = vunpack.c.h.s8.bf16 %v204_v16 }
  0xa4   :  { %5268 = vmatprep.subr.bf16.mxu0 %v8713_v50  ;;  %5432 = vmatprep.subr.bf16.mxu1 %v8715_v51  ;;  %v10082_v22 = vld [vmem:[%s10359_s0] sm:$0xff]  ;;  %v676_v27 = vunpack.c.l.s8.bf16 %v208_v17  ;;  %v8777_v28 = vcombine.high %v652_v15, %v660_v19  ;;  %v8779_v29 = vcombine.high %v653_v20, %v661_v21  ;;  %v677_v31 = vunpack.c.h.s8.bf16 %v208_v17 }
  0xa5   :  { %v212_v23 = vld [vmem:[#allocation2 + $0x280] sm:$0xff]  ;;  %v10086_v35 = vcombine.high %v10082_v22, %v10082_v22  ;;  %v8776_v36 = vcombine.low %v652_v15, %v660_v19  ;;  %v8778_v37 = vcombine.low %v653_v20, %v661_v21 }
  0xa6   :  { %v216_v32 = vld [vmem:[#allocation2 + $0x2a0] sm:$0xff]  ;;  %v8793_v38 = vcombine.high %v668_v26, %v676_v27  ;;  %v684_v39 = vunpack.c.l.s8.bf16 %v212_v23  ;;  %v8795_v40 = vcombine.high %v669_v30, %v677_v31  ;;  %v685_v42 = vunpack.c.h.s8.bf16 %v212_v23 }
  0xa7   :  { %5269 = vmatpush1.bf16.msra.mxu0 %v8712_v56  ;;  %5433 = vmatpush1.bf16.msra.mxu1 %v8714_v57  ;;  %v220_v33 = vld [vmem:[#allocation2 + $0x2c0] sm:$0xff]  ;;  %v692_v41 = vunpack.c.l.s8.bf16 %v216_v32  ;;  %v693_v43 = vunpack.c.h.s8.bf16 %v216_v32  ;;  %v8792_v45 = vcombine.low %v668_v26, %v676_v27  ;;  %v8794_v46 = vcombine.low %v669_v30, %v677_v31 }
  0xa8   :  { %5270 = vmatprep.subr.bf16.mxu0 %v8729_v58  ;;  %5434 = vmatprep.subr.bf16.mxu1 %v8731_v60  ;;  %v224_v34 = vld [vmem:[#allocation2 + $0x2e0] sm:$0xff]  ;;  %v700_v47 = vunpack.c.l.s8.bf16 %v220_v33  ;;  %v701_v51 = vunpack.c.h.s8.bf16 %v220_v33 }
  0xa9   :  { %5292 = vmatprep.mubr.bf16.mxu0 %v10086_v35  ;;  %5456 = vmatprep.mubr.bf16.mxu1 %v10086_v35  ;;  %v228_v44 = vld [vmem:[#allocation2 + $0x300] sm:$0xff]  ;;  %v708_v48 = vunpack.c.l.s8.bf16 %v224_v34  ;;  %v8809_v49 = vcombine.high %v684_v39, %v692_v41  ;;  %v8811_v50 = vcombine.high %v685_v42, %v693_v43  ;;  %v709_v52 = vunpack.c.h.s8.bf16 %v224_v34 }
  0xaa   :  { %v232_v53 = vld [vmem:[#allocation2 + $0x320] sm:$0xff]  ;;  %v8808_v56 = vcombine.low %v684_v39, %v692_v41  ;;  %v8810_v57 = vcombine.low %v685_v42, %v693_v43  ;;  %v716_v59 = vunpack.c.l.s8.bf16 %v228_v44  ;;  %v717_v62 = vunpack.c.h.s8.bf16 %v228_v44 }
  0xab   :  { %5271 = vmatpush1.bf16.msra.mxu0 %v8728_v2  ;;  %5435 = vmatpush1.bf16.msra.mxu1 %v8730_v3  ;;  %v236_v54 = vld [vmem:[#allocation2 + $0x340] sm:$0xff]  ;;  %v8825_v58 = vcombine.high %v700_v47, %v708_v48  ;;  %v8827_v60 = vcombine.high %v701_v51, %v709_v52  ;;  %v724_v61 = vunpack.c.l.s8.bf16 %v232_v53  ;;  %v725_v63 = vunpack.c.h.s8.bf16 %v232_v53  ;;  %v10097_v53 = vld [vmem:[%s10359_s0 + $0x8] sm:$0xff] }
  0xac   :  { %5272 = vmatprep.subr.bf16.mxu0 %v8745_v6  ;;  %5436 = vmatprep.subr.bf16.mxu1 %v8747_v7  ;;  %v240_v55 = vld [vmem:[#allocation2 + $0x360] sm:$0xff]  ;;  %v8824_v1 = vcombine.low %v700_v47, %v708_v48  ;;  %v8826_v2 = vcombine.low %v701_v51, %v709_v52  ;;  %v732_v3 = vunpack.c.l.s8.bf16 %v236_v54  ;;  %v733_v7 = vunpack.c.h.s8.bf16 %v236_v54 }
  0xad   :  { %v244_v0 = vld [vmem:[#allocation2 + $0x380] sm:$0xff]  ;;  %v740_v4 = vunpack.c.l.s8.bf16 %v240_v55  ;;  %v8841_v5 = vcombine.high %v716_v59, %v724_v61  ;;  %v8843_v6 = vcombine.high %v717_v62, %v725_v63  ;;  %v741_v8 = vunpack.c.h.s8.bf16 %v240_v55 }
  0xae   :  { %v248_v9 = vld [vmem:[#allocation2 + $0x3a0] sm:$0xff]  ;;  %v748_v15 = vunpack.c.l.s8.bf16 %v244_v0  ;;  %v10092_v52 = vcombine.low %v10082_v22, %v10082_v22 }
  0xaf   :  { %5273 = vmatpush1.bf16.msra.mxu0 %v8744_v12  ;;  %5437 = vmatpush1.bf16.msra.mxu1 %v8746_v13  ;;  %v252_v10 = vld [vmem:[#allocation2 + $0x3c0] sm:$0xff]  ;;  %v8840_v12 = vcombine.low %v716_v59, %v724_v61  ;;  %v8842_v13 = vcombine.low %v717_v62, %v725_v63  ;;  %v8859_v16 = vcombine.high %v733_v7, %v741_v8  ;;  %v756_v17 = vunpack.c.l.s8.bf16 %v248_v9 }
  0xb0   :  { %5274 = vmatprep.subr.bf16.mxu0 %v8761_v14  ;;  %5438 = vmatprep.subr.bf16.mxu1 %v8763_v18  ;;  %v256_v11 = vld [vmem:[#allocation2 + $0x3e0] sm:$0xff]  ;;  %v8857_v14 = vcombine.high %v732_v3, %v740_v4  ;;  %v749_v18 = vunpack.c.h.s8.bf16 %v244_v0  ;;  %v757_v19 = vunpack.c.h.s8.bf16 %v248_v9  ;;  %v8856_v20 = vcombine.low %v732_v3, %v740_v4 }
  0xb1   :  { %v8858_v21 = vcombine.low %v733_v7, %v741_v8  ;;  %v764_v23 = vunpack.c.l.s8.bf16 %v252_v10  ;;  %v765_v27 = vunpack.c.h.s8.bf16 %v252_v10  ;;  %v264_v30 = vld [vmem:[#allocation2 + $0x420] sm:$0xff]  ;;  %v8872_v31 = vcombine.low %v748_v15, %v756_v17 }
  0xb2   :  { %v8875_v26 = vcombine.high %v749_v18, %v757_v19  ;;  %v8874_v32 = vcombine.low %v749_v18, %v757_v19  ;;  %v789_v39 = vunpack.c.h.s8.bf16 %v264_v30  ;;  %v272_v41 = vld [vmem:[#allocation2 + $0x460] sm:$0xff]  ;;  %v10101_v63 = vcombine.high %v10097_v53, %v10097_v53 }
  0xb3   :  { %5275 = vmatpush1.bf16.msra.mxu0 %v8760_v24  ;;  %5439 = vmatpush1.bf16.msra.mxu1 %v8762_v25  ;;  %v772_v24 = vunpack.c.l.s8.bf16 %v256_v11  ;;  %v8873_v25 = vcombine.high %v748_v15, %v756_v17  ;;  %v280_v51 = vld [vmem:[#allocation2 + $0x4a0] sm:$0xff] }
  0xb4   :  { %5276 = vmatprep.subr.bf16.mxu0 %v8777_v28  ;;  %5440 = vmatprep.subr.bf16.mxu1 %v8779_v29  ;;  %v773_v28 = vunpack.c.h.s8.bf16 %v256_v11  ;;  %v260_v29 = vld [vmem:[#allocation2 + $0x400] sm:$0xff]  ;;  %v820_v59 = vunpack.c.l.s8.bf16 %v280_v51  ;;  %v821_v61 = vunpack.c.h.s8.bf16 %v280_v51 }
  0xb5   :  { %v8889_v33 = vcombine.high %v764_v23, %v772_v24  ;;  %v780_v34 = vunpack.c.l.s8.bf16 %v260_v29  ;;  %v8888_v42 = vcombine.low %v764_v23, %v772_v24  ;;  %v284_v62 = vld [vmem:[#allocation2 + $0x4c0] sm:$0xff] }
  0xb6   :  { %v8890_v43 = vcombine.low %v765_v27, %v773_v28  ;;  %v288_v22 = vld [vmem:[#allocation2 + $0x4e0] sm:$0xff]  ;;  %v829_v4 = vunpack.c.h.s8.bf16 %v284_v62 }
  0xb7   :  { %5277 = vmatpush1.bf16.msra.mxu0 %v8776_v36  ;;  %5441 = vmatpush1.bf16.msra.mxu1 %v8778_v37  ;;  %v8891_v36 = vcombine.high %v765_v27, %v773_v28  ;;  %v788_v37 = vunpack.c.l.s8.bf16 %v264_v30  ;;  %v836_v3 = vunpack.c.l.s8.bf16 %v288_v22  ;;  %v292_v8 = vld [vmem:[#allocation2 + $0x500] sm:$0xff] }
  0xb8   :  { %5278 = vmatprep.subr.bf16.mxu0 %v8793_v38  ;;  %5442 = vmatprep.subr.bf16.mxu1 %v8795_v40  ;;  %v781_v38 = vunpack.c.h.s8.bf16 %v260_v29  ;;  %v268_v40 = vld [vmem:[#allocation2 + $0x440] sm:$0xff] }
  0xb9   :  { %v796_v44 = vunpack.c.l.s8.bf16 %v268_v40  ;;  %v797_v48 = vunpack.c.h.s8.bf16 %v268_v40  ;;  %v8904_v54 = vcombine.low %v780_v34, %v788_v37  ;;  %v296_v9 = vld [vmem:[#allocation2 + $0x520] sm:$0xff] }
  0xba   :  { %v8907_v47 = vcombine.high %v781_v38, %v789_v39  ;;  %v8906_v55 = vcombine.low %v781_v38, %v789_v39  ;;  %v852_v15 = vunpack.c.l.s8.bf16 %v296_v9  ;;  %v853_v17 = vunpack.c.h.s8.bf16 %v296_v9  ;;  %v300_v18 = vld [vmem:[#allocation2 + $0x540] sm:$0xff] }
  0xbb   :  { %5279 = vmatpush1.bf16.msra.mxu0 %v8792_v45  ;;  %5443 = vmatpush1.bf16.msra.mxu1 %v8794_v46  ;;  %v804_v45 = vunpack.c.l.s8.bf16 %v272_v41  ;;  %v8905_v46 = vcombine.high %v780_v34, %v788_v37  ;;  %v304_v19 = vld [vmem:[#allocation2 + $0x560] sm:$0xff]  ;;  %v860_v23 = vunpack.c.l.s8.bf16 %v300_v18 }
  0xbc   :  { %5280 = vmatprep.subr.bf16.mxu0 %v8809_v49  ;;  %5444 = vmatprep.subr.bf16.mxu1 %v8811_v50  ;;  %v805_v49 = vunpack.c.h.s8.bf16 %v272_v41  ;;  %v276_v50 = vld [vmem:[#allocation2 + $0x480] sm:$0xff]  ;;  %v868_v24 = vunpack.c.l.s8.bf16 %v304_v19 }
  0xbd   :  { %v8920_v0 = vcombine.low %v796_v44, %v804_v45  ;;  %v308_v29 = vld [vmem:[#allocation2 + $0x580] sm:$0xff] }
  0xbe   :  { %v312_v30 = vld [vmem:[#allocation2 + $0x5a0] sm:$0xff]  ;;  %v877_v38 = vunpack.c.h.s8.bf16 %v308_v29 }
  0xbf   :  { %5281 = vmatpush1.bf16.msra.mxu0 %v8808_v56  ;;  %5445 = vmatpush1.bf16.msra.mxu1 %v8810_v57  ;;  %v8921_v56 = vcombine.high %v796_v44, %v804_v45  ;;  %v812_v57 = vunpack.c.l.s8.bf16 %v276_v50  ;;  %v884_v37 = vunpack.c.l.s8.bf16 %v312_v30  ;;  %v885_v39 = vunpack.c.h.s8.bf16 %v312_v30  ;;  %v316_v40 = vld [vmem:[#allocation2 + $0x5c0] sm:$0xff] }
  0xc0   :  { %5282 = vmatprep.subr.bf16.mxu0 %v8825_v58  ;;  %5446 = vmatprep.subr.bf16.mxu1 %v8827_v60  ;;  %v8923_v58 = vcombine.high %v797_v48, %v805_v49  ;;  %v813_v60 = vunpack.c.h.s8.bf16 %v276_v50  ;;  %v320_v41 = vld [vmem:[#allocation2 + $0x5e0] sm:$0xff]  ;;  %v892_v44 = vunpack.c.l.s8.bf16 %v316_v40 }
  0xc1   :  { %v8936_v10 = vcombine.low %v812_v57, %v820_v59  ;;  %v900_v45 = vunpack.c.l.s8.bf16 %v320_v41  ;;  %v324_v50 = vld [vmem:[#allocation2 + $0x600] sm:$0xff] }
  0xc2   :  { %v8939_v7 = vcombine.high %v813_v60, %v821_v61  ;;  %v8938_v11 = vcombine.low %v813_v60, %v821_v61  ;;  %v328_v51 = vld [vmem:[#allocation2 + $0x620] sm:$0xff]  ;;  %v909_v60 = vunpack.c.h.s8.bf16 %v324_v50 }
  0xc3   :  { %5283 = vmatpush1.bf16.msra.mxu0 %v8824_v1  ;;  %5447 = vmatpush1.bf16.msra.mxu1 %v8826_v2  ;;  %v8922_v1 = vcombine.low %v797_v48, %v805_v49  ;;  %v828_v2 = vunpack.c.l.s8.bf16 %v284_v62  ;;  %v9003_v49 = vcombine.high %v877_v38, %v885_v39  ;;  %v917_v61 = vunpack.c.h.s8.bf16 %v328_v51  ;;  %v332_v62 = vld [vmem:[#allocation2 + $0x640] sm:$0xff] }
  0xc4   :  { %5284 = vmatprep.subr.bf16.mxu0 %v8841_v5  ;;  %5448 = vmatprep.subr.bf16.mxu1 %v8843_v6  ;;  %v837_v5 = vunpack.c.h.s8.bf16 %v288_v22  ;;  %v8937_v6 = vcombine.high %v812_v57, %v820_v59  ;;  %v916_v59 = vunpack.c.l.s8.bf16 %v328_v51  ;;  %v336_v22 = vld [vmem:[#allocation2 + $0x660] sm:$0xff] }
  0xc5   :  { %v344_v9 = vld [vmem:[#allocation2 + $0x6a0] sm:$0xff] }
  0xc6   :  { %v360_v30 = vld [vmem:[#allocation2 + $0x720] sm:$0xff] }
  0xc7   :  { %5285 = vmatpush1.bf16.msra.mxu0 %v8840_v12  ;;  %5449 = vmatpush1.bf16.msra.mxu1 %v8842_v13  ;;  %v8953_v12 = vcombine.high %v828_v2, %v836_v3  ;;  %v8955_v13 = vcombine.high %v829_v4, %v837_v5  ;;  %v376_v51 = vld [vmem:[#allocation2 + $0x7a0] sm:$0xff] }
  0xc8   :  { %5286 = vmatprep.subr.bf16.mxu0 %v8857_v14  ;;  %5450 = vmatprep.subr.bf16.mxu1 %v8859_v16  ;;  %v844_v14 = vunpack.c.l.s8.bf16 %v292_v8  ;;  %v845_v16 = vunpack.c.h.s8.bf16 %v292_v8  ;;  %v340_v8 = vld [vmem:[#allocation2 + $0x680] sm:$0xff] }
  0xca   :  { %v8969_v27 = vcombine.high %v844_v14, %v852_v15  ;;  %v8971_v28 = vcombine.high %v845_v16, %v853_v17 }
  0xcb   :  { %5287 = vmatpush1.bf16.msra.mxu0 %v8856_v20  ;;  %5451 = vmatpush1.bf16.msra.mxu1 %v8858_v21  ;;  %v8952_v20 = vcombine.low %v828_v2, %v836_v3  ;;  %v8954_v21 = vcombine.low %v829_v4, %v837_v5  ;;  %v924_v2 = vunpack.c.l.s8.bf16 %v332_v62  ;;  %v932_v3 = vunpack.c.l.s8.bf16 %v336_v22 }
  0xcc   :  { %5288 = vmatprep.subr.bf16.mxu0 %v8873_v25  ;;  %5452 = vmatprep.subr.bf16.mxu1 %v8875_v26  ;;  %v861_v25 = vunpack.c.h.s8.bf16 %v300_v18  ;;  %v869_v26 = vunpack.c.h.s8.bf16 %v304_v19  ;;  %v925_v4 = vunpack.c.h.s8.bf16 %v332_v62  ;;  %v933_v5 = vunpack.c.h.s8.bf16 %v336_v22  ;;  %v348_v18 = vld [vmem:[#allocation2 + $0x6c0] sm:$0xff] }
  0xcd   :  { %v352_v19 = vld [vmem:[#allocation2 + $0x6e0] sm:$0xff] }
  0xce   :  { %v8987_v34 = vcombine.high %v861_v25, %v869_v26  ;;  %v380_v62 = vld [vmem:[#allocation2 + $0x7c0] sm:$0xff] }
  0xcf   :  { %5289 = vmatpush1.bf16.msra.mxu0 %v8872_v31  ;;  %5453 = vmatpush1.bf16.msra.mxu1 %v8874_v32  ;;  %v8968_v31 = vcombine.low %v844_v14, %v852_v15  ;;  %v8970_v32 = vcombine.low %v845_v16, %v853_v17  ;;  %v940_v14 = vunpack.c.l.s8.bf16 %v340_v8  ;;  %v948_v15 = vunpack.c.l.s8.bf16 %v344_v9  ;;  %v384_v22 = vld [vmem:[#allocation2 + $0x7e0] sm:$0xff] }
  0xd0   :  { %5290 = vmatprep.subr.bf16.mxu0 %v8889_v33  ;;  %5454 = vmatprep.subr.bf16.mxu1 %v8891_v36  ;;  %v8985_v33 = vcombine.high %v860_v23, %v868_v24  ;;  %v876_v36 = vunpack.c.l.s8.bf16 %v308_v29  ;;  %v941_v16 = vunpack.c.h.s8.bf16 %v340_v8  ;;  %v949_v17 = vunpack.c.h.s8.bf16 %v344_v9  ;;  %v356_v29 = vld [vmem:[#allocation2 + $0x700] sm:$0xff] }
  0xd1   :  { %v388_v8 = vld [vmem:[#allocation2 + $0x800] sm:$0xff] }
  0xd2   :  { %v9001_v48 = vcombine.high %v876_v36, %v884_v37  ;;  %v392_v9 = vld [vmem:[#allocation2 + $0x820] sm:$0xff] }
  0xd3   :  { %5291 = vmatpush1.bf16.msra.mxu0 %v8888_v42  ;;  %5455 = vmatpush1.bf16.msra.mxu1 %v8890_v43  ;;  %v8984_v42 = vcombine.low %v860_v23, %v868_v24  ;;  %v8986_v43 = vcombine.low %v861_v25, %v869_v26  ;;  %v956_v23 = vunpack.c.l.s8.bf16 %v348_v18  ;;  %v964_v24 = vunpack.c.l.s8.bf16 %v352_v19 }
  0xd4   :  { %5301 = vmatprep.subr.bf16.mxu0 %v8905_v46  ;;  %5465 = vmatprep.subr.bf16.mxu1 %v8907_v47  ;;  %v893_v46 = vunpack.c.h.s8.bf16 %v316_v40  ;;  %v901_v47 = vunpack.c.h.s8.bf16 %v320_v41  ;;  %v957_v25 = vunpack.c.h.s8.bf16 %v348_v18  ;;  %v965_v26 = vunpack.c.h.s8.bf16 %v352_v19  ;;  %v364_v40 = vld [vmem:[#allocation2 + $0x740] sm:$0xff] }
  0xd5   :  { %v368_v41 = vld [vmem:[#allocation2 + $0x760] sm:$0xff] }
  0xd6   :  { %5293 = vmatmul.mubr.bf16.vlgmr.msra.gmra.mrb[0].mxu0 %v10092_v52  ;;  %5457 = vmatmul.mubr.bf16.vlgmr.msra.gmra.mrb[0].mxu1 %v10092_v52  ;;  %v9019_v57 = vcombine.high %v893_v46, %v901_v47  ;;  %v396_v18 = vld [vmem:[#allocation2 + $0x840] sm:$0xff] }
  0xd7   :  { %5302 = vmatpush1.bf16.msra.mxu0 %v8904_v54  ;;  %5466 = vmatpush1.bf16.msra.mxu1 %v8906_v55  ;;  %v9000_v54 = vcombine.low %v876_v36, %v884_v37  ;;  %v9002_v55 = vcombine.low %v877_v38, %v885_v39  ;;  %v972_v36 = vunpack.c.l.s8.bf16 %v356_v29  ;;  %v980_v37 = vunpack.c.l.s8.bf16 %v360_v30  ;;  %v400_v19 = vld [vmem:[#allocation2 + $0x860] sm:$0xff] }
  0xd8   :  { %5303 = vmatprep.subr.bf16.mxu0 %v8921_v56  ;;  %5467 = vmatprep.subr.bf16.mxu1 %v8923_v58  ;;  %v9017_v56 = vcombine.high %v892_v44, %v900_v45  ;;  %v908_v58 = vunpack.c.l.s8.bf16 %v324_v50  ;;  %v973_v38 = vunpack.c.h.s8.bf16 %v356_v29  ;;  %v981_v39 = vunpack.c.h.s8.bf16 %v360_v30  ;;  %v372_v50 = vld [vmem:[#allocation2 + $0x780] sm:$0xff] }
  0xd9   :  { %5333 = vmatprep.mubr.bf16.mxu0 %v10101_v63  ;;  %5497 = vmatprep.mubr.bf16.mxu1 %v10101_v63  ;;  %v404_v29 = vld [vmem:[#allocation2 + $0x880] sm:$0xff] }
  0xda   :  { %v408_v30 = vld [vmem:[#allocation2 + $0x8a0] sm:$0xff] }
  0xdb   :  { %5304 = vmatpush1.bf16.msra.mxu0 %v8920_v0  ;;  %5468 = vmatpush1.bf16.msra.mxu1 %v8922_v1  ;;  %v9016_v0 = vcombine.low %v892_v44, %v900_v45  ;;  %v9018_v1 = vcombine.low %v893_v46, %v901_v47  ;;  %v988_v44 = vunpack.c.l.s8.bf16 %v364_v40  ;;  %v996_v45 = vunpack.c.l.s8.bf16 %v368_v41 }
  0xdc   :  { %5305 = vmatprep.subr.bf16.mxu0 %v8937_v6  ;;  %5469 = vmatprep.subr.bf16.mxu1 %v8939_v7  ;;  %v9033_v6 = vcombine.high %v908_v58, %v916_v59  ;;  %v9035_v7 = vcombine.high %v909_v60, %v917_v61  ;;  %v989_v46 = vunpack.c.h.s8.bf16 %v364_v40  ;;  %v997_v47 = vunpack.c.h.s8.bf16 %v368_v41 }
  0xdd   :  { %v1069_v40 = vunpack.c.h.s8.bf16 %v404_v29  ;;  %v1077_v41 = vunpack.c.h.s8.bf16 %v408_v30 }
  0xdf   :  { %5306 = vmatpush1.bf16.msra.mxu0 %v8936_v10  ;;  %5470 = vmatpush1.bf16.msra.mxu1 %v8938_v11  ;;  %v9032_v10 = vcombine.low %v908_v58, %v916_v59  ;;  %v9034_v11 = vcombine.low %v909_v60, %v917_v61  ;;  %v1004_v58 = vunpack.c.l.s8.bf16 %v372_v50  ;;  %v1012_v59 = vunpack.c.l.s8.bf16 %v376_v51 }
  0xe0   :  { %5307 = vmatprep.subr.bf16.mxu0 %v8953_v12  ;;  %5471 = vmatprep.subr.bf16.mxu1 %v8955_v13  ;;  %v9049_v12 = vcombine.high %v924_v2, %v932_v3  ;;  %v9051_v13 = vcombine.high %v925_v4, %v933_v5  ;;  %v1005_v60 = vunpack.c.h.s8.bf16 %v372_v50  ;;  %v1013_v61 = vunpack.c.h.s8.bf16 %v376_v51 }
  0xe3   :  { %5308 = vmatpush1.bf16.msra.mxu0 %v8952_v20  ;;  %5472 = vmatpush1.bf16.msra.mxu1 %v8954_v21  ;;  %v9048_v20 = vcombine.low %v924_v2, %v932_v3  ;;  %v9050_v21 = vcombine.low %v925_v4, %v933_v5  ;;  %v1020_v2 = vunpack.c.l.s8.bf16 %v380_v62  ;;  %v1028_v3 = vunpack.c.l.s8.bf16 %v384_v22 }
  0xe4   :  { %5309 = vmatprep.subr.bf16.mxu0 %v8969_v27  ;;  %5473 = vmatprep.subr.bf16.mxu1 %v8971_v28  ;;  %v9065_v27 = vcombine.high %v940_v14, %v948_v15  ;;  %v9067_v28 = vcombine.high %v941_v16, %v949_v17  ;;  %v1021_v4 = vunpack.c.h.s8.bf16 %v380_v62  ;;  %v1029_v5 = vunpack.c.h.s8.bf16 %v384_v22 }
  0xe7   :  { %5310 = vmatpush1.bf16.msra.mxu0 %v8968_v31  ;;  %5474 = vmatpush1.bf16.msra.mxu1 %v8970_v32  ;;  %v9064_v31 = vcombine.low %v940_v14, %v948_v15  ;;  %v9066_v32 = vcombine.low %v941_v16, %v949_v17  ;;  %v1036_v14 = vunpack.c.l.s8.bf16 %v388_v8  ;;  %v1044_v15 = vunpack.c.l.s8.bf16 %v392_v9 }
  0xe8   :  { %5311 = vmatprep.subr.bf16.mxu0 %v8985_v33  ;;  %5475 = vmatprep.subr.bf16.mxu1 %v8987_v34  ;;  %v9081_v33 = vcombine.high %v956_v23, %v964_v24  ;;  %v9083_v34 = vcombine.high %v957_v25, %v965_v26  ;;  %v1037_v16 = vunpack.c.h.s8.bf16 %v388_v8  ;;  %v1045_v17 = vunpack.c.h.s8.bf16 %v392_v9 }
  0xeb   :  { %5312 = vmatpush1.bf16.msra.mxu0 %v8984_v42  ;;  %5476 = vmatpush1.bf16.msra.mxu1 %v8986_v43  ;;  %v9080_v42 = vcombine.low %v956_v23, %v964_v24  ;;  %v9082_v43 = vcombine.low %v957_v25, %v965_v26  ;;  %v1052_v23 = vunpack.c.l.s8.bf16 %v396_v18  ;;  %v1060_v24 = vunpack.c.l.s8.bf16 %v400_v19 }
  0xec   :  { %5313 = vmatprep.subr.bf16.mxu0 %v9001_v48  ;;  %5477 = vmatprep.subr.bf16.mxu1 %v9003_v49  ;;  %v9097_v48 = vcombine.high %v972_v36, %v980_v37  ;;  %v9099_v49 = vcombine.high %v973_v38, %v981_v39  ;;  %v1053_v25 = vunpack.c.h.s8.bf16 %v396_v18  ;;  %v1061_v26 = vunpack.c.h.s8.bf16 %v400_v19 }
  0xef   :  { %5314 = vmatpush1.bf16.msra.mxu0 %v9000_v54  ;;  %5478 = vmatpush1.bf16.msra.mxu1 %v9002_v55  ;;  %v9096_v54 = vcombine.low %v972_v36, %v980_v37  ;;  %v9098_v55 = vcombine.low %v973_v38, %v981_v39  ;;  %v9177_v36 = vcombine.high %v1052_v23, %v1060_v24  ;;  %v1068_v38 = vunpack.c.l.s8.bf16 %v404_v29 }
  0xf0   :  { %5315 = vmatprep.subr.bf16.mxu0 %v9017_v56  ;;  %5479 = vmatprep.subr.bf16.mxu1 %v9019_v57  ;;  %v9113_v56 = vcombine.high %v988_v44, %v996_v45  ;;  %v9115_v57 = vcombine.high %v989_v46, %v997_v47  ;;  %v9179_v37 = vcombine.high %v1053_v25, %v1061_v26  ;;  %v1076_v39 = vunpack.c.l.s8.bf16 %v408_v30 }
  0xf3   :  { %5316 = vmatpush1.bf16.msra.mxu0 %v9016_v0  ;;  %5480 = vmatpush1.bf16.msra.mxu1 %v9018_v1  ;;  %v9112_v0 = vcombine.low %v988_v44, %v996_v45  ;;  %v9114_v1 = vcombine.low %v989_v46, %v997_v47  ;;  %v9176_v44 = vcombine.low %v1052_v23, %v1060_v24 }
  0xf4   :  { %5317 = vmatprep.subr.bf16.mxu0 %v9033_v6  ;;  %5481 = vmatprep.subr.bf16.mxu1 %v9035_v7  ;;  %v9129_v6 = vcombine.high %v1004_v58, %v1012_v59  ;;  %v9131_v7 = vcombine.high %v1005_v60, %v1013_v61  ;;  %v9178_v45 = vcombine.low %v1053_v25, %v1061_v26 }
  0xf7   :  { %5318 = vmatpush1.bf16.msra.mxu0 %v9032_v10  ;;  %5482 = vmatpush1.bf16.msra.mxu1 %v9034_v11  ;;  %v9128_v10 = vcombine.low %v1004_v58, %v1012_v59  ;;  %v9130_v11 = vcombine.low %v1005_v60, %v1013_v61 }
  0xf8   :  { %5319 = vmatprep.subr.bf16.mxu0 %v9049_v12  ;;  %5483 = vmatprep.subr.bf16.mxu1 %v9051_v13  ;;  %v9145_v12 = vcombine.high %v1020_v2, %v1028_v3  ;;  %v9147_v13 = vcombine.high %v1021_v4, %v1029_v5 }
  0xfb   :  { %5320 = vmatpush1.bf16.msra.mxu0 %v9048_v20  ;;  %5484 = vmatpush1.bf16.msra.mxu1 %v9050_v21  ;;  %v9144_v20 = vcombine.low %v1020_v2, %v1028_v3  ;;  %v9146_v21 = vcombine.low %v1021_v4, %v1029_v5 }
  0xfc   :  { %5321 = vmatprep.subr.bf16.mxu0 %v9065_v27  ;;  %5485 = vmatprep.subr.bf16.mxu1 %v9067_v28  ;;  %v9161_v27 = vcombine.high %v1036_v14, %v1044_v15  ;;  %v9163_v28 = vcombine.high %v1037_v16, %v1045_v17 }
  0xff   :  { %5322 = vmatpush1.bf16.msra.mxu0 %v9064_v31  ;;  %5486 = vmatpush1.bf16.msra.mxu1 %v9066_v32  ;;  %v10109_v31 = vcombine.low %v10097_v53, %v10097_v53  ;;  %v9160_v32 = vcombine.low %v1036_v14, %v1044_v15  ;;  %v416_v53 = vld [vmem:[#allocation2 + $0x8e0] sm:$0xff] }
 0x100   :  { %5323 = vmatprep.subr.bf16.mxu0 %v9081_v33  ;;  %5487 = vmatprep.subr.bf16.mxu1 %v9083_v34  ;;  %v10114_v33 = vld [vmem:[%s10359_s0 + $0x10] sm:$0xff]  ;;  %v9162_v34 = vcombine.low %v1037_v16, %v1045_v17  ;;  %v1092_v47 = vunpack.c.l.s8.bf16 %v416_v53  ;;  %v1093_v51 = vunpack.c.h.s8.bf16 %v416_v53 }
 0x103   :  { %5324 = vmatpush1.bf16.msra.mxu0 %v9080_v42  ;;  %5488 = vmatpush1.bf16.msra.mxu1 %v9082_v43  ;;  %v412_v42 = vld [vmem:[#allocation2 + $0x8c0] sm:$0xff]  ;;  %v10118_v43 = vcombine.high %v10114_v33, %v10114_v33 }
 0x104   :  { %5325 = vmatprep.subr.bf16.mxu0 %v9097_v48  ;;  %5489 = vmatprep.subr.bf16.mxu1 %v9099_v49  ;;  %v1084_v46 = vunpack.c.l.s8.bf16 %v412_v42  ;;  %v9193_v48 = vcombine.high %v1068_v38, %v1076_v39  ;;  %v9195_v49 = vcombine.high %v1069_v40, %v1077_v41  ;;  %v1085_v50 = vunpack.c.h.s8.bf16 %v412_v42 }
 0x106   :  { %v9209_v58 = vcombine.high %v1084_v46, %v1092_v47  ;;  %v9211_v60 = vcombine.high %v1085_v50, %v1093_v51  ;;  %v9208_v2 = vcombine.low %v1084_v46, %v1092_v47  ;;  %v9210_v3 = vcombine.low %v1085_v50, %v1093_v51 }
 0x107   :  { %5326 = vmatpush1.bf16.msra.mxu0 %v9096_v54  ;;  %5490 = vmatpush1.bf16.msra.mxu1 %v9098_v55  ;;  %v420_v54 = vld [vmem:[#allocation2 + $0x900] sm:$0xff] }
 0x108   :  { %5327 = vmatprep.subr.bf16.mxu0 %v9113_v56  ;;  %5491 = vmatprep.subr.bf16.mxu1 %v9115_v57  ;;  %v424_v55 = vld [vmem:[#allocation2 + $0x920] sm:$0xff]  ;;  %v9192_v56 = vcombine.low %v1068_v38, %v1076_v39  ;;  %v9194_v57 = vcombine.low %v1069_v40, %v1077_v41  ;;  %v1100_v59 = vunpack.c.l.s8.bf16 %v420_v54  ;;  %v1101_v62 = vunpack.c.h.s8.bf16 %v420_v54 }
 0x109   :  { %v1108_v61 = vunpack.c.l.s8.bf16 %v424_v55  ;;  %v1109_v22 = vunpack.c.h.s8.bf16 %v424_v55 }
 0x10b   :  { %5328 = vmatpush1.bf16.msra.mxu0 %v9112_v0  ;;  %5492 = vmatpush1.bf16.msra.mxu1 %v9114_v1  ;;  %v428_v0 = vld [vmem:[#allocation2 + $0x940] sm:$0xff]  ;;  %v9225_v8 = vcombine.high %v1100_v59, %v1108_v61  ;;  %v9227_v9 = vcombine.high %v1101_v62, %v1109_v22 }
 0x10c   :  { %5329 = vmatprep.subr.bf16.mxu0 %v9129_v6  ;;  %5493 = vmatprep.subr.bf16.mxu1 %v9131_v7  ;;  %v432_v1 = vld [vmem:[#allocation2 + $0x960] sm:$0xff]  ;;  %v1116_v4 = vunpack.c.l.s8.bf16 %v428_v0  ;;  %v1117_v6 = vunpack.c.h.s8.bf16 %v428_v0 }
 0x10d   :  { %v1124_v5 = vunpack.c.l.s8.bf16 %v432_v1  ;;  %v1125_v7 = vunpack.c.h.s8.bf16 %v432_v1 }
 0x10f   :  { %5330 = vmatpush1.bf16.msra.mxu0 %v9128_v10  ;;  %5494 = vmatpush1.bf16.msra.mxu1 %v9130_v11  ;;  %v436_v10 = vld [vmem:[#allocation2 + $0x980] sm:$0xff]  ;;  %v9241_v14 = vcombine.high %v1116_v4, %v1124_v5  ;;  %v9243_v15 = vcombine.high %v1117_v6, %v1125_v7  ;;  %v9240_v23 = vcombine.low %v1116_v4, %v1124_v5 }
 0x110   :  { %5331 = vmatprep.subr.bf16.mxu0 %v9145_v12  ;;  %5495 = vmatprep.subr.bf16.mxu1 %v9147_v13  ;;  %v440_v11 = vld [vmem:[#allocation2 + $0x9a0] sm:$0xff]  ;;  %v9224_v12 = vcombine.low %v1100_v59, %v1108_v61  ;;  %v9226_v13 = vcombine.low %v1101_v62, %v1109_v22  ;;  %v1132_v16 = vunpack.c.l.s8.bf16 %v436_v10  ;;  %v1133_v18 = vunpack.c.h.s8.bf16 %v436_v10 }
 0x111   :  { %v1140_v17 = vunpack.c.l.s8.bf16 %v440_v11  ;;  %v1141_v19 = vunpack.c.h.s8.bf16 %v440_v11  ;;  %v9242_v24 = vcombine.low %v1117_v6, %v1125_v7 }
 0x113   :  { %5332 = vmatpush1.bf16.msra.mxu0 %v9144_v20  ;;  %5496 = vmatpush1.bf16.msra.mxu1 %v9146_v21  ;;  %v444_v20 = vld [vmem:[#allocation2 + $0x9c0] sm:$0xff]  ;;  %v9257_v29 = vcombine.high %v1132_v16, %v1140_v17  ;;  %v9259_v30 = vcombine.high %v1133_v18, %v1141_v19 }
 0x114   :  { %5342 = vmatprep.subr.bf16.mxu0 %v9161_v27  ;;  %5506 = vmatprep.subr.bf16.mxu1 %v9163_v28  ;;  %v448_v21 = vld [vmem:[#allocation2 + $0x9e0] sm:$0xff]  ;;  %v1148_v25 = vunpack.c.l.s8.bf16 %v444_v20  ;;  %v1149_v27 = vunpack.c.h.s8.bf16 %v444_v20 }
 0x115   :  { %v1156_v26 = vunpack.c.l.s8.bf16 %v448_v21  ;;  %v1157_v28 = vunpack.c.h.s8.bf16 %v448_v21 }
 0x116   :  { %5334 = vmatmul.mubr.bf16.vlgmr.msra.gmra.mrb[0].mxu0 %v10109_v31  ;;  %5498 = vmatmul.mubr.bf16.vlgmr.msra.gmra.mrb[0].mxu1 %v10109_v31 }
 0x117   :  { %5343 = vmatpush1.bf16.msra.mxu0 %v9160_v32  ;;  %5507 = vmatpush1.bf16.msra.mxu1 %v9162_v34  ;;  %v452_v32 = vld [vmem:[#allocation2 + $0xa00] sm:$0xff]  ;;  %v9273_v38 = vcombine.high %v1148_v25, %v1156_v26  ;;  %v9275_v39 = vcombine.high %v1149_v27, %v1157_v28  ;;  %v9272_v46 = vcombine.low %v1148_v25, %v1156_v26 }
 0x118   :  { %5344 = vmatprep.subr.bf16.mxu0 %v9177_v36  ;;  %5508 = vmatprep.subr.bf16.mxu1 %v9179_v37  ;;  %v456_v34 = vld [vmem:[#allocation2 + $0xa20] sm:$0xff]  ;;  %v9256_v36 = vcombine.low %v1132_v16, %v1140_v17  ;;  %v9258_v37 = vcombine.low %v1133_v18, %v1141_v19  ;;  %v1164_v40 = vunpack.c.l.s8.bf16 %v452_v32  ;;  %v1165_v42 = vunpack.c.h.s8.bf16 %v452_v32 }
 0x119   :  { %5374 = vmatprep.mubr.bf16.mxu0 %v10118_v43  ;;  %5538 = vmatprep.mubr.bf16.mxu1 %v10118_v43  ;;  %v1172_v41 = vunpack.c.l.s8.bf16 %v456_v34  ;;  %v1173_v53 = vunpack.c.h.s8.bf16 %v456_v34  ;;  %v9274_v47 = vcombine.low %v1149_v27, %v1157_v28 }
 0x11b   :  { %5345 = vmatpush1.bf16.msra.mxu0 %v9176_v44  ;;  %5509 = vmatpush1.bf16.msra.mxu1 %v9178_v45  ;;  %v460_v44 = vld [vmem:[#allocation2 + $0xa40] sm:$0xff]  ;;  %v9289_v54 = vcombine.high %v1164_v40, %v1172_v41  ;;  %v9291_v55 = vcombine.high %v1165_v42, %v1173_v53  ;;  %v9290_v59 = vcombine.low %v1165_v42, %v1173_v53 }
 0x11c   :  { %5346 = vmatprep.subr.bf16.mxu0 %v9193_v48  ;;  %5510 = vmatprep.subr.bf16.mxu1 %v9195_v49  ;;  %v464_v45 = vld [vmem:[#allocation2 + $0xa60] sm:$0xff]  ;;  %v1180_v48 = vunpack.c.l.s8.bf16 %v460_v44  ;;  %v1181_v50 = vunpack.c.h.s8.bf16 %v460_v44 }
 0x11d   :  { %v1188_v49 = vunpack.c.l.s8.bf16 %v464_v45  ;;  %v1189_v51 = vunpack.c.h.s8.bf16 %v464_v45 }
 0x11f   :  { %5347 = vmatpush1.bf16.msra.mxu0 %v9192_v56  ;;  %5511 = vmatpush1.bf16.msra.mxu1 %v9194_v57  ;;  %v468_v56 = vld [vmem:[#allocation2 + $0xa80] sm:$0xff]  ;;  %v9307_v61 = vcombine.high %v1181_v50, %v1189_v51  ;;  %v9304_v4 = vcombine.low %v1180_v48, %v1188_v49  ;;  %v9306_v5 = vcombine.low %v1181_v50, %v1189_v51 }
 0x120   :  { %5348 = vmatprep.subr.bf16.mxu0 %v9209_v58  ;;  %5512 = vmatprep.subr.bf16.mxu1 %v9211_v60  ;;  %v472_v57 = vld [vmem:[#allocation2 + $0xaa0] sm:$0xff]  ;;  %v9288_v58 = vcombine.low %v1164_v40, %v1172_v41  ;;  %v9305_v60 = vcombine.high %v1180_v48, %v1188_v49  ;;  %v1196_v62 = vunpack.c.l.s8.bf16 %v468_v56  ;;  %v1197_v0 = vunpack.c.h.s8.bf16 %v468_v56 }
 0x121   :  { %v1204_v22 = vunpack.c.l.s8.bf16 %v472_v57  ;;  %v1205_v1 = vunpack.c.h.s8.bf16 %v472_v57 }
 0x123   :  { %5349 = vmatpush1.bf16.msra.mxu0 %v9208_v2  ;;  %5513 = vmatpush1.bf16.msra.mxu1 %v9210_v3  ;;  %v476_v2 = vld [vmem:[#allocation2 + $0xac0] sm:$0xff]  ;;  %v9321_v10 = vcombine.high %v1196_v62, %v1204_v22  ;;  %v9323_v11 = vcombine.high %v1197_v0, %v1205_v1 }
 0x124   :  { %5350 = vmatprep.subr.bf16.mxu0 %v9225_v8  ;;  %5514 = vmatprep.subr.bf16.mxu1 %v9227_v9  ;;  %v480_v3 = vld [vmem:[#allocation2 + $0xae0] sm:$0xff]  ;;  %v1212_v6 = vunpack.c.l.s8.bf16 %v476_v2  ;;  %v1213_v8 = vunpack.c.h.s8.bf16 %v476_v2 }
 0x125   :  { %v1220_v7 = vunpack.c.l.s8.bf16 %v480_v3  ;;  %v1221_v9 = vunpack.c.h.s8.bf16 %v480_v3 }
 0x127   :  { %5351 = vmatpush1.bf16.msra.mxu0 %v9224_v12  ;;  %5515 = vmatpush1.bf16.msra.mxu1 %v9226_v13  ;;  %v484_v12 = vld [vmem:[#allocation2 + $0xb00] sm:$0xff]  ;;  %v9337_v16 = vcombine.high %v1212_v6, %v1220_v7  ;;  %v9339_v17 = vcombine.high %v1213_v8, %v1221_v9  ;;  %v9336_v25 = vcombine.low %v1212_v6, %v1220_v7 }
 0x128   :  { %5352 = vmatprep.subr.bf16.mxu0 %v9241_v14  ;;  %5516 = vmatprep.subr.bf16.mxu1 %v9243_v15  ;;  %v488_v13 = vld [vmem:[#allocation2 + $0xb20] sm:$0xff]  ;;  %v9320_v14 = vcombine.low %v1196_v62, %v1204_v22  ;;  %v9322_v15 = vcombine.low %v1197_v0, %v1205_v1  ;;  %v1228_v18 = vunpack.c.l.s8.bf16 %v484_v12  ;;  %v1229_v20 = vunpack.c.h.s8.bf16 %v484_v12 }
 0x129   :  { %v1236_v19 = vunpack.c.l.s8.bf16 %v488_v13  ;;  %v1237_v21 = vunpack.c.h.s8.bf16 %v488_v13  ;;  %v9338_v26 = vcombine.low %v1213_v8, %v1221_v9 }
 0x12b   :  { %5353 = vmatpush1.bf16.msra.mxu0 %v9240_v23  ;;  %5517 = vmatpush1.bf16.msra.mxu1 %v9242_v24  ;;  %v492_v23 = vld [vmem:[#allocation2 + $0xb40] sm:$0xff]  ;;  %v9353_v32 = vcombine.high %v1228_v18, %v1236_v19  ;;  %v9355_v34 = vcombine.high %v1229_v20, %v1237_v21 }
 0x12c   :  { %5354 = vmatprep.subr.bf16.mxu0 %v9257_v29  ;;  %5518 = vmatprep.subr.bf16.mxu1 %v9259_v30  ;;  %v496_v24 = vld [vmem:[#allocation2 + $0xb60] sm:$0xff]  ;;  %v1244_v27 = vunpack.c.l.s8.bf16 %v492_v23  ;;  %v1245_v29 = vunpack.c.h.s8.bf16 %v492_v23 }
 0x12d   :  { %v1252_v28 = vunpack.c.l.s8.bf16 %v496_v24  ;;  %v1253_v30 = vunpack.c.h.s8.bf16 %v496_v24 }
 0x12f   :  { %5355 = vmatpush1.bf16.msra.mxu0 %v9256_v36  ;;  %5519 = vmatpush1.bf16.msra.mxu1 %v9258_v37  ;;  %v500_v36 = vld [vmem:[#allocation2 + $0xb80] sm:$0xff]  ;;  %v9369_v40 = vcombine.high %v1244_v27, %v1252_v28  ;;  %v9371_v41 = vcombine.high %v1245_v29, %v1253_v30  ;;  %v9368_v48 = vcombine.low %v1244_v27, %v1252_v28  ;;  %v153_v27 = vld [vmem:[#allocation2 + $0xa8] sm:$0xff]  ;;  %v9688_v28 = vld [vmem:[%s10359_s0 + $0x18] ss:$0 sps:$4 sm:$0xff]  }
 0x130   :  { %5356 = vmatprep.subr.bf16.mxu0 %v9273_v38  ;;  %5520 = vmatprep.subr.bf16.mxu1 %v9275_v39  ;;  %v504_v37 = vld [vmem:[#allocation2 + $0xba0] sm:$0xff]  ;;  %v9352_v38 = vcombine.low %v1228_v18, %v1236_v19  ;;  %v9354_v39 = vcombine.low %v1229_v20, %v1237_v21  ;;  %v1260_v42 = vunpack.c.l.s8.bf16 %v500_v36  ;;  %v1261_v44 = vunpack.c.h.s8.bf16 %v500_v36  ;;  %v145_v20 = vld [vmem:[#allocation2 + $0x68] sm:$0xff] }
 0x131   :  { %v1268_v53 = vunpack.c.l.s8.bf16 %v504_v37  ;;  %v1269_v45 = vunpack.c.h.s8.bf16 %v504_v37  ;;  %v9370_v49 = vcombine.low %v1245_v29, %v1253_v30  ;;  %v9926_v19 = vmov 0  }
 0x132   :  { %v550_v23 = vunpack.c.l.s8.bf16 %v145_v20  ;;  %v566_v37 = vunpack.c.l.s8.bf16 %v153_v27 }
 0x133   :  { %5357 = vmatpush1.bf16.msra.mxu0 %v9272_v46  ;;  %5521 = vmatpush1.bf16.msra.mxu1 %v9274_v47  ;;  %v508_v46 = vld [vmem:[#allocation2 + $0xbc0] sm:$0xff]  ;;  %v9385_v56 = vcombine.high %v1260_v42, %v1268_v53  ;;  %v9387_v57 = vcombine.high %v1261_v44, %v1269_v45 }
 0x134   :  { %5358 = vmatprep.subr.bf16.mxu0 %v9289_v54  ;;  %5522 = vmatprep.subr.bf16.mxu1 %v9291_v55  ;;  %v512_v47 = vld [vmem:[#allocation2 + $0xbe0] sm:$0xff]  ;;  %v1276_v50 = vunpack.c.l.s8.bf16 %v508_v46  ;;  %v1277_v54 = vunpack.c.h.s8.bf16 %v508_v46 }
 0x135   :  { %v1284_v51 = vunpack.c.l.s8.bf16 %v512_v47  ;;  %v1285_v55 = vunpack.c.h.s8.bf16 %v512_v47 }
 0x137   :  { %5359 = vmatpush1.bf16.msra.mxu0 %v9288_v58  ;;  %5523 = vmatpush1.bf16.msra.mxu1 %v9290_v59  ;;  %v516_v58 = vld [vmem:[#allocation2 + $0xc00] sm:$0xff]  ;;  %v9401_v62 = vcombine.high %v1276_v50, %v1284_v51  ;;  %v9403_v22 = vcombine.high %v1277_v54, %v1285_v55  ;;  %v9400_v6 = vcombine.low %v1276_v50, %v1284_v51  ;;  %v165_v50 = vld [vmem:[#allocation2 + $0x108] sm:$0xff] }
 0x138   :  { %5360 = vmatprep.subr.bf16.mxu0 %v9305_v60  ;;  %5524 = vmatprep.subr.bf16.mxu1 %v9307_v61  ;;  %v520_v59 = vld [vmem:[#allocation2 + $0xc20] sm:$0xff]  ;;  %v9384_v60 = vcombine.low %v1260_v42, %v1268_v53  ;;  %v9386_v61 = vcombine.low %v1261_v44, %v1269_v45  ;;  %v1292_v0 = vunpack.c.l.s8.bf16 %v516_v58  ;;  %v1293_v2 = vunpack.c.h.s8.bf16 %v516_v58  ;;  %v169_v51 = vld [vmem:[#allocation2 + $0x128] sm:$0xff] }
 0x139   :  { %v1300_v1 = vunpack.c.l.s8.bf16 %v520_v59  ;;  %v1301_v3 = vunpack.c.h.s8.bf16 %v520_v59  ;;  %v9402_v7 = vcombine.low %v1277_v54, %v1285_v55  ;;  %v598_v59 = vunpack.c.l.s8.bf16 %v169_v51 }
 0x13b   :  { %5361 = vmatpush1.bf16.msra.mxu0 %v9304_v4  ;;  %5525 = vmatpush1.bf16.msra.mxu1 %v9306_v5  ;;  %v133_v4 = vld [vmem:[#allocation2 + $0x8] sm:$0xff]  ;;  %v9417_v8 = vcombine.high %v1292_v0, %v1300_v1  ;;  %v9419_v9 = vcombine.high %v1293_v2, %v1301_v3 }
 0x13c   :  { %5362 = vmatprep.subr.bf16.mxu0 %v9321_v10  ;;  %5526 = vmatprep.subr.bf16.mxu1 %v9323_v11  ;;  %v137_v5 = vld [vmem:[#allocation2 + $0x28] sm:$0xff]  ;;  %v526_v10 = vunpack.c.l.s8.bf16 %v133_v4  ;;  %v527_v12 = vunpack.c.h.s8.bf16 %v133_v4 }
 0x13d   :  { %v534_v11 = vunpack.c.l.s8.bf16 %v137_v5  ;;  %v535_v13 = vunpack.c.h.s8.bf16 %v137_v5 }
 0x13f   :  { %5363 = vmatpush1.bf16.msra.mxu0 %v9320_v14  ;;  %5527 = vmatpush1.bf16.msra.mxu1 %v9322_v15  ;;  %v10126_v14 = vcombine.low %v10114_v33, %v10114_v33  ;;  %v9416_v15 = vcombine.low %v1292_v0, %v1300_v1  ;;  %v8655_v18 = vcombine.high %v527_v12, %v535_v13  ;;  %v141_v33 = vld [vmem:[#allocation2 + $0x48] sm:$0xff] }
 0x140   :  { %5364 = vmatprep.subr.bf16.mxu0 %v9337_v16  ;;  %5528 = vmatprep.subr.bf16.mxu1 %v9339_v17  ;;  %v9418_v16 = vcombine.low %v1293_v2, %v1301_v3  ;;  %v8653_v17 = vcombine.high %v526_v10, %v534_v11  ;;  %v542_v21 = vunpack.c.l.s8.bf16 %v141_v33  ;;  %v543_v24 = vunpack.c.h.s8.bf16 %v141_v33  ;;  %v189_v33 = vld [vmem:[#allocation2 + $0x1c8] sm:$0xff] }
 0x141   :  { %v8652_v29 = vcombine.low %v526_v10, %v534_v11  ;;  %v8654_v30 = vcombine.low %v527_v12, %v535_v13 }
 0x142   :  { %v8668_v42 = vcombine.low %v542_v21, %v550_v23 }
 0x143   :  { %5365 = vmatpush1.bf16.msra.mxu0 %v9336_v25  ;;  %5529 = vmatpush1.bf16.msra.mxu1 %v9338_v26  ;;  %v551_v25 = vunpack.c.h.s8.bf16 %v145_v20  ;;  %v149_v26 = vld [vmem:[#allocation2 + $0x88] sm:$0xff] }
 0x144   :  { %5366 = vmatprep.subr.bf16.mxu0 %v9353_v32  ;;  %5530 = vmatprep.subr.bf16.mxu1 %v9355_v34  ;;  %v8669_v32 = vcombine.high %v542_v21, %v550_v23  ;;  %v558_v34 = vunpack.c.l.s8.bf16 %v149_v26  ;;  %v193_v20 = vld [vmem:[#allocation2 + $0x1e8] sm:$0xff] }
 0x145   :  { %v8671_v36 = vcombine.high %v543_v24, %v551_v25  ;;  %v8670_v53 = vcombine.low %v543_v24, %v551_v25  ;;  %v638_v24 = vunpack.c.l.s8.bf16 %v189_v33  ;;  %v646_v25 = vunpack.c.l.s8.bf16 %v193_v20 }
 0x146   :  { %v8685_v46 = vcombine.high %v558_v34, %v566_v37  ;;  %v8684_v54 = vcombine.low %v558_v34, %v566_v37 }
 0x147   :  { %5367 = vmatpush1.bf16.msra.mxu0 %v9352_v38  ;;  %5531 = vmatpush1.bf16.msra.mxu1 %v9354_v39  ;;  %v559_v38 = vunpack.c.h.s8.bf16 %v149_v26  ;;  %v567_v39 = vunpack.c.h.s8.bf16 %v153_v27  ;;  %v8765_v37 = vcombine.high %v638_v24, %v646_v25 }
 0x148   :  { %5368 = vmatprep.subr.bf16.mxu0 %v9369_v40  ;;  %5532 = vmatprep.subr.bf16.mxu1 %v9371_v41  ;;  %v157_v40 = vld [vmem:[#allocation2 + $0xc8] sm:$0xff] }
 0x149   :  { %v161_v41 = vld [vmem:[#allocation2 + $0xe8] sm:$0xff]  ;;  %v574_v44 = vunpack.c.l.s8.bf16 %v157_v40  ;;  %v8687_v47 = vcombine.high %v559_v38, %v567_v39  ;;  %v8686_v55 = vcombine.low %v559_v38, %v567_v39 }
 0x14a   :  { %v582_v45 = vunpack.c.l.s8.bf16 %v161_v41 }
 0x14b   :  { %5369 = vmatpush1.bf16.msra.mxu0 %v9368_v48  ;;  %5533 = vmatpush1.bf16.msra.mxu1 %v9370_v49  ;;  %v575_v48 = vunpack.c.h.s8.bf16 %v157_v40  ;;  %v583_v49 = vunpack.c.h.s8.bf16 %v161_v41 }
 0x14c   :  { %5370 = vmatprep.subr.bf16.mxu0 %v9385_v56  ;;  %5534 = vmatprep.subr.bf16.mxu1 %v9387_v57  ;;  %v8701_v56 = vcombine.high %v574_v44, %v582_v45  ;;  %v590_v57 = vunpack.c.l.s8.bf16 %v165_v50  ;;  %v8700_v0 = vcombine.low %v574_v44, %v582_v45  ;;  %v209_v44 = vld [vmem:[#allocation2 + $0x268] sm:$0xff]  ;;  %v8764_v45 = vcombine.low %v638_v24, %v646_v25 }
 0x14d   :  { %v8703_v58 = vcombine.high %v575_v48, %v583_v49  ;;  %v8702_v1 = vcombine.low %v575_v48, %v583_v49  ;;  %v678_v48 = vunpack.c.l.s8.bf16 %v209_v44  ;;  %v241_v24 = vld [vmem:[#allocation2 + $0x368] sm:$0xff] }
 0x14e   :  { %v8717_v4 = vcombine.high %v590_v57, %v598_v59  ;;  %v8716_v10 = vcombine.low %v590_v57, %v598_v59 }
 0x14f   :  { %5371 = vmatpush1.bf16.msra.mxu0 %v9384_v60  ;;  %5535 = vmatpush1.bf16.msra.mxu1 %v9386_v61  ;;  %v591_v60 = vunpack.c.h.s8.bf16 %v165_v50  ;;  %v599_v61 = vunpack.c.h.s8.bf16 %v169_v51 }
 0x150   :  { %5372 = vmatprep.subr.bf16.mxu0 %v9401_v62  ;;  %5536 = vmatprep.subr.bf16.mxu1 %v9403_v22  ;;  %v173_v62 = vld [vmem:[#allocation2 + $0x148] sm:$0xff] }
 0x151   :  { %v177_v22 = vld [vmem:[#allocation2 + $0x168] sm:$0xff]  ;;  %v606_v2 = vunpack.c.l.s8.bf16 %v173_v62  ;;  %v8719_v5 = vcombine.high %v591_v60, %v599_v61  ;;  %v8718_v11 = vcombine.low %v591_v60, %v599_v61 }
 0x152   :  { %v614_v3 = vunpack.c.l.s8.bf16 %v177_v22 }
 0x153   :  { %5373 = vmatpush1.bf16.msra.mxu0 %v9400_v6  ;;  %5537 = vmatpush1.bf16.msra.mxu1 %v9402_v7  ;;  %v607_v6 = vunpack.c.h.s8.bf16 %v173_v62  ;;  %v615_v7 = vunpack.c.h.s8.bf16 %v177_v22 }
 0x154   :  { %5383 = vmatprep.subr.bf16.mxu0 %v9417_v8  ;;  %5547 = vmatprep.subr.bf16.mxu1 %v9419_v9  ;;  %v181_v8 = vld [vmem:[#allocation2 + $0x188] sm:$0xff]  ;;  %v8733_v12 = vcombine.high %v606_v2, %v614_v3  ;;  %v8732_v21 = vcombine.low %v606_v2, %v614_v3 }
 0x155   :  { %v185_v9 = vld [vmem:[#allocation2 + $0x1a8] sm:$0xff]  ;;  %v622_v13 = vunpack.c.l.s8.bf16 %v181_v8  ;;  %v8734_v23 = vcombine.low %v607_v6, %v615_v7 }
 0x156   :  { %5375 = vmatmul.mubr.bf16.vlgmr.msra.gmra.mrb[0].mxu0 %v10126_v14  ;;  %5539 = vmatmul.mubr.bf16.vlgmr.msra.gmra.mrb[0].mxu1 %v10126_v14  ;;  %v225_v2 = vld [vmem:[#allocation2 + $0x2e8] sm:$0xff] }
 0x157   :  { %5384 = vmatpush1.bf16.msra.mxu0 %v9416_v15  ;;  %5548 = vmatpush1.bf16.msra.mxu1 %v9418_v16  ;;  %v8735_v15 = vcombine.high %v607_v6, %v615_v7  ;;  %v630_v16 = vunpack.c.l.s8.bf16 %v185_v9  ;;  %v710_v6 = vunpack.c.l.s8.bf16 %v225_v2 }
 0x158   :  { %5415 = vmatprep.mubr.bf16.mxu0 %v9926_v19  ;;  %5579 = vmatprep.mubr.bf16.mxu1 %v9926_v19 }
 0x159   :  { %5588 = vmatprep.subr.bf16.mxu0 %v8653_v17  ;;  %5752 = vmatprep.subr.bf16.mxu1 %v8655_v18  ;;  %v623_v17 = vunpack.c.h.s8.bf16 %v181_v8  ;;  %v631_v18 = vunpack.c.h.s8.bf16 %v185_v9  ;;  %v8749_v26 = vcombine.high %v622_v13, %v630_v16  ;;  %v8748_v34 = vcombine.low %v622_v13, %v630_v16 }
 0x15a   :  { %v711_v8 = vunpack.c.h.s8.bf16 %v225_v2 }
 0x15b   :  { %v8751_v27 = vcombine.high %v623_v17, %v631_v18 }
 0x162   :  { %9432 = vmatmul.mubr.msk.bf16.vlgmr.msra.gmra.mrb[0].mxu0 %vm5256_vm0, %v9688_v28  ;;  %9433 = vmatmul.mubr.msk.bf16.vlgmr.msra.gmra.mrb[0].mxu1 %vm5256_vm0, %v9688_v28  ;;  %v639_v28 = vunpack.c.h.s8.bf16 %v189_v33 }
 0x163   :  { %5589 = vmatpush1.bf16.msra.mxu0 %v8652_v29  ;;  %5753 = vmatpush1.bf16.msra.mxu1 %v8654_v30  ;;  %v647_v29 = vunpack.c.h.s8.bf16 %v193_v20  ;;  %v197_v30 = vld [vmem:[#allocation2 + $0x208] sm:$0xff] }
 0x164   :  { %5590 = vmatprep.subr.bf16.mxu0 %v8669_v32  ;;  %5754 = vmatprep.subr.bf16.mxu1 %v8671_v36  ;;  %v201_v32 = vld [vmem:[#allocation2 + $0x228] sm:$0xff]  ;;  %v8750_v36 = vcombine.low %v623_v17, %v631_v18  ;;  %v654_v38 = vunpack.c.l.s8.bf16 %v197_v30  ;;  %v655_v41 = vunpack.c.h.s8.bf16 %v197_v30  ;;  %v743_v30 = vunpack.c.h.s8.bf16 %v241_v24 }
 0x165   :  { %5620 = vmatprep.mubr.bf16.mxu0 %v10086_v35  ;;  %5784 = vmatprep.mubr.bf16.mxu1 %v10086_v35  ;;  %v8767_v39 = vcombine.high %v639_v28, %v647_v29  ;;  %v662_v40 = vunpack.c.l.s8.bf16 %v201_v32 }
 0x167   :  { %5591 = vmatpush1.bf16.msra.mxu0 %v8668_v42  ;;  %5755 = vmatpush1.bf16.msra.mxu1 %v8670_v53  ;;  %v663_v42 = vunpack.c.h.s8.bf16 %v201_v32  ;;  %v205_v53 = vld [vmem:[#allocation2 + $0x248] sm:$0xff]  ;;  %v8781_v49 = vcombine.high %v654_v38, %v662_v40  ;;  %v8780_v57 = vcombine.low %v654_v38, %v662_v40 }
 0x168   :  { %5592 = vmatprep.subr.bf16.mxu0 %v8685_v46  ;;  %5756 = vmatprep.subr.bf16.mxu1 %v8687_v47  ;;  %v8766_v46 = vcombine.low %v639_v28, %v647_v29  ;;  %v670_v47 = vunpack.c.l.s8.bf16 %v205_v53  ;;  %v671_v51 = vunpack.c.h.s8.bf16 %v205_v53  ;;  %v742_v28 = vunpack.c.l.s8.bf16 %v241_v24 }
 0x169   :  { %v8783_v50 = vcombine.high %v655_v41, %v663_v42 }
 0x16a   :  { %v8797_v59 = vcombine.high %v670_v47, %v678_v48  ;;  %v8796_v3 = vcombine.low %v670_v47, %v678_v48  ;;  %v257_v47 = vld [vmem:[#allocation2 + $0x3e8] sm:$0xff] }
 0x16b   :  { %5593 = vmatpush1.bf16.msra.mxu0 %v8684_v54  ;;  %5757 = vmatpush1.bf16.msra.mxu1 %v8686_v55  ;;  %v679_v54 = vunpack.c.h.s8.bf16 %v209_v44  ;;  %v213_v55 = vld [vmem:[#allocation2 + $0x288] sm:$0xff] }
 0x16c   :  { %5594 = vmatprep.subr.bf16.mxu0 %v8701_v56  ;;  %5758 = vmatprep.subr.bf16.mxu1 %v8703_v58  ;;  %v217_v56 = vld [vmem:[#allocation2 + $0x2a8] sm:$0xff]  ;;  %v8782_v58 = vcombine.low %v655_v41, %v663_v42  ;;  %v686_v60 = vunpack.c.l.s8.bf16 %v213_v55  ;;  %v687_v22 = vunpack.c.h.s8.bf16 %v213_v55  ;;  %v775_v55 = vunpack.c.h.s8.bf16 %v257_v47 }
 0x16d   :  { %v8799_v61 = vcombine.high %v671_v51, %v679_v54  ;;  %v694_v62 = vunpack.c.l.s8.bf16 %v217_v56 }
 0x16f   :  { %5595 = vmatpush1.bf16.msra.mxu0 %v8700_v0  ;;  %5759 = vmatpush1.bf16.msra.mxu1 %v8702_v1  ;;  %v695_v0 = vunpack.c.h.s8.bf16 %v217_v56  ;;  %v221_v1 = vld [vmem:[#allocation2 + $0x2c8] sm:$0xff]  ;;  %v8813_v9 = vcombine.high %v686_v60, %v694_v62  ;;  %v8812_v13 = vcombine.low %v686_v60, %v694_v62 }
 0x170   :  { %5596 = vmatprep.subr.bf16.mxu0 %v8717_v4  ;;  %5760 = vmatprep.subr.bf16.mxu1 %v8719_v5  ;;  %v8798_v4 = vcombine.low %v671_v51, %v679_v54  ;;  %v702_v5 = vunpack.c.l.s8.bf16 %v221_v1  ;;  %v703_v7 = vunpack.c.h.s8.bf16 %v221_v1  ;;  %v774_v51 = vunpack.c.l.s8.bf16 %v257_v47 }
 0x172   :  { %v8829_v16 = vcombine.high %v702_v5, %v710_v6  ;;  %v8831_v17 = vcombine.high %v703_v7, %v711_v8  ;;  %v8828_v25 = vcombine.low %v702_v5, %v710_v6  ;;  %v273_v5 = vld [vmem:[#allocation2 + $0x468] sm:$0xff] }
 0x173   :  { %5597 = vmatpush1.bf16.msra.mxu0 %v8716_v10  ;;  %5761 = vmatpush1.bf16.msra.mxu1 %v8718_v11  ;;  %v8815_v10 = vcombine.high %v687_v22, %v695_v0  ;;  %v229_v11 = vld [vmem:[#allocation2 + $0x308] sm:$0xff] }
 0x174   :  { %5598 = vmatprep.subr.bf16.mxu0 %v8733_v12  ;;  %5762 = vmatprep.subr.bf16.mxu1 %v8735_v15  ;;  %v233_v12 = vld [vmem:[#allocation2 + $0x328] sm:$0xff]  ;;  %v8814_v15 = vcombine.low %v687_v22, %v695_v0  ;;  %v718_v18 = vunpack.c.l.s8.bf16 %v229_v11  ;;  %v719_v20 = vunpack.c.h.s8.bf16 %v229_v11  ;;  %v807_v11 = vunpack.c.h.s8.bf16 %v273_v5 }
 0x175   :  { %v726_v33 = vunpack.c.l.s8.bf16 %v233_v12 }
 0x177   :  { %5599 = vmatpush1.bf16.msra.mxu0 %v8732_v21  ;;  %5763 = vmatpush1.bf16.msra.mxu1 %v8734_v23  ;;  %v727_v21 = vunpack.c.h.s8.bf16 %v233_v12  ;;  %v237_v23 = vld [vmem:[#allocation2 + $0x348] sm:$0xff]  ;;  %v8845_v32 = vcombine.high %v718_v18, %v726_v33  ;;  %v8844_v38 = vcombine.low %v718_v18, %v726_v33 }
 0x178   :  { %5600 = vmatprep.subr.bf16.mxu0 %v8749_v26  ;;  %5764 = vmatprep.subr.bf16.mxu1 %v8751_v27  ;;  %v8830_v26 = vcombine.low %v703_v7, %v711_v8  ;;  %v734_v27 = vunpack.c.l.s8.bf16 %v237_v23  ;;  %v735_v29 = vunpack.c.h.s8.bf16 %v237_v23 }
 0x17a   :  { %v8861_v40 = vcombine.high %v734_v27, %v742_v28  ;;  %v8863_v41 = vcombine.high %v735_v29, %v743_v30  ;;  %v8860_v48 = vcombine.low %v734_v27, %v742_v28  ;;  %v289_v27 = vld [vmem:[#allocation2 + $0x4e8] sm:$0xff] }
 0x17b   :  { %5601 = vmatpush1.bf16.msra.mxu0 %v8748_v34  ;;  %5765 = vmatpush1.bf16.msra.mxu1 %v8750_v36  ;;  %v8847_v34 = vcombine.high %v719_v20, %v727_v21  ;;  %v245_v36 = vld [vmem:[#allocation2 + $0x388] sm:$0xff] }
 0x17c   :  { %5602 = vmatprep.subr.bf16.mxu0 %v8765_v37  ;;  %5766 = vmatprep.subr.bf16.mxu1 %v8767_v39  ;;  %v249_v37 = vld [vmem:[#allocation2 + $0x3a8] sm:$0xff]  ;;  %v8846_v39 = vcombine.low %v719_v20, %v727_v21  ;;  %v750_v42 = vunpack.c.l.s8.bf16 %v245_v36  ;;  %v751_v44 = vunpack.c.h.s8.bf16 %v245_v36  ;;  %v839_v36 = vunpack.c.h.s8.bf16 %v289_v27 }
 0x17d   :  { %v758_v53 = vunpack.c.l.s8.bf16 %v249_v37 }
 0x17f   :  { %5603 = vmatpush1.bf16.msra.mxu0 %v8764_v45  ;;  %5767 = vmatpush1.bf16.msra.mxu1 %v8766_v46  ;;  %v759_v45 = vunpack.c.h.s8.bf16 %v249_v37  ;;  %v253_v46 = vld [vmem:[#allocation2 + $0x3c8] sm:$0xff]  ;;  %v8877_v56 = vcombine.high %v750_v42, %v758_v53  ;;  %v8876_v60 = vcombine.low %v750_v42, %v758_v53 }
 0x180   :  { %5604 = vmatprep.subr.bf16.mxu0 %v8781_v49  ;;  %5768 = vmatprep.subr.bf16.mxu1 %v8783_v50  ;;  %v8862_v49 = vcombine.low %v735_v29, %v743_v30  ;;  %v766_v50 = vunpack.c.l.s8.bf16 %v253_v46  ;;  %v767_v54 = vunpack.c.h.s8.bf16 %v253_v46 }
 0x182   :  { %v8893_v62 = vcombine.high %v766_v50, %v774_v51  ;;  %v8895_v22 = vcombine.high %v767_v54, %v775_v55  ;;  %v8892_v6 = vcombine.low %v766_v50, %v774_v51  ;;  %v8894_v7 = vcombine.low %v767_v54, %v775_v55  ;;  %v305_v50 = vld [vmem:[#allocation2 + $0x568] sm:$0xff] }
 0x183   :  { %5605 = vmatpush1.bf16.msra.mxu0 %v8780_v57  ;;  %5769 = vmatpush1.bf16.msra.mxu1 %v8782_v58  ;;  %v8879_v57 = vcombine.high %v751_v44, %v759_v45  ;;  %v261_v58 = vld [vmem:[#allocation2 + $0x408] sm:$0xff] }
 0x184   :  { %5606 = vmatprep.subr.bf16.mxu0 %v8797_v59  ;;  %5770 = vmatprep.subr.bf16.mxu1 %v8799_v61  ;;  %v265_v59 = vld [vmem:[#allocation2 + $0x428] sm:$0xff]  ;;  %v8878_v61 = vcombine.low %v751_v44, %v759_v45  ;;  %v782_v0 = vunpack.c.l.s8.bf16 %v261_v58  ;;  %v783_v2 = vunpack.c.h.s8.bf16 %v261_v58  ;;  %v871_v58 = vunpack.c.h.s8.bf16 %v305_v50 }
 0x185   :  { %v790_v1 = vunpack.c.l.s8.bf16 %v265_v59 }
 0x187   :  { %5607 = vmatpush1.bf16.msra.mxu0 %v8796_v3  ;;  %5771 = vmatpush1.bf16.msra.mxu1 %v8798_v4  ;;  %v791_v3 = vunpack.c.h.s8.bf16 %v265_v59  ;;  %v269_v4 = vld [vmem:[#allocation2 + $0x448] sm:$0xff]  ;;  %v8909_v12 = vcombine.high %v782_v0, %v790_v1 }
 0x188   :  { %5608 = vmatprep.subr.bf16.mxu0 %v8813_v9  ;;  %5772 = vmatprep.subr.bf16.mxu1 %v8815_v10  ;;  %v798_v8 = vunpack.c.l.s8.bf16 %v269_v4  ;;  %v806_v9 = vunpack.c.l.s8.bf16 %v273_v5  ;;  %v799_v10 = vunpack.c.h.s8.bf16 %v269_v4 }
 0x189   :  { %v8910_v18 = vcombine.low %v783_v2, %v791_v3 }
 0x18a   :  { %v8925_v33 = vcombine.high %v798_v8, %v806_v9  ;;  %v8927_v20 = vcombine.high %v799_v10, %v807_v11  ;;  %v8924_v28 = vcombine.low %v798_v8, %v806_v9  ;;  %v8926_v29 = vcombine.low %v799_v10, %v807_v11  ;;  %v321_v8 = vld [vmem:[#allocation2 + $0x5e8] sm:$0xff] }
 0x18b   :  { %5609 = vmatpush1.bf16.msra.mxu0 %v8812_v13  ;;  %5773 = vmatpush1.bf16.msra.mxu1 %v8814_v15  ;;  %v8911_v13 = vcombine.high %v783_v2, %v791_v3  ;;  %v277_v15 = vld [vmem:[#allocation2 + $0x488] sm:$0xff] }
 0x18c   :  { %5610 = vmatprep.subr.bf16.mxu0 %v8829_v16  ;;  %5774 = vmatprep.subr.bf16.mxu1 %v8831_v17  ;;  %v281_v16 = vld [vmem:[#allocation2 + $0x4a8] sm:$0xff]  ;;  %v8908_v17 = vcombine.low %v782_v0, %v790_v1  ;;  %v814_v21 = vunpack.c.l.s8.bf16 %v277_v15  ;;  %v815_v24 = vunpack.c.h.s8.bf16 %v277_v15  ;;  %v903_v15 = vunpack.c.h.s8.bf16 %v321_v8 }
 0x18d   :  { %v822_v23 = vunpack.c.l.s8.bf16 %v281_v16 }
 0x18f   :  { %5611 = vmatpush1.bf16.msra.mxu0 %v8828_v25  ;;  %5775 = vmatpush1.bf16.msra.mxu1 %v8830_v26  ;;  %v823_v25 = vunpack.c.h.s8.bf16 %v281_v16  ;;  %v285_v26 = vld [vmem:[#allocation2 + $0x4c8] sm:$0xff]  ;;  %v8941_v37 = vcombine.high %v814_v21, %v822_v23 }
 0x190   :  { %5612 = vmatprep.subr.bf16.mxu0 %v8845_v32  ;;  %5776 = vmatprep.subr.bf16.mxu1 %v8847_v34  ;;  %v830_v30 = vunpack.c.l.s8.bf16 %v285_v26  ;;  %v838_v32 = vunpack.c.l.s8.bf16 %v289_v27  ;;  %v831_v34 = vunpack.c.h.s8.bf16 %v285_v26 }
 0x191   :  { %v8942_v42 = vcombine.low %v815_v24, %v823_v25 }
 0x192   :  { %v8957_v53 = vcombine.high %v830_v30, %v838_v32  ;;  %v8959_v44 = vcombine.high %v831_v34, %v839_v36  ;;  %v8956_v51 = vcombine.low %v830_v30, %v838_v32  ;;  %v8958_v54 = vcombine.low %v831_v34, %v839_v36  ;;  %v337_v30 = vld [vmem:[#allocation2 + $0x668] sm:$0xff] }
 0x193   :  { %5613 = vmatpush1.bf16.msra.mxu0 %v8844_v38  ;;  %5777 = vmatpush1.bf16.msra.mxu1 %v8846_v39  ;;  %v8943_v38 = vcombine.high %v815_v24, %v823_v25  ;;  %v293_v39 = vld [vmem:[#allocation2 + $0x508] sm:$0xff] }
 0x194   :  { %5614 = vmatprep.subr.bf16.mxu0 %v8861_v40  ;;  %5778 = vmatprep.subr.bf16.mxu1 %v8863_v41  ;;  %v297_v40 = vld [vmem:[#allocation2 + $0x528] sm:$0xff]  ;;  %v8940_v41 = vcombine.low %v814_v21, %v822_v23  ;;  %v846_v45 = vunpack.c.l.s8.bf16 %v293_v39  ;;  %v847_v47 = vunpack.c.h.s8.bf16 %v293_v39  ;;  %v935_v39 = vunpack.c.h.s8.bf16 %v337_v30 }
 0x195   :  { %v854_v46 = vunpack.c.l.s8.bf16 %v297_v40 }
 0x197   :  { %5615 = vmatpush1.bf16.msra.mxu0 %v8860_v48  ;;  %5779 = vmatpush1.bf16.msra.mxu1 %v8862_v49  ;;  %v855_v48 = vunpack.c.h.s8.bf16 %v297_v40  ;;  %v301_v49 = vld [vmem:[#allocation2 + $0x548] sm:$0xff]  ;;  %v8973_v59 = vcombine.high %v846_v45, %v854_v46 }
 0x198   :  { %5616 = vmatprep.subr.bf16.mxu0 %v8877_v56  ;;  %5780 = vmatprep.subr.bf16.mxu1 %v8879_v57  ;;  %v862_v55 = vunpack.c.l.s8.bf16 %v301_v49  ;;  %v870_v56 = vunpack.c.l.s8.bf16 %v305_v50  ;;  %v863_v57 = vunpack.c.h.s8.bf16 %v301_v49 }
 0x199   :  { %v8974_v0 = vcombine.low %v847_v47, %v855_v48 }
 0x19a   :  { %v8989_v1 = vcombine.high %v862_v55, %v870_v56  ;;  %v8991_v2 = vcombine.high %v863_v57, %v871_v58  ;;  %v8988_v9 = vcombine.low %v862_v55, %v870_v56  ;;  %v8990_v10 = vcombine.low %v863_v57, %v871_v58  ;;  %v353_v55 = vld [vmem:[#allocation2 + $0x6e8] sm:$0xff] }
 0x19b   :  { %5617 = vmatpush1.bf16.msra.mxu0 %v8876_v60  ;;  %5781 = vmatpush1.bf16.msra.mxu1 %v8878_v61  ;;  %v8975_v60 = vcombine.high %v847_v47, %v855_v48  ;;  %v309_v61 = vld [vmem:[#allocation2 + $0x588] sm:$0xff] }
 0x19c   :  { %5618 = vmatprep.subr.bf16.mxu0 %v8893_v62  ;;  %5782 = vmatprep.subr.bf16.mxu1 %v8895_v22  ;;  %v313_v62 = vld [vmem:[#allocation2 + $0x5a8] sm:$0xff]  ;;  %v8972_v22 = vcombine.low %v846_v45, %v854_v46  ;;  %v878_v3 = vunpack.c.l.s8.bf16 %v309_v61  ;;  %v879_v5 = vunpack.c.h.s8.bf16 %v309_v61  ;;  %v967_v61 = vunpack.c.h.s8.bf16 %v353_v55 }
 0x19d   :  { %v886_v4 = vunpack.c.l.s8.bf16 %v313_v62 }
 0x19f   :  { %5619 = vmatpush1.bf16.msra.mxu0 %v8892_v6  ;;  %5783 = vmatpush1.bf16.msra.mxu1 %v8894_v7  ;;  %v887_v6 = vunpack.c.h.s8.bf16 %v313_v62  ;;  %v317_v7 = vld [vmem:[#allocation2 + $0x5c8] sm:$0xff]  ;;  %v9005_v16 = vcombine.high %v878_v3, %v886_v4 }
 0x1a0   :  { %5629 = vmatprep.subr.bf16.mxu0 %v8909_v12  ;;  %5793 = vmatprep.subr.bf16.mxu1 %v8911_v13  ;;  %v894_v11 = vunpack.c.l.s8.bf16 %v317_v7  ;;  %v902_v12 = vunpack.c.l.s8.bf16 %v321_v8  ;;  %v895_v13 = vunpack.c.h.s8.bf16 %v317_v7 }
 0x1a1   :  { %v9006_v21 = vcombine.low %v879_v5, %v887_v6 }
 0x1a2   :  { %5621 = vmatmul.mubr.bf16.vlgmr.msra.gmra.mrb[4].mxu0 %v10092_v52  ;;  %5785 = vmatmul.mubr.bf16.vlgmr.msra.gmra.mrb[4].mxu1 %v10092_v52  ;;  %v9021_v23 = vcombine.high %v894_v11, %v902_v12  ;;  %v9023_v24 = vcombine.high %v895_v13, %v903_v15  ;;  %v9020_v32 = vcombine.low %v894_v11, %v902_v12  ;;  %v369_v11 = vld [vmem:[#allocation2 + $0x768] sm:$0xff] }
 0x1a3   :  { %5630 = vmatpush1.bf16.msra.mxu0 %v8908_v17  ;;  %5794 = vmatpush1.bf16.msra.mxu1 %v8910_v18  ;;  %v9007_v17 = vcombine.high %v879_v5, %v887_v6  ;;  %v325_v18 = vld [vmem:[#allocation2 + $0x608] sm:$0xff]  ;;  %v9022_v34 = vcombine.low %v895_v13, %v903_v15 }
 0x1a4   :  { %5631 = vmatprep.subr.bf16.mxu0 %v8925_v33  ;;  %5795 = vmatprep.subr.bf16.mxu1 %v8927_v20  ;;  %v329_v33 = vld [vmem:[#allocation2 + $0x628] sm:$0xff]  ;;  %v9004_v20 = vcombine.low %v878_v3, %v886_v4  ;;  %v910_v25 = vunpack.c.l.s8.bf16 %v325_v18  ;;  %v911_v27 = vunpack.c.h.s8.bf16 %v325_v18  ;;  %v999_v18 = vunpack.c.h.s8.bf16 %v369_v11 }
 0x1a5   :  { %5661 = vmatprep.mubr.bf16.mxu0 %v10101_v63  ;;  %5825 = vmatprep.mubr.bf16.mxu1 %v10101_v63  ;;  %v918_v26 = vunpack.c.l.s8.bf16 %v329_v33 }
 0x1a7   :  { %5632 = vmatpush1.bf16.msra.mxu0 %v8924_v28  ;;  %5796 = vmatpush1.bf16.msra.mxu1 %v8926_v29  ;;  %v919_v28 = vunpack.c.h.s8.bf16 %v329_v33  ;;  %v333_v29 = vld [vmem:[#allocation2 + $0x648] sm:$0xff]  ;;  %v9037_v40 = vcombine.high %v910_v25, %v918_v26 }
 0x1a8   :  { %5633 = vmatprep.subr.bf16.mxu0 %v8941_v37  ;;  %5797 = vmatprep.subr.bf16.mxu1 %v8943_v38  ;;  %v926_v36 = vunpack.c.l.s8.bf16 %v333_v29  ;;  %v934_v37 = vunpack.c.l.s8.bf16 %v337_v30  ;;  %v927_v38 = vunpack.c.h.s8.bf16 %v333_v29 }
 0x1a9   :  { %v9038_v45 = vcombine.low %v911_v27, %v919_v28 }
 0x1aa   :  { %v9053_v46 = vcombine.high %v926_v36, %v934_v37  ;;  %v9055_v47 = vcombine.high %v927_v38, %v935_v39  ;;  %v9052_v56 = vcombine.low %v926_v36, %v934_v37  ;;  %v9054_v57 = vcombine.low %v927_v38, %v935_v39  ;;  %v385_v36 = vld [vmem:[#allocation2 + $0x7e8] sm:$0xff] }
 0x1ab   :  { %5634 = vmatpush1.bf16.msra.mxu0 %v8940_v41  ;;  %5798 = vmatpush1.bf16.msra.mxu1 %v8942_v42  ;;  %v9039_v41 = vcombine.high %v911_v27, %v919_v28  ;;  %v341_v42 = vld [vmem:[#allocation2 + $0x688] sm:$0xff] }
 0x1ac   :  { %5635 = vmatprep.subr.bf16.mxu0 %v8957_v53  ;;  %5799 = vmatprep.subr.bf16.mxu1 %v8959_v44  ;;  %v345_v53 = vld [vmem:[#allocation2 + $0x6a8] sm:$0xff]  ;;  %v9036_v44 = vcombine.low %v910_v25, %v918_v26  ;;  %v942_v48 = vunpack.c.l.s8.bf16 %v341_v42  ;;  %v943_v50 = vunpack.c.h.s8.bf16 %v341_v42  ;;  %v1031_v42 = vunpack.c.h.s8.bf16 %v385_v36 }
 0x1ad   :  { %v950_v49 = vunpack.c.l.s8.bf16 %v345_v53 }
 0x1af   :  { %5636 = vmatpush1.bf16.msra.mxu0 %v8956_v51  ;;  %5800 = vmatpush1.bf16.msra.mxu1 %v8958_v54  ;;  %v951_v51 = vunpack.c.h.s8.bf16 %v345_v53  ;;  %v349_v54 = vld [vmem:[#allocation2 + $0x6c8] sm:$0xff]  ;;  %v9069_v62 = vcombine.high %v942_v48, %v950_v49 }
 0x1b0   :  { %5637 = vmatprep.subr.bf16.mxu0 %v8973_v59  ;;  %5801 = vmatprep.subr.bf16.mxu1 %v8975_v60  ;;  %v958_v58 = vunpack.c.l.s8.bf16 %v349_v54  ;;  %v966_v59 = vunpack.c.l.s8.bf16 %v353_v55  ;;  %v959_v60 = vunpack.c.h.s8.bf16 %v349_v54 }
 0x1b1   :  { %v9070_v3 = vcombine.low %v943_v50, %v951_v51 }
 0x1b2   :  { %v9085_v4 = vcombine.high %v958_v58, %v966_v59  ;;  %v9087_v5 = vcombine.high %v959_v60, %v967_v61  ;;  %v9084_v12 = vcombine.low %v958_v58, %v966_v59  ;;  %v9086_v13 = vcombine.low %v959_v60, %v967_v61  ;;  %v401_v58 = vld [vmem:[#allocation2 + $0x868] sm:$0xff] }
 0x1b3   :  { %5638 = vmatpush1.bf16.msra.mxu0 %v8972_v22  ;;  %5802 = vmatpush1.bf16.msra.mxu1 %v8974_v0  ;;  %v9071_v22 = vcombine.high %v943_v50, %v951_v51  ;;  %v357_v0 = vld [vmem:[#allocation2 + $0x708] sm:$0xff] }
 0x1b4   :  { %5639 = vmatprep.subr.bf16.mxu0 %v8989_v1  ;;  %5803 = vmatprep.subr.bf16.mxu1 %v8991_v2  ;;  %v361_v1 = vld [vmem:[#allocation2 + $0x728] sm:$0xff]  ;;  %v9068_v2 = vcombine.low %v942_v48, %v950_v49  ;;  %v974_v6 = vunpack.c.l.s8.bf16 %v357_v0  ;;  %v975_v8 = vunpack.c.h.s8.bf16 %v357_v0  ;;  %v1063_v0 = vunpack.c.h.s8.bf16 %v401_v58 }
 0x1b5   :  { %v982_v7 = vunpack.c.l.s8.bf16 %v361_v1 }
 0x1b7   :  { %5640 = vmatpush1.bf16.msra.mxu0 %v8988_v9  ;;  %5804 = vmatpush1.bf16.msra.mxu1 %v8990_v10  ;;  %v983_v9 = vunpack.c.h.s8.bf16 %v361_v1  ;;  %v365_v10 = vld [vmem:[#allocation2 + $0x748] sm:$0xff]  ;;  %v9101_v33 = vcombine.high %v974_v6, %v982_v7 }
 0x1b8   :  { %5641 = vmatprep.subr.bf16.mxu0 %v9005_v16  ;;  %5805 = vmatprep.subr.bf16.mxu1 %v9007_v17  ;;  %v990_v15 = vunpack.c.l.s8.bf16 %v365_v10  ;;  %v998_v16 = vunpack.c.l.s8.bf16 %v369_v11  ;;  %v991_v17 = vunpack.c.h.s8.bf16 %v365_v10 }
 0x1b9   :  { %v9102_v25 = vcombine.low %v975_v8, %v983_v9 }
 0x1ba   :  { %v9117_v26 = vcombine.high %v990_v15, %v998_v16  ;;  %v9119_v27 = vcombine.high %v991_v17, %v999_v18  ;;  %v9116_v37 = vcombine.low %v990_v15, %v998_v16  ;;  %v9118_v38 = vcombine.low %v991_v17, %v999_v18  ;;  %v417_v15 = vld [vmem:[#allocation2 + $0x8e8] sm:$0xff] }
 0x1bb   :  { %5642 = vmatpush1.bf16.msra.mxu0 %v9004_v20  ;;  %5806 = vmatpush1.bf16.msra.mxu1 %v9006_v21  ;;  %v9103_v20 = vcombine.high %v975_v8, %v983_v9  ;;  %v373_v21 = vld [vmem:[#allocation2 + $0x788] sm:$0xff] }
 0x1bc   :  { %5643 = vmatprep.subr.bf16.mxu0 %v9021_v23  ;;  %5807 = vmatprep.subr.bf16.mxu1 %v9023_v24  ;;  %v377_v23 = vld [vmem:[#allocation2 + $0x7a8] sm:$0xff]  ;;  %v9100_v24 = vcombine.low %v974_v6, %v982_v7  ;;  %v1006_v28 = vunpack.c.l.s8.bf16 %v373_v21  ;;  %v1007_v30 = vunpack.c.h.s8.bf16 %v373_v21  ;;  %v1095_v21 = vunpack.c.h.s8.bf16 %v417_v15 }
 0x1bd   :  { %v1014_v29 = vunpack.c.l.s8.bf16 %v377_v23 }
 0x1bf   :  { %5644 = vmatpush1.bf16.msra.mxu0 %v9020_v32  ;;  %5808 = vmatpush1.bf16.msra.mxu1 %v9022_v34  ;;  %v1015_v32 = vunpack.c.h.s8.bf16 %v377_v23  ;;  %v381_v34 = vld [vmem:[#allocation2 + $0x7c8] sm:$0xff]  ;;  %v9133_v53 = vcombine.high %v1006_v28, %v1014_v29 }
 0x1c0   :  { %5645 = vmatprep.subr.bf16.mxu0 %v9037_v40  ;;  %5809 = vmatprep.subr.bf16.mxu1 %v9039_v41  ;;  %v1022_v39 = vunpack.c.l.s8.bf16 %v381_v34  ;;  %v1030_v40 = vunpack.c.l.s8.bf16 %v385_v36  ;;  %v1023_v41 = vunpack.c.h.s8.bf16 %v381_v34 }
 0x1c1   :  { %v9134_v48 = vcombine.low %v1007_v30, %v1015_v32 }
 0x1c2   :  { %v9149_v49 = vcombine.high %v1022_v39, %v1030_v40  ;;  %v9151_v50 = vcombine.high %v1023_v41, %v1031_v42  ;;  %v9148_v59 = vcombine.low %v1022_v39, %v1030_v40  ;;  %v9150_v60 = vcombine.low %v1023_v41, %v1031_v42  ;;  %v433_v39 = vld [vmem:[#allocation2 + $0x968] sm:$0xff] }
 0x1c3   :  { %5646 = vmatpush1.bf16.msra.mxu0 %v9036_v44  ;;  %5810 = vmatpush1.bf16.msra.mxu1 %v9038_v45  ;;  %v9135_v44 = vcombine.high %v1007_v30, %v1015_v32  ;;  %v389_v45 = vld [vmem:[#allocation2 + $0x808] sm:$0xff] }
 0x1c4   :  { %5647 = vmatprep.subr.bf16.mxu0 %v9053_v46  ;;  %5811 = vmatprep.subr.bf16.mxu1 %v9055_v47  ;;  %v393_v46 = vld [vmem:[#allocation2 + $0x828] sm:$0xff]  ;;  %v9132_v47 = vcombine.low %v1006_v28, %v1014_v29  ;;  %v1038_v51 = vunpack.c.l.s8.bf16 %v389_v45  ;;  %v1039_v55 = vunpack.c.h.s8.bf16 %v389_v45  ;;  %v1127_v45 = vunpack.c.h.s8.bf16 %v433_v39 }
 0x1c5   :  { %v1046_v54 = vunpack.c.l.s8.bf16 %v393_v46 }
 0x1c7   :  { %5648 = vmatpush1.bf16.msra.mxu0 %v9052_v56  ;;  %5812 = vmatpush1.bf16.msra.mxu1 %v9054_v57  ;;  %v1047_v56 = vunpack.c.h.s8.bf16 %v393_v46  ;;  %v397_v57 = vld [vmem:[#allocation2 + $0x848] sm:$0xff]  ;;  %v9165_v1 = vcombine.high %v1038_v51, %v1046_v54 }
 0x1c8   :  { %5649 = vmatprep.subr.bf16.mxu0 %v9069_v62  ;;  %5813 = vmatprep.subr.bf16.mxu1 %v9071_v22  ;;  %v1054_v61 = vunpack.c.l.s8.bf16 %v397_v57  ;;  %v1062_v62 = vunpack.c.l.s8.bf16 %v401_v58  ;;  %v1055_v22 = vunpack.c.h.s8.bf16 %v397_v57 }
 0x1c9   :  { %v9166_v6 = vcombine.low %v1039_v55, %v1047_v56 }
 0x1ca   :  { %v9181_v7 = vcombine.high %v1054_v61, %v1062_v62  ;;  %v9183_v8 = vcombine.high %v1055_v22, %v1063_v0  ;;  %v9180_v16 = vcombine.low %v1054_v61, %v1062_v62  ;;  %v9182_v17 = vcombine.low %v1055_v22, %v1063_v0  ;;  %v449_v61 = vld [vmem:[#allocation2 + $0x9e8] sm:$0xff] }
 0x1cb   :  { %5650 = vmatpush1.bf16.msra.mxu0 %v9068_v2  ;;  %5814 = vmatpush1.bf16.msra.mxu1 %v9070_v3  ;;  %v9167_v2 = vcombine.high %v1039_v55, %v1047_v56  ;;  %v405_v3 = vld [vmem:[#allocation2 + $0x888] sm:$0xff] }
 0x1cc   :  { %5651 = vmatprep.subr.bf16.mxu0 %v9085_v4  ;;  %5815 = vmatprep.subr.bf16.mxu1 %v9087_v5  ;;  %v409_v4 = vld [vmem:[#allocation2 + $0x8a8] sm:$0xff]  ;;  %v9164_v5 = vcombine.low %v1038_v51, %v1046_v54  ;;  %v1070_v9 = vunpack.c.l.s8.bf16 %v405_v3  ;;  %v1071_v11 = vunpack.c.h.s8.bf16 %v405_v3  ;;  %v1159_v3 = vunpack.c.h.s8.bf16 %v449_v61 }
 0x1cd   :  { %v1078_v10 = vunpack.c.l.s8.bf16 %v409_v4 }
 0x1cf   :  { %5652 = vmatpush1.bf16.msra.mxu0 %v9084_v12  ;;  %5816 = vmatpush1.bf16.msra.mxu1 %v9086_v13  ;;  %v1079_v12 = vunpack.c.h.s8.bf16 %v409_v4  ;;  %v413_v13 = vld [vmem:[#allocation2 + $0x8c8] sm:$0xff]  ;;  %v9197_v23 = vcombine.high %v1070_v9, %v1078_v10 }
 0x1d0   :  { %5653 = vmatprep.subr.bf16.mxu0 %v9101_v33  ;;  %5817 = vmatprep.subr.bf16.mxu1 %v9103_v20  ;;  %v1086_v18 = vunpack.c.l.s8.bf16 %v413_v13  ;;  %v1094_v33 = vunpack.c.l.s8.bf16 %v417_v15  ;;  %v1087_v20 = vunpack.c.h.s8.bf16 %v413_v13 }
 0x1d1   :  { %v9198_v28 = vcombine.low %v1071_v11, %v1079_v12 }
 0x1d2   :  { %v9213_v29 = vcombine.high %v1086_v18, %v1094_v33  ;;  %v9215_v30 = vcombine.high %v1087_v20, %v1095_v21  ;;  %v9212_v40 = vcombine.low %v1086_v18, %v1094_v33  ;;  %v9214_v41 = vcombine.low %v1087_v20, %v1095_v21  ;;  %v465_v18 = vld [vmem:[#allocation2 + $0xa68] sm:$0xff] }
 0x1d3   :  { %5654 = vmatpush1.bf16.msra.mxu0 %v9100_v24  ;;  %5818 = vmatpush1.bf16.msra.mxu1 %v9102_v25  ;;  %v9199_v24 = vcombine.high %v1071_v11, %v1079_v12  ;;  %v421_v25 = vld [vmem:[#allocation2 + $0x908] sm:$0xff] }
 0x1d4   :  { %5655 = vmatprep.subr.bf16.mxu0 %v9117_v26  ;;  %5819 = vmatprep.subr.bf16.mxu1 %v9119_v27  ;;  %v425_v26 = vld [vmem:[#allocation2 + $0x928] sm:$0xff]  ;;  %v9196_v27 = vcombine.low %v1070_v9, %v1078_v10  ;;  %v1102_v32 = vunpack.c.l.s8.bf16 %v421_v25  ;;  %v1103_v36 = vunpack.c.h.s8.bf16 %v421_v25  ;;  %v1191_v25 = vunpack.c.h.s8.bf16 %v465_v18 }
 0x1d5   :  { %v1110_v34 = vunpack.c.l.s8.bf16 %v425_v26 }
 0x1d7   :  { %5656 = vmatpush1.bf16.msra.mxu0 %v9116_v37  ;;  %5820 = vmatpush1.bf16.msra.mxu1 %v9118_v38  ;;  %v1111_v37 = vunpack.c.h.s8.bf16 %v425_v26  ;;  %v429_v38 = vld [vmem:[#allocation2 + $0x948] sm:$0xff]  ;;  %v9229_v46 = vcombine.high %v1102_v32, %v1110_v34 }
 0x1d8   :  { %5657 = vmatprep.subr.bf16.mxu0 %v9133_v53  ;;  %5821 = vmatprep.subr.bf16.mxu1 %v9135_v44  ;;  %v1118_v42 = vunpack.c.l.s8.bf16 %v429_v38  ;;  %v1126_v53 = vunpack.c.l.s8.bf16 %v433_v39  ;;  %v1119_v44 = vunpack.c.h.s8.bf16 %v429_v38 }
 0x1d9   :  { %v9230_v51 = vcombine.low %v1103_v36, %v1111_v37 }
 0x1da   :  { %v9245_v54 = vcombine.high %v1118_v42, %v1126_v53  ;;  %v9247_v55 = vcombine.high %v1119_v44, %v1127_v45  ;;  %v9244_v62 = vcombine.low %v1118_v42, %v1126_v53  ;;  %v9246_v22 = vcombine.low %v1119_v44, %v1127_v45  ;;  %v481_v42 = vld [vmem:[#allocation2 + $0xae8] sm:$0xff] }
 0x1db   :  { %5658 = vmatpush1.bf16.msra.mxu0 %v9132_v47  ;;  %5822 = vmatpush1.bf16.msra.mxu1 %v9134_v48  ;;  %v9231_v47 = vcombine.high %v1103_v36, %v1111_v37  ;;  %v437_v48 = vld [vmem:[#allocation2 + $0x988] sm:$0xff] }
 0x1dc   :  { %5659 = vmatprep.subr.bf16.mxu0 %v9149_v49  ;;  %5823 = vmatprep.subr.bf16.mxu1 %v9151_v50  ;;  %v441_v49 = vld [vmem:[#allocation2 + $0x9a8] sm:$0xff]  ;;  %v9228_v50 = vcombine.low %v1102_v32, %v1110_v34  ;;  %v1134_v56 = vunpack.c.l.s8.bf16 %v437_v48  ;;  %v1135_v58 = vunpack.c.h.s8.bf16 %v437_v48  ;;  %v1223_v48 = vunpack.c.h.s8.bf16 %v481_v42 }
 0x1dd   :  { %v1142_v57 = vunpack.c.l.s8.bf16 %v441_v49 }
 0x1df   :  { %5660 = vmatpush1.bf16.msra.mxu0 %v9148_v59  ;;  %5824 = vmatpush1.bf16.msra.mxu1 %v9150_v60  ;;  %v1143_v59 = vunpack.c.h.s8.bf16 %v441_v49  ;;  %v445_v60 = vld [vmem:[#allocation2 + $0x9c8] sm:$0xff]  ;;  %v9261_v4 = vcombine.high %v1134_v56, %v1142_v57 }
 0x1e0   :  { %5670 = vmatprep.subr.bf16.mxu0 %v9165_v1  ;;  %5834 = vmatprep.subr.bf16.mxu1 %v9167_v2  ;;  %v1150_v0 = vunpack.c.l.s8.bf16 %v445_v60  ;;  %v1158_v1 = vunpack.c.l.s8.bf16 %v449_v61  ;;  %v1151_v2 = vunpack.c.h.s8.bf16 %v445_v60 }
 0x1e1   :  { %v9262_v9 = vcombine.low %v1135_v58, %v1143_v59 }
 0x1e2   :  { %5662 = vmatmul.mubr.bf16.vlgmr.msra.gmra.mrb[4].mxu0 %v10109_v31  ;;  %5826 = vmatmul.mubr.bf16.vlgmr.msra.gmra.mrb[4].mxu1 %v10109_v31  ;;  %v9277_v10 = vcombine.high %v1150_v0, %v1158_v1  ;;  %v9279_v11 = vcombine.high %v1151_v2, %v1159_v3  ;;  %v9276_v33 = vcombine.low %v1150_v0, %v1158_v1  ;;  %v497_v0 = vld [vmem:[#allocation2 + $0xb68] sm:$0xff] }
 0x1e3   :  { %5671 = vmatpush1.bf16.msra.mxu0 %v9164_v5  ;;  %5835 = vmatpush1.bf16.msra.mxu1 %v9166_v6  ;;  %v9263_v5 = vcombine.high %v1135_v58, %v1143_v59  ;;  %v453_v6 = vld [vmem:[#allocation2 + $0xa08] sm:$0xff]  ;;  %v9278_v20 = vcombine.low %v1151_v2, %v1159_v3 }
 0x1e4   :  { %5672 = vmatprep.subr.bf16.mxu0 %v9181_v7  ;;  %5836 = vmatprep.subr.bf16.mxu1 %v9183_v8  ;;  %v457_v7 = vld [vmem:[#allocation2 + $0xa28] sm:$0xff]  ;;  %v9260_v8 = vcombine.low %v1134_v56, %v1142_v57  ;;  %v1166_v12 = vunpack.c.l.s8.bf16 %v453_v6  ;;  %v1167_v15 = vunpack.c.h.s8.bf16 %v453_v6  ;;  %v1255_v6 = vunpack.c.h.s8.bf16 %v497_v0 }
 0x1e5   :  { %5702 = vmatprep.mubr.bf16.mxu0 %v10118_v43  ;;  %5866 = vmatprep.mubr.bf16.mxu1 %v10118_v43  ;;  %v1174_v13 = vunpack.c.l.s8.bf16 %v457_v7 }
 0x1e7   :  { %5673 = vmatpush1.bf16.msra.mxu0 %v9180_v16  ;;  %5837 = vmatpush1.bf16.msra.mxu1 %v9182_v17  ;;  %v1175_v16 = vunpack.c.h.s8.bf16 %v457_v7  ;;  %v461_v17 = vld [vmem:[#allocation2 + $0xa48] sm:$0xff]  ;;  %v9293_v26 = vcombine.high %v1166_v12, %v1174_v13 }
 0x1e8   :  { %5674 = vmatprep.subr.bf16.mxu0 %v9197_v23  ;;  %5838 = vmatprep.subr.bf16.mxu1 %v9199_v24  ;;  %v1182_v21 = vunpack.c.l.s8.bf16 %v461_v17  ;;  %v1190_v23 = vunpack.c.l.s8.bf16 %v465_v18  ;;  %v1183_v24 = vunpack.c.h.s8.bf16 %v461_v17 }
 0x1e9   :  { %v9294_v32 = vcombine.low %v1167_v15, %v1175_v16 }
 0x1ea   :  { %v9309_v34 = vcombine.high %v1182_v21, %v1190_v23  ;;  %v9311_v36 = vcombine.high %v1183_v24, %v1191_v25  ;;  %v9308_v53 = vcombine.low %v1182_v21, %v1190_v23  ;;  %v9310_v44 = vcombine.low %v1183_v24, %v1191_v25  ;;  %v513_v21 = vld [vmem:[#allocation2 + $0xbe8] sm:$0xff] }
 0x1eb   :  { %5675 = vmatpush1.bf16.msra.mxu0 %v9196_v27  ;;  %5839 = vmatpush1.bf16.msra.mxu1 %v9198_v28  ;;  %v9295_v27 = vcombine.high %v1167_v15, %v1175_v16  ;;  %v469_v28 = vld [vmem:[#allocation2 + $0xa88] sm:$0xff] }
 0x1ec   :  { %5676 = vmatprep.subr.bf16.mxu0 %v9213_v29  ;;  %5840 = vmatprep.subr.bf16.mxu1 %v9215_v30  ;;  %v473_v29 = vld [vmem:[#allocation2 + $0xaa8] sm:$0xff]  ;;  %v9292_v30 = vcombine.low %v1166_v12, %v1174_v13  ;;  %v1198_v37 = vunpack.c.l.s8.bf16 %v469_v28  ;;  %v1199_v39 = vunpack.c.h.s8.bf16 %v469_v28  ;;  %v1287_v28 = vunpack.c.h.s8.bf16 %v513_v21 }
 0x1ed   :  { %v1206_v38 = vunpack.c.l.s8.bf16 %v473_v29 }
 0x1ef   :  { %5677 = vmatpush1.bf16.msra.mxu0 %v9212_v40  ;;  %5841 = vmatpush1.bf16.msra.mxu1 %v9214_v41  ;;  %v1207_v40 = vunpack.c.h.s8.bf16 %v473_v29  ;;  %v477_v41 = vld [vmem:[#allocation2 + $0xac8] sm:$0xff]  ;;  %v9325_v49 = vcombine.high %v1198_v37, %v1206_v38 }
 0x1f0   :  { %5678 = vmatprep.subr.bf16.mxu0 %v9229_v46  ;;  %5842 = vmatprep.subr.bf16.mxu1 %v9231_v47  ;;  %v1214_v45 = vunpack.c.l.s8.bf16 %v477_v41  ;;  %v1222_v46 = vunpack.c.l.s8.bf16 %v481_v42  ;;  %v1215_v47 = vunpack.c.h.s8.bf16 %v477_v41 }
 0x1f1   :  { %v9326_v56 = vcombine.low %v1199_v39, %v1207_v40 }
 0x1f2   :  { %v9341_v57 = vcombine.high %v1214_v45, %v1222_v46  ;;  %v9343_v58 = vcombine.high %v1215_v47, %v1223_v48  ;;  %v9340_v1 = vcombine.low %v1214_v45, %v1222_v46  ;;  %v9342_v2 = vcombine.low %v1215_v47, %v1223_v48  ;;  %v138_v45 = vld [vmem:[#allocation2 + $0x30] sm:$0xff] }
 0x1f3   :  { %5679 = vmatpush1.bf16.msra.mxu0 %v9228_v50  ;;  %5843 = vmatpush1.bf16.msra.mxu1 %v9230_v51  ;;  %v9327_v50 = vcombine.high %v1199_v39, %v1207_v40  ;;  %v485_v51 = vld [vmem:[#allocation2 + $0xb08] sm:$0xff] }
 0x1f4   :  { %5680 = vmatprep.subr.bf16.mxu0 %v9245_v54  ;;  %5844 = vmatprep.subr.bf16.mxu1 %v9247_v55  ;;  %v489_v54 = vld [vmem:[#allocation2 + $0xb28] sm:$0xff]  ;;  %v9324_v55 = vcombine.low %v1198_v37, %v1206_v38  ;;  %v1230_v59 = vunpack.c.l.s8.bf16 %v485_v51  ;;  %v1231_v61 = vunpack.c.h.s8.bf16 %v485_v51  ;;  %v536_v51 = vunpack.c.l.s8.bf16 %v138_v45 }
 0x1f5   :  { %v1238_v60 = vunpack.c.l.s8.bf16 %v489_v54 }
 0x1f7   :  { %5681 = vmatpush1.bf16.msra.mxu0 %v9244_v62  ;;  %5845 = vmatpush1.bf16.msra.mxu1 %v9246_v22  ;;  %v1239_v62 = vunpack.c.h.s8.bf16 %v489_v54  ;;  %v493_v22 = vld [vmem:[#allocation2 + $0xb48] sm:$0xff]  ;;  %v9357_v7 = vcombine.high %v1230_v59, %v1238_v60 }
 0x1f8   :  { %5682 = vmatprep.subr.bf16.mxu0 %v9261_v4  ;;  %5846 = vmatprep.subr.bf16.mxu1 %v9263_v5  ;;  %v1246_v3 = vunpack.c.l.s8.bf16 %v493_v22  ;;  %v1254_v4 = vunpack.c.l.s8.bf16 %v497_v0  ;;  %v1247_v5 = vunpack.c.h.s8.bf16 %v493_v22 }
 0x1f9   :  { %v9358_v12 = vcombine.low %v1231_v61, %v1239_v62 }
 0x1fa   :  { %v9373_v13 = vcombine.high %v1246_v3, %v1254_v4  ;;  %v9375_v15 = vcombine.high %v1247_v5, %v1255_v6  ;;  %v9372_v23 = vcombine.low %v1246_v3, %v1254_v4  ;;  %v9374_v24 = vcombine.low %v1247_v5, %v1255_v6  ;;  %v154_v3 = vld [vmem:[#allocation2 + $0xb0] sm:$0xff] }
 0x1fb   :  { %5683 = vmatpush1.bf16.msra.mxu0 %v9260_v8  ;;  %5847 = vmatpush1.bf16.msra.mxu1 %v9262_v9  ;;  %v9359_v8 = vcombine.high %v1231_v61, %v1239_v62  ;;  %v501_v9 = vld [vmem:[#allocation2 + $0xb88] sm:$0xff]  ;;  %v146_v61 = vld [vmem:[#allocation2 + $0x70] sm:$0xff] }
 0x1fc   :  { %5684 = vmatprep.subr.bf16.mxu0 %v9277_v10  ;;  %5848 = vmatprep.subr.bf16.mxu1 %v9279_v11  ;;  %v505_v10 = vld [vmem:[#allocation2 + $0xba8] sm:$0xff]  ;;  %v9356_v11 = vcombine.low %v1230_v59, %v1238_v60  ;;  %v1262_v16 = vunpack.c.l.s8.bf16 %v501_v9  ;;  %v1263_v18 = vunpack.c.h.s8.bf16 %v501_v9  ;;  %v142_v60 = vld [vmem:[#allocation2 + $0x50] sm:$0xff]  ;;  %v552_v22 = vunpack.c.l.s8.bf16 %v146_v61 }
 0x1fd   :  { %v1270_v17 = vunpack.c.l.s8.bf16 %v505_v10  ;;  %v544_v62 = vunpack.c.l.s8.bf16 %v142_v60  ;;  %v545_v0 = vunpack.c.h.s8.bf16 %v142_v60  ;;  %v568_v9 = vunpack.c.l.s8.bf16 %v154_v3 }
 0x1ff   :  { %5685 = vmatpush1.bf16.msra.mxu0 %v9276_v33  ;;  %5849 = vmatpush1.bf16.msra.mxu1 %v9278_v20  ;;  %v1271_v33 = vunpack.c.h.s8.bf16 %v505_v10  ;;  %v509_v20 = vld [vmem:[#allocation2 + $0xbc8] sm:$0xff]  ;;  %v9389_v29 = vcombine.high %v1262_v16, %v1270_v17  ;;  %v8673_v6 = vcombine.high %v544_v62, %v552_v22 }
 0x200   :  { %5686 = vmatprep.subr.bf16.mxu0 %v9293_v26  ;;  %5850 = vmatprep.subr.bf16.mxu1 %v9295_v27  ;;  %v1278_v25 = vunpack.c.l.s8.bf16 %v509_v20  ;;  %v1286_v26 = vunpack.c.l.s8.bf16 %v513_v21  ;;  %v1279_v27 = vunpack.c.h.s8.bf16 %v509_v20 }
 0x201   :  { %v9390_v37 = vcombine.low %v1263_v18, %v1271_v33 }
 0x202   :  { %v9405_v38 = vcombine.high %v1278_v25, %v1286_v26  ;;  %v9407_v39 = vcombine.high %v1279_v27, %v1287_v28  ;;  %v9404_v46 = vcombine.low %v1278_v25, %v1286_v26  ;;  %v9406_v47 = vcombine.low %v1279_v27, %v1287_v28  ;;  %v166_v25 = vld [vmem:[#allocation2 + $0x110] sm:$0xff] }
 0x203   :  { %5687 = vmatpush1.bf16.msra.mxu0 %v9292_v30  ;;  %5851 = vmatpush1.bf16.msra.mxu1 %v9294_v32  ;;  %v9391_v30 = vcombine.high %v1263_v18, %v1271_v33  ;;  %v517_v32 = vld [vmem:[#allocation2 + $0xc08] sm:$0xff]  ;;  %v170_v26 = vld [vmem:[#allocation2 + $0x130] sm:$0xff] }
 0x204   :  { %5688 = vmatprep.subr.bf16.mxu0 %v9309_v34  ;;  %5852 = vmatprep.subr.bf16.mxu1 %v9311_v36  ;;  %v521_v34 = vld [vmem:[#allocation2 + $0xc28] sm:$0xff]  ;;  %v9388_v36 = vcombine.low %v1262_v16, %v1270_v17  ;;  %v1294_v40 = vunpack.c.l.s8.bf16 %v517_v32  ;;  %v1295_v42 = vunpack.c.h.s8.bf16 %v517_v32  ;;  %v8672_v16 = vcombine.low %v544_v62, %v552_v22 }
 0x205   :  { %v1302_v41 = vunpack.c.l.s8.bf16 %v521_v34  ;;  %v592_v32 = vunpack.c.l.s8.bf16 %v166_v25 }
 0x207   :  { %5689 = vmatpush1.bf16.msra.mxu0 %v9308_v53  ;;  %5853 = vmatpush1.bf16.msra.mxu1 %v9310_v44  ;;  %v1303_v53 = vunpack.c.h.s8.bf16 %v521_v34  ;;  %v134_v44 = vld [vmem:[#allocation2 + $0x10] sm:$0xff]  ;;  %v9421_v48 = vcombine.high %v1294_v40, %v1302_v41  ;;  %v600_v34 = vunpack.c.l.s8.bf16 %v170_v26 }
 0x208   :  { %5690 = vmatprep.subr.bf16.mxu0 %v9325_v49  ;;  %5854 = vmatprep.subr.bf16.mxu1 %v9327_v50  ;;  %v528_v50 = vunpack.c.l.s8.bf16 %v134_v44  ;;  %v529_v54 = vunpack.c.h.s8.bf16 %v134_v44 }
 0x209   :  { %v9423_v49 = vcombine.high %v1295_v42, %v1303_v53  ;;  %v8720_v60 = vcombine.low %v592_v32, %v600_v34 }
 0x20a   :  { %v8656_v4 = vcombine.low %v528_v50, %v536_v51 }
 0x20b   :  { %5691 = vmatpush1.bf16.msra.mxu0 %v9324_v55  ;;  %5855 = vmatpush1.bf16.msra.mxu1 %v9326_v56  ;;  %v537_v55 = vunpack.c.h.s8.bf16 %v138_v45  ;;  %v9420_v56 = vcombine.low %v1294_v40, %v1302_v41 }
 0x20c   :  { %5692 = vmatprep.subr.bf16.mxu0 %v9341_v57  ;;  %5856 = vmatprep.subr.bf16.mxu1 %v9343_v58  ;;  %v9422_v57 = vcombine.low %v1295_v42, %v1303_v53  ;;  %v8657_v58 = vcombine.high %v528_v50, %v536_v51 }
 0x20d   :  { %v8659_v59 = vcombine.high %v529_v54, %v537_v55  ;;  %v8658_v5 = vcombine.low %v529_v54, %v537_v55 }
 0x20f   :  { %5693 = vmatpush1.bf16.msra.mxu0 %v9340_v1  ;;  %5857 = vmatpush1.bf16.msra.mxu1 %v9342_v2  ;;  %v553_v1 = vunpack.c.h.s8.bf16 %v146_v61  ;;  %v150_v2 = vld [vmem:[#allocation2 + $0x90] sm:$0xff] }
 0x210   :  { %5694 = vmatprep.subr.bf16.mxu0 %v9357_v7  ;;  %5858 = vmatprep.subr.bf16.mxu1 %v9359_v8  ;;  %v560_v8 = vunpack.c.l.s8.bf16 %v150_v2  ;;  %v561_v10 = vunpack.c.h.s8.bf16 %v150_v2 }
 0x211   :  { %v8675_v7 = vcombine.high %v545_v0, %v553_v1  ;;  %v8674_v17 = vcombine.low %v545_v0, %v553_v1 }
 0x212   :  { %v8688_v27 = vcombine.low %v560_v8, %v568_v9 }
 0x213   :  { %5695 = vmatpush1.bf16.msra.mxu0 %v9356_v11  ;;  %5859 = vmatpush1.bf16.msra.mxu1 %v9358_v12  ;;  %v569_v11 = vunpack.c.h.s8.bf16 %v154_v3  ;;  %v158_v12 = vld [vmem:[#allocation2 + $0xd0] sm:$0xff] }
 0x214   :  { %5696 = vmatprep.subr.bf16.mxu0 %v9373_v13  ;;  %5860 = vmatprep.subr.bf16.mxu1 %v9375_v15  ;;  %v162_v13 = vld [vmem:[#allocation2 + $0xf0] sm:$0xff]  ;;  %v9721_v15 = vld [vmem:[%s10359_s0 + $0x18] ss:$0 sps:$4 sm:$0xff]   ;;  %v576_v18 = vunpack.c.l.s8.bf16 %v158_v12  ;;  %v577_v20 = vunpack.c.h.s8.bf16 %v158_v12 }
 0x215   :  { %v584_v33 = vunpack.c.l.s8.bf16 %v162_v13  ;;  %v585_v21 = vunpack.c.h.s8.bf16 %v162_v13  ;;  %v8690_v28 = vcombine.low %v561_v10, %v569_v11 }
 0x217   :  { %5697 = vmatpush1.bf16.msra.mxu0 %v9372_v23  ;;  %5861 = vmatpush1.bf16.msra.mxu1 %v9374_v24  ;;  %v8689_v23 = vcombine.high %v560_v8, %v568_v9  ;;  %v8691_v24 = vcombine.high %v561_v10, %v569_v11  ;;  %v8704_v44 = vcombine.low %v576_v18, %v584_v33 }
 0x218   :  { %5698 = vmatprep.subr.bf16.mxu0 %v9389_v29  ;;  %5862 = vmatprep.subr.bf16.mxu1 %v9391_v30  ;;  %v8705_v29 = vcombine.high %v576_v18, %v584_v33  ;;  %v8707_v30 = vcombine.high %v577_v20, %v585_v21  ;;  %v8706_v45 = vcombine.low %v577_v20, %v585_v21 }
 0x21b   :  { %5699 = vmatpush1.bf16.msra.mxu0 %v9388_v36  ;;  %5863 = vmatpush1.bf16.msra.mxu1 %v9390_v37  ;;  %v593_v36 = vunpack.c.h.s8.bf16 %v166_v25  ;;  %v601_v37 = vunpack.c.h.s8.bf16 %v170_v26  ;;  %v206_v26 = vld [vmem:[#allocation2 + $0x250] sm:$0xff] }
 0x21c   :  { %5700 = vmatprep.subr.bf16.mxu0 %v9405_v38  ;;  %5864 = vmatprep.subr.bf16.mxu1 %v9407_v39  ;;  %v174_v38 = vld [vmem:[#allocation2 + $0x150] sm:$0xff] }
 0x21d   :  { %v178_v39 = vld [vmem:[#allocation2 + $0x170] sm:$0xff]  ;;  %v609_v50 = vunpack.c.h.s8.bf16 %v174_v38  ;;  %v8722_v61 = vcombine.low %v593_v36, %v601_v37 }
 0x21e   :  { %v617_v51 = vunpack.c.h.s8.bf16 %v178_v39 }
 0x21f   :  { %5701 = vmatpush1.bf16.msra.mxu0 %v9404_v46  ;;  %5865 = vmatpush1.bf16.msra.mxu1 %v9406_v47 }
 0x220   :  { %5711 = vmatprep.subr.bf16.mxu0 %v9421_v48  ;;  %5875 = vmatprep.subr.bf16.mxu1 %v9423_v49  ;;  %v608_v48 = vunpack.c.l.s8.bf16 %v174_v38  ;;  %v616_v49 = vunpack.c.l.s8.bf16 %v178_v39  ;;  %v8739_v22 = vcombine.high %v609_v50, %v617_v51  ;;  %v214_v39 = vld [vmem:[#allocation2 + $0x290] sm:$0xff] }
 0x222   :  { %5703 = vmatmul.mubr.bf16.vlgmr.msra.gmra.mrb[4].mxu0 %v10126_v14  ;;  %5867 = vmatmul.mubr.bf16.vlgmr.msra.gmra.mrb[4].mxu1 %v10126_v14  ;;  %v8737_v62 = vcombine.high %v608_v48, %v616_v49 }
 0x223   :  { %5712 = vmatpush1.bf16.msra.mxu0 %v9420_v56  ;;  %5876 = vmatpush1.bf16.msra.mxu1 %v9422_v57  ;;  %v8721_v56 = vcombine.high %v592_v32, %v600_v34  ;;  %v8723_v57 = vcombine.high %v593_v36, %v601_v37  ;;  %v673_v34 = vunpack.c.h.s8.bf16 %v206_v26 }
 0x224   :  { %5743 = vmatprep.mubr.bf16.mxu0 %v9926_v19  ;;  %5907 = vmatprep.mubr.bf16.mxu1 %v9926_v19 }
 0x225   :  { %5916 = vmatprep.subr.bf16.mxu0 %v8657_v58  ;;  %6080 = vmatprep.subr.bf16.mxu1 %v8659_v59  ;;  %v182_v58 = vld [vmem:[#allocation2 + $0x190] sm:$0xff] }
 0x226   :  { %v186_v59 = vld [vmem:[#allocation2 + $0x1b0] sm:$0xff]  ;;  %v624_v0 = vunpack.c.l.s8.bf16 %v182_v58  ;;  %v625_v2 = vunpack.c.h.s8.bf16 %v182_v58 }
 0x227   :  { %v632_v1 = vunpack.c.l.s8.bf16 %v186_v59  ;;  %v633_v3 = vunpack.c.h.s8.bf16 %v186_v59 }
 0x229   :  { %v8753_v12 = vcombine.high %v624_v0, %v632_v1  ;;  %v8755_v13 = vcombine.high %v625_v2, %v633_v3  ;;  %v8754_v18 = vcombine.low %v625_v2, %v633_v3  ;;  %v234_v2 = vld [vmem:[#allocation2 + $0x330] sm:$0xff] }
 0x22e   :  { %9434 = vmatmul.mubr.msk.bf16.vlgmr.msra.gmra.mrb[4].mxu0 %vm5256_vm0, %v9721_v15  ;;  %9435 = vmatmul.mubr.msk.bf16.vlgmr.msra.gmra.mrb[4].mxu1 %vm5256_vm0, %v9721_v15  ;;  %v198_v15 = vld [vmem:[#allocation2 + $0x210] sm:$0xff] }
 0x22f   :  { %5917 = vmatpush1.bf16.msra.mxu0 %v8656_v4  ;;  %6081 = vmatpush1.bf16.msra.mxu1 %v8658_v5  ;;  %v190_v4 = vld [vmem:[#allocation2 + $0x1d0] sm:$0xff]  ;;  %v656_v21 = vunpack.c.l.s8.bf16 %v198_v15 }
 0x230   :  { %5918 = vmatprep.subr.bf16.mxu0 %v8673_v6  ;;  %6082 = vmatprep.subr.bf16.mxu1 %v8675_v7  ;;  %v194_v5 = vld [vmem:[#allocation2 + $0x1f0] sm:$0xff]  ;;  %v8736_v6 = vcombine.low %v608_v48, %v616_v49  ;;  %v8738_v7 = vcombine.low %v609_v50, %v617_v51  ;;  %v640_v8 = vunpack.c.l.s8.bf16 %v190_v4  ;;  %v641_v10 = vunpack.c.h.s8.bf16 %v190_v4 }
 0x231   :  { %5948 = vmatprep.mubr.bf16.mxu0 %v10086_v35  ;;  %6112 = vmatprep.mubr.bf16.mxu1 %v10086_v35  ;;  %v648_v9 = vunpack.c.l.s8.bf16 %v194_v5  ;;  %v649_v11 = vunpack.c.h.s8.bf16 %v194_v5  ;;  %v688_v49 = vunpack.c.l.s8.bf16 %v214_v39  ;;  %v689_v51 = vunpack.c.h.s8.bf16 %v214_v39 }
 0x233   :  { %5919 = vmatpush1.bf16.msra.mxu0 %v8672_v16  ;;  %6083 = vmatpush1.bf16.msra.mxu1 %v8674_v17  ;;  %v202_v16 = vld [vmem:[#allocation2 + $0x230] sm:$0xff]  ;;  %v8752_v17 = vcombine.low %v624_v0, %v632_v1  ;;  %v8769_v33 = vcombine.high %v640_v8, %v648_v9  ;;  %v8771_v20 = vcombine.high %v641_v10, %v649_v11 }
 0x234   :  { %5920 = vmatprep.subr.bf16.mxu0 %v8689_v23  ;;  %6084 = vmatprep.subr.bf16.mxu1 %v8691_v24  ;;  %v664_v23 = vunpack.c.l.s8.bf16 %v202_v16  ;;  %v657_v24 = vunpack.c.h.s8.bf16 %v198_v15  ;;  %v665_v25 = vunpack.c.h.s8.bf16 %v202_v16  ;;  %v230_v1 = vld [vmem:[#allocation2 + $0x310] sm:$0xff] }
 0x235   :  { %v10158_v40 = vpop.f32.mrb[0].mxu0  ;;  %v10160_v41 = vpop.f32.mrb[0].mxu1 }
 0x236   :  { %v10162_v42 = vpop.f32.mrb[1].mxu0  ;;  %v10164_v53 = vpop.f32.mrb[1].mxu1  ;;  %v8785_v37 = vcombine.high %v656_v21, %v664_v23  ;;  %v8787_v38 = vcombine.high %v657_v24, %v665_v25 }
 0x237   :  { %5921 = vmatpush1.bf16.msra.mxu0 %v8688_v27  ;;  %6085 = vmatpush1.bf16.msra.mxu1 %v8690_v28  ;;  %v5421_v46 = vpop.f32.mrb[2].mxu0  ;;  %v5585_v47 = vpop.f32.mrb[2].mxu1  ;;  %v210_v27 = vld [vmem:[#allocation2 + $0x270] sm:$0xff]  ;;  %v8768_v28 = vcombine.low %v640_v8, %v648_v9  ;;  %v728_v8 = vunpack.c.l.s8.bf16 %v234_v2  ;;  %v721_v9 = vunpack.c.h.s8.bf16 %v230_v1 }
 0x238   :  { %v5422_v54 = vpop.f32.mrb[3].mxu0  ;;  %v5586_v55 = vpop.f32.mrb[3].mxu1  ;;  %5922 = vmatprep.subr.bf16.mxu0 %v8705_v29  ;;  %6086 = vmatprep.subr.bf16.mxu1 %v8707_v30  ;;  %v8770_v29 = vcombine.low %v641_v10, %v649_v11  ;;  %v672_v30 = vunpack.c.l.s8.bf16 %v206_v26  ;;  %v680_v32 = vunpack.c.l.s8.bf16 %v210_v27  ;;  %v681_v36 = vunpack.c.h.s8.bf16 %v210_v27  ;;  %v238_v11 = vld [vmem:[#allocation2 + $0x350] sm:$0xff] }
 0x239   :  { %v8786_v46 = vcombine.low %v657_v24, %v665_v25  ;;  %v222_v55 = vld [vmem:[#allocation2 + $0x2d0] sm:$0xff]  ;;  %v729_v10 = vunpack.c.h.s8.bf16 %v234_v2  ;;  %v736_v16 = vunpack.c.l.s8.bf16 %v238_v11 }
 0x23a   :  { %v8801_v47 = vcombine.high %v672_v30, %v680_v32  ;;  %v8803_v48 = vcombine.high %v673_v34, %v681_v36  ;;  %v8802_v58 = vcombine.low %v673_v34, %v681_v36  ;;  %v704_v59 = vunpack.c.l.s8.bf16 %v222_v55  ;;  %v250_v24 = vld [vmem:[#allocation2 + $0x3b0] sm:$0xff] }
 0x23b   :  { %5923 = vmatpush1.bf16.msra.mxu0 %v8704_v44  ;;  %6087 = vmatpush1.bf16.msra.mxu1 %v8706_v45  ;;  %v218_v44 = vld [vmem:[#allocation2 + $0x2b0] sm:$0xff]  ;;  %v8784_v45 = vcombine.low %v656_v21, %v664_v23  ;;  %v8851_v21 = vcombine.high %v721_v9, %v729_v10  ;;  %v8850_v26 = vcombine.low %v721_v9, %v729_v10  ;;  %v761_v34 = vunpack.c.h.s8.bf16 %v250_v24 }
 0x23c   :  { %5924 = vmatprep.subr.bf16.mxu0 %v8721_v56  ;;  %6088 = vmatprep.subr.bf16.mxu1 %v8723_v57  ;;  %v696_v50 = vunpack.c.l.s8.bf16 %v218_v44  ;;  %v697_v54 = vunpack.c.h.s8.bf16 %v218_v44  ;;  %v226_v56 = vld [vmem:[#allocation2 + $0x2f0] sm:$0xff]  ;;  %v8800_v57 = vcombine.low %v672_v30, %v680_v32  ;;  %v760_v30 = vunpack.c.l.s8.bf16 %v250_v24 }
 0x23d   :  { %v246_v23 = vld [vmem:[#allocation2 + $0x390] sm:$0xff] }
 0x23e   :  { %v8819_v0 = vcombine.high %v689_v51, %v697_v54  ;;  %v8816_v3 = vcombine.low %v688_v49, %v696_v50  ;;  %v8818_v4 = vcombine.low %v689_v51, %v697_v54  ;;  %v753_v32 = vunpack.c.h.s8.bf16 %v246_v23  ;;  %v254_v36 = vld [vmem:[#allocation2 + $0x3d0] sm:$0xff] }
 0x23f   :  { %5925 = vmatpush1.bf16.msra.mxu0 %v8720_v60  ;;  %6089 = vmatpush1.bf16.msra.mxu1 %v8722_v61  ;;  %v712_v60 = vunpack.c.l.s8.bf16 %v226_v56  ;;  %v705_v61 = vunpack.c.h.s8.bf16 %v222_v55  ;;  %v768_v44 = vunpack.c.l.s8.bf16 %v254_v36  ;;  %v266_v51 = vld [vmem:[#allocation2 + $0x430] sm:$0xff] }
 0x240   :  { %5926 = vmatprep.subr.bf16.mxu0 %v8737_v62  ;;  %6090 = vmatprep.subr.bf16.mxu1 %v8739_v22  ;;  %v713_v62 = vunpack.c.h.s8.bf16 %v226_v56  ;;  %v8817_v22 = vcombine.high %v688_v49, %v696_v50  ;;  %v8883_v49 = vcombine.high %v753_v32, %v761_v34  ;;  %v262_v50 = vld [vmem:[#allocation2 + $0x410] sm:$0xff]  ;;  %v8882_v55 = vcombine.low %v753_v32, %v761_v34 }
 0x241   :  { %v8833_v5 = vcombine.high %v704_v59, %v712_v60  ;;  %v282_v9 = vld [vmem:[#allocation2 + $0x4b0] sm:$0xff] }
 0x242   :  { %v8834_v15 = vcombine.low %v705_v61, %v713_v62  ;;  %v298_v32 = vld [vmem:[#allocation2 + $0x530] sm:$0xff] }
 0x243   :  { %5927 = vmatpush1.bf16.msra.mxu0 %v8736_v6  ;;  %6091 = vmatpush1.bf16.msra.mxu1 %v8738_v7  ;;  %v8835_v6 = vcombine.high %v705_v61, %v713_v62  ;;  %v720_v7 = vunpack.c.l.s8.bf16 %v230_v1  ;;  %v793_v61 = vunpack.c.h.s8.bf16 %v266_v51  ;;  %v270_v62 = vld [vmem:[#allocation2 + $0x450] sm:$0xff] }
 0x244   :  { %5928 = vmatprep.subr.bf16.mxu0 %v8753_v12  ;;  %6092 = vmatprep.subr.bf16.mxu1 %v8755_v13  ;;  %v242_v12 = vld [vmem:[#allocation2 + $0x370] sm:$0xff]  ;;  %v8832_v13 = vcombine.low %v704_v59, %v712_v60  ;;  %v792_v59 = vunpack.c.l.s8.bf16 %v266_v51  ;;  %v785_v60 = vunpack.c.h.s8.bf16 %v262_v50  ;;  %v800_v2 = vunpack.c.l.s8.bf16 %v270_v62 }
 0x245   :  { %v8848_v25 = vcombine.low %v720_v7, %v728_v8 }
 0x247   :  { %5929 = vmatpush1.bf16.msra.mxu0 %v8752_v17  ;;  %6093 = vmatpush1.bf16.msra.mxu1 %v8754_v18  ;;  %v744_v17 = vunpack.c.l.s8.bf16 %v242_v12  ;;  %v737_v18 = vunpack.c.h.s8.bf16 %v238_v11  ;;  %v8914_v11 = vcombine.low %v785_v60, %v793_v61 }
 0x248   :  { %5930 = vmatprep.subr.bf16.mxu0 %v8769_v33  ;;  %6094 = vmatprep.subr.bf16.mxu1 %v8771_v20  ;;  %v745_v33 = vunpack.c.h.s8.bf16 %v242_v12  ;;  %v8849_v20 = vcombine.high %v720_v7, %v728_v8  ;;  %v8915_v7 = vcombine.high %v785_v60, %v793_v61  ;;  %v278_v8 = vld [vmem:[#allocation2 + $0x490] sm:$0xff] }
 0x249   :  { %v8865_v27 = vcombine.high %v736_v16, %v744_v17  ;;  %v314_v60 = vld [vmem:[#allocation2 + $0x5b0] sm:$0xff] }
 0x24a   :  { %v8866_v39 = vcombine.low %v737_v18, %v745_v33 }
 0x24b   :  { %5931 = vmatpush1.bf16.msra.mxu0 %v8768_v28  ;;  %6095 = vmatpush1.bf16.msra.mxu1 %v8770_v29  ;;  %v8867_v28 = vcombine.high %v737_v18, %v745_v33  ;;  %v752_v29 = vunpack.c.l.s8.bf16 %v246_v23  ;;  %v825_v18 = vunpack.c.h.s8.bf16 %v282_v9  ;;  %v286_v33 = vld [vmem:[#allocation2 + $0x4d0] sm:$0xff] }
 0x24c   :  { %5932 = vmatprep.subr.bf16.mxu0 %v8785_v37  ;;  %6096 = vmatprep.subr.bf16.mxu1 %v8787_v38  ;;  %v258_v37 = vld [vmem:[#allocation2 + $0x3f0] sm:$0xff]  ;;  %v8864_v38 = vcombine.low %v736_v16, %v744_v17  ;;  %v824_v16 = vunpack.c.l.s8.bf16 %v282_v9  ;;  %v817_v17 = vunpack.c.h.s8.bf16 %v278_v8  ;;  %v832_v24 = vunpack.c.l.s8.bf16 %v286_v33 }
 0x24d   :  { %v8880_v54 = vcombine.low %v752_v29, %v760_v30 }
 0x24f   :  { %5933 = vmatpush1.bf16.msra.mxu0 %v8784_v45  ;;  %6097 = vmatpush1.bf16.msra.mxu1 %v8786_v46  ;;  %v776_v45 = vunpack.c.l.s8.bf16 %v258_v37  ;;  %v769_v46 = vunpack.c.h.s8.bf16 %v254_v36  ;;  %v8946_v36 = vcombine.low %v817_v17, %v825_v18 }
 0x250   :  { %5934 = vmatprep.subr.bf16.mxu0 %v8801_v47  ;;  %6098 = vmatprep.subr.bf16.mxu1 %v8803_v48  ;;  %v777_v47 = vunpack.c.h.s8.bf16 %v258_v37  ;;  %v8881_v48 = vcombine.high %v752_v29, %v760_v30  ;;  %v8947_v29 = vcombine.high %v817_v17, %v825_v18  ;;  %v294_v30 = vld [vmem:[#allocation2 + $0x510] sm:$0xff] }
 0x251   :  { %v8897_v56 = vcombine.high %v768_v44, %v776_v45  ;;  %v330_v17 = vld [vmem:[#allocation2 + $0x630] sm:$0xff] }
 0x252   :  { %v8898_v1 = vcombine.low %v769_v46, %v777_v47 }
 0x253   :  { %5935 = vmatpush1.bf16.msra.mxu0 %v8800_v57  ;;  %6099 = vmatpush1.bf16.msra.mxu1 %v8802_v58  ;;  %v8899_v57 = vcombine.high %v769_v46, %v777_v47  ;;  %v784_v58 = vunpack.c.l.s8.bf16 %v262_v50  ;;  %v857_v46 = vunpack.c.h.s8.bf16 %v298_v32  ;;  %v302_v47 = vld [vmem:[#allocation2 + $0x550] sm:$0xff] }
 0x254   :  { %5936 = vmatprep.subr.bf16.mxu0 %v8817_v22  ;;  %6100 = vmatprep.subr.bf16.mxu1 %v8819_v0  ;;  %v274_v22 = vld [vmem:[#allocation2 + $0x470] sm:$0xff]  ;;  %v8896_v0 = vcombine.low %v768_v44, %v776_v45  ;;  %v856_v44 = vunpack.c.l.s8.bf16 %v298_v32  ;;  %v849_v45 = vunpack.c.h.s8.bf16 %v294_v30  ;;  %v864_v51 = vunpack.c.l.s8.bf16 %v302_v47 }
 0x255   :  { %v8912_v10 = vcombine.low %v784_v58, %v792_v59 }
 0x257   :  { %5937 = vmatpush1.bf16.msra.mxu0 %v8816_v3  ;;  %6101 = vmatpush1.bf16.msra.mxu1 %v8818_v4  ;;  %v808_v3 = vunpack.c.l.s8.bf16 %v274_v22  ;;  %v801_v4 = vunpack.c.h.s8.bf16 %v270_v62  ;;  %v8978_v62 = vcombine.low %v849_v45, %v857_v46 }
 0x258   :  { %5938 = vmatprep.subr.bf16.mxu0 %v8833_v5  ;;  %6102 = vmatprep.subr.bf16.mxu1 %v8835_v6  ;;  %v809_v5 = vunpack.c.h.s8.bf16 %v274_v22  ;;  %v8913_v6 = vcombine.high %v784_v58, %v792_v59  ;;  %v8979_v58 = vcombine.high %v849_v45, %v857_v46  ;;  %v310_v59 = vld [vmem:[#allocation2 + $0x590] sm:$0xff] }
 0x259   :  { %v8929_v12 = vcombine.high %v800_v2, %v808_v3  ;;  %v346_v45 = vld [vmem:[#allocation2 + $0x6b0] sm:$0xff] }
 0x25a   :  { %v8930_v23 = vcombine.low %v801_v4, %v809_v5 }
 0x25b   :  { %5939 = vmatpush1.bf16.msra.mxu0 %v8832_v13  ;;  %6103 = vmatpush1.bf16.msra.mxu1 %v8834_v15  ;;  %v8931_v13 = vcombine.high %v801_v4, %v809_v5  ;;  %v816_v15 = vunpack.c.l.s8.bf16 %v278_v8  ;;  %v889_v4 = vunpack.c.h.s8.bf16 %v314_v60  ;;  %v318_v5 = vld [vmem:[#allocation2 + $0x5d0] sm:$0xff] }
 0x25c   :  { %5940 = vmatprep.subr.bf16.mxu0 %v8849_v20  ;;  %6104 = vmatprep.subr.bf16.mxu1 %v8851_v21  ;;  %v290_v20 = vld [vmem:[#allocation2 + $0x4f0] sm:$0xff]  ;;  %v8928_v21 = vcombine.low %v800_v2, %v808_v3  ;;  %v888_v2 = vunpack.c.l.s8.bf16 %v314_v60  ;;  %v881_v3 = vunpack.c.h.s8.bf16 %v310_v59  ;;  %v896_v9 = vunpack.c.l.s8.bf16 %v318_v5 }
 0x25d   :  { %v8944_v34 = vcombine.low %v816_v15, %v824_v16 }
 0x25f   :  { %5941 = vmatpush1.bf16.msra.mxu0 %v8848_v25  ;;  %6105 = vmatpush1.bf16.msra.mxu1 %v8850_v26  ;;  %v840_v25 = vunpack.c.l.s8.bf16 %v290_v20  ;;  %v833_v26 = vunpack.c.h.s8.bf16 %v286_v33  ;;  %v9010_v33 = vcombine.low %v881_v3, %v889_v4 }
 0x260   :  { %5942 = vmatprep.subr.bf16.mxu0 %v8865_v27  ;;  %6106 = vmatprep.subr.bf16.mxu1 %v8867_v28  ;;  %v841_v27 = vunpack.c.h.s8.bf16 %v290_v20  ;;  %v8945_v28 = vcombine.high %v816_v15, %v824_v16  ;;  %v9011_v15 = vcombine.high %v881_v3, %v889_v4  ;;  %v326_v16 = vld [vmem:[#allocation2 + $0x610] sm:$0xff] }
 0x261   :  { %v8961_v37 = vcombine.high %v832_v24, %v840_v25  ;;  %v362_v3 = vld [vmem:[#allocation2 + $0x730] sm:$0xff] }
 0x262   :  { %v8962_v50 = vcombine.low %v833_v26, %v841_v27 }
 0x263   :  { %5943 = vmatpush1.bf16.msra.mxu0 %v8864_v38  ;;  %6107 = vmatpush1.bf16.msra.mxu1 %v8866_v39  ;;  %v8963_v38 = vcombine.high %v833_v26, %v841_v27  ;;  %v848_v39 = vunpack.c.l.s8.bf16 %v294_v30  ;;  %v921_v26 = vunpack.c.h.s8.bf16 %v330_v17  ;;  %v334_v27 = vld [vmem:[#allocation2 + $0x650] sm:$0xff] }
 0x264   :  { %5944 = vmatprep.subr.bf16.mxu0 %v8881_v48  ;;  %6108 = vmatprep.subr.bf16.mxu1 %v8883_v49  ;;  %v306_v48 = vld [vmem:[#allocation2 + $0x570] sm:$0xff]  ;;  %v8960_v49 = vcombine.low %v832_v24, %v840_v25  ;;  %v920_v24 = vunpack.c.l.s8.bf16 %v330_v17  ;;  %v913_v25 = vunpack.c.h.s8.bf16 %v326_v16  ;;  %v928_v32 = vunpack.c.l.s8.bf16 %v334_v27 }
 0x265   :  { %v8976_v61 = vcombine.low %v848_v39, %v856_v44 }
 0x267   :  { %5945 = vmatpush1.bf16.msra.mxu0 %v8880_v54  ;;  %6109 = vmatpush1.bf16.msra.mxu1 %v8882_v55  ;;  %v872_v54 = vunpack.c.l.s8.bf16 %v306_v48  ;;  %v865_v55 = vunpack.c.h.s8.bf16 %v302_v47  ;;  %v9042_v47 = vcombine.low %v913_v25, %v921_v26 }
 0x268   :  { %5946 = vmatprep.subr.bf16.mxu0 %v8897_v56  ;;  %6110 = vmatprep.subr.bf16.mxu1 %v8899_v57  ;;  %v873_v56 = vunpack.c.h.s8.bf16 %v306_v48  ;;  %v8977_v57 = vcombine.high %v848_v39, %v856_v44  ;;  %v9043_v39 = vcombine.high %v913_v25, %v921_v26  ;;  %v342_v44 = vld [vmem:[#allocation2 + $0x690] sm:$0xff] }
 0x269   :  { %v8993_v22 = vcombine.high %v864_v51, %v872_v54  ;;  %v378_v25 = vld [vmem:[#allocation2 + $0x7b0] sm:$0xff] }
 0x26a   :  { %v8994_v8 = vcombine.low %v865_v55, %v873_v56 }
 0x26b   :  { %5947 = vmatpush1.bf16.msra.mxu0 %v8896_v0  ;;  %6111 = vmatpush1.bf16.msra.mxu1 %v8898_v1  ;;  %v8995_v0 = vcombine.high %v865_v55, %v873_v56  ;;  %v880_v1 = vunpack.c.l.s8.bf16 %v310_v59  ;;  %v953_v55 = vunpack.c.h.s8.bf16 %v346_v45  ;;  %v350_v56 = vld [vmem:[#allocation2 + $0x6d0] sm:$0xff] }
 0x26c   :  { %5957 = vmatprep.subr.bf16.mxu0 %v8913_v6  ;;  %6121 = vmatprep.subr.bf16.mxu1 %v8915_v7  ;;  %v322_v6 = vld [vmem:[#allocation2 + $0x5f0] sm:$0xff]  ;;  %v8992_v7 = vcombine.low %v864_v51, %v872_v54  ;;  %v952_v51 = vunpack.c.l.s8.bf16 %v346_v45  ;;  %v945_v54 = vunpack.c.h.s8.bf16 %v342_v44  ;;  %v960_v60 = vunpack.c.l.s8.bf16 %v350_v56 }
 0x26d   :  { %v9008_v18 = vcombine.low %v880_v1, %v888_v2 }
 0x26e   :  { %5949 = vmatmul.mubr.bf16.vlgmr.msra.gmra.mrb[8].mxu0 %v10092_v52  ;;  %6113 = vmatmul.mubr.bf16.vlgmr.msra.gmra.mrb[8].mxu1 %v10092_v52 }
 0x26f   :  { %5958 = vmatpush1.bf16.msra.mxu0 %v8912_v10  ;;  %6122 = vmatpush1.bf16.msra.mxu1 %v8914_v11  ;;  %v904_v10 = vunpack.c.l.s8.bf16 %v322_v6  ;;  %v897_v11 = vunpack.c.h.s8.bf16 %v318_v5  ;;  %v9074_v5 = vcombine.low %v945_v54, %v953_v55 }
 0x270   :  { %5959 = vmatprep.subr.bf16.mxu0 %v8929_v12  ;;  %6123 = vmatprep.subr.bf16.mxu1 %v8931_v13  ;;  %v905_v12 = vunpack.c.h.s8.bf16 %v322_v6  ;;  %v9009_v13 = vcombine.high %v880_v1, %v888_v2  ;;  %v9075_v1 = vcombine.high %v945_v54, %v953_v55  ;;  %v358_v2 = vld [vmem:[#allocation2 + $0x710] sm:$0xff] }
 0x271   :  { %5989 = vmatprep.mubr.bf16.mxu0 %v10101_v63  ;;  %6153 = vmatprep.mubr.bf16.mxu1 %v10101_v63  ;;  %v9025_v20 = vcombine.high %v896_v9, %v904_v10  ;;  %v394_v54 = vld [vmem:[#allocation2 + $0x830] sm:$0xff] }
 0x272   :  { %v9026_v30 = vcombine.low %v897_v11, %v905_v12 }
 0x273   :  { %5960 = vmatpush1.bf16.msra.mxu0 %v8928_v21  ;;  %6124 = vmatpush1.bf16.msra.mxu1 %v8930_v23  ;;  %v9027_v21 = vcombine.high %v897_v11, %v905_v12  ;;  %v912_v23 = vunpack.c.l.s8.bf16 %v326_v16  ;;  %v985_v11 = vunpack.c.h.s8.bf16 %v362_v3  ;;  %v366_v12 = vld [vmem:[#allocation2 + $0x750] sm:$0xff] }
 0x274   :  { %5961 = vmatprep.subr.bf16.mxu0 %v8945_v28  ;;  %6125 = vmatprep.subr.bf16.mxu1 %v8947_v29  ;;  %v338_v28 = vld [vmem:[#allocation2 + $0x670] sm:$0xff]  ;;  %v9024_v29 = vcombine.low %v896_v9, %v904_v10  ;;  %v984_v9 = vunpack.c.l.s8.bf16 %v362_v3  ;;  %v977_v10 = vunpack.c.h.s8.bf16 %v358_v2  ;;  %v992_v17 = vunpack.c.l.s8.bf16 %v366_v12 }
 0x275   :  { %v9040_v46 = vcombine.low %v912_v23, %v920_v24 }
 0x277   :  { %5962 = vmatpush1.bf16.msra.mxu0 %v8944_v34  ;;  %6126 = vmatpush1.bf16.msra.mxu1 %v8946_v36  ;;  %v936_v34 = vunpack.c.l.s8.bf16 %v338_v28  ;;  %v929_v36 = vunpack.c.h.s8.bf16 %v334_v27  ;;  %v9106_v27 = vcombine.low %v977_v10, %v985_v11 }
 0x278   :  { %5963 = vmatprep.subr.bf16.mxu0 %v8961_v37  ;;  %6127 = vmatprep.subr.bf16.mxu1 %v8963_v38  ;;  %v937_v37 = vunpack.c.h.s8.bf16 %v338_v28  ;;  %v9041_v38 = vcombine.high %v912_v23, %v920_v24  ;;  %v9107_v23 = vcombine.high %v977_v10, %v985_v11  ;;  %v374_v24 = vld [vmem:[#allocation2 + $0x790] sm:$0xff] }
 0x279   :  { %v9057_v48 = vcombine.high %v928_v32, %v936_v34  ;;  %v410_v10 = vld [vmem:[#allocation2 + $0x8b0] sm:$0xff] }
 0x27a   :  { %v9058_v59 = vcombine.low %v929_v36, %v937_v37 }
 0x27b   :  { %5964 = vmatpush1.bf16.msra.mxu0 %v8960_v49  ;;  %6128 = vmatpush1.bf16.msra.mxu1 %v8962_v50  ;;  %v9059_v49 = vcombine.high %v929_v36, %v937_v37  ;;  %v944_v50 = vunpack.c.l.s8.bf16 %v342_v44  ;;  %v1017_v36 = vunpack.c.h.s8.bf16 %v378_v25  ;;  %v382_v37 = vld [vmem:[#allocation2 + $0x7d0] sm:$0xff] }
 0x27c   :  { %5965 = vmatprep.subr.bf16.mxu0 %v8977_v57  ;;  %6129 = vmatprep.subr.bf16.mxu1 %v8979_v58  ;;  %v354_v57 = vld [vmem:[#allocation2 + $0x6f0] sm:$0xff]  ;;  %v9056_v58 = vcombine.low %v928_v32, %v936_v34  ;;  %v1016_v32 = vunpack.c.l.s8.bf16 %v378_v25  ;;  %v1009_v34 = vunpack.c.h.s8.bf16 %v374_v24  ;;  %v1024_v45 = vunpack.c.l.s8.bf16 %v382_v37 }
 0x27d   :  { %v9072_v4 = vcombine.low %v944_v50, %v952_v51 }
 0x27f   :  { %5966 = vmatpush1.bf16.msra.mxu0 %v8976_v61  ;;  %6130 = vmatpush1.bf16.msra.mxu1 %v8978_v62  ;;  %v968_v61 = vunpack.c.l.s8.bf16 %v354_v57  ;;  %v961_v62 = vunpack.c.h.s8.bf16 %v350_v56  ;;  %v9138_v56 = vcombine.low %v1009_v34, %v1017_v36 }
 0x280   :  { %5967 = vmatprep.subr.bf16.mxu0 %v8993_v22  ;;  %6131 = vmatprep.subr.bf16.mxu1 %v8995_v0  ;;  %v969_v22 = vunpack.c.h.s8.bf16 %v354_v57  ;;  %v9073_v0 = vcombine.high %v944_v50, %v952_v51  ;;  %v9139_v50 = vcombine.high %v1009_v34, %v1017_v36  ;;  %v390_v51 = vld [vmem:[#allocation2 + $0x810] sm:$0xff] }
 0x281   :  { %v9089_v6 = vcombine.high %v960_v60, %v968_v61  ;;  %v426_v34 = vld [vmem:[#allocation2 + $0x930] sm:$0xff] }
 0x282   :  { %v9090_v16 = vcombine.low %v961_v62, %v969_v22 }
 0x283   :  { %5968 = vmatpush1.bf16.msra.mxu0 %v8992_v7  ;;  %6132 = vmatpush1.bf16.msra.mxu1 %v8994_v8  ;;  %v9091_v7 = vcombine.high %v961_v62, %v969_v22  ;;  %v976_v8 = vunpack.c.l.s8.bf16 %v358_v2  ;;  %v1049_v62 = vunpack.c.h.s8.bf16 %v394_v54  ;;  %v398_v22 = vld [vmem:[#allocation2 + $0x850] sm:$0xff] }
 0x284   :  { %5969 = vmatprep.subr.bf16.mxu0 %v9009_v13  ;;  %6133 = vmatprep.subr.bf16.mxu1 %v9011_v15  ;;  %v370_v13 = vld [vmem:[#allocation2 + $0x770] sm:$0xff]  ;;  %v9088_v15 = vcombine.low %v960_v60, %v968_v61  ;;  %v1048_v60 = vunpack.c.l.s8.bf16 %v394_v54  ;;  %v1041_v61 = vunpack.c.h.s8.bf16 %v390_v51  ;;  %v1056_v3 = vunpack.c.l.s8.bf16 %v398_v22 }
 0x285   :  { %v9104_v26 = vcombine.low %v976_v8, %v984_v9 }
 0x287   :  { %5970 = vmatpush1.bf16.msra.mxu0 %v9008_v18  ;;  %6134 = vmatpush1.bf16.msra.mxu1 %v9010_v33  ;;  %v1000_v18 = vunpack.c.l.s8.bf16 %v370_v13  ;;  %v993_v33 = vunpack.c.h.s8.bf16 %v366_v12  ;;  %v9170_v12 = vcombine.low %v1041_v61, %v1049_v62 }
 0x288   :  { %5971 = vmatprep.subr.bf16.mxu0 %v9025_v20  ;;  %6135 = vmatprep.subr.bf16.mxu1 %v9027_v21  ;;  %v1001_v20 = vunpack.c.h.s8.bf16 %v370_v13  ;;  %v9105_v21 = vcombine.high %v976_v8, %v984_v9  ;;  %v9171_v8 = vcombine.high %v1041_v61, %v1049_v62  ;;  %v406_v9 = vld [vmem:[#allocation2 + $0x890] sm:$0xff] }
 0x289   :  { %v9121_v28 = vcombine.high %v992_v17, %v1000_v18  ;;  %v442_v61 = vld [vmem:[#allocation2 + $0x9b0] sm:$0xff] }
 0x28a   :  { %v9122_v44 = vcombine.low %v993_v33, %v1001_v20 }
 0x28b   :  { %5972 = vmatpush1.bf16.msra.mxu0 %v9024_v29  ;;  %6136 = vmatpush1.bf16.msra.mxu1 %v9026_v30  ;;  %v9123_v29 = vcombine.high %v993_v33, %v1001_v20  ;;  %v1008_v30 = vunpack.c.l.s8.bf16 %v374_v24  ;;  %v1081_v33 = vunpack.c.h.s8.bf16 %v410_v10  ;;  %v414_v20 = vld [vmem:[#allocation2 + $0x8d0] sm:$0xff] }
 0x28c   :  { %5973 = vmatprep.subr.bf16.mxu0 %v9041_v38  ;;  %6137 = vmatprep.subr.bf16.mxu1 %v9043_v39  ;;  %v386_v38 = vld [vmem:[#allocation2 + $0x7f0] sm:$0xff]  ;;  %v9120_v39 = vcombine.low %v992_v17, %v1000_v18  ;;  %v1080_v17 = vunpack.c.l.s8.bf16 %v410_v10  ;;  %v1073_v18 = vunpack.c.h.s8.bf16 %v406_v9  ;;  %v1088_v25 = vunpack.c.l.s8.bf16 %v414_v20 }
 0x28d   :  { %v9136_v55 = vcombine.low %v1008_v30, %v1016_v32 }
 0x28f   :  { %5974 = vmatpush1.bf16.msra.mxu0 %v9040_v46  ;;  %6138 = vmatpush1.bf16.msra.mxu1 %v9042_v47  ;;  %v1032_v46 = vunpack.c.l.s8.bf16 %v386_v38  ;;  %v1025_v47 = vunpack.c.h.s8.bf16 %v382_v37  ;;  %v9202_v37 = vcombine.low %v1073_v18, %v1081_v33 }
 0x290   :  { %5975 = vmatprep.subr.bf16.mxu0 %v9057_v48  ;;  %6139 = vmatprep.subr.bf16.mxu1 %v9059_v49  ;;  %v1033_v48 = vunpack.c.h.s8.bf16 %v386_v38  ;;  %v9137_v49 = vcombine.high %v1008_v30, %v1016_v32  ;;  %v9203_v30 = vcombine.high %v1073_v18, %v1081_v33  ;;  %v422_v32 = vld [vmem:[#allocation2 + $0x910] sm:$0xff] }
 0x291   :  { %v9153_v57 = vcombine.high %v1024_v45, %v1032_v46  ;;  %v458_v18 = vld [vmem:[#allocation2 + $0xa30] sm:$0xff] }
 0x292   :  { %v9154_v2 = vcombine.low %v1025_v47, %v1033_v48 }
 0x293   :  { %5976 = vmatpush1.bf16.msra.mxu0 %v9056_v58  ;;  %6140 = vmatpush1.bf16.msra.mxu1 %v9058_v59  ;;  %v9155_v58 = vcombine.high %v1025_v47, %v1033_v48  ;;  %v1040_v59 = vunpack.c.l.s8.bf16 %v390_v51  ;;  %v1113_v47 = vunpack.c.h.s8.bf16 %v426_v34  ;;  %v430_v48 = vld [vmem:[#allocation2 + $0x950] sm:$0xff] }
 0x294   :  { %5977 = vmatprep.subr.bf16.mxu0 %v9073_v0  ;;  %6141 = vmatprep.subr.bf16.mxu1 %v9075_v1  ;;  %v402_v0 = vld [vmem:[#allocation2 + $0x870] sm:$0xff]  ;;  %v9152_v1 = vcombine.low %v1024_v45, %v1032_v46  ;;  %v1112_v45 = vunpack.c.l.s8.bf16 %v426_v34  ;;  %v1105_v46 = vunpack.c.h.s8.bf16 %v422_v32  ;;  %v1120_v54 = vunpack.c.l.s8.bf16 %v430_v48 }
 0x295   :  { %v9168_v11 = vcombine.low %v1040_v59, %v1048_v60 }
 0x297   :  { %5978 = vmatpush1.bf16.msra.mxu0 %v9072_v4  ;;  %6142 = vmatpush1.bf16.msra.mxu1 %v9074_v5  ;;  %v1064_v4 = vunpack.c.l.s8.bf16 %v402_v0  ;;  %v1057_v5 = vunpack.c.h.s8.bf16 %v398_v22  ;;  %v9234_v22 = vcombine.low %v1105_v46, %v1113_v47 }
 0x298   :  { %5979 = vmatprep.subr.bf16.mxu0 %v9089_v6  ;;  %6143 = vmatprep.subr.bf16.mxu1 %v9091_v7  ;;  %v1065_v6 = vunpack.c.h.s8.bf16 %v402_v0  ;;  %v9169_v7 = vcombine.high %v1040_v59, %v1048_v60  ;;  %v9235_v59 = vcombine.high %v1105_v46, %v1113_v47  ;;  %v438_v60 = vld [vmem:[#allocation2 + $0x990] sm:$0xff] }
 0x299   :  { %v9185_v13 = vcombine.high %v1056_v3, %v1064_v4  ;;  %v474_v46 = vld [vmem:[#allocation2 + $0xab0] sm:$0xff] }
 0x29a   :  { %v9186_v24 = vcombine.low %v1057_v5, %v1065_v6 }
 0x29b   :  { %5980 = vmatpush1.bf16.msra.mxu0 %v9088_v15  ;;  %6144 = vmatpush1.bf16.msra.mxu1 %v9090_v16  ;;  %v9187_v15 = vcombine.high %v1057_v5, %v1065_v6  ;;  %v1072_v16 = vunpack.c.l.s8.bf16 %v406_v9  ;;  %v1145_v5 = vunpack.c.h.s8.bf16 %v442_v61  ;;  %v446_v6 = vld [vmem:[#allocation2 + $0x9d0] sm:$0xff] }
 0x29c   :  { %5981 = vmatprep.subr.bf16.mxu0 %v9105_v21  ;;  %6145 = vmatprep.subr.bf16.mxu1 %v9107_v23  ;;  %v418_v21 = vld [vmem:[#allocation2 + $0x8f0] sm:$0xff]  ;;  %v9184_v23 = vcombine.low %v1056_v3, %v1064_v4  ;;  %v1144_v3 = vunpack.c.l.s8.bf16 %v442_v61  ;;  %v1137_v4 = vunpack.c.h.s8.bf16 %v438_v60  ;;  %v1152_v10 = vunpack.c.l.s8.bf16 %v446_v6 }
 0x29d   :  { %v9200_v36 = vcombine.low %v1072_v16, %v1080_v17 }
 0x29f   :  { %5982 = vmatpush1.bf16.msra.mxu0 %v9104_v26  ;;  %6146 = vmatpush1.bf16.msra.mxu1 %v9106_v27  ;;  %v1096_v26 = vunpack.c.l.s8.bf16 %v418_v21  ;;  %v1089_v27 = vunpack.c.h.s8.bf16 %v414_v20  ;;  %v9266_v20 = vcombine.low %v1137_v4, %v1145_v5 }
 0x2a0   :  { %5983 = vmatprep.subr.bf16.mxu0 %v9121_v28  ;;  %6147 = vmatprep.subr.bf16.mxu1 %v9123_v29  ;;  %v1097_v28 = vunpack.c.h.s8.bf16 %v418_v21  ;;  %v9201_v29 = vcombine.high %v1072_v16, %v1080_v17  ;;  %v9267_v16 = vcombine.high %v1137_v4, %v1145_v5  ;;  %v454_v17 = vld [vmem:[#allocation2 + $0xa10] sm:$0xff] }
 0x2a1   :  { %v9217_v38 = vcombine.high %v1088_v25, %v1096_v26  ;;  %v490_v4 = vld [vmem:[#allocation2 + $0xb30] sm:$0xff] }
 0x2a2   :  { %v9218_v51 = vcombine.low %v1089_v27, %v1097_v28 }
 0x2a3   :  { %5984 = vmatpush1.bf16.msra.mxu0 %v9120_v39  ;;  %6148 = vmatpush1.bf16.msra.mxu1 %v9122_v44  ;;  %v9219_v39 = vcombine.high %v1089_v27, %v1097_v28  ;;  %v1104_v44 = vunpack.c.l.s8.bf16 %v422_v32  ;;  %v1177_v27 = vunpack.c.h.s8.bf16 %v458_v18  ;;  %v462_v28 = vld [vmem:[#allocation2 + $0xa50] sm:$0xff] }
 0x2a4   :  { %5985 = vmatprep.subr.bf16.mxu0 %v9137_v49  ;;  %6149 = vmatprep.subr.bf16.mxu1 %v9139_v50  ;;  %v434_v49 = vld [vmem:[#allocation2 + $0x970] sm:$0xff]  ;;  %v9216_v50 = vcombine.low %v1088_v25, %v1096_v26  ;;  %v1176_v25 = vunpack.c.l.s8.bf16 %v458_v18  ;;  %v1169_v26 = vunpack.c.h.s8.bf16 %v454_v17  ;;  %v1184_v34 = vunpack.c.l.s8.bf16 %v462_v28 }
 0x2a5   :  { %v9232_v62 = vcombine.low %v1104_v44, %v1112_v45 }
 0x2a7   :  { %5986 = vmatpush1.bf16.msra.mxu0 %v9136_v55  ;;  %6150 = vmatpush1.bf16.msra.mxu1 %v9138_v56  ;;  %v1128_v55 = vunpack.c.l.s8.bf16 %v434_v49  ;;  %v1121_v56 = vunpack.c.h.s8.bf16 %v430_v48  ;;  %v9298_v48 = vcombine.low %v1169_v26, %v1177_v27 }
 0x2a8   :  { %5987 = vmatprep.subr.bf16.mxu0 %v9153_v57  ;;  %6151 = vmatprep.subr.bf16.mxu1 %v9155_v58  ;;  %v1129_v57 = vunpack.c.h.s8.bf16 %v434_v49  ;;  %v9233_v58 = vcombine.high %v1104_v44, %v1112_v45  ;;  %v9299_v44 = vcombine.high %v1169_v26, %v1177_v27  ;;  %v470_v45 = vld [vmem:[#allocation2 + $0xa90] sm:$0xff] }
 0x2a9   :  { %v9249_v0 = vcombine.high %v1120_v54, %v1128_v55  ;;  %v506_v26 = vld [vmem:[#allocation2 + $0xbb0] sm:$0xff] }
 0x2aa   :  { %v9250_v9 = vcombine.low %v1121_v56, %v1129_v57 }
 0x2ab   :  { %5988 = vmatpush1.bf16.msra.mxu0 %v9152_v1  ;;  %6152 = vmatpush1.bf16.msra.mxu1 %v9154_v2  ;;  %v9251_v1 = vcombine.high %v1121_v56, %v1129_v57  ;;  %v1136_v2 = vunpack.c.l.s8.bf16 %v438_v60  ;;  %v1209_v56 = vunpack.c.h.s8.bf16 %v474_v46  ;;  %v478_v57 = vld [vmem:[#allocation2 + $0xad0] sm:$0xff] }
 0x2ac   :  { %5998 = vmatprep.subr.bf16.mxu0 %v9169_v7  ;;  %6162 = vmatprep.subr.bf16.mxu1 %v9171_v8  ;;  %v450_v7 = vld [vmem:[#allocation2 + $0x9f0] sm:$0xff]  ;;  %v9248_v8 = vcombine.low %v1120_v54, %v1128_v55  ;;  %v1208_v54 = vunpack.c.l.s8.bf16 %v474_v46  ;;  %v1201_v55 = vunpack.c.h.s8.bf16 %v470_v45  ;;  %v1216_v61 = vunpack.c.l.s8.bf16 %v478_v57 }
 0x2ad   :  { %v9264_v33 = vcombine.low %v1136_v2, %v1144_v3 }
 0x2ae   :  { %5990 = vmatmul.mubr.bf16.vlgmr.msra.gmra.mrb[8].mxu0 %v10109_v31  ;;  %6154 = vmatmul.mubr.bf16.vlgmr.msra.gmra.mrb[8].mxu1 %v10109_v31 }
 0x2af   :  { %5999 = vmatpush1.bf16.msra.mxu0 %v9168_v11  ;;  %6163 = vmatpush1.bf16.msra.mxu1 %v9170_v12  ;;  %v1160_v11 = vunpack.c.l.s8.bf16 %v450_v7  ;;  %v1153_v12 = vunpack.c.h.s8.bf16 %v446_v6  ;;  %v9330_v6 = vcombine.low %v1201_v55, %v1209_v56 }
 0x2b0   :  { %6000 = vmatprep.subr.bf16.mxu0 %v9185_v13  ;;  %6164 = vmatprep.subr.bf16.mxu1 %v9187_v15  ;;  %v1161_v13 = vunpack.c.h.s8.bf16 %v450_v7  ;;  %v9265_v15 = vcombine.high %v1136_v2, %v1144_v3  ;;  %v9331_v2 = vcombine.high %v1201_v55, %v1209_v56  ;;  %v486_v3 = vld [vmem:[#allocation2 + $0xb10] sm:$0xff] }
 0x2b1   :  { %6030 = vmatprep.mubr.bf16.mxu0 %v10118_v43  ;;  %6194 = vmatprep.mubr.bf16.mxu1 %v10118_v43  ;;  %v9281_v21 = vcombine.high %v1152_v10, %v1160_v11  ;;  %v522_v55 = vld [vmem:[#allocation2 + $0xc30] sm:$0xff] }
 0x2b2   :  { %v9282_v32 = vcombine.low %v1153_v12, %v1161_v13 }
 0x2b3   :  { %6001 = vmatpush1.bf16.msra.mxu0 %v9184_v23  ;;  %6165 = vmatpush1.bf16.msra.mxu1 %v9186_v24  ;;  %v9283_v23 = vcombine.high %v1153_v12, %v1161_v13  ;;  %v1168_v24 = vunpack.c.l.s8.bf16 %v454_v17  ;;  %v1241_v12 = vunpack.c.h.s8.bf16 %v490_v4  ;;  %v494_v13 = vld [vmem:[#allocation2 + $0xb50] sm:$0xff] }
 0x2b4   :  { %6002 = vmatprep.subr.bf16.mxu0 %v9201_v29  ;;  %6166 = vmatprep.subr.bf16.mxu1 %v9203_v30  ;;  %v466_v29 = vld [vmem:[#allocation2 + $0xa70] sm:$0xff]  ;;  %v9280_v30 = vcombine.low %v1152_v10, %v1160_v11  ;;  %v1240_v10 = vunpack.c.l.s8.bf16 %v490_v4  ;;  %v1233_v11 = vunpack.c.h.s8.bf16 %v486_v3  ;;  %v1248_v18 = vunpack.c.l.s8.bf16 %v494_v13 }
 0x2b5   :  { %v9296_v47 = vcombine.low %v1168_v24, %v1176_v25 }
 0x2b7   :  { %6003 = vmatpush1.bf16.msra.mxu0 %v9200_v36  ;;  %6167 = vmatpush1.bf16.msra.mxu1 %v9202_v37  ;;  %v1192_v36 = vunpack.c.l.s8.bf16 %v466_v29  ;;  %v1185_v37 = vunpack.c.h.s8.bf16 %v462_v28  ;;  %v9362_v28 = vcombine.low %v1233_v11, %v1241_v12 }
 0x2b8   :  { %6004 = vmatprep.subr.bf16.mxu0 %v9217_v38  ;;  %6168 = vmatprep.subr.bf16.mxu1 %v9219_v39  ;;  %v1193_v38 = vunpack.c.h.s8.bf16 %v466_v29  ;;  %v9297_v39 = vcombine.high %v1168_v24, %v1176_v25  ;;  %v9363_v24 = vcombine.high %v1233_v11, %v1241_v12  ;;  %v502_v25 = vld [vmem:[#allocation2 + $0xb90] sm:$0xff] }
 0x2b9   :  { %v9313_v49 = vcombine.high %v1184_v34, %v1192_v36 }
 0x2ba   :  { %v9314_v60 = vcombine.low %v1185_v37, %v1193_v38 }
 0x2bb   :  { %6005 = vmatpush1.bf16.msra.mxu0 %v9216_v50  ;;  %6169 = vmatpush1.bf16.msra.mxu1 %v9218_v51  ;;  %v9315_v50 = vcombine.high %v1185_v37, %v1193_v38  ;;  %v1200_v51 = vunpack.c.l.s8.bf16 %v470_v45  ;;  %v1273_v37 = vunpack.c.h.s8.bf16 %v506_v26  ;;  %v510_v38 = vld [vmem:[#allocation2 + $0xbd0] sm:$0xff] }
 0x2bc   :  { %6006 = vmatprep.subr.bf16.mxu0 %v9233_v58  ;;  %6170 = vmatprep.subr.bf16.mxu1 %v9235_v59  ;;  %v482_v58 = vld [vmem:[#allocation2 + $0xaf0] sm:$0xff]  ;;  %v9312_v59 = vcombine.low %v1184_v34, %v1192_v36  ;;  %v1272_v34 = vunpack.c.l.s8.bf16 %v506_v26  ;;  %v1265_v36 = vunpack.c.h.s8.bf16 %v502_v25  ;;  %v1280_v46 = vunpack.c.l.s8.bf16 %v510_v38 }
 0x2bd   :  { %v9328_v5 = vcombine.low %v1200_v51, %v1208_v54 }
 0x2bf   :  { %6007 = vmatpush1.bf16.msra.mxu0 %v9232_v62  ;;  %6171 = vmatpush1.bf16.msra.mxu1 %v9234_v22  ;;  %v1224_v62 = vunpack.c.l.s8.bf16 %v482_v58  ;;  %v1217_v22 = vunpack.c.h.s8.bf16 %v478_v57  ;;  %v9394_v57 = vcombine.low %v1265_v36, %v1273_v37 }
 0x2c0   :  { %6008 = vmatprep.subr.bf16.mxu0 %v9249_v0  ;;  %6172 = vmatprep.subr.bf16.mxu1 %v9251_v1  ;;  %v1225_v0 = vunpack.c.h.s8.bf16 %v482_v58  ;;  %v9329_v1 = vcombine.high %v1200_v51, %v1208_v54  ;;  %v9395_v51 = vcombine.high %v1265_v36, %v1273_v37  ;;  %v518_v54 = vld [vmem:[#allocation2 + $0xc10] sm:$0xff]  ;;  %v163_v36 = vld [vmem:[#allocation2 + $0xf8] sm:$0xff] }
 0x2c1   :  { %v9345_v7 = vcombine.high %v1216_v61, %v1224_v62  ;;  %v9722_v37 = vld [vmem:[%s10359_s0 + $0x18] ss:$0 sps:$4 sm:$0xff]  }
 0x2c2   :  { %v9346_v17 = vcombine.low %v1217_v22, %v1225_v0 }
 0x2c3   :  { %6009 = vmatpush1.bf16.msra.mxu0 %v9248_v8  ;;  %6173 = vmatpush1.bf16.msra.mxu1 %v9250_v9  ;;  %v9347_v8 = vcombine.high %v1217_v22, %v1225_v0  ;;  %v1232_v9 = vunpack.c.l.s8.bf16 %v486_v3  ;;  %v1305_v22 = vunpack.c.h.s8.bf16 %v522_v55  ;;  %v135_v0 = vld [vmem:[#allocation2 + $0x18] sm:$0xff] }
 0x2c4   :  { %6010 = vmatprep.subr.bf16.mxu0 %v9265_v15  ;;  %6174 = vmatprep.subr.bf16.mxu1 %v9267_v16  ;;  %v498_v15 = vld [vmem:[#allocation2 + $0xb70] sm:$0xff]  ;;  %v9344_v16 = vcombine.low %v1216_v61, %v1224_v62  ;;  %v1304_v61 = vunpack.c.l.s8.bf16 %v522_v55  ;;  %v1297_v62 = vunpack.c.h.s8.bf16 %v518_v54 }
 0x2c5   :  { %v9360_v27 = vcombine.low %v1232_v9, %v1240_v10 }
 0x2c6   :  { %v9426_v11 = vcombine.low %v1297_v62, %v1305_v22 }
 0x2c7   :  { %6011 = vmatpush1.bf16.msra.mxu0 %v9264_v33  ;;  %6175 = vmatpush1.bf16.msra.mxu1 %v9266_v20  ;;  %v1256_v33 = vunpack.c.l.s8.bf16 %v498_v15  ;;  %v1249_v20 = vunpack.c.h.s8.bf16 %v494_v13 }
 0x2c8   :  { %6012 = vmatprep.subr.bf16.mxu0 %v9281_v21  ;;  %6176 = vmatprep.subr.bf16.mxu1 %v9283_v23  ;;  %v1257_v21 = vunpack.c.h.s8.bf16 %v498_v15  ;;  %v9361_v23 = vcombine.high %v1232_v9, %v1240_v10  ;;  %v143_v15 = vld [vmem:[#allocation2 + $0x58] sm:$0xff] }
 0x2c9   :  { %v9377_v29 = vcombine.high %v1248_v18, %v1256_v33 }
 0x2ca   :  { %v9378_v45 = vcombine.low %v1249_v20, %v1257_v21 }
 0x2cb   :  { %6013 = vmatpush1.bf16.msra.mxu0 %v9280_v30  ;;  %6177 = vmatpush1.bf16.msra.mxu1 %v9282_v32  ;;  %v9379_v30 = vcombine.high %v1249_v20, %v1257_v21  ;;  %v1264_v32 = vunpack.c.l.s8.bf16 %v502_v25  ;;  %v151_v21 = vld [vmem:[#allocation2 + $0x98] sm:$0xff] }
 0x2cc   :  { %6014 = vmatprep.subr.bf16.mxu0 %v9297_v39  ;;  %6178 = vmatprep.subr.bf16.mxu1 %v9299_v44  ;;  %v514_v39 = vld [vmem:[#allocation2 + $0xbf0] sm:$0xff]  ;;  %v9376_v44 = vcombine.low %v1248_v18, %v1256_v33  ;;  %v547_v33 = vunpack.c.h.s8.bf16 %v143_v15 }
 0x2cd   :  { %v9392_v56 = vcombine.low %v1264_v32, %v1272_v34 }
 0x2cf   :  { %6015 = vmatpush1.bf16.msra.mxu0 %v9296_v47  ;;  %6179 = vmatpush1.bf16.msra.mxu1 %v9298_v48  ;;  %v1288_v47 = vunpack.c.l.s8.bf16 %v514_v39  ;;  %v1281_v48 = vunpack.c.h.s8.bf16 %v510_v38 }
 0x2d0   :  { %6016 = vmatprep.subr.bf16.mxu0 %v9313_v49  ;;  %6180 = vmatprep.subr.bf16.mxu1 %v9315_v50  ;;  %v1289_v49 = vunpack.c.h.s8.bf16 %v514_v39  ;;  %v9393_v50 = vcombine.high %v1264_v32, %v1272_v34  ;;  %v159_v34 = vld [vmem:[#allocation2 + $0xd8] sm:$0xff] }
 0x2d1   :  { %v9409_v58 = vcombine.high %v1280_v46, %v1288_v47 }
 0x2d2   :  { %v9410_v3 = vcombine.low %v1281_v48, %v1289_v49 }
 0x2d3   :  { %6017 = vmatpush1.bf16.msra.mxu0 %v9312_v59  ;;  %6181 = vmatpush1.bf16.msra.mxu1 %v9314_v60  ;;  %v9411_v59 = vcombine.high %v1281_v48, %v1289_v49  ;;  %v1296_v60 = vunpack.c.l.s8.bf16 %v518_v54 }
 0x2d4   :  { %6018 = vmatprep.subr.bf16.mxu0 %v9329_v1  ;;  %6182 = vmatprep.subr.bf16.mxu1 %v9331_v2  ;;  %v139_v1 = vld [vmem:[#allocation2 + $0x38] sm:$0xff]  ;;  %v9408_v2 = vcombine.low %v1280_v46, %v1288_v47  ;;  %v579_v46 = vunpack.c.h.s8.bf16 %v159_v34  ;;  %v587_v47 = vunpack.c.h.s8.bf16 %v163_v36 }
 0x2d5   :  { %v9425_v4 = vcombine.high %v1296_v60, %v1304_v61  ;;  %v539_v9 = vunpack.c.h.s8.bf16 %v139_v1  ;;  %v9424_v10 = vcombine.low %v1296_v60, %v1304_v61 }
 0x2d7   :  { %6019 = vmatpush1.bf16.msra.mxu0 %v9328_v5  ;;  %6183 = vmatpush1.bf16.msra.mxu1 %v9330_v6  ;;  %v9427_v5 = vcombine.high %v1297_v62, %v1305_v22  ;;  %v530_v6 = vunpack.c.l.s8.bf16 %v135_v0  ;;  %v175_v62 = vld [vmem:[#allocation2 + $0x158] sm:$0xff] }
 0x2d8   :  { %6020 = vmatprep.subr.bf16.mxu0 %v9345_v7  ;;  %6184 = vmatprep.subr.bf16.mxu1 %v9347_v8  ;;  %v538_v7 = vunpack.c.l.s8.bf16 %v139_v1  ;;  %v531_v8 = vunpack.c.h.s8.bf16 %v135_v0  ;;  %v179_v22 = vld [vmem:[#allocation2 + $0x178] sm:$0xff] }
 0x2da   :  { %v8661_v12 = vcombine.high %v530_v6, %v538_v7  ;;  %v8663_v13 = vcombine.high %v531_v8, %v539_v9  ;;  %v8662_v25 = vcombine.low %v531_v8, %v539_v9  ;;  %v618_v8 = vunpack.c.l.s8.bf16 %v179_v22 }
 0x2db   :  { %6021 = vmatpush1.bf16.msra.mxu0 %v9344_v16  ;;  %6185 = vmatpush1.bf16.msra.mxu1 %v9346_v17  ;;  %v147_v16 = vld [vmem:[#allocation2 + $0x78] sm:$0xff]  ;;  %v546_v17 = vunpack.c.l.s8.bf16 %v143_v15  ;;  %v611_v9 = vunpack.c.h.s8.bf16 %v175_v62 }
 0x2dc   :  { %6022 = vmatprep.subr.bf16.mxu0 %v9361_v23  ;;  %6186 = vmatprep.subr.bf16.mxu1 %v9363_v24  ;;  %v554_v18 = vunpack.c.l.s8.bf16 %v147_v16  ;;  %v555_v20 = vunpack.c.h.s8.bf16 %v147_v16  ;;  %v155_v23 = vld [vmem:[#allocation2 + $0xb8] sm:$0xff]  ;;  %v8660_v24 = vcombine.low %v530_v6, %v538_v7  ;;  %v610_v7 = vunpack.c.l.s8.bf16 %v175_v62 }
 0x2dd   :  { %v571_v32 = vunpack.c.h.s8.bf16 %v155_v23  ;;  %v183_v16 = vld [vmem:[#allocation2 + $0x198] sm:$0xff] }
 0x2de   :  { %v8677_v26 = vcombine.high %v546_v17, %v554_v18  ;;  %v8676_v38 = vcombine.low %v546_v17, %v554_v18  ;;  %v8678_v39 = vcombine.low %v547_v33, %v555_v20  ;;  %v187_v17 = vld [vmem:[#allocation2 + $0x1b8] sm:$0xff] }
 0x2df   :  { %6023 = vmatpush1.bf16.msra.mxu0 %v9360_v27  ;;  %6187 = vmatpush1.bf16.msra.mxu1 %v9362_v28  ;;  %v8679_v27 = vcombine.high %v547_v33, %v555_v20  ;;  %v562_v28 = vunpack.c.l.s8.bf16 %v151_v21  ;;  %v8741_v20 = vcombine.high %v610_v7, %v618_v8 }
 0x2e0   :  { %6024 = vmatprep.subr.bf16.mxu0 %v9377_v29  ;;  %6188 = vmatprep.subr.bf16.mxu1 %v9379_v30  ;;  %v570_v29 = vunpack.c.l.s8.bf16 %v155_v23  ;;  %v563_v30 = vunpack.c.h.s8.bf16 %v151_v21  ;;  %v626_v23 = vunpack.c.l.s8.bf16 %v183_v16 }
 0x2e2   :  { %v8693_v48 = vcombine.high %v562_v28, %v570_v29  ;;  %v8695_v49 = vcombine.high %v563_v30, %v571_v32  ;;  %v8692_v54 = vcombine.low %v562_v28, %v570_v29  ;;  %v8694_v55 = vcombine.low %v563_v30, %v571_v32  ;;  %v195_v28 = vld [vmem:[#allocation2 + $0x1f8] sm:$0xff] }
 0x2e3   :  { %6025 = vmatpush1.bf16.msra.mxu0 %v9376_v44  ;;  %6189 = vmatpush1.bf16.msra.mxu1 %v9378_v45  ;;  %v578_v44 = vunpack.c.l.s8.bf16 %v159_v34  ;;  %v586_v45 = vunpack.c.l.s8.bf16 %v163_v36  ;;  %v8740_v29 = vcombine.low %v610_v7, %v618_v8  ;;  %v650_v34 = vunpack.c.l.s8.bf16 %v195_v28 }
 0x2e4   :  { %6026 = vmatprep.subr.bf16.mxu0 %v9393_v50  ;;  %6190 = vmatprep.subr.bf16.mxu1 %v9395_v51  ;;  %v167_v50 = vld [vmem:[#allocation2 + $0x118] sm:$0xff] }
 0x2e5   :  { %v171_v51 = vld [vmem:[#allocation2 + $0x138] sm:$0xff]  ;;  %v595_v60 = vunpack.c.h.s8.bf16 %v167_v50 }
 0x2e6   :  { %v603_v61 = vunpack.c.h.s8.bf16 %v171_v51 }
 0x2e7   :  { %6027 = vmatpush1.bf16.msra.mxu0 %v9392_v56  ;;  %6191 = vmatpush1.bf16.msra.mxu1 %v9394_v57  ;;  %v8709_v56 = vcombine.high %v578_v44, %v586_v45  ;;  %v8711_v57 = vcombine.high %v579_v46, %v587_v47 }
 0x2e8   :  { %6028 = vmatprep.subr.bf16.mxu0 %v9409_v58  ;;  %6192 = vmatprep.subr.bf16.mxu1 %v9411_v59  ;;  %v594_v58 = vunpack.c.l.s8.bf16 %v167_v50  ;;  %v602_v59 = vunpack.c.l.s8.bf16 %v171_v51  ;;  %v8727_v15 = vcombine.high %v595_v60, %v603_v61  ;;  %v8726_v33 = vcombine.low %v595_v60, %v603_v61 }
 0x2ea   :  { %v8724_v18 = vcombine.low %v594_v58, %v602_v59 }
 0x2eb   :  { %6029 = vmatpush1.bf16.msra.mxu0 %v9408_v2  ;;  %6193 = vmatpush1.bf16.msra.mxu1 %v9410_v3  ;;  %v8708_v3 = vcombine.low %v578_v44, %v586_v45  ;;  %v199_v44 = vld [vmem:[#allocation2 + $0x218] sm:$0xff] }
 0x2ec   :  { %6039 = vmatprep.subr.bf16.mxu0 %v9425_v4  ;;  %6203 = vmatprep.subr.bf16.mxu1 %v9427_v5  ;;  %v8710_v4 = vcombine.low %v579_v46, %v587_v47  ;;  %v203_v45 = vld [vmem:[#allocation2 + $0x238] sm:$0xff]  ;;  %v658_v50 = vunpack.c.l.s8.bf16 %v199_v44 }
 0x2ed   :  { %v666_v51 = vunpack.c.l.s8.bf16 %v203_v45 }
 0x2ee   :  { %6031 = vmatmul.mubr.bf16.vlgmr.msra.gmra.mrb[8].mxu0 %v10126_v14  ;;  %6195 = vmatmul.mubr.bf16.vlgmr.msra.gmra.mrb[8].mxu1 %v10126_v14 }
 0x2ef   :  { %6040 = vmatpush1.bf16.msra.mxu0 %v9424_v10  ;;  %6204 = vmatpush1.bf16.msra.mxu1 %v9426_v11  ;;  %v619_v10 = vunpack.c.h.s8.bf16 %v179_v22  ;;  %v8788_v7 = vcombine.low %v658_v50, %v666_v51 }
 0x2f0   :  { %6071 = vmatprep.mubr.bf16.mxu0 %v9926_v19  ;;  %6235 = vmatprep.mubr.bf16.mxu1 %v9926_v19 }
 0x2f1   :  { %6244 = vmatprep.subr.bf16.mxu0 %v8661_v12  ;;  %6408 = vmatprep.subr.bf16.mxu1 %v8663_v13  ;;  %v8725_v13 = vcombine.high %v594_v58, %v602_v59  ;;  %v8743_v21 = vcombine.high %v611_v9, %v619_v10  ;;  %v8742_v30 = vcombine.low %v611_v9, %v619_v10 }
 0x2fa   :  { %9436 = vmatmul.mubr.msk.bf16.vlgmr.msra.gmra.mrb[8].mxu0 %vm5256_vm0, %v9722_v37  ;;  %9437 = vmatmul.mubr.msk.bf16.vlgmr.msra.gmra.mrb[8].mxu1 %vm5256_vm0, %v9722_v37  ;;  %v651_v37 = vunpack.c.h.s8.bf16 %v195_v28  ;;  %v235_v28 = vld [vmem:[#allocation2 + $0x338] sm:$0xff] }
 0x2fb   :  { %6245 = vmatpush1.bf16.msra.mxu0 %v8660_v24  ;;  %6409 = vmatpush1.bf16.msra.mxu1 %v8662_v25  ;;  %v634_v24 = vunpack.c.l.s8.bf16 %v187_v17  ;;  %v627_v25 = vunpack.c.h.s8.bf16 %v183_v16  ;;  %v223_v16 = vld [vmem:[#allocation2 + $0x2d8] sm:$0xff] }
 0x2fc   :  { %6246 = vmatprep.subr.bf16.mxu0 %v8677_v26  ;;  %6410 = vmatprep.subr.bf16.mxu1 %v8679_v27  ;;  %v635_v26 = vunpack.c.h.s8.bf16 %v187_v17  ;;  %v191_v27 = vld [vmem:[#allocation2 + $0x1d8] sm:$0xff] }
 0x2fd   :  { %6276 = vmatprep.mubr.bf16.mxu0 %v10086_v35  ;;  %6440 = vmatprep.mubr.bf16.mxu1 %v10086_v35  ;;  %v642_v32 = vunpack.c.l.s8.bf16 %v191_v27  ;;  %v643_v36 = vunpack.c.h.s8.bf16 %v191_v27  ;;  %v8756_v46 = vcombine.low %v626_v23, %v634_v24  ;;  %v227_v17 = vld [vmem:[#allocation2 + $0x2f8] sm:$0xff] }
 0x2fe   :  { %v8758_v47 = vcombine.low %v627_v25, %v635_v26  ;;  %v231_v27 = vld [vmem:[#allocation2 + $0x318] sm:$0xff] }
 0x2ff   :  { %6247 = vmatpush1.bf16.msra.mxu0 %v8676_v38  ;;  %6411 = vmatpush1.bf16.msra.mxu1 %v8678_v39  ;;  %v8757_v38 = vcombine.high %v626_v23, %v634_v24  ;;  %v8759_v39 = vcombine.high %v627_v25, %v635_v26  ;;  %v8772_v58 = vcombine.low %v642_v32, %v650_v34  ;;  %v707_v23 = vunpack.c.h.s8.bf16 %v223_v16 }
 0x300   :  { %6248 = vmatprep.subr.bf16.mxu0 %v8693_v48  ;;  %6412 = vmatprep.subr.bf16.mxu1 %v8695_v49  ;;  %v8773_v48 = vcombine.high %v642_v32, %v650_v34  ;;  %v8775_v49 = vcombine.high %v643_v36, %v651_v37  ;;  %v8774_v59 = vcombine.low %v643_v36, %v651_v37  ;;  %v715_v24 = vunpack.c.h.s8.bf16 %v227_v17 }
 0x301   :  { %v10185_v0 = vpop.f32.mrb[4].mxu0  ;;  %v10187_v1 = vpop.f32.mrb[4].mxu1  ;;  %v722_v36 = vunpack.c.l.s8.bf16 %v231_v27  ;;  %v730_v37 = vunpack.c.l.s8.bf16 %v235_v28 }
 0x302   :  { %v10189_v2 = vpop.f32.mrb[5].mxu0  ;;  %v10191_v35 = vpop.f32.mrb[5].mxu1  ;;  %v8839_v34 = vcombine.high %v707_v23, %v715_v24 }
 0x303   :  { %6249 = vmatpush1.bf16.msra.mxu0 %v8692_v54  ;;  %6413 = vmatpush1.bf16.msra.mxu1 %v8694_v55  ;;  %v5749_v5 = vpop.f32.mrb[6].mxu0  ;;  %v5913_v6 = vpop.f32.mrb[6].mxu1  ;;  %v659_v54 = vunpack.c.h.s8.bf16 %v199_v44  ;;  %v667_v55 = vunpack.c.h.s8.bf16 %v203_v45  ;;  %v239_v44 = vld [vmem:[#allocation2 + $0x358] sm:$0xff] }
 0x304   :  { %v5750_v11 = vpop.f32.mrb[7].mxu0  ;;  %v5914_v12 = vpop.f32.mrb[7].mxu1  ;;  %6250 = vmatprep.subr.bf16.mxu0 %v8709_v56  ;;  %6414 = vmatprep.subr.bf16.mxu1 %v8711_v57  ;;  %v207_v56 = vld [vmem:[#allocation2 + $0x258] sm:$0xff] }
 0x305   :  { %v211_v57 = vld [vmem:[#allocation2 + $0x278] sm:$0xff]  ;;  %v674_v60 = vunpack.c.l.s8.bf16 %v207_v56  ;;  %v675_v62 = vunpack.c.h.s8.bf16 %v207_v56  ;;  %v8790_v8 = vcombine.low %v659_v54, %v667_v55 }
 0x306   :  { %v682_v61 = vunpack.c.l.s8.bf16 %v211_v57  ;;  %v683_v22 = vunpack.c.h.s8.bf16 %v211_v57  ;;  %v215_v5 = vld [vmem:[#allocation2 + $0x298] sm:$0xff] }
 0x307   :  { %6251 = vmatpush1.bf16.msra.mxu0 %v8708_v3  ;;  %6415 = vmatpush1.bf16.msra.mxu1 %v8710_v4  ;;  %v8789_v3 = vcombine.high %v658_v50, %v666_v51  ;;  %v8791_v4 = vcombine.high %v659_v54, %v667_v55  ;;  %v219_v6 = vld [vmem:[#allocation2 + $0x2b8] sm:$0xff]  ;;  %v690_v11 = vunpack.c.l.s8.bf16 %v215_v5  ;;  %v739_v50 = vunpack.c.h.s8.bf16 %v239_v44 }
 0x308   :  { %6252 = vmatprep.subr.bf16.mxu0 %v8725_v13  ;;  %6416 = vmatprep.subr.bf16.mxu1 %v8727_v15  ;;  %v8805_v9 = vcombine.high %v674_v60, %v682_v61  ;;  %v8807_v10 = vcombine.high %v675_v62, %v683_v22  ;;  %v698_v12 = vunpack.c.l.s8.bf16 %v219_v6  ;;  %v691_v13 = vunpack.c.h.s8.bf16 %v215_v5  ;;  %v243_v45 = vld [vmem:[#allocation2 + $0x378] sm:$0xff] }
 0x309   :  { %v699_v15 = vunpack.c.h.s8.bf16 %v219_v6  ;;  %v747_v51 = vunpack.c.h.s8.bf16 %v243_v45  ;;  %v8853_v54 = vcombine.high %v722_v36, %v730_v37  ;;  %v247_v56 = vld [vmem:[#allocation2 + $0x398] sm:$0xff] }
 0x30a   :  { %v8821_v25 = vcombine.high %v690_v11, %v698_v12  ;;  %v251_v57 = vld [vmem:[#allocation2 + $0x3b8] sm:$0xff] }
 0x30b   :  { %6253 = vmatpush1.bf16.msra.mxu0 %v8724_v18  ;;  %6417 = vmatpush1.bf16.msra.mxu1 %v8726_v33  ;;  %v8804_v18 = vcombine.low %v674_v60, %v682_v61  ;;  %v8806_v33 = vcombine.low %v675_v62, %v683_v22  ;;  %v8823_v26 = vcombine.high %v691_v13, %v699_v15  ;;  %v754_v62 = vunpack.c.l.s8.bf16 %v247_v56  ;;  %v255_v5 = vld [vmem:[#allocation2 + $0x3d8] sm:$0xff] }
 0x30c   :  { %6254 = vmatprep.subr.bf16.mxu0 %v8741_v20  ;;  %6418 = vmatprep.subr.bf16.mxu1 %v8743_v21  ;;  %v706_v20 = vunpack.c.l.s8.bf16 %v223_v16  ;;  %v714_v21 = vunpack.c.l.s8.bf16 %v227_v17  ;;  %v8871_v61 = vcombine.high %v739_v50, %v747_v51  ;;  %v762_v22 = vunpack.c.l.s8.bf16 %v251_v57  ;;  %v259_v6 = vld [vmem:[#allocation2 + $0x3f8] sm:$0xff] }
 0x30d   :  { %v263_v16 = vld [vmem:[#allocation2 + $0x418] sm:$0xff] }
 0x30e   :  { %v8837_v32 = vcombine.high %v706_v20, %v714_v21  ;;  %v267_v17 = vld [vmem:[#allocation2 + $0x438] sm:$0xff] }
 0x30f   :  { %6255 = vmatpush1.bf16.msra.mxu0 %v8740_v29  ;;  %6419 = vmatpush1.bf16.msra.mxu1 %v8742_v30  ;;  %v8820_v29 = vcombine.low %v690_v11, %v698_v12  ;;  %v8822_v30 = vcombine.low %v691_v13, %v699_v15  ;;  %v771_v11 = vunpack.c.h.s8.bf16 %v255_v5  ;;  %v779_v12 = vunpack.c.h.s8.bf16 %v259_v6 }
 0x310   :  { %6256 = vmatprep.subr.bf16.mxu0 %v8757_v38  ;;  %6420 = vmatprep.subr.bf16.mxu1 %v8759_v39  ;;  %v723_v38 = vunpack.c.h.s8.bf16 %v231_v27  ;;  %v731_v39 = vunpack.c.h.s8.bf16 %v235_v28  ;;  %v8885_v13 = vcombine.high %v754_v62, %v762_v22  ;;  %v271_v27 = vld [vmem:[#allocation2 + $0x458] sm:$0xff] }
 0x311   :  { %v275_v28 = vld [vmem:[#allocation2 + $0x478] sm:$0xff] }
 0x312   :  { %v8855_v55 = vcombine.high %v723_v38, %v731_v39 }
 0x313   :  { %6257 = vmatpush1.bf16.msra.mxu0 %v8756_v46  ;;  %6421 = vmatpush1.bf16.msra.mxu1 %v8758_v47  ;;  %v8836_v46 = vcombine.low %v706_v20, %v714_v21  ;;  %v8838_v47 = vcombine.low %v707_v23, %v715_v24  ;;  %v8903_v21 = vcombine.high %v771_v11, %v779_v12  ;;  %v786_v23 = vunpack.c.l.s8.bf16 %v263_v16 }
 0x314   :  { %6258 = vmatprep.subr.bf16.mxu0 %v8773_v48  ;;  %6422 = vmatprep.subr.bf16.mxu1 %v8775_v49  ;;  %v738_v48 = vunpack.c.l.s8.bf16 %v239_v44  ;;  %v746_v49 = vunpack.c.l.s8.bf16 %v243_v45  ;;  %v794_v24 = vunpack.c.l.s8.bf16 %v267_v17  ;;  %v279_v44 = vld [vmem:[#allocation2 + $0x498] sm:$0xff] }
 0x315   :  { %v283_v45 = vld [vmem:[#allocation2 + $0x4b8] sm:$0xff] }
 0x316   :  { %v8869_v60 = vcombine.high %v738_v48, %v746_v49 }
 0x317   :  { %6259 = vmatpush1.bf16.msra.mxu0 %v8772_v58  ;;  %6423 = vmatpush1.bf16.msra.mxu1 %v8774_v59  ;;  %v8852_v58 = vcombine.low %v722_v36, %v730_v37  ;;  %v8854_v59 = vcombine.low %v723_v38, %v731_v39  ;;  %v803_v36 = vunpack.c.h.s8.bf16 %v271_v27  ;;  %v811_v37 = vunpack.c.h.s8.bf16 %v275_v28 }
 0x318   :  { %6260 = vmatprep.subr.bf16.mxu0 %v8789_v3  ;;  %6424 = vmatprep.subr.bf16.mxu1 %v8791_v4  ;;  %v755_v3 = vunpack.c.h.s8.bf16 %v247_v56  ;;  %v763_v4 = vunpack.c.h.s8.bf16 %v251_v57  ;;  %v8917_v38 = vcombine.high %v786_v23, %v794_v24  ;;  %v287_v56 = vld [vmem:[#allocation2 + $0x4d8] sm:$0xff] }
 0x319   :  { %v291_v57 = vld [vmem:[#allocation2 + $0x4f8] sm:$0xff] }
 0x31a   :  { %v8887_v15 = vcombine.high %v755_v3, %v763_v4 }
 0x31b   :  { %6261 = vmatpush1.bf16.msra.mxu0 %v8788_v7  ;;  %6425 = vmatpush1.bf16.msra.mxu1 %v8790_v8  ;;  %v8868_v7 = vcombine.low %v738_v48, %v746_v49  ;;  %v8870_v8 = vcombine.low %v739_v50, %v747_v51  ;;  %v8935_v49 = vcombine.high %v803_v36, %v811_v37  ;;  %v818_v50 = vunpack.c.l.s8.bf16 %v279_v44 }
 0x31c   :  { %6262 = vmatprep.subr.bf16.mxu0 %v8805_v9  ;;  %6426 = vmatprep.subr.bf16.mxu1 %v8807_v10  ;;  %v770_v9 = vunpack.c.l.s8.bf16 %v255_v5  ;;  %v778_v10 = vunpack.c.l.s8.bf16 %v259_v6  ;;  %v826_v51 = vunpack.c.l.s8.bf16 %v283_v45  ;;  %v295_v5 = vld [vmem:[#allocation2 + $0x518] sm:$0xff] }
 0x31d   :  { %v299_v6 = vld [vmem:[#allocation2 + $0x538] sm:$0xff] }
 0x31e   :  { %v8901_v20 = vcombine.high %v770_v9, %v778_v10 }
 0x31f   :  { %6263 = vmatpush1.bf16.msra.mxu0 %v8804_v18  ;;  %6427 = vmatpush1.bf16.msra.mxu1 %v8806_v33  ;;  %v8884_v18 = vcombine.low %v754_v62, %v762_v22  ;;  %v8886_v33 = vcombine.low %v755_v3, %v763_v4  ;;  %v835_v62 = vunpack.c.h.s8.bf16 %v287_v56  ;;  %v843_v22 = vunpack.c.h.s8.bf16 %v291_v57 }
 0x320   :  { %6264 = vmatprep.subr.bf16.mxu0 %v8821_v25  ;;  %6428 = vmatprep.subr.bf16.mxu1 %v8823_v26  ;;  %v787_v25 = vunpack.c.h.s8.bf16 %v263_v16  ;;  %v795_v26 = vunpack.c.h.s8.bf16 %v267_v17  ;;  %v8949_v3 = vcombine.high %v818_v50, %v826_v51  ;;  %v307_v16 = vld [vmem:[#allocation2 + $0x578] sm:$0xff] }
 0x322   :  { %v8919_v39 = vcombine.high %v787_v25, %v795_v26 }
 0x323   :  { %6265 = vmatpush1.bf16.msra.mxu0 %v8820_v29  ;;  %6429 = vmatpush1.bf16.msra.mxu1 %v8822_v30  ;;  %v8900_v29 = vcombine.low %v770_v9, %v778_v10  ;;  %v8902_v30 = vcombine.low %v771_v11, %v779_v12  ;;  %v8967_v9 = vcombine.high %v835_v62, %v843_v22  ;;  %v850_v10 = vunpack.c.l.s8.bf16 %v295_v5 }
 0x324   :  { %6266 = vmatprep.subr.bf16.mxu0 %v8837_v32  ;;  %6430 = vmatprep.subr.bf16.mxu1 %v8839_v34  ;;  %v802_v32 = vunpack.c.l.s8.bf16 %v271_v27  ;;  %v810_v34 = vunpack.c.l.s8.bf16 %v275_v28  ;;  %v858_v11 = vunpack.c.l.s8.bf16 %v299_v6  ;;  %v851_v12 = vunpack.c.h.s8.bf16 %v295_v5 }
 0x326   :  { %v8933_v48 = vcombine.high %v802_v32, %v810_v34  ;;  %v8980_v27 = vcombine.low %v850_v10, %v858_v11 }
 0x327   :  { %6267 = vmatpush1.bf16.msra.mxu0 %v8836_v46  ;;  %6431 = vmatpush1.bf16.msra.mxu1 %v8838_v47  ;;  %v8916_v46 = vcombine.low %v786_v23, %v794_v24  ;;  %v8918_v47 = vcombine.low %v787_v25, %v795_v26  ;;  %v8981_v23 = vcombine.high %v850_v10, %v858_v11  ;;  %v311_v25 = vld [vmem:[#allocation2 + $0x598] sm:$0xff] }
 0x328   :  { %6268 = vmatprep.subr.bf16.mxu0 %v8853_v54  ;;  %6432 = vmatprep.subr.bf16.mxu1 %v8855_v55  ;;  %v819_v54 = vunpack.c.h.s8.bf16 %v279_v44  ;;  %v827_v55 = vunpack.c.h.s8.bf16 %v283_v45  ;;  %v315_v26 = vld [vmem:[#allocation2 + $0x5b8] sm:$0xff] }
 0x32a   :  { %v8951_v4 = vcombine.high %v819_v54, %v827_v55 }
 0x32b   :  { %6269 = vmatpush1.bf16.msra.mxu0 %v8852_v58  ;;  %6433 = vmatpush1.bf16.msra.mxu1 %v8854_v59  ;;  %v8932_v58 = vcombine.low %v802_v32, %v810_v34  ;;  %v8934_v59 = vcombine.low %v803_v36, %v811_v37  ;;  %v882_v32 = vunpack.c.l.s8.bf16 %v311_v25  ;;  %v890_v34 = vunpack.c.l.s8.bf16 %v315_v26 }
 0x32c   :  { %6270 = vmatprep.subr.bf16.mxu0 %v8869_v60  ;;  %6434 = vmatprep.subr.bf16.mxu1 %v8871_v61  ;;  %v834_v60 = vunpack.c.l.s8.bf16 %v287_v56  ;;  %v842_v61 = vunpack.c.l.s8.bf16 %v291_v57  ;;  %v883_v36 = vunpack.c.h.s8.bf16 %v311_v25  ;;  %v891_v37 = vunpack.c.h.s8.bf16 %v315_v26 }
 0x32d   :  { %v9012_v56 = vcombine.low %v882_v32, %v890_v34 }
 0x32e   :  { %v8964_v17 = vcombine.low %v834_v60, %v842_v61  ;;  %v9014_v57 = vcombine.low %v883_v36, %v891_v37 }
 0x32f   :  { %6271 = vmatpush1.bf16.msra.mxu0 %v8868_v7  ;;  %6435 = vmatpush1.bf16.msra.mxu1 %v8870_v8  ;;  %v8948_v7 = vcombine.low %v818_v50, %v826_v51  ;;  %v8965_v8 = vcombine.high %v834_v60, %v842_v61  ;;  %v9013_v50 = vcombine.high %v882_v32, %v890_v34 }
 0x330   :  { %6272 = vmatprep.subr.bf16.mxu0 %v8885_v13  ;;  %6436 = vmatprep.subr.bf16.mxu1 %v8887_v15  ;;  %v859_v13 = vunpack.c.h.s8.bf16 %v299_v6  ;;  %v303_v15 = vld [vmem:[#allocation2 + $0x558] sm:$0xff]  ;;  %v9015_v51 = vcombine.high %v883_v36, %v891_v37 }
 0x331   :  { %v359_v36 = vld [vmem:[#allocation2 + $0x718] sm:$0xff] }
 0x332   :  { %v8983_v24 = vcombine.high %v851_v12, %v859_v13  ;;  %v8982_v28 = vcombine.low %v851_v12, %v859_v13  ;;  %v343_v12 = vld [vmem:[#allocation2 + $0x698] sm:$0xff] }
 0x333   :  { %6273 = vmatpush1.bf16.msra.mxu0 %v8884_v18  ;;  %6437 = vmatpush1.bf16.msra.mxu1 %v8886_v33  ;;  %v8966_v18 = vcombine.low %v835_v62, %v843_v22  ;;  %v866_v33 = vunpack.c.l.s8.bf16 %v303_v15  ;;  %v347_v13 = vld [vmem:[#allocation2 + $0x6b8] sm:$0xff] }
 0x334   :  { %6274 = vmatprep.subr.bf16.mxu0 %v8901_v20  ;;  %6438 = vmatprep.subr.bf16.mxu1 %v8903_v21  ;;  %v867_v20 = vunpack.c.h.s8.bf16 %v303_v15  ;;  %v875_v21 = vunpack.c.h.s8.bf16 %v307_v16  ;;  %v363_v37 = vld [vmem:[#allocation2 + $0x738] sm:$0xff] }
 0x336   :  { %v8998_v45 = vcombine.low %v867_v20, %v875_v21 }
 0x337   :  { %6275 = vmatpush1.bf16.msra.mxu0 %v8900_v29  ;;  %6439 = vmatpush1.bf16.msra.mxu1 %v8902_v30  ;;  %v8999_v30 = vcombine.high %v867_v20, %v875_v21  ;;  %v947_v20 = vunpack.c.h.s8.bf16 %v343_v12  ;;  %v955_v21 = vunpack.c.h.s8.bf16 %v347_v13 }
 0x338   :  { %6285 = vmatprep.subr.bf16.mxu0 %v8917_v38  ;;  %6449 = vmatprep.subr.bf16.mxu1 %v8919_v39  ;;  %v319_v38 = vld [vmem:[#allocation2 + $0x5d8] sm:$0xff] }
 0x339   :  { %v323_v39 = vld [vmem:[#allocation2 + $0x5f8] sm:$0xff]  ;;  %v9079_v34 = vcombine.high %v947_v20, %v955_v21 }
 0x33a   :  { %6277 = vmatmul.mubr.bf16.vlgmr.msra.gmra.mrb[12].mxu0 %v10092_v52  ;;  %6441 = vmatmul.mubr.bf16.vlgmr.msra.gmra.mrb[12].mxu1 %v10092_v52  ;;  %v8950_v52 = vcombine.low %v819_v54, %v827_v55  ;;  %v327_v54 = vld [vmem:[#allocation2 + $0x618] sm:$0xff] }
 0x33b   :  { %6286 = vmatpush1.bf16.msra.mxu0 %v8916_v46  ;;  %6450 = vmatpush1.bf16.msra.mxu1 %v8918_v47  ;;  %v898_v46 = vunpack.c.l.s8.bf16 %v319_v38  ;;  %v906_v47 = vunpack.c.l.s8.bf16 %v323_v39  ;;  %v331_v55 = vld [vmem:[#allocation2 + $0x638] sm:$0xff]  ;;  %v914_v60 = vunpack.c.l.s8.bf16 %v327_v54  ;;  %v915_v62 = vunpack.c.h.s8.bf16 %v327_v54 }
 0x33c   :  { %6287 = vmatprep.subr.bf16.mxu0 %v8933_v48  ;;  %6451 = vmatprep.subr.bf16.mxu1 %v8935_v49  ;;  %v899_v48 = vunpack.c.h.s8.bf16 %v319_v38  ;;  %v907_v49 = vunpack.c.h.s8.bf16 %v323_v39  ;;  %v922_v61 = vunpack.c.l.s8.bf16 %v331_v55  ;;  %v923_v22 = vunpack.c.h.s8.bf16 %v331_v55 }
 0x33d   :  { %6317 = vmatprep.mubr.bf16.mxu0 %v10101_v63  ;;  %6481 = vmatprep.mubr.bf16.mxu1 %v10101_v63  ;;  %v874_v63 = vunpack.c.l.s8.bf16 %v307_v16  ;;  %v9028_v5 = vcombine.low %v898_v46, %v906_v47  ;;  %v9078_v39 = vcombine.low %v947_v20, %v955_v21  ;;  %v391_v20 = vld [vmem:[#allocation2 + $0x818] sm:$0xff] }
 0x33e   :  { %v9030_v6 = vcombine.low %v899_v48, %v907_v49  ;;  %v9045_v10 = vcombine.high %v914_v60, %v922_v61  ;;  %v9047_v11 = vcombine.high %v915_v62, %v923_v22  ;;  %v9044_v15 = vcombine.low %v914_v60, %v922_v61  ;;  %v395_v21 = vld [vmem:[#allocation2 + $0x838] sm:$0xff] }
 0x33f   :  { %6288 = vmatpush1.bf16.msra.mxu0 %v8932_v58  ;;  %6452 = vmatpush1.bf16.msra.mxu1 %v8934_v59  ;;  %v8997_v29 = vcombine.high %v866_v33, %v874_v63  ;;  %v8996_v44 = vcombine.low %v866_v33, %v874_v63  ;;  %v9029_v58 = vcombine.high %v898_v46, %v906_v47  ;;  %v946_v33 = vunpack.c.l.s8.bf16 %v343_v12 }
 0x340   :  { %6289 = vmatprep.subr.bf16.mxu0 %v8949_v3  ;;  %6453 = vmatprep.subr.bf16.mxu1 %v8951_v4  ;;  %v9031_v59 = vcombine.high %v899_v48, %v907_v49  ;;  %v335_v3 = vld [vmem:[#allocation2 + $0x658] sm:$0xff]  ;;  %v9046_v16 = vcombine.low %v915_v62, %v923_v22  ;;  %v954_v63 = vunpack.c.l.s8.bf16 %v347_v13  ;;  %v978_v46 = vunpack.c.l.s8.bf16 %v359_v36 }
 0x341   :  { %v339_v4 = vld [vmem:[#allocation2 + $0x678] sm:$0xff]  ;;  %v986_v47 = vunpack.c.l.s8.bf16 %v363_v37  ;;  %v979_v48 = vunpack.c.h.s8.bf16 %v359_v36  ;;  %v987_v49 = vunpack.c.h.s8.bf16 %v363_v37 }
 0x342   :  { %v9077_v32 = vcombine.high %v946_v33, %v954_v63  ;;  %v9076_v38 = vcombine.low %v946_v33, %v954_v63  ;;  %v375_v62 = vld [vmem:[#allocation2 + $0x798] sm:$0xff] }
 0x343   :  { %6290 = vmatpush1.bf16.msra.mxu0 %v8948_v7  ;;  %6454 = vmatpush1.bf16.msra.mxu1 %v8950_v52  ;;  %v930_v7 = vunpack.c.l.s8.bf16 %v335_v3  ;;  %v938_v52 = vunpack.c.l.s8.bf16 %v339_v4  ;;  %v9109_v60 = vcombine.high %v978_v46, %v986_v47  ;;  %v9111_v61 = vcombine.high %v979_v48, %v987_v49  ;;  %v379_v22 = vld [vmem:[#allocation2 + $0x7b8] sm:$0xff] }
 0x344   :  { %6291 = vmatprep.subr.bf16.mxu0 %v8965_v8  ;;  %6455 = vmatprep.subr.bf16.mxu1 %v8967_v9  ;;  %v931_v8 = vunpack.c.h.s8.bf16 %v335_v3  ;;  %v939_v9 = vunpack.c.h.s8.bf16 %v339_v4  ;;  %v9108_v3 = vcombine.low %v978_v46, %v986_v47  ;;  %v9110_v4 = vcombine.low %v979_v48, %v987_v49  ;;  %v407_v48 = vld [vmem:[#allocation2 + $0x898] sm:$0xff] }
 0x345   :  { %v9060_v25 = vcombine.low %v930_v7, %v938_v52  ;;  %v411_v49 = vld [vmem:[#allocation2 + $0x8b8] sm:$0xff] }
 0x346   :  { %v9062_v26 = vcombine.low %v931_v8, %v939_v9 }
 0x347   :  { %6292 = vmatpush1.bf16.msra.mxu0 %v8964_v17  ;;  %6456 = vmatpush1.bf16.msra.mxu1 %v8966_v18  ;;  %v9061_v17 = vcombine.high %v930_v7, %v938_v52  ;;  %v9063_v18 = vcombine.high %v931_v8, %v939_v9  ;;  %v1010_v7 = vunpack.c.l.s8.bf16 %v375_v62  ;;  %v1018_v52 = vunpack.c.l.s8.bf16 %v379_v22 }
 0x348   :  { %6293 = vmatprep.subr.bf16.mxu0 %v8981_v23  ;;  %6457 = vmatprep.subr.bf16.mxu1 %v8983_v24  ;;  %v351_v23 = vld [vmem:[#allocation2 + $0x6d8] sm:$0xff]  ;;  %v1011_v8 = vunpack.c.h.s8.bf16 %v375_v62  ;;  %v1019_v9 = vunpack.c.h.s8.bf16 %v379_v22 }
 0x349   :  { %v355_v24 = vld [vmem:[#allocation2 + $0x6f8] sm:$0xff]  ;;  %v9141_v33 = vcombine.high %v1010_v7, %v1018_v52 }
 0x34a   :  { %v9143_v63 = vcombine.high %v1011_v8, %v1019_v9 }
 0x34b   :  { %6294 = vmatpush1.bf16.msra.mxu0 %v8980_v27  ;;  %6458 = vmatpush1.bf16.msra.mxu1 %v8982_v28  ;;  %v962_v27 = vunpack.c.l.s8.bf16 %v351_v23  ;;  %v970_v28 = vunpack.c.l.s8.bf16 %v355_v24 }
 0x34c   :  { %6295 = vmatprep.subr.bf16.mxu0 %v8997_v29  ;;  %6459 = vmatprep.subr.bf16.mxu1 %v8999_v30  ;;  %v963_v29 = vunpack.c.h.s8.bf16 %v351_v23  ;;  %v971_v30 = vunpack.c.h.s8.bf16 %v355_v24  ;;  %v9140_v23 = vcombine.low %v1010_v7, %v1018_v52  ;;  %v9142_v24 = vcombine.low %v1011_v8, %v1019_v9  ;;  %v423_v8 = vld [vmem:[#allocation2 + $0x918] sm:$0xff] }
 0x34d   :  { %v9092_v54 = vcombine.low %v962_v27, %v970_v28  ;;  %v427_v9 = vld [vmem:[#allocation2 + $0x938] sm:$0xff] }
 0x34e   :  { %v9094_v55 = vcombine.low %v963_v29, %v971_v30 }
 0x34f   :  { %6296 = vmatpush1.bf16.msra.mxu0 %v8996_v44  ;;  %6460 = vmatpush1.bf16.msra.mxu1 %v8998_v45  ;;  %v9093_v44 = vcombine.high %v962_v27, %v970_v28  ;;  %v9095_v45 = vcombine.high %v963_v29, %v971_v30  ;;  %v1042_v27 = vunpack.c.l.s8.bf16 %v391_v20  ;;  %v1050_v28 = vunpack.c.l.s8.bf16 %v395_v21 }
 0x350   :  { %6297 = vmatprep.subr.bf16.mxu0 %v9013_v50  ;;  %6461 = vmatprep.subr.bf16.mxu1 %v9015_v51  ;;  %v367_v50 = vld [vmem:[#allocation2 + $0x758] sm:$0xff]  ;;  %v1043_v29 = vunpack.c.h.s8.bf16 %v391_v20  ;;  %v1051_v30 = vunpack.c.h.s8.bf16 %v395_v21 }
 0x351   :  { %v371_v51 = vld [vmem:[#allocation2 + $0x778] sm:$0xff]  ;;  %v9173_v46 = vcombine.high %v1042_v27, %v1050_v28 }
 0x352   :  { %v9175_v47 = vcombine.high %v1043_v29, %v1051_v30 }
 0x353   :  { %6298 = vmatpush1.bf16.msra.mxu0 %v9012_v56  ;;  %6462 = vmatpush1.bf16.msra.mxu1 %v9014_v57  ;;  %v994_v56 = vunpack.c.l.s8.bf16 %v367_v50  ;;  %v1002_v57 = vunpack.c.l.s8.bf16 %v371_v51 }
 0x354   :  { %6299 = vmatprep.subr.bf16.mxu0 %v9029_v58  ;;  %6463 = vmatprep.subr.bf16.mxu1 %v9031_v59  ;;  %v995_v58 = vunpack.c.h.s8.bf16 %v367_v50  ;;  %v1003_v59 = vunpack.c.h.s8.bf16 %v371_v51  ;;  %v9172_v50 = vcombine.low %v1042_v27, %v1050_v28  ;;  %v9174_v51 = vcombine.low %v1043_v29, %v1051_v30  ;;  %v439_v27 = vld [vmem:[#allocation2 + $0x998] sm:$0xff] }
 0x355   :  { %v9124_v12 = vcombine.low %v994_v56, %v1002_v57  ;;  %v443_v28 = vld [vmem:[#allocation2 + $0x9b8] sm:$0xff] }
 0x356   :  { %v9126_v13 = vcombine.low %v995_v58, %v1003_v59 }
 0x357   :  { %6300 = vmatpush1.bf16.msra.mxu0 %v9028_v5  ;;  %6464 = vmatpush1.bf16.msra.mxu1 %v9030_v6  ;;  %v9125_v5 = vcombine.high %v994_v56, %v1002_v57  ;;  %v9127_v6 = vcombine.high %v995_v58, %v1003_v59  ;;  %v1074_v56 = vunpack.c.l.s8.bf16 %v407_v48  ;;  %v1082_v57 = vunpack.c.l.s8.bf16 %v411_v49 }
 0x358   :  { %6301 = vmatprep.subr.bf16.mxu0 %v9045_v10  ;;  %6465 = vmatprep.subr.bf16.mxu1 %v9047_v11  ;;  %v383_v10 = vld [vmem:[#allocation2 + $0x7d8] sm:$0xff]  ;;  %v1075_v58 = vunpack.c.h.s8.bf16 %v407_v48  ;;  %v1083_v59 = vunpack.c.h.s8.bf16 %v411_v49 }
 0x359   :  { %v387_v11 = vld [vmem:[#allocation2 + $0x7f8] sm:$0xff]  ;;  %v9205_v7 = vcombine.high %v1074_v56, %v1082_v57 }
 0x35a   :  { %v9207_v52 = vcombine.high %v1075_v58, %v1083_v59 }
 0x35b   :  { %6302 = vmatpush1.bf16.msra.mxu0 %v9044_v15  ;;  %6466 = vmatpush1.bf16.msra.mxu1 %v9046_v16  ;;  %v1026_v15 = vunpack.c.l.s8.bf16 %v383_v10  ;;  %v1034_v16 = vunpack.c.l.s8.bf16 %v387_v11 }
 0x35c   :  { %6303 = vmatprep.subr.bf16.mxu0 %v9061_v17  ;;  %6467 = vmatprep.subr.bf16.mxu1 %v9063_v18  ;;  %v1027_v17 = vunpack.c.h.s8.bf16 %v383_v10  ;;  %v1035_v18 = vunpack.c.h.s8.bf16 %v387_v11  ;;  %v9204_v10 = vcombine.low %v1074_v56, %v1082_v57  ;;  %v455_v56 = vld [vmem:[#allocation2 + $0xa18] sm:$0xff] }
 0x35d   :  { %v9156_v36 = vcombine.low %v1026_v15, %v1034_v16  ;;  %v459_v57 = vld [vmem:[#allocation2 + $0xa38] sm:$0xff] }
 0x35e   :  { %v9158_v37 = vcombine.low %v1027_v17, %v1035_v18 }
 0x35f   :  { %6304 = vmatpush1.bf16.msra.mxu0 %v9060_v25  ;;  %6468 = vmatpush1.bf16.msra.mxu1 %v9062_v26  ;;  %v9157_v25 = vcombine.high %v1026_v15, %v1034_v16  ;;  %v9159_v26 = vcombine.high %v1027_v17, %v1035_v18  ;;  %v1114_v15 = vunpack.c.l.s8.bf16 %v427_v9  ;;  %v1107_v16 = vunpack.c.h.s8.bf16 %v423_v8  ;;  %v431_v18 = vld [vmem:[#allocation2 + $0x958] sm:$0xff] }
 0x360   :  { %6305 = vmatprep.subr.bf16.mxu0 %v9077_v32  ;;  %6469 = vmatprep.subr.bf16.mxu1 %v9079_v34  ;;  %v399_v32 = vld [vmem:[#allocation2 + $0x858] sm:$0xff]  ;;  %v1115_v17 = vunpack.c.h.s8.bf16 %v427_v9  ;;  %v1122_v21 = vunpack.c.l.s8.bf16 %v431_v18 }
 0x361   :  { %v403_v34 = vld [vmem:[#allocation2 + $0x878] sm:$0xff] }
 0x362   :  { %v9238_v30 = vcombine.low %v1107_v16, %v1115_v17 }
 0x363   :  { %6306 = vmatpush1.bf16.msra.mxu0 %v9076_v38  ;;  %6470 = vmatpush1.bf16.msra.mxu1 %v9078_v39  ;;  %v1058_v38 = vunpack.c.l.s8.bf16 %v399_v32  ;;  %v1066_v39 = vunpack.c.l.s8.bf16 %v403_v34 }
 0x364   :  { %6307 = vmatprep.subr.bf16.mxu0 %v9093_v44  ;;  %6471 = vmatprep.subr.bf16.mxu1 %v9095_v45  ;;  %v1059_v44 = vunpack.c.h.s8.bf16 %v399_v32  ;;  %v1067_v45 = vunpack.c.h.s8.bf16 %v403_v34 }
 0x365   :  { %v9188_v62 = vcombine.low %v1058_v38, %v1066_v39 }
 0x366   :  { %v9190_v22 = vcombine.low %v1059_v44, %v1067_v45 }
 0x367   :  { %6308 = vmatpush1.bf16.msra.mxu0 %v9092_v54  ;;  %6472 = vmatpush1.bf16.msra.mxu1 %v9094_v55  ;;  %v9189_v54 = vcombine.high %v1058_v38, %v1066_v39  ;;  %v9191_v55 = vcombine.high %v1059_v44, %v1067_v45  ;;  %v1139_v38 = vunpack.c.h.s8.bf16 %v439_v27  ;;  %v1147_v39 = vunpack.c.h.s8.bf16 %v443_v28  ;;  %v447_v44 = vld [vmem:[#allocation2 + $0x9d8] sm:$0xff] }
 0x368   :  { %6309 = vmatprep.subr.bf16.mxu0 %v9109_v60  ;;  %6473 = vmatprep.subr.bf16.mxu1 %v9111_v61  ;;  %v415_v60 = vld [vmem:[#allocation2 + $0x8d8] sm:$0xff]  ;;  %v1154_v48 = vunpack.c.l.s8.bf16 %v447_v44 }
 0x369   :  { %v419_v61 = vld [vmem:[#allocation2 + $0x8f8] sm:$0xff] }
 0x36a   :  { %v451_v45 = vld [vmem:[#allocation2 + $0x9f8] sm:$0xff] }
 0x36b   :  { %6310 = vmatpush1.bf16.msra.mxu0 %v9108_v3  ;;  %6474 = vmatpush1.bf16.msra.mxu1 %v9110_v4  ;;  %v1090_v3 = vunpack.c.l.s8.bf16 %v415_v60  ;;  %v1098_v4 = vunpack.c.l.s8.bf16 %v419_v61  ;;  %v1162_v49 = vunpack.c.l.s8.bf16 %v451_v45 }
 0x36c   :  { %6311 = vmatprep.subr.bf16.mxu0 %v9125_v5  ;;  %6475 = vmatprep.subr.bf16.mxu1 %v9127_v6  ;;  %v1091_v5 = vunpack.c.h.s8.bf16 %v415_v60  ;;  %v1099_v6 = vunpack.c.h.s8.bf16 %v419_v61 }
 0x36d   :  { %v9221_v11 = vcombine.high %v1090_v3, %v1098_v4  ;;  %v9285_v60 = vcombine.high %v1154_v48, %v1162_v49 }
 0x36e   :  { %v9222_v20 = vcombine.low %v1091_v5, %v1099_v6 }
 0x36f   :  { %6312 = vmatpush1.bf16.msra.mxu0 %v9124_v12  ;;  %6476 = vmatpush1.bf16.msra.mxu1 %v9126_v13  ;;  %v9223_v12 = vcombine.high %v1091_v5, %v1099_v6  ;;  %v1106_v13 = vunpack.c.l.s8.bf16 %v423_v8  ;;  %v463_v5 = vld [vmem:[#allocation2 + $0xa58] sm:$0xff] }
 0x370   :  { %6313 = vmatprep.subr.bf16.mxu0 %v9141_v33  ;;  %6477 = vmatprep.subr.bf16.mxu1 %v9143_v63  ;;  %v435_v33 = vld [vmem:[#allocation2 + $0x978] sm:$0xff]  ;;  %v9220_v63 = vcombine.low %v1090_v3, %v1098_v4  ;;  %v1171_v3 = vunpack.c.h.s8.bf16 %v455_v56  ;;  %v1179_v4 = vunpack.c.h.s8.bf16 %v459_v57  ;;  %v1186_v8 = vunpack.c.l.s8.bf16 %v463_v5 }
 0x371   :  { %v9236_v29 = vcombine.low %v1106_v13, %v1114_v15  ;;  %v467_v6 = vld [vmem:[#allocation2 + $0xa78] sm:$0xff] }
 0x372   :  { %v1194_v9 = vunpack.c.l.s8.bf16 %v467_v6 }
 0x373   :  { %6314 = vmatpush1.bf16.msra.mxu0 %v9140_v23  ;;  %6478 = vmatpush1.bf16.msra.mxu1 %v9142_v24  ;;  %v1123_v23 = vunpack.c.h.s8.bf16 %v431_v18  ;;  %v1131_v24 = vunpack.c.h.s8.bf16 %v435_v33 }
 0x374   :  { %6315 = vmatprep.subr.bf16.mxu0 %v9157_v25  ;;  %6479 = vmatprep.subr.bf16.mxu1 %v9159_v26  ;;  %v9237_v25 = vcombine.high %v1106_v13, %v1114_v15  ;;  %v9239_v26 = vcombine.high %v1107_v16, %v1115_v17  ;;  %v471_v13 = vld [vmem:[#allocation2 + $0xa98] sm:$0xff]  ;;  %v9302_v17 = vcombine.low %v1171_v3, %v1179_v4 }
 0x375   :  { %v9255_v34 = vcombine.high %v1123_v23, %v1131_v24  ;;  %v475_v15 = vld [vmem:[#allocation2 + $0xab8] sm:$0xff]  ;;  %v9317_v18 = vcombine.high %v1186_v8, %v1194_v9 }
 0x377   :  { %6316 = vmatpush1.bf16.msra.mxu0 %v9156_v36  ;;  %6480 = vmatpush1.bf16.msra.mxu1 %v9158_v37  ;;  %v1138_v36 = vunpack.c.l.s8.bf16 %v439_v27  ;;  %v1146_v37 = vunpack.c.l.s8.bf16 %v443_v28 }
 0x378   :  { %6326 = vmatprep.subr.bf16.mxu0 %v9173_v46  ;;  %6490 = vmatprep.subr.bf16.mxu1 %v9175_v47  ;;  %v9254_v47 = vcombine.low %v1123_v23, %v1131_v24  ;;  %v479_v23 = vld [vmem:[#allocation2 + $0xad8] sm:$0xff] }
 0x379   :  { %v483_v24 = vld [vmem:[#allocation2 + $0xaf8] sm:$0xff]  ;;  %v1218_v27 = vunpack.c.l.s8.bf16 %v479_v23 }
 0x37a   :  { %6318 = vmatmul.mubr.bf16.vlgmr.msra.gmra.mrb[12].mxu0 %v10109_v31  ;;  %6482 = vmatmul.mubr.bf16.vlgmr.msra.gmra.mrb[12].mxu1 %v10109_v31  ;;  %v9206_v31 = vcombine.low %v1075_v58, %v1083_v59  ;;  %v9268_v58 = vcombine.low %v1138_v36, %v1146_v37  ;;  %v9270_v59 = vcombine.low %v1139_v38, %v1147_v39  ;;  %v1226_v28 = vunpack.c.l.s8.bf16 %v483_v24 }
 0x37b   :  { %6327 = vmatpush1.bf16.msra.mxu0 %v9172_v50  ;;  %6491 = vmatpush1.bf16.msra.mxu1 %v9174_v51  ;;  %v1155_v50 = vunpack.c.h.s8.bf16 %v447_v44  ;;  %v1163_v51 = vunpack.c.h.s8.bf16 %v451_v45 }
 0x37c   :  { %6328 = vmatprep.subr.bf16.mxu0 %v9189_v54  ;;  %6492 = vmatprep.subr.bf16.mxu1 %v9191_v55  ;;  %v9269_v54 = vcombine.high %v1138_v36, %v1146_v37  ;;  %v9271_v55 = vcombine.high %v1139_v38, %v1147_v39  ;;  %v487_v36 = vld [vmem:[#allocation2 + $0xb18] sm:$0xff]  ;;  %v9349_v44 = vcombine.high %v1218_v27, %v1226_v28 }
 0x37d   :  { %6358 = vmatprep.mubr.bf16.mxu0 %v10118_v43  ;;  %6522 = vmatprep.mubr.bf16.mxu1 %v10118_v43  ;;  %v1130_v43 = vunpack.c.l.s8.bf16 %v435_v33  ;;  %v9287_v61 = vcombine.high %v1155_v50, %v1163_v51  ;;  %v491_v37 = vld [vmem:[#allocation2 + $0xb38] sm:$0xff] }
 0x37f   :  { %6329 = vmatpush1.bf16.msra.mxu0 %v9188_v62  ;;  %6493 = vmatpush1.bf16.msra.mxu1 %v9190_v22  ;;  %v9253_v32 = vcombine.high %v1122_v21, %v1130_v43  ;;  %v9252_v46 = vcombine.low %v1122_v21, %v1130_v43  ;;  %v1170_v62 = vunpack.c.l.s8.bf16 %v455_v56  ;;  %v1178_v22 = vunpack.c.l.s8.bf16 %v459_v57 }
 0x380   :  { %6330 = vmatprep.subr.bf16.mxu0 %v9205_v7  ;;  %6494 = vmatprep.subr.bf16.mxu1 %v9207_v52  ;;  %v9284_v7 = vcombine.low %v1154_v48, %v1162_v49  ;;  %v9286_v52 = vcombine.low %v1155_v50, %v1163_v51  ;;  %v1203_v21 = vunpack.c.h.s8.bf16 %v471_v13  ;;  %v1211_v43 = vunpack.c.h.s8.bf16 %v475_v15  ;;  %v495_v50 = vld [vmem:[#allocation2 + $0xb58] sm:$0xff] }
 0x381   :  { %v9300_v16 = vcombine.low %v1170_v62, %v1178_v22  ;;  %v1235_v48 = vunpack.c.h.s8.bf16 %v487_v36  ;;  %v1243_v49 = vunpack.c.h.s8.bf16 %v491_v37  ;;  %v499_v51 = vld [vmem:[#allocation2 + $0xb78] sm:$0xff]  ;;  %v1250_v56 = vunpack.c.l.s8.bf16 %v495_v50 }
 0x382   :  { %v9334_v39 = vcombine.low %v1203_v21, %v1211_v43  ;;  %v1258_v57 = vunpack.c.l.s8.bf16 %v499_v51 }
 0x383   :  { %6331 = vmatpush1.bf16.msra.mxu0 %v9204_v10  ;;  %6495 = vmatpush1.bf16.msra.mxu1 %v9206_v31  ;;  %v1187_v10 = vunpack.c.h.s8.bf16 %v463_v5  ;;  %v1195_v31 = vunpack.c.h.s8.bf16 %v467_v6 }
 0x384   :  { %6332 = vmatprep.subr.bf16.mxu0 %v9221_v11  ;;  %6496 = vmatprep.subr.bf16.mxu1 %v9223_v12  ;;  %v9301_v11 = vcombine.high %v1170_v62, %v1178_v22  ;;  %v9303_v12 = vcombine.high %v1171_v3, %v1179_v4  ;;  %v503_v62 = vld [vmem:[#allocation2 + $0xb98] sm:$0xff]  ;;  %v9366_v4 = vcombine.low %v1235_v48, %v1243_v49 }
 0x385   :  { %v9319_v33 = vcombine.high %v1187_v10, %v1195_v31  ;;  %v507_v22 = vld [vmem:[#allocation2 + $0xbb8] sm:$0xff]  ;;  %v9381_v5 = vcombine.high %v1250_v56, %v1258_v57 }
 0x387   :  { %6333 = vmatpush1.bf16.msra.mxu0 %v9220_v63  ;;  %6497 = vmatpush1.bf16.msra.mxu1 %v9222_v20  ;;  %v1202_v63 = vunpack.c.l.s8.bf16 %v471_v13  ;;  %v1210_v20 = vunpack.c.l.s8.bf16 %v475_v15 }
 0x388   :  { %6334 = vmatprep.subr.bf16.mxu0 %v9237_v25  ;;  %6498 = vmatprep.subr.bf16.mxu1 %v9239_v26  ;;  %v9316_v25 = vcombine.low %v1186_v8, %v1194_v9  ;;  %v9318_v26 = vcombine.low %v1187_v10, %v1195_v31  ;;  %v1267_v8 = vunpack.c.h.s8.bf16 %v503_v62  ;;  %v1275_v9 = vunpack.c.h.s8.bf16 %v507_v22  ;;  %v511_v10 = vld [vmem:[#allocation2 + $0xbd8] sm:$0xff] }
 0x389   :  { %v9332_v38 = vcombine.low %v1202_v63, %v1210_v20  ;;  %v515_v31 = vld [vmem:[#allocation2 + $0xbf8] sm:$0xff]  ;;  %v1282_v15 = vunpack.c.l.s8.bf16 %v511_v10 }
 0x38b   :  { %6335 = vmatpush1.bf16.msra.mxu0 %v9236_v29  ;;  %6499 = vmatpush1.bf16.msra.mxu1 %v9238_v30  ;;  %v1219_v29 = vunpack.c.h.s8.bf16 %v479_v23  ;;  %v1227_v30 = vunpack.c.h.s8.bf16 %v483_v24  ;;  %v9398_v24 = vcombine.low %v1267_v8, %v1275_v9 }
 0x38c   :  { %6336 = vmatprep.subr.bf16.mxu0 %v9253_v32  ;;  %6500 = vmatprep.subr.bf16.mxu1 %v9255_v34  ;;  %v9333_v32 = vcombine.high %v1202_v63, %v1210_v20  ;;  %v9335_v34 = vcombine.high %v1203_v21, %v1211_v43  ;;  %v9399_v63 = vcombine.high %v1267_v8, %v1275_v9  ;;  %v519_v20 = vld [vmem:[#allocation2 + $0xc18] sm:$0xff]  ;;  %v6794_v8 = vld [vmem:[#allocation7 + $0x30] sm:$0xff] }
 0x38d   :  { %v9351_v45 = vcombine.high %v1219_v29, %v1227_v30  ;;  %v523_v21 = vld [vmem:[#allocation2 + $0xc38] sm:$0xff] }
 0x38f   :  { %6337 = vmatpush1.bf16.msra.mxu0 %v9252_v46  ;;  %6501 = vmatpush1.bf16.msra.mxu1 %v9254_v47  ;;  %v1234_v46 = vunpack.c.l.s8.bf16 %v487_v36  ;;  %v1242_v47 = vunpack.c.l.s8.bf16 %v491_v37 }
 0x390   :  { %6338 = vmatprep.subr.bf16.mxu0 %v9269_v54  ;;  %6502 = vmatprep.subr.bf16.mxu1 %v9271_v55  ;;  %v9348_v54 = vcombine.low %v1218_v27, %v1226_v28  ;;  %v9350_v55 = vcombine.low %v1219_v29, %v1227_v30  ;;  %v1298_v27 = vunpack.c.l.s8.bf16 %v519_v20  ;;  %v1306_v28 = vunpack.c.l.s8.bf16 %v523_v21 }
 0x391   :  { %v9364_v3 = vcombine.low %v1234_v46, %v1242_v47  ;;  %v1299_v29 = vunpack.c.h.s8.bf16 %v519_v20  ;;  %v1307_v30 = vunpack.c.h.s8.bf16 %v523_v21  ;;  %v7058_v21 = vunpack.c.h.s8.bf16 %v6794_v8 }
 0x393   :  { %6339 = vmatpush1.bf16.msra.mxu0 %v9268_v58  ;;  %6503 = vmatpush1.bf16.msra.mxu1 %v9270_v59  ;;  %v1251_v58 = vunpack.c.h.s8.bf16 %v495_v50  ;;  %v1259_v59 = vunpack.c.h.s8.bf16 %v499_v51 }
 0x394   :  { %6340 = vmatprep.subr.bf16.mxu0 %v9285_v60  ;;  %6504 = vmatprep.subr.bf16.mxu1 %v9287_v61  ;;  %v9365_v60 = vcombine.high %v1234_v46, %v1242_v47  ;;  %v9367_v61 = vcombine.high %v1235_v48, %v1243_v49  ;;  %v6791_v46 = vld [vmem:[#allocation7 + $0x18] sm:$0xff]  ;;  %v10210_v47 = vld [vmem:[#allocation6] sm:$0xff]  ;;  %v9428_v48 = vcombine.low %v1298_v27, %v1306_v28 }
 0x395   :  { %v9383_v6 = vcombine.high %v1251_v58, %v1259_v59  ;;  %v9382_v13 = vcombine.low %v1251_v58, %v1259_v59  ;;  %v9430_v49 = vcombine.low %v1299_v29, %v1307_v30  ;;  %v7047_v51 = vunpack.c.l.s8.bf16 %v6791_v46  ;;  %v6790_v58 = vld [vmem:[#allocation7 + $0x10] sm:$0xff] }
 0x397   :  { %6341 = vmatpush1.bf16.msra.mxu0 %v9284_v7  ;;  %6505 = vmatpush1.bf16.msra.mxu1 %v9286_v52  ;;  %v1266_v7 = vunpack.c.l.s8.bf16 %v503_v62  ;;  %v1274_v52 = vunpack.c.l.s8.bf16 %v507_v22  ;;  %v7051_v62 = vunpack.c.h.s8.bf16 %v6791_v46  ;;  %v6793_v22 = vld [vmem:[#allocation7 + $0x28] sm:$0xff] }
 0x398   :  { %6342 = vmatprep.subr.bf16.mxu0 %v9301_v11  ;;  %6506 = vmatprep.subr.bf16.mxu1 %v9303_v12  ;;  %v6576_v11 = vlaneseq  ;;  %v9380_v12 = vcombine.low %v1250_v56, %v1258_v57  ;;  %v6788_v57 = vld [vmem:[#allocation7] sm:$0xff] }
 0x399   :  { %v9396_v23 = vcombine.low %v1266_v7, %v1274_v52 }
 0x39a   :  { %v10201_v43 = vshrl.u32 %v6576_v11, 7 }
 0x39b   :  { %6343 = vmatpush1.bf16.msra.mxu0 %v9300_v16  ;;  %6507 = vmatpush1.bf16.msra.mxu1 %v9302_v17  ;;  %v1290_v16 = vunpack.c.l.s8.bf16 %v515_v31  ;;  %v1283_v17 = vunpack.c.h.s8.bf16 %v511_v10  ;;  %v7054_v10 = vunpack.c.l.s8.bf16 %v6794_v8 }
 0x39c   :  { %6344 = vmatprep.subr.bf16.mxu0 %v9317_v18  ;;  %6508 = vmatprep.subr.bf16.mxu1 %v9319_v33  ;;  %v1291_v18 = vunpack.c.h.s8.bf16 %v515_v31  ;;  %v9397_v33 = vcombine.high %v1266_v7, %v1274_v52  ;;  %v6792_v52 = vld [vmem:[#allocation7 + $0x20] sm:$0xff]  ;;  %v7057_v31 = vunpack.c.h.s8.bf16 %v6793_v22 }
 0x39d   :  { %v9412_v36 = vcombine.low %v1282_v15, %v1290_v16  ;;  %v7052_v9 = vunpack.c.l.s8.bf16 %v6792_v52  ;;  %v7056_v20 = vunpack.c.h.s8.bf16 %v6792_v52 }
 0x39e   :  { %v9414_v37 = vcombine.low %v1283_v17, %v1291_v18 }
 0x39f   :  { %6345 = vmatpush1.bf16.msra.mxu0 %v9316_v25  ;;  %6509 = vmatpush1.bf16.msra.mxu1 %v9318_v26  ;;  %v9413_v25 = vcombine.high %v1282_v15, %v1290_v16  ;;  %v9415_v26 = vcombine.high %v1283_v17, %v1291_v18  ;;  %v6797_v15 = vld [vmem:[#allocation7 + $0x48] sm:$0xff]  ;;  %v6799_v16 = vld [vmem:[#allocation7 + $0x58] sm:$0xff] }
 0x3a0   :  { %6346 = vmatprep.subr.bf16.mxu0 %v9333_v32  ;;  %6510 = vmatprep.subr.bf16.mxu1 %v9335_v34  ;;  %v10204_v32 = vsub.s32 1, %v10201_v43  ;;  %v10206_v34 = vld [vmem:[#allocation4] sm:$0xff] }
 0x3a3   :  { %6347 = vmatpush1.bf16.msra.mxu0 %v9332_v38  ;;  %6511 = vmatpush1.bf16.msra.mxu1 %v9334_v39  ;;  %v9429_v38 = vcombine.high %v1298_v27, %v1306_v28  ;;  %v9431_v39 = vcombine.high %v1299_v29, %v1307_v30  ;;  %v6796_v27 = vld [vmem:[#allocation7 + $0x40] sm:$0xff]  ;;  %v6798_v28 = vld [vmem:[#allocation7 + $0x50] sm:$0xff] }
 0x3a4   :  { %6348 = vmatprep.subr.bf16.mxu0 %v9349_v44  ;;  %6512 = vmatprep.subr.bf16.mxu1 %v9351_v45  ;;  %v6583_v44 = vrot.slane %v10206_v34, %v10204_v32  ;;  %v6789_v45 = vld [vmem:[#allocation7 + $0x8] sm:$0xff]  ;;  %v7060_v29 = vunpack.c.l.s8.bf16 %v6796_v27  ;;  %v7062_v30 = vunpack.c.l.s8.bf16 %v6798_v28 }
 0x3a5   :  { %v7045_v50 = vunpack.c.l.s8.bf16 %v6789_v45 }
 0x3a7   :  { %6349 = vmatpush1.bf16.msra.mxu0 %v9348_v54  ;;  %6513 = vmatpush1.bf16.msra.mxu1 %v9350_v55  ;;  %v6657_v54 = vmul.f32 %v6583_v44, %v10162_v42  ;;  %v6683_v55 = vrot.slane %v10210_v47, %v10204_v32  ;;  %v7044_v42 = vunpack.c.l.s8.bf16 %v6788_v57  ;;  %v7064_v44 = vunpack.c.h.s8.bf16 %v6796_v27  ;;  %v6812_v27 = vld [vmem:[#allocation7 + $0xc0] sm:$0xff] }
 0x3a8   :  { %6350 = vmatprep.subr.bf16.mxu0 %v9365_v60  ;;  %6514 = vmatprep.subr.bf16.mxu1 %v9367_v61  ;;  %v7046_v60 = vunpack.c.l.s8.bf16 %v6790_v58  ;;  %v7049_v61 = vunpack.c.h.s8.bf16 %v6789_v45  ;;  %v7066_v45 = vunpack.c.h.s8.bf16 %v6798_v28  ;;  %v6814_v28 = vld [vmem:[#allocation7 + $0xd0] sm:$0xff] }
 0x3a9   :  { %v6757_v56 = vadd.f32 %v6683_v55, %v6657_v54 }
 0x3ab   :  { %6351 = vmatpush1.bf16.msra.mxu0 %v9364_v3  ;;  %6515 = vmatpush1.bf16.msra.mxu1 %v9366_v4  ;;  %v6773_v59 = vmax.f32 %v6757_v56, 0.0  ;;  %v6795_v3 = vld [vmem:[#allocation7 + $0x38] sm:$0xff] }
 0x3ac   :  { %6352 = vmatprep.subr.bf16.mxu0 %v9381_v5  ;;  %6516 = vmatprep.subr.bf16.mxu1 %v9383_v6  ;;  %v7050_v5 = vunpack.c.h.s8.bf16 %v6790_v58  ;;  %v7053_v6 = vunpack.c.l.s8.bf16 %v6793_v22  ;;  %v7055_v7 = vunpack.c.l.s8.bf16 %v6795_v3  ;;  %v7059_v11 = vunpack.c.h.s8.bf16 %v6795_v3  ;;  %v6807_v58 = vld [vmem:[#allocation7 + $0x98] sm:$0xff]  ;;  %v6806_v22 = vld [vmem:[#allocation7 + $0x90] sm:$0xff] }
 0x3ad   :  { %v7557_v4 = vpack.c.bf16 %v6773_v59, %v6773_v59  ;;  %v7082_v52 = vunpack.c.h.s8.bf16 %v6806_v22 }
 0x3af   :  { %6353 = vmatpush1.bf16.msra.mxu0 %v9380_v12  ;;  %6517 = vmatpush1.bf16.msra.mxu1 %v9382_v13 }
 0x3b0   :  { %6354 = vmatprep.subr.bf16.mxu0 %v9397_v33  ;;  %6518 = vmatprep.subr.bf16.mxu1 %v9399_v63 }
 0x3b3   :  { %6355 = vmatpush1.bf16.msra.mxu0 %v9396_v23  ;;  %6519 = vmatpush1.bf16.msra.mxu1 %v9398_v24 }
 0x3b4   :  { %6356 = vmatprep.subr.bf16.mxu0 %v9413_v25  ;;  %6520 = vmatprep.subr.bf16.mxu1 %v9415_v26  ;;  %v7061_v25 = vunpack.c.l.s8.bf16 %v6797_v15  ;;  %v7063_v26 = vunpack.c.l.s8.bf16 %v6799_v16 }
 0x3b7   :  { %6357 = vmatpush1.bf16.msra.mxu0 %v9412_v36  ;;  %6521 = vmatpush1.bf16.msra.mxu1 %v9414_v37  ;;  %v7065_v36 = vunpack.c.h.s8.bf16 %v6797_v15  ;;  %v7067_v37 = vunpack.c.h.s8.bf16 %v6799_v16 }
 0x3b8   :  { %6367 = vmatprep.subr.bf16.mxu0 %v9429_v38  ;;  %6531 = vmatprep.subr.bf16.mxu1 %v9431_v39  ;;  %v6801_v38 = vld [vmem:[#allocation7 + $0x68] sm:$0xff]  ;;  %v6803_v39 = vld [vmem:[#allocation7 + $0x78] sm:$0xff] }
 0x3b9   :  { %v7069_v46 = vunpack.c.l.s8.bf16 %v6801_v38  ;;  %v7073_v55 = vunpack.c.h.s8.bf16 %v6801_v38  ;;  %v7075_v56 = vunpack.c.h.s8.bf16 %v6803_v39 }
 0x3ba   :  { %6359 = vmatmul.mubr.bf16.vlgmr.msra.gmra.mrb[12].mxu0 %v10126_v14  ;;  %6523 = vmatmul.mubr.bf16.vlgmr.msra.gmra.mrb[12].mxu1 %v10126_v14  ;;  %v9723_v14 = vld [vmem:[%s10359_s0 + $0x18] ss:$0 sps:$4 sm:$0xff]  }
 0x3bb   :  { %6368 = vmatpush1.bf16.msra.mxu0 %v9428_v48  ;;  %6532 = vmatpush1.bf16.msra.mxu1 %v9430_v49  ;;  %v7071_v48 = vunpack.c.l.s8.bf16 %v6803_v39  ;;  %v6800_v49 = vld [vmem:[#allocation7 + $0x60] sm:$0xff] }
 0x3bc   :  { %6399 = vmatprep.mubr.bf16.mxu0 %v9926_v19  ;;  %6563 = vmatprep.mubr.bf16.mxu1 %v9926_v19  ;;  %v7048_v19 = vunpack.c.h.s8.bf16 %v6788_v57  ;;  %v6805_v57 = vld [vmem:[#allocation7 + $0x88] sm:$0xff]  ;;  %v7072_v59 = vunpack.c.h.s8.bf16 %v6800_v49 }
 0x3bd   :  { %7572 = vmatprep.subr.bf16.mxu0 %v7045_v50  ;;  %7900 = vmatprep.subr.bf16.mxu1 %v7047_v51  ;;  %v6802_v50 = vld [vmem:[#allocation7 + $0x70] sm:$0xff]  ;;  %v7068_v51 = vunpack.c.l.s8.bf16 %v6800_v49  ;;  %v7098_v49 = vunpack.c.h.s8.bf16 %v6814_v28 }
 0x3be   :  { %v7070_v54 = vunpack.c.l.s8.bf16 %v6802_v50 }
 0x3c6   :  { %9438 = vmatmul.mubr.msk.bf16.vlgmr.msra.gmra.mrb[12].mxu0 %vm5256_vm0, %v9723_v14  ;;  %9439 = vmatmul.mubr.msk.bf16.vlgmr.msra.gmra.mrb[12].mxu1 %vm5256_vm0, %v9723_v14  ;;  %v7081_v14 = vunpack.c.h.s8.bf16 %v6805_v57 }
 0x3c7   :  { %7573 = vmatpush1.bf16.msra.mxu0 %v7044_v42  ;;  %7901 = vmatpush1.bf16.msra.mxu1 %v7046_v60  ;;  %v7074_v42 = vunpack.c.h.s8.bf16 %v6802_v50  ;;  %v7077_v60 = vunpack.c.l.s8.bf16 %v6805_v57  ;;  %v6818_v57 = vld [vmem:[#allocation7 + $0xf0] sm:$0xff] }
 0x3c8   :  { %7604 = vmatprep.mubr.bf16.mxu0 %v7557_v4  ;;  %7932 = vmatprep.mubr.bf16.mxu1 %v7557_v4  ;;  %v7078_v4 = vunpack.c.l.s8.bf16 %v6806_v22 }
 0x3c9   :  { %7574 = vmatprep.subr.bf16.mxu0 %v7049_v61  ;;  %7902 = vmatprep.subr.bf16.mxu1 %v7051_v62  ;;  %v7079_v61 = vunpack.c.l.s8.bf16 %v6807_v58  ;;  %v6804_v62 = vld [vmem:[#allocation7 + $0x80] sm:$0xff] }
 0x3ca   :  { %v7076_v3 = vunpack.c.l.s8.bf16 %v6804_v62 }
 0x3cb   :  { %7575 = vmatpush1.bf16.msra.mxu0 %v7048_v19  ;;  %7903 = vmatpush1.bf16.msra.mxu1 %v7050_v5  ;;  %v7083_v19 = vunpack.c.h.s8.bf16 %v6807_v58  ;;  %v6809_v5 = vld [vmem:[#allocation7 + $0xa8] sm:$0xff] }
 0x3cc   :  { %7576 = vmatprep.subr.bf16.mxu0 %v7053_v6  ;;  %7904 = vmatprep.subr.bf16.mxu1 %v7055_v7  ;;  %v6811_v6 = vld [vmem:[#allocation7 + $0xb8] sm:$0xff]  ;;  %v7080_v7 = vunpack.c.h.s8.bf16 %v6804_v62  ;;  %v7085_v8 = vunpack.c.l.s8.bf16 %v6809_v5  ;;  %v7089_v16 = vunpack.c.h.s8.bf16 %v6809_v5 }
 0x3cd   :  { %v10224_v12 = vpop.f32.mrb[8].mxu0  ;;  %v10226_v13 = vpop.f32.mrb[8].mxu1 }
 0x3ce   :  { %v10228_v17 = vpop.f32.mrb[9].mxu0  ;;  %v10230_v18 = vpop.f32.mrb[9].mxu1 }
 0x3cf   :  { %7577 = vmatpush1.bf16.msra.mxu0 %v7052_v9  ;;  %7905 = vmatpush1.bf16.msra.mxu1 %v7054_v10  ;;  %v6077_v33 = vpop.f32.mrb[10].mxu0  ;;  %v6241_v63 = vpop.f32.mrb[10].mxu1  ;;  %v7087_v9 = vunpack.c.l.s8.bf16 %v6811_v6  ;;  %v6808_v10 = vld [vmem:[#allocation7 + $0xa0] sm:$0xff] }
 0x3d0   :  { %v6078_v23 = vpop.f32.mrb[11].mxu0  ;;  %v6242_v24 = vpop.f32.mrb[11].mxu1  ;;  %7578 = vmatprep.subr.bf16.mxu0 %v7057_v31  ;;  %7906 = vmatprep.subr.bf16.mxu1 %v7059_v11  ;;  %v6810_v31 = vld [vmem:[#allocation7 + $0xb0] sm:$0xff]  ;;  %v7084_v11 = vunpack.c.l.s8.bf16 %v6808_v10  ;;  %v7091_v33 = vunpack.c.h.s8.bf16 %v6811_v6  ;;  %v6813_v63 = vld [vmem:[#allocation7 + $0xc8] sm:$0xff] }
 0x3d1   :  { %v7086_v15 = vunpack.c.l.s8.bf16 %v6810_v31  ;;  %v7090_v23 = vunpack.c.h.s8.bf16 %v6810_v31  ;;  %v10233_v24 = vsub.s32 0, %v10201_v43  ;;  %v7097_v38 = vunpack.c.h.s8.bf16 %v6813_v63 }
 0x3d3   :  { %7579 = vmatpush1.bf16.msra.mxu0 %v7056_v20  ;;  %7907 = vmatpush1.bf16.msra.mxu1 %v7058_v21  ;;  %v6815_v20 = vld [vmem:[#allocation7 + $0xd8] sm:$0xff]  ;;  %v7088_v21 = vunpack.c.h.s8.bf16 %v6808_v10 }
 0x3d4   :  { %7580 = vmatprep.subr.bf16.mxu0 %v7061_v25  ;;  %7908 = vmatprep.subr.bf16.mxu1 %v7063_v26  ;;  %v7093_v25 = vunpack.c.l.s8.bf16 %v6813_v63  ;;  %v7095_v26 = vunpack.c.l.s8.bf16 %v6815_v20  ;;  %v7099_v39 = vunpack.c.h.s8.bf16 %v6815_v20  ;;  %v6827_v63 = vld [vmem:[#allocation7 + $0x138] sm:$0xff] }
 0x3d7   :  { %7581 = vmatpush1.bf16.msra.mxu0 %v7060_v29  ;;  %7909 = vmatpush1.bf16.msra.mxu1 %v7062_v30  ;;  %v10236_v29 = vsub.s32 3, %v10201_v43  ;;  %v7092_v30 = vunpack.c.l.s8.bf16 %v6812_v27 }
 0x3d8   :  { %7582 = vmatprep.subr.bf16.mxu0 %v7065_v36  ;;  %7910 = vmatprep.subr.bf16.mxu1 %v7067_v37  ;;  %v7094_v36 = vunpack.c.l.s8.bf16 %v6814_v28  ;;  %v6579_v37 = vrot.slane %v10206_v34, %v10233_v24 }
 0x3da   :  { %v6656_v50 = vmul.f32 %v6579_v37, %v10158_v40  ;;  %v7123_v37 = vunpack.c.h.s8.bf16 %v6827_v63 }
 0x3db   :  { %7583 = vmatpush1.bf16.msra.mxu0 %v7064_v44  ;;  %7911 = vmatpush1.bf16.msra.mxu1 %v7066_v45  ;;  %v6591_v44 = vrot.slane %v10206_v34, %v10236_v29  ;;  %v6817_v45 = vld [vmem:[#allocation7 + $0xe8] sm:$0xff] }
 0x3dc   :  { %7584 = vmatprep.subr.bf16.mxu0 %v7069_v46  ;;  %7912 = vmatprep.subr.bf16.mxu1 %v7071_v48  ;;  %v6819_v46 = vld [vmem:[#allocation7 + $0xf8] sm:$0xff]  ;;  %v7096_v48 = vunpack.c.h.s8.bf16 %v6812_v27  ;;  %v7105_v40 = vunpack.c.h.s8.bf16 %v6817_v45  ;;  %v6826_v27 = vld [vmem:[#allocation7 + $0x130] sm:$0xff] }
 0x3dd   :  { %v6659_v58 = vmul.f32 %v6591_v44, %v10164_v53  ;;  %v7107_v62 = vunpack.c.h.s8.bf16 %v6819_v46 }
 0x3df   :  { %7585 = vmatpush1.bf16.msra.mxu0 %v7068_v51  ;;  %7913 = vmatpush1.bf16.msra.mxu1 %v7070_v54  ;;  %v6679_v51 = vrot.slane %v10210_v47, %v10233_v24  ;;  %v7101_v54 = vunpack.c.l.s8.bf16 %v6817_v45  ;;  %v7122_v45 = vunpack.c.h.s8.bf16 %v6826_v27 }
 0x3e0   :  { %7586 = vmatprep.subr.bf16.mxu0 %v7073_v55  ;;  %7914 = vmatprep.subr.bf16.mxu1 %v7075_v56  ;;  %v7103_v55 = vunpack.c.l.s8.bf16 %v6819_v46  ;;  %v6816_v56 = vld [vmem:[#allocation7 + $0xe0] sm:$0xff] }
 0x3e3   :  { %7587 = vmatpush1.bf16.msra.mxu0 %v7072_v59  ;;  %7915 = vmatpush1.bf16.msra.mxu1 %v7074_v42  ;;  %v6691_v59 = vrot.slane %v10210_v47, %v10236_v29  ;;  %v7100_v42 = vunpack.c.l.s8.bf16 %v6816_v56 }
 0x3e4   :  { %7588 = vmatprep.subr.bf16.mxu0 %v7077_v60  ;;  %7916 = vmatprep.subr.bf16.mxu1 %v7079_v61  ;;  %v7102_v60 = vunpack.c.l.s8.bf16 %v6818_v57  ;;  %v6756_v61 = vadd.f32 %v6679_v51, %v6656_v50  ;;  %v6830_v50 = vld [vmem:[#allocation7 + $0x150] sm:$0xff] }
 0x3e5   :  { %v6759_v22 = vadd.f32 %v6691_v59, %v6659_v58  ;;  %v6835_v58 = vld [vmem:[#allocation7 + $0x178] sm:$0xff] }
 0x3e6   :  { %v6772_v53 = vmax.f32 %v6756_v61, 0.0  ;;  %v6832_v61 = vld [vmem:[#allocation7 + $0x160] sm:$0xff] }
 0x3e7   :  { %7589 = vmatpush1.bf16.msra.mxu0 %v7076_v3  ;;  %7917 = vmatpush1.bf16.msra.mxu1 %v7078_v4  ;;  %v6821_v3 = vld [vmem:[#allocation7 + $0x108] sm:$0xff]  ;;  %v6823_v4 = vld [vmem:[#allocation7 + $0x118] sm:$0xff] }
 0x3e8   :  { %7590 = vmatprep.subr.bf16.mxu0 %v7081_v14  ;;  %7918 = vmatprep.subr.bf16.mxu1 %v7083_v19  ;;  %v7104_v14 = vunpack.c.h.s8.bf16 %v6816_v56  ;;  %v7106_v19 = vunpack.c.h.s8.bf16 %v6818_v57  ;;  %v7109_v5 = vunpack.c.l.s8.bf16 %v6821_v3  ;;  %v7111_v6 = vunpack.c.l.s8.bf16 %v6823_v4  ;;  %v6833_v57 = vld [vmem:[#allocation7 + $0x168] sm:$0xff] }
 0x3e9   :  { %v7556_v10 = vpack.c.bf16 %v6772_v53, %v6772_v53  ;;  %v6839_v53 = vld [vmem:[#allocation7 + $0x198] sm:$0xff] }
 0x3eb   :  { %7591 = vmatpush1.bf16.msra.mxu0 %v7080_v7  ;;  %7919 = vmatpush1.bf16.msra.mxu1 %v7082_v52  ;;  %v6820_v7 = vld [vmem:[#allocation7 + $0x100] sm:$0xff]  ;;  %v6775_v52 = vmax.f32 %v6759_v22, 0.0  ;;  %v7132_v22 = vunpack.c.l.s8.bf16 %v6832_v61 }
 0x3ec   :  { %7592 = vmatprep.subr.bf16.mxu0 %v7085_v8  ;;  %7920 = vmatprep.subr.bf16.mxu1 %v7087_v9  ;;  %v6822_v8 = vld [vmem:[#allocation7 + $0x110] sm:$0xff]  ;;  %v7108_v9 = vunpack.c.l.s8.bf16 %v6820_v7  ;;  %v7112_v20 = vunpack.c.h.s8.bf16 %v6820_v7 }
 0x3ed   :  { %v7110_v31 = vunpack.c.l.s8.bf16 %v6822_v8 }
 0x3ef   :  { %7593 = vmatpush1.bf16.msra.mxu0 %v7084_v11  ;;  %7921 = vmatpush1.bf16.msra.mxu1 %v7086_v15  ;;  %v7559_v11 = vpack.c.bf16 %v6775_v52, %v6775_v52  ;;  %v7113_v15 = vunpack.c.h.s8.bf16 %v6821_v3  ;;  %v6836_v52 = vld [vmem:[#allocation7 + $0x180] sm:$0xff] }
 0x3f0   :  { %7594 = vmatprep.subr.bf16.mxu0 %v7089_v16  ;;  %7922 = vmatprep.subr.bf16.mxu1 %v7091_v33  ;;  %v7115_v16 = vunpack.c.h.s8.bf16 %v6823_v4  ;;  %v6825_v33 = vld [vmem:[#allocation7 + $0x128] sm:$0xff]  ;;  %v7137_v4 = vunpack.c.h.s8.bf16 %v6833_v57 }
 0x3f3   :  { %7595 = vmatpush1.bf16.msra.mxu0 %v7088_v21  ;;  %7923 = vmatpush1.bf16.msra.mxu1 %v7090_v23  ;;  %v7114_v21 = vunpack.c.h.s8.bf16 %v6822_v8  ;;  %v7117_v23 = vunpack.c.l.s8.bf16 %v6825_v33  ;;  %v7143_v8 = vunpack.c.l.s8.bf16 %v6839_v53 }
 0x3f4   :  { %7596 = vmatprep.subr.bf16.mxu0 %v7093_v25  ;;  %7924 = vmatprep.subr.bf16.mxu1 %v7095_v26  ;;  %v6824_v25 = vld [vmem:[#allocation7 + $0x120] sm:$0xff]  ;;  %v7119_v26 = vunpack.c.l.s8.bf16 %v6827_v63  ;;  %v7144_v63 = vunpack.c.h.s8.bf16 %v6836_v52 }
 0x3f5   :  { %v7116_v28 = vunpack.c.l.s8.bf16 %v6824_v25  ;;  %v7120_v44 = vunpack.c.h.s8.bf16 %v6824_v25 }
 0x3f7   :  { %7597 = vmatpush1.bf16.msra.mxu0 %v7092_v30  ;;  %7925 = vmatpush1.bf16.msra.mxu1 %v7094_v36  ;;  %v7118_v30 = vunpack.c.l.s8.bf16 %v6826_v27  ;;  %v7121_v36 = vunpack.c.h.s8.bf16 %v6825_v33  ;;  %v6843_v33 = vld [vmem:[#allocation7 + $0x1b8] sm:$0xff] }
 0x3f8   :  { %7598 = vmatprep.subr.bf16.mxu0 %v7097_v38  ;;  %7926 = vmatprep.subr.bf16.mxu1 %v7099_v39  ;;  %v6829_v38 = vld [vmem:[#allocation7 + $0x148] sm:$0xff]  ;;  %v6831_v39 = vld [vmem:[#allocation7 + $0x158] sm:$0xff]  ;;  %v7151_v25 = vunpack.c.l.s8.bf16 %v6843_v33 }
 0x3f9   :  { %v7125_v46 = vunpack.c.l.s8.bf16 %v6829_v38  ;;  %v7131_v56 = vunpack.c.h.s8.bf16 %v6831_v39 }
 0x3fb   :  { %7599 = vmatpush1.bf16.msra.mxu0 %v7096_v48  ;;  %7927 = vmatpush1.bf16.msra.mxu1 %v7098_v49  ;;  %v6828_v48 = vld [vmem:[#allocation7 + $0x140] sm:$0xff]  ;;  %v7127_v49 = vunpack.c.l.s8.bf16 %v6831_v39 }
 0x3fc   :  { %7600 = vmatprep.subr.bf16.mxu0 %v7101_v54  ;;  %7928 = vmatprep.subr.bf16.mxu1 %v7103_v55  ;;  %v7124_v51 = vunpack.c.l.s8.bf16 %v6828_v48  ;;  %v7126_v54 = vunpack.c.l.s8.bf16 %v6830_v50  ;;  %v7129_v55 = vunpack.c.h.s8.bf16 %v6829_v38  ;;  %v7128_v59 = vunpack.c.h.s8.bf16 %v6828_v48  ;;  %v6847_v38 = vld [vmem:[#allocation7 + $0x1d8] sm:$0xff]  ;;  %v6844_v48 = vld [vmem:[#allocation7 + $0x1c0] sm:$0xff] }
 0x3ff   :  { %7601 = vmatpush1.bf16.msra.mxu0 %v7100_v42  ;;  %7929 = vmatpush1.bf16.msra.mxu1 %v7102_v60  ;;  %v7130_v42 = vunpack.c.h.s8.bf16 %v6830_v50  ;;  %v7133_v60 = vunpack.c.l.s8.bf16 %v6833_v57  ;;  %v6846_v50 = vld [vmem:[#allocation7 + $0x1d0] sm:$0xff] }
 0x400   :  { %7602 = vmatprep.subr.bf16.mxu0 %v7105_v40  ;;  %7930 = vmatprep.subr.bf16.mxu1 %v7107_v62  ;;  %v7135_v40 = vunpack.c.l.s8.bf16 %v6835_v58  ;;  %v6834_v62 = vld [vmem:[#allocation7 + $0x170] sm:$0xff] }
 0x401   :  { %v7134_v3 = vunpack.c.l.s8.bf16 %v6834_v62 }
 0x403   :  { %7603 = vmatpush1.bf16.msra.mxu0 %v7104_v14  ;;  %7931 = vmatpush1.bf16.msra.mxu1 %v7106_v19  ;;  %v7139_v14 = vunpack.c.h.s8.bf16 %v6835_v58  ;;  %v6837_v19 = vld [vmem:[#allocation7 + $0x188] sm:$0xff]  ;;  %v7163_v58 = vunpack.c.h.s8.bf16 %v6847_v38 }
 0x404   :  { %7613 = vmatprep.subr.bf16.mxu0 %v7109_v5  ;;  %7941 = vmatprep.subr.bf16.mxu1 %v7111_v6  ;;  %v7136_v5 = vunpack.c.h.s8.bf16 %v6832_v61  ;;  %v7138_v6 = vunpack.c.h.s8.bf16 %v6834_v62  ;;  %v7141_v7 = vunpack.c.l.s8.bf16 %v6837_v19  ;;  %v7160_v61 = vunpack.c.h.s8.bf16 %v6844_v48 }
 0x406   :  { %7605 = vmatmul.mubr.bf16.vlgmr.msra.gmra.mrb[16].mxu0 %v7556_v10  ;;  %7933 = vmatmul.mubr.bf16.vlgmr.msra.gmra.mrb[16].mxu1 %v7556_v10  ;;  %v7140_v10 = vunpack.c.l.s8.bf16 %v6836_v52 }
 0x407   :  { %7614 = vmatpush1.bf16.msra.mxu0 %v7108_v9  ;;  %7645 = vmatprep.mubr.bf16.mxu0 %v7559_v11  ;;  %v6838_v9 = vld [vmem:[#allocation7 + $0x190] sm:$0xff] }
 0x408   :  { %7942 = vmatpush1.bf16.msra.mxu1 %v7110_v31  ;;  %7973 = vmatprep.mubr.bf16.mxu1 %v7559_v11  ;;  %v7142_v31 = vunpack.c.l.s8.bf16 %v6838_v9  ;;  %v7145_v11 = vunpack.c.h.s8.bf16 %v6837_v19  ;;  %v6850_v19 = vld [vmem:[#allocation7 + $0x1f0] sm:$0xff] }
 0x409   :  { %7615 = vmatprep.subr.bf16.mxu0 %v7113_v15  ;;  %7943 = vmatprep.subr.bf16.mxu1 %v7115_v16  ;;  %v7147_v15 = vunpack.c.h.s8.bf16 %v6839_v53  ;;  %v6841_v16 = vld [vmem:[#allocation7 + $0x1a8] sm:$0xff] }
 0x40b   :  { %7616 = vmatpush1.bf16.msra.mxu0 %v7112_v20  ;;  %v7146_v20 = vunpack.c.h.s8.bf16 %v6838_v9 }
 0x40c   :  { %7944 = vmatpush1.bf16.msra.mxu1 %v7114_v21  ;;  %7617 = vmatprep.subr.bf16.mxu0 %v7117_v23  ;;  %v7149_v21 = vunpack.c.l.s8.bf16 %v6841_v16  ;;  %v6840_v23 = vld [vmem:[#allocation7 + $0x1a0] sm:$0xff] }
 0x40d   :  { %7945 = vmatprep.subr.bf16.mxu1 %v7119_v26  ;;  %v6842_v26 = vld [vmem:[#allocation7 + $0x1b0] sm:$0xff]  ;;  %v7148_v27 = vunpack.c.l.s8.bf16 %v6840_v23  ;;  %v7152_v39 = vunpack.c.h.s8.bf16 %v6840_v23 }
 0x40f   :  { %7618 = vmatpush1.bf16.msra.mxu0 %v7116_v28  ;;  %v7150_v28 = vunpack.c.l.s8.bf16 %v6842_v26 }
 0x410   :  { %7946 = vmatpush1.bf16.msra.mxu1 %v7118_v30  ;;  %7619 = vmatprep.subr.bf16.mxu0 %v7121_v36  ;;  %v7153_v30 = vunpack.c.h.s8.bf16 %v6841_v16  ;;  %v7155_v36 = vunpack.c.h.s8.bf16 %v6843_v33  ;;  %v6854_v33 = vld [vmem:[#allocation7 + $0x210] sm:$0xff] }
 0x411   :  { %7947 = vmatprep.subr.bf16.mxu1 %v7123_v37  ;;  %v6845_v37 = vld [vmem:[#allocation7 + $0x1c8] sm:$0xff]  ;;  %v7174_v23 = vunpack.c.l.s8.bf16 %v6854_v33 }
 0x412   :  { %v7161_v57 = vunpack.c.h.s8.bf16 %v6845_v37 }
 0x413   :  { %7620 = vmatpush1.bf16.msra.mxu0 %v7120_v44  ;;  %v10249_v44 = vsub.s32 2, %v10201_v43 }
 0x414   :  { %7948 = vmatpush1.bf16.msra.mxu1 %v7122_v45  ;;  %7621 = vmatprep.subr.bf16.mxu0 %v7125_v46  ;;  %v7154_v45 = vunpack.c.h.s8.bf16 %v6842_v26  ;;  %v7157_v46 = vunpack.c.l.s8.bf16 %v6845_v37  ;;  %v6857_v26 = vld [vmem:[#allocation7 + $0x228] sm:$0xff]  ;;  %v7178_v37 = vunpack.c.h.s8.bf16 %v6854_v33  ;;  %v6870_v33 = vld [vmem:[#allocation7 + $0x290] sm:$0xff] }
 0x415   :  { %7949 = vmatprep.subr.bf16.mxu1 %v7127_v49  ;;  %v7159_v49 = vunpack.c.l.s8.bf16 %v6847_v38  ;;  %v6687_v62 = vrot.slane %v10210_v47, %v10249_v44  ;;  %v7181_v38 = vunpack.c.l.s8.bf16 %v6857_v26 }
 0x417   :  { %7622 = vmatpush1.bf16.msra.mxu0 %v7124_v51  ;;  %v10252_v51 = vsub.s32 5, %v10201_v43 }
 0x418   :  { %7950 = vmatpush1.bf16.msra.mxu1 %v7126_v54  ;;  %7623 = vmatprep.subr.bf16.mxu0 %v7129_v55  ;;  %v7156_v54 = vunpack.c.l.s8.bf16 %v6844_v48  ;;  %v6587_v55 = vrot.slane %v10206_v34, %v10249_v44 }
 0x419   :  { %7951 = vmatprep.subr.bf16.mxu1 %v7131_v56  ;;  %v7158_v56 = vunpack.c.l.s8.bf16 %v6846_v50 }
 0x41b   :  { %7624 = vmatpush1.bf16.msra.mxu0 %v7128_v59  ;;  %v6849_v59 = vld [vmem:[#allocation7 + $0x1e8] sm:$0xff] }
 0x41c   :  { %7952 = vmatpush1.bf16.msra.mxu1 %v7130_v42  ;;  %7625 = vmatprep.subr.bf16.mxu0 %v7133_v60  ;;  %v6599_v42 = vrot.slane %v10206_v34, %v10252_v51  ;;  %v6851_v60 = vld [vmem:[#allocation7 + $0x1f8] sm:$0xff]  ;;  %v6699_v34 = vrot.slane %v10210_v47, %v10252_v51  ;;  %v6852_v47 = vld [vmem:[#allocation7 + $0x200] sm:$0xff] }
 0x41d   :  { %7953 = vmatprep.subr.bf16.mxu1 %v7135_v40  ;;  %v6658_v40 = vmul.f32 %v6587_v55, %v10160_v41  ;;  %v7166_v41 = vunpack.c.l.s8.bf16 %v6850_v19  ;;  %v7171_v52 = vunpack.c.h.s8.bf16 %v6851_v60  ;;  %v6861_v55 = vld [vmem:[#allocation7 + $0x248] sm:$0xff] }
 0x41e   :  { %v6661_v53 = vmul.f32 %v6599_v42, %v10189_v2  ;;  %v7170_v2 = vunpack.c.h.s8.bf16 %v6850_v19  ;;  %v6860_v42 = vld [vmem:[#allocation7 + $0x240] sm:$0xff] }
 0x41f   :  { %7626 = vmatpush1.bf16.msra.mxu0 %v7132_v22  ;;  %v7162_v22 = vunpack.c.h.s8.bf16 %v6846_v50  ;;  %v7185_v50 = vunpack.c.h.s8.bf16 %v6857_v26  ;;  %v7192_v19 = vunpack.c.h.s8.bf16 %v6860_v42  ;;  %v6875_v26 = vld [vmem:[#allocation7 + $0x2b8] sm:$0xff] }
 0x420   :  { %7954 = vmatpush1.bf16.msra.mxu1 %v7134_v3  ;;  %7627 = vmatprep.subr.bf16.mxu0 %v7137_v4  ;;  %v7165_v3 = vunpack.c.l.s8.bf16 %v6849_v59  ;;  %v6848_v4 = vld [vmem:[#allocation7 + $0x1e0] sm:$0xff]  ;;  %v6761_v9 = vadd.f32 %v6699_v34, %v6661_v53 }
 0x421   :  { %7955 = vmatprep.subr.bf16.mxu1 %v7139_v14  ;;  %v7167_v14 = vunpack.c.l.s8.bf16 %v6851_v60 }
 0x423   :  { %7628 = vmatpush1.bf16.msra.mxu0 %v7136_v5  ;;  %v7164_v5 = vunpack.c.l.s8.bf16 %v6848_v4 }
 0x424   :  { %7956 = vmatpush1.bf16.msra.mxu1 %v7138_v6  ;;  %7629 = vmatprep.subr.bf16.mxu0 %v7141_v7  ;;  %v6758_v6 = vadd.f32 %v6687_v62, %v6658_v40  ;;  %v7169_v7 = vunpack.c.h.s8.bf16 %v6849_v59  ;;  %v7189_v59 = vunpack.c.l.s8.bf16 %v6861_v55  ;;  %v7188_v40 = vunpack.c.l.s8.bf16 %v6860_v42  ;;  %v6878_v42 = vld [vmem:[#allocation7 + $0x2d0] sm:$0xff] }
 0x425   :  { %7957 = vmatprep.subr.bf16.mxu1 %v7143_v8  ;;  %v6853_v8 = vld [vmem:[#allocation7 + $0x208] sm:$0xff] }
 0x427   :  { %7630 = vmatpush1.bf16.msra.mxu0 %v7140_v10  ;;  %v6855_v10 = vld [vmem:[#allocation7 + $0x218] sm:$0xff] }
 0x428   :  { %7958 = vmatpush1.bf16.msra.mxu1 %v7142_v31  ;;  %7631 = vmatprep.subr.bf16.mxu0 %v7145_v11  ;;  %v7168_v31 = vunpack.c.h.s8.bf16 %v6848_v4  ;;  %v6774_v11 = vmax.f32 %v6758_v6, 0.0  ;;  %v7175_v16 = vunpack.c.l.s8.bf16 %v6855_v10  ;;  %v6865_v4 = vld [vmem:[#allocation7 + $0x268] sm:$0xff] }
 0x429   :  { %7959 = vmatprep.subr.bf16.mxu1 %v7147_v15  ;;  %v7173_v15 = vunpack.c.l.s8.bf16 %v6853_v8  ;;  %v7197_v34 = vunpack.c.l.s8.bf16 %v6865_v4 }
 0x42b   :  { %7632 = vmatpush1.bf16.msra.mxu0 %v7144_v63  ;;  %v6777_v63 = vmax.f32 %v6761_v9, 0.0 }
 0x42c   :  { %7960 = vmatpush1.bf16.msra.mxu1 %v7146_v20  ;;  %7633 = vmatprep.subr.bf16.mxu0 %v7149_v21  ;;  %v7172_v20 = vunpack.c.l.s8.bf16 %v6852_v47  ;;  %v7558_v21 = vpack.c.bf16 %v6774_v11, %v6774_v11 }
 0x42d   :  { %7961 = vmatprep.subr.bf16.mxu1 %v7151_v25  ;;  %v7177_v25 = vunpack.c.h.s8.bf16 %v6853_v8  ;;  %v7201_v8 = vunpack.c.h.s8.bf16 %v6865_v4 }
 0x42f   :  { %7634 = vmatpush1.bf16.msra.mxu0 %v7148_v27  ;;  %v7561_v27 = vpack.c.bf16 %v6777_v63, %v6777_v63 }
 0x430   :  { %7962 = vmatpush1.bf16.msra.mxu1 %v7150_v28  ;;  %7635 = vmatprep.subr.bf16.mxu0 %v7153_v30  ;;  %v7179_v28 = vunpack.c.h.s8.bf16 %v6855_v10  ;;  %v6859_v30 = vld [vmem:[#allocation7 + $0x238] sm:$0xff]  ;;  %v6869_v10 = vld [vmem:[#allocation7 + $0x288] sm:$0xff] }
 0x431   :  { %7963 = vmatprep.subr.bf16.mxu1 %v7155_v36  ;;  %v7176_v36 = vunpack.c.h.s8.bf16 %v6852_v47  ;;  %v6868_v47 = vld [vmem:[#allocation7 + $0x280] sm:$0xff] }
 0x432   :  { %v7204_v63 = vunpack.c.l.s8.bf16 %v6868_v47 }
 0x433   :  { %7636 = vmatpush1.bf16.msra.mxu0 %v7152_v39  ;;  %v6856_v39 = vld [vmem:[#allocation7 + $0x220] sm:$0xff] }
 0x434   :  { %7964 = vmatpush1.bf16.msra.mxu1 %v7154_v45  ;;  %7637 = vmatprep.subr.bf16.mxu0 %v7157_v46  ;;  %v7183_v45 = vunpack.c.l.s8.bf16 %v6859_v30  ;;  %v6858_v46 = vld [vmem:[#allocation7 + $0x230] sm:$0xff]  ;;  %v7180_v48 = vunpack.c.l.s8.bf16 %v6856_v39 }
 0x435   :  { %7965 = vmatprep.subr.bf16.mxu1 %v7159_v49  ;;  %v7182_v49 = vunpack.c.l.s8.bf16 %v6858_v46 }
 0x437   :  { %7638 = vmatpush1.bf16.msra.mxu0 %v7156_v54  ;;  %v7187_v54 = vunpack.c.h.s8.bf16 %v6859_v30 }
 0x438   :  { %7966 = vmatpush1.bf16.msra.mxu1 %v7158_v56  ;;  %7639 = vmatprep.subr.bf16.mxu0 %v7161_v57  ;;  %v6863_v56 = vld [vmem:[#allocation7 + $0x258] sm:$0xff]  ;;  %v7184_v57 = vunpack.c.h.s8.bf16 %v6856_v39 }
 0x439   :  { %7967 = vmatprep.subr.bf16.mxu1 %v7163_v58  ;;  %v7186_v58 = vunpack.c.h.s8.bf16 %v6858_v46  ;;  %v7191_v60 = vunpack.c.l.s8.bf16 %v6863_v56 }
 0x43b   :  { %7640 = vmatpush1.bf16.msra.mxu0 %v7160_v61  ;;  %v6862_v61 = vld [vmem:[#allocation7 + $0x250] sm:$0xff] }
 0x43c   :  { %7968 = vmatpush1.bf16.msra.mxu1 %v7162_v22  ;;  %7641 = vmatprep.subr.bf16.mxu0 %v7165_v3  ;;  %v7190_v62 = vunpack.c.l.s8.bf16 %v6862_v61  ;;  %v7193_v22 = vunpack.c.h.s8.bf16 %v6861_v55  ;;  %v7195_v3 = vunpack.c.h.s8.bf16 %v6863_v56  ;;  %v7194_v53 = vunpack.c.h.s8.bf16 %v6862_v61 }
 0x43d   :  { %7969 = vmatprep.subr.bf16.mxu1 %v7167_v14  ;;  %v6867_v14 = vld [vmem:[#allocation7 + $0x278] sm:$0xff]  ;;  %v10265_v55 = vsub.s32 4, %v10201_v43 }
 0x43e   :  { %v7199_v6 = vunpack.c.l.s8.bf16 %v6867_v14  ;;  %v7203_v9 = vunpack.c.h.s8.bf16 %v6867_v14  ;;  %v6881_v14 = vld [vmem:[#allocation7 + $0x2e8] sm:$0xff] }
 0x43f   :  { %7642 = vmatpush1.bf16.msra.mxu0 %v7164_v5  ;;  %v6864_v5 = vld [vmem:[#allocation7 + $0x260] sm:$0xff] }
 0x440   :  { %7970 = vmatpush1.bf16.msra.mxu1 %v7166_v41  ;;  %7643 = vmatprep.subr.bf16.mxu0 %v7169_v7  ;;  %v6866_v41 = vld [vmem:[#allocation7 + $0x270] sm:$0xff]  ;;  %v7196_v7 = vunpack.c.l.s8.bf16 %v6864_v5  ;;  %v7200_v11 = vunpack.c.h.s8.bf16 %v6864_v5 }
 0x441   :  { %7971 = vmatprep.subr.bf16.mxu1 %v7171_v52  ;;  %v7198_v52 = vunpack.c.l.s8.bf16 %v6866_v41 }
 0x443   :  { %7644 = vmatpush1.bf16.msra.mxu0 %v7168_v31  ;;  %v6871_v31 = vld [vmem:[#allocation7 + $0x298] sm:$0xff] }
 0x444   :  { %7972 = vmatpush1.bf16.msra.mxu1 %v7170_v2  ;;  %7654 = vmatprep.subr.bf16.mxu0 %v7173_v15  ;;  %v7202_v2 = vunpack.c.h.s8.bf16 %v6866_v41  ;;  %v7205_v15 = vunpack.c.l.s8.bf16 %v6869_v10 }
 0x445   :  { %7982 = vmatprep.subr.bf16.mxu1 %v7175_v16  ;;  %v7207_v16 = vunpack.c.l.s8.bf16 %v6871_v31 }
 0x446   :  { %7646 = vmatmul.mubr.bf16.vlgmr.msra.gmra.mrb[16].mxu0 %v7558_v21 }
 0x447   :  { %7974 = vmatmul.mubr.bf16.vlgmr.msra.gmra.mrb[16].mxu1 %v7558_v21  ;;  %7655 = vmatpush1.bf16.msra.mxu0 %v7172_v20  ;;  %v7206_v20 = vunpack.c.l.s8.bf16 %v6870_v33  ;;  %v7209_v21 = vunpack.c.h.s8.bf16 %v6869_v10  ;;  %v6882_v10 = vld [vmem:[#allocation7 + $0x2f0] sm:$0xff] }
 0x448   :  { %7686 = vmatprep.mubr.bf16.mxu0 %v7561_v27  ;;  %7983 = vmatpush1.bf16.msra.mxu1 %v7174_v23  ;;  %v7211_v23 = vunpack.c.h.s8.bf16 %v6871_v31 }
 0x449   :  { %8014 = vmatprep.mubr.bf16.mxu1 %v7561_v27  ;;  %7656 = vmatprep.subr.bf16.mxu0 %v7177_v25  ;;  %v6873_v25 = vld [vmem:[#allocation7 + $0x2a8] sm:$0xff]  ;;  %v7208_v27 = vunpack.c.h.s8.bf16 %v6868_v47  ;;  %v7233_v47 = vunpack.c.h.s8.bf16 %v6881_v14 }
 0x44a   :  { %7984 = vmatprep.subr.bf16.mxu1 %v7179_v28  ;;  %v7210_v28 = vunpack.c.h.s8.bf16 %v6870_v33  ;;  %v7213_v30 = vunpack.c.l.s8.bf16 %v6873_v25  ;;  %v7217_v46 = vunpack.c.h.s8.bf16 %v6873_v25  ;;  %v6885_v33 = vld [vmem:[#allocation7 + $0x308] sm:$0xff] }
 0x44b   :  { %7657 = vmatpush1.bf16.msra.mxu0 %v7176_v36  ;;  %v6872_v36 = vld [vmem:[#allocation7 + $0x2a0] sm:$0xff]  ;;  %v7237_v25 = vunpack.c.l.s8.bf16 %v6885_v33 }
 0x44c   :  { %7985 = vmatpush1.bf16.msra.mxu1 %v7178_v37  ;;  %7658 = vmatprep.subr.bf16.mxu0 %v7181_v38  ;;  %v7215_v37 = vunpack.c.l.s8.bf16 %v6875_v26  ;;  %v6874_v38 = vld [vmem:[#allocation7 + $0x2b0] sm:$0xff]  ;;  %v7212_v39 = vunpack.c.l.s8.bf16 %v6872_v36 }
 0x44d   :  { %7986 = vmatprep.subr.bf16.mxu1 %v7183_v45  ;;  %v7214_v45 = vunpack.c.l.s8.bf16 %v6874_v38  ;;  %v7218_v56 = vunpack.c.h.s8.bf16 %v6874_v38 }
 0x44f   :  { %7659 = vmatpush1.bf16.msra.mxu0 %v7180_v48  ;;  %v7219_v48 = vunpack.c.h.s8.bf16 %v6875_v26  ;;  %v6884_v26 = vld [vmem:[#allocation7 + $0x300] sm:$0xff] }
 0x450   :  { %7987 = vmatpush1.bf16.msra.mxu1 %v7182_v49  ;;  %7660 = vmatprep.subr.bf16.mxu0 %v7185_v50  ;;  %v6877_v49 = vld [vmem:[#allocation7 + $0x2c8] sm:$0xff]  ;;  %v6879_v50 = vld [vmem:[#allocation7 + $0x2d8] sm:$0xff] }
 0x451   :  { %7988 = vmatprep.subr.bf16.mxu1 %v7187_v54  ;;  %v7216_v54 = vunpack.c.h.s8.bf16 %v6872_v36  ;;  %v7227_v4 = vunpack.c.h.s8.bf16 %v6879_v50  ;;  %v7236_v36 = vunpack.c.l.s8.bf16 %v6884_v26 }
 0x453   :  { %7661 = vmatpush1.bf16.msra.mxu0 %v7184_v57  ;;  %v7221_v57 = vunpack.c.l.s8.bf16 %v6877_v49 }
 0x454   :  { %7989 = vmatpush1.bf16.msra.mxu1 %v7186_v58  ;;  %7662 = vmatprep.subr.bf16.mxu0 %v7189_v59  ;;  %v6876_v58 = vld [vmem:[#allocation7 + $0x2c0] sm:$0xff]  ;;  %v7223_v59 = vunpack.c.l.s8.bf16 %v6879_v50  ;;  %v7240_v50 = vunpack.c.h.s8.bf16 %v6884_v26 }
 0x455   :  { %7990 = vmatprep.subr.bf16.mxu1 %v7191_v60  ;;  %v10268_v60 = vsub.s32 7, %v10201_v43  ;;  %v7220_v61 = vunpack.c.l.s8.bf16 %v6876_v58 }
 0x457   :  { %7663 = vmatpush1.bf16.msra.mxu0 %v7188_v40  ;;  %v10270_v40 = vld [vmem:[#allocation4] sm:$0xff] }
 0x458   :  { %7991 = vmatpush1.bf16.msra.mxu1 %v7190_v62  ;;  %7664 = vmatprep.subr.bf16.mxu0 %v7193_v22  ;;  %v6595_v62 = vrot.slane %v10270_v40, %v10265_v55  ;;  %v7222_v22 = vunpack.c.l.s8.bf16 %v6878_v42 }
 0x459   :  { %7992 = vmatprep.subr.bf16.mxu1 %v7195_v3  ;;  %v7225_v3 = vunpack.c.h.s8.bf16 %v6877_v49  ;;  %v6891_v49 = vld [vmem:[#allocation7 + $0x338] sm:$0xff] }
 0x45a   :  { %v6660_v5 = vmul.f32 %v6595_v62, %v10185_v0 }
 0x45b   :  { %7665 = vmatpush1.bf16.msra.mxu0 %v7192_v19  ;;  %v6607_v19 = vrot.slane %v10270_v40, %v10268_v60 }
 0x45c   :  { %7993 = vmatpush1.bf16.msra.mxu1 %v7194_v53  ;;  %7666 = vmatprep.subr.bf16.mxu0 %v7197_v34  ;;  %v6883_v53 = vld [vmem:[#allocation7 + $0x2f8] sm:$0xff]  ;;  %v7224_v34 = vunpack.c.h.s8.bf16 %v6876_v58  ;;  %v7247_v58 = vunpack.c.l.s8.bf16 %v6891_v49 }
 0x45d   :  { %7994 = vmatprep.subr.bf16.mxu1 %v7199_v6  ;;  %v10277_v6 = vld [vmem:[#allocation6] sm:$0xff]  ;;  %v6663_v31 = vmul.f32 %v6607_v19, %v10191_v35  ;;  %v7234_v35 = vunpack.c.h.s8.bf16 %v6882_v10 }
 0x45e   :  { %v6695_v41 = vrot.slane %v10277_v6, %v10265_v55 }
 0x45f   :  { %7667 = vmatpush1.bf16.msra.mxu0 %v7196_v7  ;;  %v7226_v7 = vunpack.c.h.s8.bf16 %v6878_v42 }
 0x460   :  { %7995 = vmatpush1.bf16.msra.mxu1 %v7198_v52  ;;  %7668 = vmatprep.subr.bf16.mxu0 %v7201_v8  ;;  %v7229_v52 = vunpack.c.l.s8.bf16 %v6881_v14  ;;  %v6880_v8 = vld [vmem:[#allocation7 + $0x2e0] sm:$0xff] }
 0x461   :  { %7996 = vmatprep.subr.bf16.mxu1 %v7203_v9  ;;  %v7231_v9 = vunpack.c.l.s8.bf16 %v6883_v53  ;;  %v7228_v0 = vunpack.c.l.s8.bf16 %v6880_v8 }
 0x463   :  { %7669 = vmatpush1.bf16.msra.mxu0 %v7200_v11  ;;  %v6707_v11 = vrot.slane %v10277_v6, %v10268_v60 }
 0x464   :  { %7997 = vmatpush1.bf16.msra.mxu1 %v7202_v2  ;;  %7670 = vmatprep.subr.bf16.mxu0 %v7205_v15  ;;  %v6760_v2 = vadd.f32 %v6695_v41, %v6660_v5  ;;  %v7230_v15 = vunpack.c.l.s8.bf16 %v6882_v10  ;;  %v6894_v41 = vld [vmem:[#allocation7 + $0x350] sm:$0xff]  ;;  %v6897_v10 = vld [vmem:[#allocation7 + $0x368] sm:$0xff] }
 0x465   :  { %7998 = vmatprep.subr.bf16.mxu1 %v7207_v16  ;;  %v7235_v16 = vunpack.c.h.s8.bf16 %v6883_v53 }
 0x467   :  { %7671 = vmatpush1.bf16.msra.mxu0 %v7204_v63  ;;  %v6763_v63 = vadd.f32 %v6707_v11, %v6663_v31  ;;  %v6899_v31 = vld [vmem:[#allocation7 + $0x378] sm:$0xff] }
 0x468   :  { %7999 = vmatpush1.bf16.msra.mxu1 %v7206_v20  ;;  %7672 = vmatprep.subr.bf16.mxu0 %v7209_v21  ;;  %v6887_v20 = vld [vmem:[#allocation7 + $0x318] sm:$0xff]  ;;  %v7232_v21 = vunpack.c.h.s8.bf16 %v6880_v8 }
 0x469   :  { %8000 = vmatprep.subr.bf16.mxu1 %v7211_v23  ;;  %v6776_v23 = vmax.f32 %v6760_v2, 0.0  ;;  %v7261_v2 = vunpack.c.l.s8.bf16 %v6897_v10 }
 0x46b   :  { %7673 = vmatpush1.bf16.msra.mxu0 %v7208_v27  ;;  %v7239_v27 = vunpack.c.l.s8.bf16 %v6887_v20 }
 0x46c   :  { %8001 = vmatpush1.bf16.msra.mxu1 %v7210_v28  ;;  %7674 = vmatprep.subr.bf16.mxu0 %v7213_v30  ;;  %v6886_v28 = vld [vmem:[#allocation7 + $0x310] sm:$0xff]  ;;  %v6779_v30 = vmax.f32 %v6763_v63, 0.0 }
 0x46d   :  { %8002 = vmatprep.subr.bf16.mxu1 %v7215_v37  ;;  %v7560_v37 = vpack.c.bf16 %v6776_v23, %v6776_v23  ;;  %v7238_v38 = vunpack.c.l.s8.bf16 %v6886_v28  ;;  %v6898_v63 = vld [vmem:[#allocation7 + $0x370] sm:$0xff] }
 0x46f   :  { %7675 = vmatpush1.bf16.msra.mxu0 %v7212_v39  ;;  %v7241_v39 = vunpack.c.h.s8.bf16 %v6885_v33  ;;  %v7263_v33 = vunpack.c.l.s8.bf16 %v6899_v31 }
 0x470   :  { %8003 = vmatpush1.bf16.msra.mxu1 %v7214_v45  ;;  %7676 = vmatprep.subr.bf16.mxu0 %v7217_v46  ;;  %v6889_v45 = vld [vmem:[#allocation7 + $0x328] sm:$0xff]  ;;  %v7563_v46 = vpack.c.bf16 %v6779_v30, %v6779_v30  ;;  %v7265_v30 = vunpack.c.h.s8.bf16 %v6897_v10 }
 0x471   :  { %8004 = vmatprep.subr.bf16.mxu1 %v7219_v48  ;;  %v7243_v48 = vunpack.c.h.s8.bf16 %v6887_v20  ;;  %v7249_v62 = vunpack.c.h.s8.bf16 %v6889_v45 }
 0x473   :  { %7677 = vmatpush1.bf16.msra.mxu0 %v7216_v54  ;;  %v7242_v54 = vunpack.c.h.s8.bf16 %v6886_v28  ;;  %v7262_v28 = vunpack.c.l.s8.bf16 %v6898_v63 }
 0x474   :  { %8005 = vmatpush1.bf16.msra.mxu1 %v7218_v56  ;;  %7678 = vmatprep.subr.bf16.mxu0 %v7221_v57  ;;  %v7245_v56 = vunpack.c.l.s8.bf16 %v6889_v45  ;;  %v6888_v57 = vld [vmem:[#allocation7 + $0x320] sm:$0xff]  ;;  %v7266_v45 = vunpack.c.h.s8.bf16 %v6898_v63 }
 0x475   :  { %8006 = vmatprep.subr.bf16.mxu1 %v7223_v59  ;;  %v6890_v59 = vld [vmem:[#allocation7 + $0x330] sm:$0xff]  ;;  %v7244_v42 = vunpack.c.l.s8.bf16 %v6888_v57  ;;  %v7248_v14 = vunpack.c.h.s8.bf16 %v6888_v57 }
 0x476   :  { %v7250_v19 = vunpack.c.h.s8.bf16 %v6890_v59 }
 0x477   :  { %7679 = vmatpush1.bf16.msra.mxu0 %v7220_v61  ;;  %v7246_v61 = vunpack.c.l.s8.bf16 %v6890_v59  ;;  %v6905_v59 = vld [vmem:[#allocation7 + $0x3a8] sm:$0xff] }
 0x478   :  { %8007 = vmatpush1.bf16.msra.mxu1 %v7222_v22  ;;  %7680 = vmatprep.subr.bf16.mxu0 %v7225_v3  ;;  %v7251_v22 = vunpack.c.h.s8.bf16 %v6891_v49  ;;  %v6893_v3 = vld [vmem:[#allocation7 + $0x348] sm:$0xff] }
 0x479   :  { %8008 = vmatprep.subr.bf16.mxu1 %v7227_v4  ;;  %v6895_v4 = vld [vmem:[#allocation7 + $0x358] sm:$0xff]  ;;  %v7253_v53 = vunpack.c.l.s8.bf16 %v6893_v3  ;;  %v7257_v8 = vunpack.c.h.s8.bf16 %v6893_v3  ;;  %v6904_v3 = vld [vmem:[#allocation7 + $0x3a0] sm:$0xff] }
 0x47a   :  { %v7255_v5 = vunpack.c.l.s8.bf16 %v6895_v4 }
 0x47b   :  { %7681 = vmatpush1.bf16.msra.mxu0 %v7224_v34  ;;  %v6892_v34 = vld [vmem:[#allocation7 + $0x340] sm:$0xff] }
 0x47c   :  { %8009 = vmatpush1.bf16.msra.mxu1 %v7226_v7  ;;  %7682 = vmatprep.subr.bf16.mxu0 %v7229_v52  ;;  %v7252_v7 = vunpack.c.l.s8.bf16 %v6892_v34  ;;  %v7254_v52 = vunpack.c.l.s8.bf16 %v6894_v41  ;;  %v7256_v11 = vunpack.c.h.s8.bf16 %v6892_v34  ;;  %v7281_v34 = vunpack.c.h.s8.bf16 %v6905_v59 }
 0x47d   :  { %8010 = vmatprep.subr.bf16.mxu1 %v7231_v9  ;;  %v7259_v9 = vunpack.c.h.s8.bf16 %v6895_v4 }
 0x47f   :  { %7683 = vmatpush1.bf16.msra.mxu0 %v7228_v0  ;;  %v7258_v0 = vunpack.c.h.s8.bf16 %v6894_v41  ;;  %v6909_v41 = vld [vmem:[#allocation7 + $0x3c8] sm:$0xff] }
 0x480   :  { %8011 = vmatpush1.bf16.msra.mxu1 %v7230_v15  ;;  %7684 = vmatprep.subr.bf16.mxu0 %v7233_v47  ;;  %v6896_v15 = vld [vmem:[#allocation7 + $0x360] sm:$0xff]  ;;  %v7285_v10 = vunpack.c.l.s8.bf16 %v6909_v41 }
 0x481   :  { %8012 = vmatprep.subr.bf16.mxu1 %v7235_v16 }
 0x483   :  { %7685 = vmatpush1.bf16.msra.mxu0 %v7232_v21 }
 0x484   :  { %8013 = vmatpush1.bf16.msra.mxu1 %v7234_v35  ;;  %7695 = vmatprep.subr.bf16.mxu0 %v7237_v25  ;;  %v7260_v25 = vunpack.c.l.s8.bf16 %v6896_v15 }
 0x485   :  { %8023 = vmatprep.subr.bf16.mxu1 %v7239_v27 }
 0x486   :  { %7687 = vmatmul.mubr.bf16.vlgmr.msra.gmra.mrb[16].mxu0 %v7560_v37 }
 0x487   :  { %8015 = vmatmul.mubr.bf16.vlgmr.msra.gmra.mrb[16].mxu1 %v7560_v37  ;;  %7696 = vmatpush1.bf16.msra.mxu0 %v7236_v36  ;;  %v7267_v36 = vunpack.c.h.s8.bf16 %v6899_v31  ;;  %v6901_v37 = vld [vmem:[#allocation7 + $0x388] sm:$0xff]  ;;  %v6908_v31 = vld [vmem:[#allocation7 + $0x3c0] sm:$0xff] }
 0x488   :  { %7727 = vmatprep.mubr.bf16.mxu0 %v7563_v46  ;;  %8024 = vmatpush1.bf16.msra.mxu1 %v7238_v38  ;;  %v6903_v38 = vld [vmem:[#allocation7 + $0x398] sm:$0xff]  ;;  %v7273_v57 = vunpack.c.h.s8.bf16 %v6901_v37 }
 0x489   :  { %8055 = vmatprep.mubr.bf16.mxu1 %v7563_v46  ;;  %7697 = vmatprep.subr.bf16.mxu0 %v7241_v39  ;;  %v7264_v39 = vunpack.c.h.s8.bf16 %v6896_v15  ;;  %v7269_v46 = vunpack.c.l.s8.bf16 %v6901_v37  ;;  %v7271_v49 = vunpack.c.l.s8.bf16 %v6903_v38  ;;  %v7284_v15 = vunpack.c.l.s8.bf16 %v6908_v31 }
 0x48a   :  { %8025 = vmatprep.subr.bf16.mxu1 %v7243_v48  ;;  %v6900_v48 = vld [vmem:[#allocation7 + $0x380] sm:$0xff] }
 0x48b   :  { %7698 = vmatpush1.bf16.msra.mxu0 %v7240_v50  ;;  %v6902_v50 = vld [vmem:[#allocation7 + $0x390] sm:$0xff] }
 0x48c   :  { %8026 = vmatpush1.bf16.msra.mxu1 %v7242_v54  ;;  %7699 = vmatprep.subr.bf16.mxu0 %v7245_v56  ;;  %v7268_v54 = vunpack.c.l.s8.bf16 %v6900_v48  ;;  %v7270_v56 = vunpack.c.l.s8.bf16 %v6902_v50 }
 0x48d   :  { %8027 = vmatprep.subr.bf16.mxu1 %v7247_v58  ;;  %v7275_v58 = vunpack.c.h.s8.bf16 %v6903_v38  ;;  %v6912_v38 = vld [vmem:[#allocation7 + $0x3e0] sm:$0xff] }
 0x48f   :  { %7700 = vmatpush1.bf16.msra.mxu0 %v7244_v42  ;;  %v6907_v42 = vld [vmem:[#allocation7 + $0x3b8] sm:$0xff] }
 0x490   :  { %8028 = vmatpush1.bf16.msra.mxu1 %v7246_v61  ;;  %7701 = vmatprep.subr.bf16.mxu0 %v7249_v62  ;;  %v7272_v61 = vunpack.c.h.s8.bf16 %v6900_v48  ;;  %v7274_v62 = vunpack.c.h.s8.bf16 %v6902_v50  ;;  %v7279_v4 = vunpack.c.l.s8.bf16 %v6907_v42 }
 0x491   :  { %8029 = vmatprep.subr.bf16.mxu1 %v7251_v22  ;;  %v7277_v22 = vunpack.c.l.s8.bf16 %v6905_v59  ;;  %v7296_v59 = vunpack.c.h.s8.bf16 %v6912_v38 }
 0x493   :  { %7702 = vmatpush1.bf16.msra.mxu0 %v7248_v14  ;;  %v6906_v14 = vld [vmem:[#allocation7 + $0x3b0] sm:$0xff] }
 0x494   :  { %8030 = vmatpush1.bf16.msra.mxu1 %v7250_v19  ;;  %7703 = vmatprep.subr.bf16.mxu0 %v7253_v53  ;;  %v7276_v19 = vunpack.c.l.s8.bf16 %v6904_v3  ;;  %v7278_v53 = vunpack.c.l.s8.bf16 %v6906_v14 }
 0x495   :  { %8031 = vmatprep.subr.bf16.mxu1 %v7255_v5  ;;  %v7283_v5 = vunpack.c.h.s8.bf16 %v6907_v42 }
 0x497   :  { %7704 = vmatpush1.bf16.msra.mxu0 %v7252_v7  ;;  %v6911_v7 = vld [vmem:[#allocation7 + $0x3d8] sm:$0xff] }
 0x498   :  { %8032 = vmatpush1.bf16.msra.mxu1 %v7254_v52  ;;  %7705 = vmatprep.subr.bf16.mxu0 %v7257_v8  ;;  %v7280_v52 = vunpack.c.h.s8.bf16 %v6904_v3  ;;  %v10293_v8 = vsub.s32 6, %v10201_v43  ;;  %v7289_v43 = vunpack.c.h.s8.bf16 %v6909_v41  ;;  %v6918_v3 = vld [vmem:[#allocation7 + $0x410] sm:$0xff] }
 0x499   :  { %v10284_v47 = vpop.f32.mrb[12].mxu0  ;;  %v10286_v16 = vpop.f32.mrb[12].mxu1  ;;  %8033 = vmatprep.subr.bf16.mxu1 %v7259_v9  ;;  %v7282_v9 = vunpack.c.h.s8.bf16 %v6906_v14 }
 0x49a   :  { %v10288_v20 = vpop.f32.mrb[13].mxu0  ;;  %v10290_v21 = vpop.f32.mrb[13].mxu1 }
 0x49b   :  { %7706 = vmatpush1.bf16.msra.mxu0 %v7256_v11  ;;  %v6405_v23 = vpop.f32.mrb[14].mxu0  ;;  %v6569_v35 = vpop.f32.mrb[14].mxu1  ;;  %v7287_v11 = vunpack.c.l.s8.bf16 %v6911_v7 }
 0x49c   :  { %8034 = vmatpush1.bf16.msra.mxu1 %v7258_v0  ;;  %v6406_v26 = vpop.f32.mrb[15].mxu0  ;;  %v6570_v27 = vpop.f32.mrb[15].mxu1  ;;  %7707 = vmatprep.subr.bf16.mxu0 %v7261_v2  ;;  %v6910_v0 = vld [vmem:[#allocation7 + $0x3d0] sm:$0xff]  ;;  %v10295_v2 = vld [vmem:[#allocation4 + $0x8] sm:$0xff]  ;;  %v7291_v23 = vunpack.c.h.s8.bf16 %v6911_v7 }
 0x49d   :  { %8035 = vmatprep.subr.bf16.mxu1 %v7263_v33  ;;  %v6603_v33 = vrot.slane %v10270_v40, %v10293_v8  ;;  %v7286_v63 = vunpack.c.l.s8.bf16 %v6910_v0  ;;  %v6913_v35 = vld [vmem:[#allocation7 + $0x3e8] sm:$0xff]  ;;  %v6915_v26 = vld [vmem:[#allocation7 + $0x3f8] sm:$0xff]  ;;  %v6703_v40 = vrot.slane %v10277_v6, %v10293_v8 }
 0x49e   :  { %v10301_v27 = vld [vmem:[#allocation6 + $0x8] sm:$0xff]  ;;  %v7293_v37 = vunpack.c.l.s8.bf16 %v6913_v35  ;;  %v7297_v6 = vunpack.c.h.s8.bf16 %v6913_v35  ;;  %v6925_v35 = vld [vmem:[#allocation7 + $0x448] sm:$0xff] }
 0x49f   :  { %7708 = vmatpush1.bf16.msra.mxu0 %v7260_v25  ;;  %v6615_v25 = vrot.slane %v10295_v2, %v10204_v32  ;;  %v6715_v48 = vrot.slane %v10301_v27, %v10204_v32 }
 0x4a0   :  { %8036 = vmatpush1.bf16.msra.mxu1 %v7262_v28  ;;  %7709 = vmatprep.subr.bf16.mxu0 %v7265_v30  ;;  %v7288_v28 = vunpack.c.h.s8.bf16 %v6908_v31  ;;  %v6662_v30 = vmul.f32 %v6603_v33, %v10187_v1 }
 0x4a1   :  { %8037 = vmatprep.subr.bf16.mxu1 %v7267_v36  ;;  %v7290_v36 = vunpack.c.h.s8.bf16 %v6910_v0 }
 0x4a2   :  { %v6762_v50 = vadd.f32 %v6703_v40, %v6662_v30  ;;  %v7317_v30 = vunpack.c.l.s8.bf16 %v6925_v35  ;;  %v6924_v40 = vld [vmem:[#allocation7 + $0x440] sm:$0xff] }
 0x4a3   :  { %7710 = vmatpush1.bf16.msra.mxu0 %v7264_v39  ;;  %v7295_v39 = vunpack.c.l.s8.bf16 %v6915_v26 }
 0x4a4   :  { %8038 = vmatpush1.bf16.msra.mxu1 %v7266_v45  ;;  %7711 = vmatprep.subr.bf16.mxu0 %v7269_v46  ;;  %v6914_v45 = vld [vmem:[#allocation7 + $0x3f0] sm:$0xff]  ;;  %v6665_v46 = vmul.f32 %v6615_v25, %v10228_v17  ;;  %v6778_v42 = vmax.f32 %v6762_v50, 0.0  ;;  %v6927_v25 = vld [vmem:[#allocation7 + $0x458] sm:$0xff]  ;;  %v7320_v50 = vunpack.c.h.s8.bf16 %v6924_v40 }
 0x4a5   :  { %8039 = vmatprep.subr.bf16.mxu1 %v7271_v49  ;;  %v7292_v49 = vunpack.c.l.s8.bf16 %v6912_v38  ;;  %v7294_v1 = vunpack.c.l.s8.bf16 %v6914_v45  ;;  %v7298_v17 = vunpack.c.h.s8.bf16 %v6914_v45  ;;  %v7316_v38 = vunpack.c.l.s8.bf16 %v6924_v40 }
 0x4a6   :  { %v7321_v45 = vunpack.c.h.s8.bf16 %v6925_v35 }
 0x4a7   :  { %7712 = vmatpush1.bf16.msra.mxu0 %v7268_v54  ;;  %v7299_v54 = vunpack.c.h.s8.bf16 %v6915_v26 }
 0x4a8   :  { %8040 = vmatpush1.bf16.msra.mxu1 %v7270_v56  ;;  %7713 = vmatprep.subr.bf16.mxu0 %v7273_v57  ;;  %v6917_v56 = vld [vmem:[#allocation7 + $0x408] sm:$0xff]  ;;  %v6765_v57 = vadd.f32 %v6715_v48, %v6665_v46  ;;  %v7323_v46 = vunpack.c.h.s8.bf16 %v6927_v25 }
 0x4a9   :  { %8041 = vmatprep.subr.bf16.mxu1 %v7275_v58  ;;  %v6919_v58 = vld [vmem:[#allocation7 + $0x418] sm:$0xff]  ;;  %v6929_v48 = vld [vmem:[#allocation7 + $0x468] sm:$0xff] }
 0x4aa   :  { %v7307_v7 = vunpack.c.h.s8.bf16 %v6919_v58 }
 0x4ab   :  { %7714 = vmatpush1.bf16.msra.mxu0 %v7272_v61  ;;  %v7301_v61 = vunpack.c.l.s8.bf16 %v6917_v56 }
 0x4ac   :  { %8042 = vmatpush1.bf16.msra.mxu1 %v7274_v62  ;;  %7715 = vmatprep.subr.bf16.mxu0 %v7277_v22  ;;  %v6916_v62 = vld [vmem:[#allocation7 + $0x400] sm:$0xff]  ;;  %v7303_v22 = vunpack.c.l.s8.bf16 %v6919_v58 }
 0x4ad   :  { %8043 = vmatprep.subr.bf16.mxu1 %v7279_v4  ;;  %v6781_v4 = vmax.f32 %v6765_v57, 0.0  ;;  %v7300_v14 = vunpack.c.l.s8.bf16 %v6916_v62  ;;  %v6930_v57 = vld [vmem:[#allocation7 + $0x470] sm:$0xff] }
 0x4af   :  { %7716 = vmatpush1.bf16.msra.mxu0 %v7276_v19  ;;  %v7562_v19 = vpack.c.bf16 %v6778_v42, %v6778_v42  ;;  %v7565_v41 = vpack.c.bf16 %v6781_v4, %v6781_v4  ;;  %v7329_v42 = vunpack.c.h.s8.bf16 %v6929_v48 }
 0x4b0   :  { %8044 = vmatpush1.bf16.msra.mxu1 %v7278_v53  ;;  %7717 = vmatprep.subr.bf16.mxu0 %v7281_v34  ;;  %v7302_v53 = vunpack.c.l.s8.bf16 %v6918_v3  ;;  %v7305_v34 = vunpack.c.h.s8.bf16 %v6917_v56 }
 0x4b1   :  { %8045 = vmatprep.subr.bf16.mxu1 %v7283_v5  ;;  %v6921_v5 = vld [vmem:[#allocation7 + $0x428] sm:$0xff] }
 0x4b2   :  { %v7309_v31 = vunpack.c.l.s8.bf16 %v6921_v5 }
 0x4b3   :  { %7718 = vmatpush1.bf16.msra.mxu0 %v7280_v52  ;;  %v6923_v52 = vld [vmem:[#allocation7 + $0x438] sm:$0xff] }
 0x4b4   :  { %8046 = vmatpush1.bf16.msra.mxu1 %v7282_v9  ;;  %7719 = vmatprep.subr.bf16.mxu0 %v7285_v10  ;;  %v7304_v9 = vunpack.c.h.s8.bf16 %v6916_v62  ;;  %v7306_v10 = vunpack.c.h.s8.bf16 %v6918_v3  ;;  %v7311_v0 = vunpack.c.l.s8.bf16 %v6923_v52  ;;  %v6935_v62 = vld [vmem:[#allocation7 + $0x498] sm:$0xff]  ;;  %v7330_v3 = vunpack.c.h.s8.bf16 %v6930_v57 }
 0x4b5   :  { %8047 = vmatprep.subr.bf16.mxu1 %v7287_v11  ;;  %v6920_v11 = vld [vmem:[#allocation7 + $0x420] sm:$0xff] }
 0x4b6   :  { %v7308_v33 = vunpack.c.l.s8.bf16 %v6920_v11  ;;  %v7312_v26 = vunpack.c.h.s8.bf16 %v6920_v11 }
 0x4b7   :  { %7720 = vmatpush1.bf16.msra.mxu0 %v7284_v15  ;;  %v6922_v15 = vld [vmem:[#allocation7 + $0x430] sm:$0xff] }
 0x4b8   :  { %8048 = vmatpush1.bf16.msra.mxu1 %v7286_v63  ;;  %7721 = vmatprep.subr.bf16.mxu0 %v7289_v43  ;;  %v7310_v63 = vunpack.c.l.s8.bf16 %v6922_v15  ;;  %v7313_v43 = vunpack.c.h.s8.bf16 %v6921_v5 }
 0x4b9   :  { %8049 = vmatprep.subr.bf16.mxu1 %v7291_v23  ;;  %v7315_v23 = vunpack.c.h.s8.bf16 %v6923_v52  ;;  %v6937_v52 = vld [vmem:[#allocation7 + $0x4a8] sm:$0xff] }
 0x4ba   :  { %v7341_v11 = vunpack.c.l.s8.bf16 %v6937_v52 }
 0x4bb   :  { %7722 = vmatpush1.bf16.msra.mxu0 %v7288_v28  ;;  %v7314_v28 = vunpack.c.h.s8.bf16 %v6922_v15 }
 0x4bc   :  { %8050 = vmatpush1.bf16.msra.mxu1 %v7290_v36  ;;  %7723 = vmatprep.subr.bf16.mxu0 %v7293_v37  ;;  %v7319_v36 = vunpack.c.l.s8.bf16 %v6927_v25  ;;  %v6926_v37 = vld [vmem:[#allocation7 + $0x450] sm:$0xff]  ;;  %v6941_v25 = vld [vmem:[#allocation7 + $0x4c8] sm:$0xff] }
 0x4bd   :  { %8051 = vmatprep.subr.bf16.mxu1 %v7295_v39  ;;  %v7318_v39 = vunpack.c.l.s8.bf16 %v6926_v37  ;;  %v7349_v40 = vunpack.c.l.s8.bf16 %v6941_v25 }
 0x4bf   :  { %7724 = vmatpush1.bf16.msra.mxu0 %v7292_v49  ;;  %v6931_v49 = vld [vmem:[#allocation7 + $0x478] sm:$0xff] }
 0x4c0   :  { %8052 = vmatpush1.bf16.msra.mxu1 %v7294_v1  ;;  %7725 = vmatprep.subr.bf16.mxu0 %v7297_v6  ;;  %v7322_v1 = vunpack.c.h.s8.bf16 %v6926_v37  ;;  %v7325_v6 = vunpack.c.l.s8.bf16 %v6929_v48  ;;  %v7327_v56 = vunpack.c.l.s8.bf16 %v6931_v49  ;;  %v7353_v48 = vunpack.c.h.s8.bf16 %v6941_v25  ;;  %v6955_v25 = vld [vmem:[#allocation7 + $0x538] sm:$0xff] }
 0x4c1   :  { %8053 = vmatprep.subr.bf16.mxu1 %v7299_v54  ;;  %v6928_v54 = vld [vmem:[#allocation7 + $0x460] sm:$0xff] }
 0x4c2   :  { %v7324_v58 = vunpack.c.l.s8.bf16 %v6928_v54 }
 0x4c3   :  { %7726 = vmatpush1.bf16.msra.mxu0 %v7296_v59  ;;  %v7326_v59 = vunpack.c.l.s8.bf16 %v6930_v57  ;;  %v6711_v57 = vrot.slane %v10301_v27, %v10233_v24 }
 0x4c4   :  { %8054 = vmatpush1.bf16.msra.mxu1 %v7298_v17  ;;  %7736 = vmatprep.subr.bf16.mxu0 %v7301_v61  ;;  %v7331_v17 = vunpack.c.h.s8.bf16 %v6931_v49  ;;  %v6933_v61 = vld [vmem:[#allocation7 + $0x488] sm:$0xff] }
 0x4c5   :  { %8064 = vmatprep.subr.bf16.mxu1 %v7303_v22  ;;  %v7328_v22 = vunpack.c.h.s8.bf16 %v6928_v54  ;;  %v7333_v4 = vunpack.c.l.s8.bf16 %v6933_v61 }
 0x4c6   :  { %7728 = vmatmul.mubr.bf16.vlgmr.msra.gmra.mrb[16].mxu0 %v7562_v19 }
 0x4c7   :  { %8056 = vmatmul.mubr.bf16.vlgmr.msra.gmra.mrb[16].mxu1 %v7562_v19  ;;  %7737 = vmatpush1.bf16.msra.mxu0 %v7300_v14  ;;  %v6932_v14 = vld [vmem:[#allocation7 + $0x480] sm:$0xff]  ;;  %v7335_v19 = vunpack.c.l.s8.bf16 %v6935_v62 }
 0x4c8   :  { %7768 = vmatprep.mubr.bf16.mxu0 %v7565_v41  ;;  %8065 = vmatpush1.bf16.msra.mxu1 %v7302_v53  ;;  %v6934_v53 = vld [vmem:[#allocation7 + $0x490] sm:$0xff] }
 0x4c9   :  { %8096 = vmatprep.mubr.bf16.mxu1 %v7565_v41  ;;  %7738 = vmatprep.subr.bf16.mxu0 %v7305_v34  ;;  %v7332_v34 = vunpack.c.l.s8.bf16 %v6932_v14  ;;  %v7334_v5 = vunpack.c.l.s8.bf16 %v6934_v53  ;;  %v7337_v41 = vunpack.c.h.s8.bf16 %v6933_v61  ;;  %v6946_v61 = vld [vmem:[#allocation7 + $0x4f0] sm:$0xff] }
 0x4ca   :  { %8066 = vmatprep.subr.bf16.mxu1 %v7307_v7  ;;  %v7339_v7 = vunpack.c.h.s8.bf16 %v6935_v62 }
 0x4cb   :  { %7739 = vmatpush1.bf16.msra.mxu0 %v7304_v9  ;;  %v6939_v9 = vld [vmem:[#allocation7 + $0x4b8] sm:$0xff] }
 0x4cc   :  { %8067 = vmatpush1.bf16.msra.mxu1 %v7306_v10  ;;  %7740 = vmatprep.subr.bf16.mxu0 %v7309_v31  ;;  %v7336_v10 = vunpack.c.h.s8.bf16 %v6932_v14  ;;  %v7338_v31 = vunpack.c.h.s8.bf16 %v6934_v53  ;;  %v7343_v15 = vunpack.c.l.s8.bf16 %v6939_v9  ;;  %v7347_v35 = vunpack.c.h.s8.bf16 %v6939_v9  ;;  %v6949_v53 = vld [vmem:[#allocation7 + $0x508] sm:$0xff]  ;;  %v6948_v9 = vld [vmem:[#allocation7 + $0x500] sm:$0xff] }
 0x4cd   :  { %8068 = vmatprep.subr.bf16.mxu1 %v7311_v0  ;;  %v6936_v0 = vld [vmem:[#allocation7 + $0x4a0] sm:$0xff] }
 0x4cf   :  { %7741 = vmatpush1.bf16.msra.mxu0 %v7308_v33  ;;  %v6938_v33 = vld [vmem:[#allocation7 + $0x4b0] sm:$0xff] }
 0x4d0   :  { %8069 = vmatpush1.bf16.msra.mxu1 %v7310_v63  ;;  %7742 = vmatprep.subr.bf16.mxu0 %v7313_v43  ;;  %v7340_v63 = vunpack.c.l.s8.bf16 %v6936_v0  ;;  %v7342_v43 = vunpack.c.l.s8.bf16 %v6938_v33 }
 0x4d1   :  { %8070 = vmatprep.subr.bf16.mxu1 %v7315_v23  ;;  %v7345_v23 = vunpack.c.h.s8.bf16 %v6937_v52  ;;  %v7365_v52 = vunpack.c.l.s8.bf16 %v6949_v53 }
 0x4d3   :  { %7743 = vmatpush1.bf16.msra.mxu0 %v7312_v26  ;;  %v6943_v26 = vld [vmem:[#allocation7 + $0x4d8] sm:$0xff] }
 0x4d4   :  { %8071 = vmatpush1.bf16.msra.mxu1 %v7314_v28  ;;  %7744 = vmatprep.subr.bf16.mxu0 %v7317_v30  ;;  %v7344_v28 = vunpack.c.h.s8.bf16 %v6936_v0  ;;  %v7346_v30 = vunpack.c.h.s8.bf16 %v6938_v33  ;;  %v7351_v37 = vunpack.c.l.s8.bf16 %v6943_v26  ;;  %v7355_v49 = vunpack.c.h.s8.bf16 %v6943_v26 }
 0x4d5   :  { %8072 = vmatprep.subr.bf16.mxu1 %v7319_v36  ;;  %v6940_v36 = vld [vmem:[#allocation7 + $0x4c0] sm:$0xff]  ;;  %v7364_v0 = vunpack.c.l.s8.bf16 %v6948_v9  ;;  %v7368_v26 = vunpack.c.h.s8.bf16 %v6948_v9 }
 0x4d6   :  { %v7352_v54 = vunpack.c.h.s8.bf16 %v6940_v36 }
 0x4d7   :  { %7745 = vmatpush1.bf16.msra.mxu0 %v7316_v38  ;;  %v6942_v38 = vld [vmem:[#allocation7 + $0x4d0] sm:$0xff] }
 0x4d8   :  { %8073 = vmatpush1.bf16.msra.mxu1 %v7318_v39  ;;  %7746 = vmatprep.subr.bf16.mxu0 %v7321_v45  ;;  %v7348_v39 = vunpack.c.l.s8.bf16 %v6940_v36  ;;  %v6611_v45 = vrot.slane %v10295_v2, %v10233_v24  ;;  %v7375_v36 = vunpack.c.l.s8.bf16 %v6955_v25 }
 0x4d9   :  { %8074 = vmatprep.subr.bf16.mxu1 %v7323_v46  ;;  %v7350_v46 = vunpack.c.l.s8.bf16 %v6942_v38 }
 0x4db   :  { %7747 = vmatpush1.bf16.msra.mxu0 %v7320_v50  ;;  %v6945_v50 = vld [vmem:[#allocation7 + $0x4e8] sm:$0xff] }
 0x4dc   :  { %8075 = vmatpush1.bf16.msra.mxu1 %v7322_v1  ;;  %7748 = vmatprep.subr.bf16.mxu0 %v7325_v6  ;;  %v6623_v1 = vrot.slane %v10295_v2, %v10236_v29  ;;  %v6947_v6 = vld [vmem:[#allocation7 + $0x4f8] sm:$0xff]  ;;  %v7361_v14 = vunpack.c.h.s8.bf16 %v6945_v50 }
 0x4dd   :  { %8076 = vmatprep.subr.bf16.mxu1 %v7327_v56  ;;  %v6664_v56 = vmul.f32 %v6611_v45, %v10224_v12  ;;  %v7358_v12 = vunpack.c.l.s8.bf16 %v6946_v61 }
 0x4de   :  { %v6667_v62 = vmul.f32 %v6623_v1, %v10230_v18  ;;  %v7362_v18 = vunpack.c.h.s8.bf16 %v6946_v61  ;;  %v6961_v61 = vld [vmem:[#allocation7 + $0x568] sm:$0xff] }
 0x4df   :  { %7749 = vmatpush1.bf16.msra.mxu0 %v7324_v58  ;;  %v7354_v58 = vunpack.c.h.s8.bf16 %v6942_v38 }
 0x4e0   :  { %8077 = vmatpush1.bf16.msra.mxu1 %v7326_v59  ;;  %7750 = vmatprep.subr.bf16.mxu0 %v7329_v42  ;;  %v7357_v59 = vunpack.c.l.s8.bf16 %v6945_v50  ;;  %v6944_v42 = vld [vmem:[#allocation7 + $0x4e0] sm:$0xff] }
 0x4e1   :  { %8078 = vmatprep.subr.bf16.mxu1 %v7331_v17  ;;  %v7359_v17 = vunpack.c.l.s8.bf16 %v6947_v6 }
 0x4e3   :  { %7751 = vmatpush1.bf16.msra.mxu0 %v7328_v22  ;;  %v6723_v22 = vrot.slane %v10301_v27, %v10236_v29 }
 0x4e4   :  { %8079 = vmatpush1.bf16.msra.mxu1 %v7330_v3  ;;  %7752 = vmatprep.subr.bf16.mxu0 %v7333_v4  ;;  %v7356_v3 = vunpack.c.l.s8.bf16 %v6944_v42  ;;  %v6764_v4 = vadd.f32 %v6711_v57, %v6664_v56  ;;  %v6958_v57 = vld [vmem:[#allocation7 + $0x550] sm:$0xff] }
 0x4e5   :  { %8080 = vmatprep.subr.bf16.mxu1 %v7335_v19  ;;  %v7363_v19 = vunpack.c.h.s8.bf16 %v6947_v6 }
 0x4e7   :  { %7753 = vmatpush1.bf16.msra.mxu0 %v7332_v34  ;;  %v6767_v34 = vadd.f32 %v6723_v22, %v6667_v62  ;;  %v6963_v62 = vld [vmem:[#allocation7 + $0x578] sm:$0xff] }
 0x4e8   :  { %8081 = vmatpush1.bf16.msra.mxu1 %v7334_v5  ;;  %7754 = vmatprep.subr.bf16.mxu0 %v7337_v41  ;;  %v6951_v5 = vld [vmem:[#allocation7 + $0x518] sm:$0xff]  ;;  %v7360_v41 = vunpack.c.h.s8.bf16 %v6944_v42 }
 0x4e9   :  { %8082 = vmatprep.subr.bf16.mxu1 %v7339_v7  ;;  %v6780_v7 = vmax.f32 %v6764_v4, 0.0  ;;  %v7389_v4 = vunpack.c.l.s8.bf16 %v6961_v61 }
 0x4eb   :  { %7755 = vmatpush1.bf16.msra.mxu0 %v7336_v10  ;;  %v7367_v10 = vunpack.c.l.s8.bf16 %v6951_v5 }
 0x4ec   :  { %8083 = vmatpush1.bf16.msra.mxu1 %v7338_v31  ;;  %7756 = vmatprep.subr.bf16.mxu0 %v7341_v11  ;;  %v6950_v31 = vld [vmem:[#allocation7 + $0x510] sm:$0xff]  ;;  %v6783_v11 = vmax.f32 %v6767_v34, 0.0 }
 0x4ed   :  { %8084 = vmatprep.subr.bf16.mxu1 %v7343_v15  ;;  %v7564_v15 = vpack.c.bf16 %v6780_v7, %v6780_v7  ;;  %v7366_v33 = vunpack.c.l.s8.bf16 %v6950_v31  ;;  %v6965_v7 = vld [vmem:[#allocation7 + $0x588] sm:$0xff] }
 0x4ef   :  { %7757 = vmatpush1.bf16.msra.mxu0 %v7340_v63  ;;  %v7369_v63 = vunpack.c.h.s8.bf16 %v6949_v53 }
 0x4f0   :  { %8085 = vmatpush1.bf16.msra.mxu1 %v7342_v43  ;;  %7758 = vmatprep.subr.bf16.mxu0 %v7345_v23  ;;  %v6953_v43 = vld [vmem:[#allocation7 + $0x528] sm:$0xff]  ;;  %v7567_v23 = vpack.c.bf16 %v6783_v11, %v6783_v11 }
 0x4f1   :  { %8086 = vmatprep.subr.bf16.mxu1 %v7347_v35  ;;  %v7371_v35 = vunpack.c.h.s8.bf16 %v6951_v5  ;;  %v7377_v45 = vunpack.c.h.s8.bf16 %v6953_v43  ;;  %v7393_v5 = vunpack.c.h.s8.bf16 %v6961_v61  ;;  %v6977_v61 = vld [vmem:[#allocation7 + $0x5e8] sm:$0xff] }
 0x4f3   :  { %7759 = vmatpush1.bf16.msra.mxu0 %v7344_v28  ;;  %v7370_v28 = vunpack.c.h.s8.bf16 %v6950_v31  ;;  %v6964_v31 = vld [vmem:[#allocation7 + $0x580] sm:$0xff] }
 0x4f4   :  { %8087 = vmatpush1.bf16.msra.mxu1 %v7346_v30  ;;  %7760 = vmatprep.subr.bf16.mxu0 %v7349_v40  ;;  %v7373_v30 = vunpack.c.l.s8.bf16 %v6953_v43  ;;  %v6952_v40 = vld [vmem:[#allocation7 + $0x520] sm:$0xff] }
 0x4f5   :  { %8088 = vmatprep.subr.bf16.mxu1 %v7351_v37  ;;  %v6954_v37 = vld [vmem:[#allocation7 + $0x530] sm:$0xff]  ;;  %v7372_v38 = vunpack.c.l.s8.bf16 %v6952_v40  ;;  %v7376_v50 = vunpack.c.h.s8.bf16 %v6952_v40 }
 0x4f6   :  { %v7378_v1 = vunpack.c.h.s8.bf16 %v6954_v37 }
 0x4f7   :  { %7761 = vmatpush1.bf16.msra.mxu0 %v7348_v39  ;;  %v7374_v39 = vunpack.c.l.s8.bf16 %v6954_v37 }
 0x4f8   :  { %8089 = vmatpush1.bf16.msra.mxu1 %v7350_v46  ;;  %7762 = vmatprep.subr.bf16.mxu0 %v7353_v48  ;;  %v7379_v46 = vunpack.c.h.s8.bf16 %v6955_v25  ;;  %v6957_v48 = vld [vmem:[#allocation7 + $0x548] sm:$0xff]  ;;  %v7400_v25 = vunpack.c.h.s8.bf16 %v6964_v31 }
 0x4f9   :  { %8090 = vmatprep.subr.bf16.mxu1 %v7355_v49  ;;  %v6959_v49 = vld [vmem:[#allocation7 + $0x558] sm:$0xff]  ;;  %v7381_v6 = vunpack.c.l.s8.bf16 %v6957_v48  ;;  %v7385_v42 = vunpack.c.h.s8.bf16 %v6957_v48 }
 0x4fa   :  { %v7383_v56 = vunpack.c.l.s8.bf16 %v6959_v49  ;;  %v6975_v48 = vld [vmem:[#allocation7 + $0x5d8] sm:$0xff] }
 0x4fb   :  { %7763 = vmatpush1.bf16.msra.mxu0 %v7352_v54  ;;  %v6956_v54 = vld [vmem:[#allocation7 + $0x540] sm:$0xff] }
 0x4fc   :  { %8091 = vmatpush1.bf16.msra.mxu1 %v7354_v58  ;;  %7764 = vmatprep.subr.bf16.mxu0 %v7357_v59  ;;  %v7380_v58 = vunpack.c.l.s8.bf16 %v6956_v54  ;;  %v7382_v59 = vunpack.c.l.s8.bf16 %v6958_v57  ;;  %v7384_v22 = vunpack.c.h.s8.bf16 %v6956_v54  ;;  %v7415_v54 = vunpack.c.l.s8.bf16 %v6975_v48 }
 0x4fd   :  { %8092 = vmatprep.subr.bf16.mxu1 %v7359_v17  ;;  %v7387_v17 = vunpack.c.h.s8.bf16 %v6959_v49 }
 0x4ff   :  { %7765 = vmatpush1.bf16.msra.mxu0 %v7356_v3  ;;  %v7386_v3 = vunpack.c.h.s8.bf16 %v6958_v57 }
 0x500   :  { %8093 = vmatpush1.bf16.msra.mxu1 %v7358_v12  ;;  %7766 = vmatprep.subr.bf16.mxu0 %v7361_v14  ;;  %v6960_v12 = vld [vmem:[#allocation7 + $0x560] sm:$0xff]  ;;  %v7391_v14 = vunpack.c.l.s8.bf16 %v6963_v62 }
 0x501   :  { %8094 = vmatprep.subr.bf16.mxu1 %v7363_v19  ;;  %v6962_v19 = vld [vmem:[#allocation7 + $0x570] sm:$0xff]  ;;  %v7388_v53 = vunpack.c.l.s8.bf16 %v6960_v12 }
 0x502   :  { %v7390_v34 = vunpack.c.l.s8.bf16 %v6962_v19  ;;  %v7394_v9 = vunpack.c.h.s8.bf16 %v6962_v19  ;;  %v7421_v19 = vunpack.c.l.s8.bf16 %v6977_v61 }
 0x503   :  { %7767 = vmatpush1.bf16.msra.mxu0 %v7360_v41  ;;  %v7395_v41 = vunpack.c.h.s8.bf16 %v6963_v62  ;;  %v6631_v62 = vrot.slane %v10295_v2, %v10252_v51 }
 0x504   :  { %8095 = vmatpush1.bf16.msra.mxu1 %v7362_v18  ;;  %7777 = vmatprep.subr.bf16.mxu0 %v7365_v52  ;;  %v6967_v18 = vld [vmem:[#allocation7 + $0x598] sm:$0xff]  ;;  %v7392_v52 = vunpack.c.h.s8.bf16 %v6960_v12  ;;  %v6719_v12 = vrot.slane %v10301_v27, %v10249_v44 }
 0x505   :  { %8105 = vmatprep.subr.bf16.mxu1 %v7367_v10  ;;  %v7397_v10 = vunpack.c.l.s8.bf16 %v6965_v7  ;;  %v7399_v11 = vunpack.c.l.s8.bf16 %v6967_v18  ;;  %v7403_v43 = vunpack.c.h.s8.bf16 %v6967_v18 }
 0x506   :  { %7769 = vmatmul.mubr.bf16.vlgmr.msra.gmra.mrb[16].mxu0 %v7564_v15 }
 0x507   :  { %8097 = vmatmul.mubr.bf16.vlgmr.msra.gmra.mrb[16].mxu1 %v7564_v15  ;;  %7778 = vmatpush1.bf16.msra.mxu0 %v7364_v0  ;;  %v6966_v0 = vld [vmem:[#allocation7 + $0x590] sm:$0xff]  ;;  %v7396_v15 = vunpack.c.l.s8.bf16 %v6964_v31 }
 0x508   :  { %7809 = vmatprep.mubr.bf16.mxu0 %v7567_v23  ;;  %8106 = vmatpush1.bf16.msra.mxu1 %v7366_v33  ;;  %v7398_v33 = vunpack.c.l.s8.bf16 %v6966_v0 }
 0x509   :  { %8137 = vmatprep.mubr.bf16.mxu1 %v7567_v23  ;;  %7779 = vmatprep.subr.bf16.mxu0 %v7369_v63  ;;  %v7401_v63 = vunpack.c.h.s8.bf16 %v6965_v7  ;;  %v6969_v23 = vld [vmem:[#allocation7 + $0x5a8] sm:$0xff] }
 0x50a   :  { %8107 = vmatprep.subr.bf16.mxu1 %v7371_v35  ;;  %v6971_v35 = vld [vmem:[#allocation7 + $0x5b8] sm:$0xff] }
 0x50b   :  { %7780 = vmatpush1.bf16.msra.mxu0 %v7368_v26  ;;  %v7402_v26 = vunpack.c.h.s8.bf16 %v6966_v0  ;;  %v7407_v40 = vunpack.c.l.s8.bf16 %v6971_v35 }
 0x50c   :  { %8108 = vmatpush1.bf16.msra.mxu1 %v7370_v28  ;;  %7781 = vmatprep.subr.bf16.mxu0 %v7373_v30  ;;  %v7405_v28 = vunpack.c.l.s8.bf16 %v6969_v23  ;;  %v6968_v30 = vld [vmem:[#allocation7 + $0x5a0] sm:$0xff] }
 0x50d   :  { %8109 = vmatprep.subr.bf16.mxu1 %v7375_v36  ;;  %v6970_v36 = vld [vmem:[#allocation7 + $0x5b0] sm:$0xff]  ;;  %v7404_v37 = vunpack.c.l.s8.bf16 %v6968_v30  ;;  %v7408_v49 = vunpack.c.h.s8.bf16 %v6968_v30 }
 0x50f   :  { %7782 = vmatpush1.bf16.msra.mxu0 %v7372_v38  ;;  %v7406_v38 = vunpack.c.l.s8.bf16 %v6970_v36 }
 0x510   :  { %8110 = vmatpush1.bf16.msra.mxu1 %v7374_v39  ;;  %7783 = vmatprep.subr.bf16.mxu0 %v7377_v45  ;;  %v7409_v39 = vunpack.c.h.s8.bf16 %v6969_v23  ;;  %v7411_v45 = vunpack.c.h.s8.bf16 %v6971_v35 }
 0x511   :  { %8111 = vmatprep.subr.bf16.mxu1 %v7379_v46  ;;  %v6973_v46 = vld [vmem:[#allocation7 + $0x5c8] sm:$0xff] }
 0x513   :  { %7784 = vmatpush1.bf16.msra.mxu0 %v7376_v50  ;;  %v7410_v50 = vunpack.c.h.s8.bf16 %v6970_v36  ;;  %v6987_v36 = vld [vmem:[#allocation7 + $0x638] sm:$0xff] }
 0x514   :  { %8112 = vmatpush1.bf16.msra.mxu1 %v7378_v1  ;;  %7785 = vmatprep.subr.bf16.mxu0 %v7381_v6  ;;  %v7413_v1 = vunpack.c.l.s8.bf16 %v6973_v46  ;;  %v6972_v6 = vld [vmem:[#allocation7 + $0x5c0] sm:$0xff] }
 0x515   :  { %8113 = vmatprep.subr.bf16.mxu1 %v7383_v56  ;;  %v6974_v56 = vld [vmem:[#allocation7 + $0x5d0] sm:$0xff]  ;;  %v7412_v57 = vunpack.c.l.s8.bf16 %v6972_v6 }
 0x517   :  { %7786 = vmatpush1.bf16.msra.mxu0 %v7380_v58  ;;  %v6619_v58 = vrot.slane %v10295_v2, %v10249_v44  ;;  %v6731_v2 = vrot.slane %v10301_v27, %v10252_v51  ;;  %v6980_v51 = vld [vmem:[#allocation7 + $0x600] sm:$0xff] }
 0x518   :  { %8114 = vmatpush1.bf16.msra.mxu1 %v7382_v59  ;;  %7787 = vmatprep.subr.bf16.mxu0 %v7385_v42  ;;  %v7414_v59 = vunpack.c.l.s8.bf16 %v6974_v56  ;;  %v7417_v42 = vunpack.c.h.s8.bf16 %v6973_v46  ;;  %v7428_v23 = vunpack.c.l.s8.bf16 %v6980_v51  ;;  %v7439_v46 = vunpack.c.l.s8.bf16 %v6987_v36 }
 0x519   :  { %8115 = vmatprep.subr.bf16.mxu1 %v7387_v17  ;;  %v7419_v17 = vunpack.c.h.s8.bf16 %v6975_v48  ;;  %v6986_v48 = vld [vmem:[#allocation7 + $0x630] sm:$0xff] }
 0x51b   :  { %7788 = vmatpush1.bf16.msra.mxu0 %v7384_v22  ;;  %v6979_v22 = vld [vmem:[#allocation7 + $0x5f8] sm:$0xff] }
 0x51c   :  { %8116 = vmatpush1.bf16.msra.mxu1 %v7386_v3  ;;  %7789 = vmatprep.subr.bf16.mxu0 %v7389_v4  ;;  %v7416_v3 = vunpack.c.h.s8.bf16 %v6972_v6  ;;  %v6666_v4 = vmul.f32 %v6619_v58, %v10226_v13  ;;  %v7443_v6 = vunpack.c.h.s8.bf16 %v6987_v36  ;;  %v7442_v58 = vunpack.c.h.s8.bf16 %v6986_v48  ;;  %v7002_v36 = vld [vmem:[#allocation7 + $0x6b0] sm:$0xff] }
 0x51d   :  { %8117 = vmatprep.subr.bf16.mxu1 %v7391_v14  ;;  %v7418_v14 = vunpack.c.h.s8.bf16 %v6974_v56  ;;  %v6991_v56 = vld [vmem:[#allocation7 + $0x658] sm:$0xff] }
 0x51e   :  { %v6766_v18 = vadd.f32 %v6719_v12, %v6666_v4  ;;  %v7451_v4 = vunpack.c.h.s8.bf16 %v6991_v56  ;;  %v6993_v12 = vld [vmem:[#allocation7 + $0x668] sm:$0xff] }
 0x51f   :  { %7790 = vmatpush1.bf16.msra.mxu0 %v7388_v53  ;;  %v6976_v53 = vld [vmem:[#allocation7 + $0x5e0] sm:$0xff] }
 0x520   :  { %8118 = vmatpush1.bf16.msra.mxu1 %v7390_v34  ;;  %7791 = vmatprep.subr.bf16.mxu0 %v7393_v5  ;;  %v7423_v34 = vunpack.c.l.s8.bf16 %v6979_v22  ;;  %v6978_v5 = vld [vmem:[#allocation7 + $0x5f0] sm:$0xff]  ;;  %v7420_v7 = vunpack.c.l.s8.bf16 %v6976_v53  ;;  %v7424_v0 = vunpack.c.h.s8.bf16 %v6976_v53 }
 0x521   :  { %8119 = vmatprep.subr.bf16.mxu1 %v7395_v41  ;;  %v6669_v41 = vmul.f32 %v6631_v62, %v10288_v20  ;;  %v7422_v13 = vunpack.c.l.s8.bf16 %v6978_v5  ;;  %v7426_v20 = vunpack.c.h.s8.bf16 %v6978_v5  ;;  %v6992_v5 = vld [vmem:[#allocation7 + $0x660] sm:$0xff] }
 0x523   :  { %7792 = vmatpush1.bf16.msra.mxu0 %v7392_v52  ;;  %v7425_v52 = vunpack.c.h.s8.bf16 %v6977_v61  ;;  %v6769_v31 = vadd.f32 %v6731_v2, %v6669_v41  ;;  %v6990_v61 = vld [vmem:[#allocation7 + $0x650] sm:$0xff] }
 0x524   :  { %8120 = vmatpush1.bf16.msra.mxu1 %v7394_v9  ;;  %7793 = vmatprep.subr.bf16.mxu0 %v7397_v10  ;;  %v7427_v9 = vunpack.c.h.s8.bf16 %v6979_v22  ;;  %v6981_v10 = vld [vmem:[#allocation7 + $0x608] sm:$0xff]  ;;  %v7446_v22 = vunpack.c.l.s8.bf16 %v6990_v61  ;;  %v7450_v53 = vunpack.c.h.s8.bf16 %v6990_v61  ;;  %v6994_v2 = vld [vmem:[#allocation7 + $0x670] sm:$0xff] }
 0x525   :  { %8121 = vmatprep.subr.bf16.mxu1 %v7399_v11  ;;  %v6983_v11 = vld [vmem:[#allocation7 + $0x618] sm:$0xff] }
 0x526   :  { %v7431_v27 = vunpack.c.l.s8.bf16 %v6983_v11 }
 0x527   :  { %7794 = vmatpush1.bf16.msra.mxu0 %v7396_v15  ;;  %v6782_v15 = vmax.f32 %v6766_v18, 0.0  ;;  %v7454_v18 = vunpack.c.l.s8.bf16 %v6994_v2 }
 0x528   :  { %8122 = vmatpush1.bf16.msra.mxu1 %v7398_v33  ;;  %7795 = vmatprep.subr.bf16.mxu0 %v7401_v63  ;;  %v7429_v33 = vunpack.c.l.s8.bf16 %v6981_v10  ;;  %v6982_v63 = vld [vmem:[#allocation7 + $0x610] sm:$0xff] }
 0x529   :  { %8123 = vmatprep.subr.bf16.mxu1 %v7403_v43  ;;  %v6785_v43 = vmax.f32 %v6769_v31, 0.0  ;;  %v7566_v35 = vpack.c.bf16 %v6782_v15, %v6782_v15  ;;  %v7456_v31 = vunpack.c.h.s8.bf16 %v6992_v5  ;;  %v6996_v15 = vld [vmem:[#allocation7 + $0x680] sm:$0xff] }
 0x52b   :  { %7796 = vmatpush1.bf16.msra.mxu0 %v7400_v25  ;;  %v7430_v25 = vunpack.c.l.s8.bf16 %v6982_v63  ;;  %v7569_v30 = vpack.c.bf16 %v6785_v43, %v6785_v43 }
 0x52c   :  { %8124 = vmatpush1.bf16.msra.mxu1 %v7402_v26  ;;  %7797 = vmatprep.subr.bf16.mxu0 %v7405_v28  ;;  %v7433_v26 = vunpack.c.h.s8.bf16 %v6981_v10  ;;  %v6985_v28 = vld [vmem:[#allocation7 + $0x628] sm:$0xff]  ;;  %v6999_v10 = vld [vmem:[#allocation7 + $0x698] sm:$0xff] }
 0x52d   :  { %8125 = vmatprep.subr.bf16.mxu1 %v7407_v40  ;;  %v7435_v40 = vunpack.c.h.s8.bf16 %v6983_v11  ;;  %v7458_v11 = vunpack.c.h.s8.bf16 %v6994_v2  ;;  %v7467_v43 = vunpack.c.h.s8.bf16 %v6999_v10  ;;  %v7010_v2 = vld [vmem:[#allocation7 + $0x6f0] sm:$0xff] }
 0x52f   :  { %7798 = vmatpush1.bf16.msra.mxu0 %v7404_v37  ;;  %v7432_v37 = vunpack.c.h.s8.bf16 %v6980_v51  ;;  %v7460_v51 = vunpack.c.l.s8.bf16 %v6996_v15 }
 0x530   :  { %8126 = vmatpush1.bf16.msra.mxu1 %v7406_v38  ;;  %7799 = vmatprep.subr.bf16.mxu0 %v7409_v39  ;;  %v7434_v38 = vunpack.c.h.s8.bf16 %v6982_v63  ;;  %v7437_v39 = vunpack.c.l.s8.bf16 %v6985_v28 }
 0x531   :  { %8127 = vmatprep.subr.bf16.mxu1 %v7411_v45  ;;  %v6984_v45 = vld [vmem:[#allocation7 + $0x620] sm:$0xff] }
 0x533   :  { %7800 = vmatpush1.bf16.msra.mxu0 %v7408_v49  ;;  %v7436_v49 = vunpack.c.l.s8.bf16 %v6984_v45 }
 0x534   :  { %8128 = vmatpush1.bf16.msra.mxu1 %v7410_v50  ;;  %7801 = vmatprep.subr.bf16.mxu0 %v7413_v1  ;;  %v7438_v50 = vunpack.c.l.s8.bf16 %v6986_v48  ;;  %v7441_v1 = vunpack.c.h.s8.bf16 %v6985_v28  ;;  %v7007_v48 = vld [vmem:[#allocation7 + $0x6d8] sm:$0xff] }
 0x535   :  { %8129 = vmatprep.subr.bf16.mxu1 %v7415_v54  ;;  %v6989_v54 = vld [vmem:[#allocation7 + $0x648] sm:$0xff]  ;;  %v7483_v61 = vunpack.c.h.s8.bf16 %v7007_v48 }
 0x537   :  { %7802 = vmatpush1.bf16.msra.mxu0 %v7412_v57  ;;  %v7440_v57 = vunpack.c.h.s8.bf16 %v6984_v45 }
 0x538   :  { %8130 = vmatpush1.bf16.msra.mxu1 %v7414_v59  ;;  %7803 = vmatprep.subr.bf16.mxu0 %v7417_v42  ;;  %v7445_v59 = vunpack.c.l.s8.bf16 %v6989_v54  ;;  %v6988_v42 = vld [vmem:[#allocation7 + $0x640] sm:$0xff] }
 0x539   :  { %8131 = vmatprep.subr.bf16.mxu1 %v7419_v17  ;;  %v7447_v17 = vunpack.c.l.s8.bf16 %v6991_v56  ;;  %v7444_v62 = vunpack.c.l.s8.bf16 %v6988_v42  ;;  %v7006_v56 = vld [vmem:[#allocation7 + $0x6d0] sm:$0xff] }
 0x53b   :  { %7804 = vmatpush1.bf16.msra.mxu0 %v7416_v3  ;;  %v7449_v3 = vunpack.c.h.s8.bf16 %v6989_v54  ;;  %v7479_v54 = vunpack.c.l.s8.bf16 %v7007_v48 }
 0x53c   :  { %8132 = vmatpush1.bf16.msra.mxu1 %v7418_v14  ;;  %7805 = vmatprep.subr.bf16.mxu0 %v7421_v19  ;;  %v6995_v14 = vld [vmem:[#allocation7 + $0x678] sm:$0xff]  ;;  %v7448_v19 = vunpack.c.h.s8.bf16 %v6988_v42  ;;  %v7478_v42 = vunpack.c.l.s8.bf16 %v7006_v56 }
 0x53d   :  { %8133 = vmatprep.subr.bf16.mxu1 %v7423_v34  ;;  %v7453_v34 = vunpack.c.l.s8.bf16 %v6993_v12  ;;  %v7455_v41 = vunpack.c.l.s8.bf16 %v6995_v14 }
 0x53f   :  { %7806 = vmatpush1.bf16.msra.mxu0 %v7420_v7  ;;  %v7452_v7 = vunpack.c.l.s8.bf16 %v6992_v5  ;;  %v7008_v5 = vld [vmem:[#allocation7 + $0x6e0] sm:$0xff] }
 0x540   :  { %8134 = vmatpush1.bf16.msra.mxu1 %v7422_v13  ;;  %7807 = vmatprep.subr.bf16.mxu0 %v7425_v52  ;;  %v7457_v13 = vunpack.c.h.s8.bf16 %v6993_v12  ;;  %v7459_v52 = vunpack.c.h.s8.bf16 %v6995_v14  ;;  %v10336_v14 = vld [vmem:[#allocation6 + $0x8] sm:$0xff] }
 0x541   :  { %8135 = vmatprep.subr.bf16.mxu1 %v7427_v9  ;;  %v6997_v9 = vld [vmem:[#allocation7 + $0x688] sm:$0xff] }
 0x542   :  { %v7465_v63 = vunpack.c.h.s8.bf16 %v6997_v9 }
 0x543   :  { %7808 = vmatpush1.bf16.msra.mxu0 %v7424_v0  ;;  %v7461_v0 = vunpack.c.l.s8.bf16 %v6997_v9 }
 0x544   :  { %8136 = vmatpush1.bf16.msra.mxu1 %v7426_v20  ;;  %7818 = vmatprep.subr.bf16.mxu0 %v7429_v33  ;;  %v7463_v20 = vunpack.c.l.s8.bf16 %v6999_v10  ;;  %v6998_v33 = vld [vmem:[#allocation7 + $0x690] sm:$0xff]  ;;  %v7013_v10 = vld [vmem:[#allocation7 + $0x708] sm:$0xff] }
 0x545   :  { %8146 = vmatprep.subr.bf16.mxu1 %v7431_v27  ;;  %v7462_v27 = vunpack.c.l.s8.bf16 %v6998_v33 }
 0x546   :  { %7810 = vmatmul.mubr.bf16.vlgmr.msra.gmra.mrb[16].mxu0 %v7566_v35 }
 0x547   :  { %8138 = vmatmul.mubr.bf16.vlgmr.msra.gmra.mrb[16].mxu1 %v7566_v35  ;;  %7819 = vmatpush1.bf16.msra.mxu0 %v7428_v23  ;;  %v7001_v23 = vld [vmem:[#allocation7 + $0x6a8] sm:$0xff]  ;;  %v7003_v35 = vld [vmem:[#allocation7 + $0x6b8] sm:$0xff] }
 0x548   :  { %7850 = vmatprep.mubr.bf16.mxu0 %v7569_v30  ;;  %8147 = vmatpush1.bf16.msra.mxu1 %v7430_v25  ;;  %v7464_v25 = vunpack.c.h.s8.bf16 %v6996_v15  ;;  %v7469_v28 = vunpack.c.l.s8.bf16 %v7001_v23  ;;  %v7475_v45 = vunpack.c.h.s8.bf16 %v7003_v35 }
 0x549   :  { %8178 = vmatprep.mubr.bf16.mxu1 %v7569_v30  ;;  %7820 = vmatprep.subr.bf16.mxu0 %v7433_v26  ;;  %v7466_v26 = vunpack.c.h.s8.bf16 %v6998_v33  ;;  %v7000_v30 = vld [vmem:[#allocation7 + $0x6a0] sm:$0xff] }
 0x54a   :  { %8148 = vmatprep.subr.bf16.mxu1 %v7435_v40  ;;  %v7471_v40 = vunpack.c.l.s8.bf16 %v7003_v35  ;;  %v7497_v35 = vunpack.c.h.s8.bf16 %v7013_v10 }
 0x54b   :  { %7821 = vmatpush1.bf16.msra.mxu0 %v7432_v37  ;;  %v7468_v37 = vunpack.c.l.s8.bf16 %v7000_v30 }
 0x54c   :  { %8149 = vmatpush1.bf16.msra.mxu1 %v7434_v38  ;;  %7822 = vmatprep.subr.bf16.mxu0 %v7437_v39  ;;  %v7470_v38 = vunpack.c.l.s8.bf16 %v7002_v36  ;;  %v7473_v39 = vunpack.c.h.s8.bf16 %v7001_v23 }
 0x54d   :  { %8150 = vmatprep.subr.bf16.mxu1 %v7439_v46  ;;  %v7005_v46 = vld [vmem:[#allocation7 + $0x6c8] sm:$0xff] }
 0x54f   :  { %7823 = vmatpush1.bf16.msra.mxu0 %v7436_v49  ;;  %v7472_v49 = vunpack.c.h.s8.bf16 %v7000_v30  ;;  %v7019_v30 = vld [vmem:[#allocation7 + $0x738] sm:$0xff] }
 0x550   :  { %8151 = vmatpush1.bf16.msra.mxu1 %v7438_v50  ;;  %7824 = vmatprep.subr.bf16.mxu0 %v7441_v1  ;;  %v7474_v50 = vunpack.c.h.s8.bf16 %v7002_v36  ;;  %v7477_v1 = vunpack.c.l.s8.bf16 %v7005_v46 }
 0x551   :  { %8152 = vmatprep.subr.bf16.mxu1 %v7443_v6  ;;  %v7004_v6 = vld [vmem:[#allocation7 + $0x6c0] sm:$0xff] }
 0x553   :  { %7825 = vmatpush1.bf16.msra.mxu0 %v7440_v57  ;;  %v7476_v57 = vunpack.c.l.s8.bf16 %v7004_v6 }
 0x554   :  { %8153 = vmatpush1.bf16.msra.mxu1 %v7442_v58  ;;  %7826 = vmatprep.subr.bf16.mxu0 %v7445_v59  ;;  %v10329_v58 = vld [vmem:[#allocation4 + $0x8] sm:$0xff] }
 0x555   :  { %8154 = vmatprep.subr.bf16.mxu1 %v7447_v17  ;;  %v6627_v59 = vrot.slane %v10329_v58, %v10265_v55  ;;  %v7481_v17 = vunpack.c.h.s8.bf16 %v7005_v46 }
 0x557   :  { %7827 = vmatpush1.bf16.msra.mxu0 %v7444_v62  ;;  %v7009_v62 = vld [vmem:[#allocation7 + $0x6e8] sm:$0xff]  ;;  %v6668_v12 = vmul.f32 %v6627_v59, %v10284_v47  ;;  %v7484_v47 = vunpack.c.l.s8.bf16 %v7008_v5  ;;  %v7020_v59 = vld [vmem:[#allocation7 + $0x740] sm:$0xff] }
 0x558   :  { %8155 = vmatpush1.bf16.msra.mxu1 %v7446_v22  ;;  %7828 = vmatprep.subr.bf16.mxu0 %v7449_v3  ;;  %v6639_v22 = vrot.slane %v10329_v58, %v10268_v60  ;;  %v7011_v3 = vld [vmem:[#allocation7 + $0x6f8] sm:$0xff] }
 0x559   :  { %8156 = vmatprep.subr.bf16.mxu1 %v7451_v4  ;;  %v7480_v4 = vunpack.c.h.s8.bf16 %v7004_v6  ;;  %v7491_v9 = vunpack.c.h.s8.bf16 %v7011_v3  ;;  %v7023_v6 = vld [vmem:[#allocation7 + $0x758] sm:$0xff] }
 0x55b   :  { %7829 = vmatpush1.bf16.msra.mxu0 %v7448_v19  ;;  %v6727_v19 = vrot.slane %v10336_v14, %v10265_v55  ;;  %v7489_v55 = vunpack.c.h.s8.bf16 %v7009_v62 }
 0x55c   :  { %8157 = vmatpush1.bf16.msra.mxu1 %v7450_v53  ;;  %7830 = vmatprep.subr.bf16.mxu0 %v7453_v34  ;;  %v7482_v53 = vunpack.c.h.s8.bf16 %v7006_v56  ;;  %v7485_v34 = vunpack.c.l.s8.bf16 %v7009_v62 }
 0x55d   :  { %8158 = vmatprep.subr.bf16.mxu1 %v7455_v41  ;;  %v7487_v41 = vunpack.c.l.s8.bf16 %v7011_v3  ;;  %v7515_v3 = vunpack.c.h.s8.bf16 %v7023_v6 }
 0x55f   :  { %7831 = vmatpush1.bf16.msra.mxu0 %v7452_v7  ;;  %v6671_v7 = vmul.f32 %v6639_v22, %v10290_v21  ;;  %v7490_v21 = vunpack.c.h.s8.bf16 %v7010_v2 }
 0x560   :  { %8159 = vmatpush1.bf16.msra.mxu1 %v7454_v18  ;;  %7832 = vmatprep.subr.bf16.mxu0 %v7457_v13  ;;  %v6739_v18 = vrot.slane %v10336_v14, %v10268_v60  ;;  %v6768_v13 = vadd.f32 %v6727_v19, %v6668_v12  ;;  %v7012_v60 = vld [vmem:[#allocation7 + $0x700] sm:$0xff]  ;;  %v7027_v12 = vld [vmem:[#allocation7 + $0x778] sm:$0xff]  ;;  %v7512_v19 = vunpack.c.h.s8.bf16 %v7020_v59 }
 0x561   :  { %8160 = vmatprep.subr.bf16.mxu1 %v7459_v52  ;;  %v7486_v52 = vunpack.c.l.s8.bf16 %v7010_v2  ;;  %v7026_v2 = vld [vmem:[#allocation7 + $0x770] sm:$0xff] }
 0x562   :  { %v6784_v15 = vmax.f32 %v6768_v13, 0.0  ;;  %v7523_v13 = vunpack.c.h.s8.bf16 %v7027_v12 }
 0x563   :  { %7833 = vmatpush1.bf16.msra.mxu0 %v7456_v31  ;;  %v6771_v31 = vadd.f32 %v6739_v18, %v6671_v7  ;;  %v7518_v18 = vunpack.c.l.s8.bf16 %v7026_v2 }
 0x564   :  { %8161 = vmatpush1.bf16.msra.mxu1 %v7458_v11  ;;  %7834 = vmatprep.subr.bf16.mxu0 %v7461_v0  ;;  %v7015_v11 = vld [vmem:[#allocation7 + $0x718] sm:$0xff]  ;;  %v7488_v0 = vunpack.c.h.s8.bf16 %v7008_v5  ;;  %v7024_v5 = vld [vmem:[#allocation7 + $0x760] sm:$0xff] }
 0x565   :  { %8162 = vmatprep.subr.bf16.mxu1 %v7463_v20  ;;  %v7493_v20 = vunpack.c.l.s8.bf16 %v7013_v10  ;;  %v7495_v33 = vunpack.c.l.s8.bf16 %v7015_v11  ;;  %v7516_v7 = vunpack.c.l.s8.bf16 %v7024_v5  ;;  %v7522_v10 = vunpack.c.h.s8.bf16 %v7026_v2  ;;  %v9689_v2 = vld [vmem:[#allocation12 + $0x40] sm:$0xff]  }
 0x567   :  { %7835 = vmatpush1.bf16.msra.mxu0 %v7460_v51  ;;  %v7014_v51 = vld [vmem:[#allocation7 + $0x710] sm:$0xff] }
 0x568   :  { %8163 = vmatpush1.bf16.msra.mxu1 %v7462_v27  ;;  %7836 = vmatprep.subr.bf16.mxu0 %v7465_v63  ;;  %v6787_v27 = vmax.f32 %v6771_v31, 0.0  ;;  %v7492_v63 = vunpack.c.l.s8.bf16 %v7012_v60  ;;  %v7494_v23 = vunpack.c.l.s8.bf16 %v7014_v51  ;;  %v7498_v36 = vunpack.c.h.s8.bf16 %v7014_v51  ;;  %v7033_v51 = vld [vmem:[#allocation7 + $0x7a8] sm:$0xff] }
 0x569   :  { %8164 = vmatprep.subr.bf16.mxu1 %v7467_v43  ;;  %v7568_v43 = vpack.c.bf16 %v6784_v15, %v6784_v15  ;;  %v7030_v15 = vld [vmem:[#allocation7 + $0x790] sm:$0xff] }
 0x56b   :  { %7837 = vmatpush1.bf16.msra.mxu0 %v7464_v25  ;;  %v7017_v25 = vld [vmem:[#allocation7 + $0x728] sm:$0xff] }
 0x56c   :  { %8165 = vmatpush1.bf16.msra.mxu1 %v7466_v26  ;;  %7838 = vmatprep.subr.bf16.mxu0 %v7469_v28  ;;  %v7571_v26 = vpack.c.bf16 %v6787_v27, %v6787_v27  ;;  %v7499_v28 = vunpack.c.h.s8.bf16 %v7015_v11  ;;  %v7028_v11 = vld [vmem:[#allocation7 + $0x780] sm:$0xff]  ;;  %v7035_v27 = vld [vmem:[#allocation7 + $0x7b8] sm:$0xff] }
 0x56d   :  { %8166 = vmatprep.subr.bf16.mxu1 %v7471_v40  ;;  %v7496_v40 = vunpack.c.h.s8.bf16 %v7012_v60 }
 0x56f   :  { %7839 = vmatpush1.bf16.msra.mxu0 %v7468_v37  ;;  %v7501_v37 = vunpack.c.l.s8.bf16 %v7017_v25 }
 0x570   :  { %8167 = vmatpush1.bf16.msra.mxu1 %v7470_v38  ;;  %7840 = vmatprep.subr.bf16.mxu0 %v7473_v39  ;;  %v7016_v38 = vld [vmem:[#allocation7 + $0x720] sm:$0xff]  ;;  %v7503_v39 = vunpack.c.l.s8.bf16 %v7019_v30 }
 0x571   :  { %8168 = vmatprep.subr.bf16.mxu1 %v7475_v45  ;;  %v7018_v45 = vld [vmem:[#allocation7 + $0x730] sm:$0xff]  ;;  %v7500_v46 = vunpack.c.l.s8.bf16 %v7016_v38 }
 0x572   :  { %v7502_v48 = vunpack.c.l.s8.bf16 %v7018_v45  ;;  %v7506_v56 = vunpack.c.h.s8.bf16 %v7018_v45 }
 0x573   :  { %7841 = vmatpush1.bf16.msra.mxu0 %v7472_v49  ;;  %v7505_v49 = vunpack.c.h.s8.bf16 %v7017_v25  ;;  %v7535_v25 = vunpack.c.l.s8.bf16 %v7035_v27 }
 0x574   :  { %8169 = vmatpush1.bf16.msra.mxu1 %v7474_v50  ;;  %7842 = vmatprep.subr.bf16.mxu0 %v7477_v1  ;;  %v7507_v50 = vunpack.c.h.s8.bf16 %v7019_v30  ;;  %v7021_v1 = vld [vmem:[#allocation7 + $0x748] sm:$0xff] }
 0x575   :  { %8170 = vmatprep.subr.bf16.mxu1 %v7479_v54  ;;  %v7504_v54 = vunpack.c.h.s8.bf16 %v7016_v38  ;;  %v7513_v22 = vunpack.c.h.s8.bf16 %v7021_v1  ;;  %v7039_v38 = vld [vmem:[#allocation7 + $0x7d8] sm:$0xff] }
 0x577   :  { %7843 = vmatpush1.bf16.msra.mxu0 %v7476_v57  ;;  %v7509_v57 = vunpack.c.l.s8.bf16 %v7021_v1 }
 0x578   :  { %8171 = vmatpush1.bf16.msra.mxu1 %v7478_v42  ;;  %7844 = vmatprep.subr.bf16.mxu0 %v7481_v17  ;;  %v7511_v42 = vunpack.c.l.s8.bf16 %v7023_v6  ;;  %v7022_v17 = vld [vmem:[#allocation7 + $0x750] sm:$0xff]  ;;  %v6635_v6 = vrot.slane %v10329_v58, %v10293_v8  ;;  %v7040_v58 = vld [vmem:[#allocation7 + $0x7e0] sm:$0xff] }
 0x579   :  { %8172 = vmatprep.subr.bf16.mxu1 %v7483_v61  ;;  %v7508_v61 = vunpack.c.l.s8.bf16 %v7020_v59  ;;  %v7510_v62 = vunpack.c.l.s8.bf16 %v7022_v17  ;;  %v7041_v59 = vld [vmem:[#allocation7 + $0x7e8] sm:$0xff] }
 0x57b   :  { %7845 = vmatpush1.bf16.msra.mxu0 %v7480_v4  ;;  %v7025_v4 = vld [vmem:[#allocation7 + $0x768] sm:$0xff] }
 0x57c   :  { %8173 = vmatpush1.bf16.msra.mxu1 %v7482_v53  ;;  %7846 = vmatprep.subr.bf16.mxu0 %v7485_v34  ;;  %v7514_v53 = vunpack.c.h.s8.bf16 %v7022_v17  ;;  %v7517_v34 = vunpack.c.l.s8.bf16 %v7025_v4 }
 0x57d   :  { %8174 = vmatprep.subr.bf16.mxu1 %v7487_v41  ;;  %v7519_v41 = vunpack.c.l.s8.bf16 %v7027_v12  ;;  %v7042_v12 = vld [vmem:[#allocation7 + $0x7f0] sm:$0xff] }
 0x57f   :  { %7847 = vmatpush1.bf16.msra.mxu0 %v7484_v47  ;;  %v7521_v47 = vunpack.c.h.s8.bf16 %v7025_v4 }
 0x580   :  { %8175 = vmatpush1.bf16.msra.mxu1 %v7486_v52  ;;  %7848 = vmatprep.subr.bf16.mxu0 %v7489_v55  ;;  %v7029_v52 = vld [vmem:[#allocation7 + $0x788] sm:$0xff]  ;;  %v7031_v55 = vld [vmem:[#allocation7 + $0x798] sm:$0xff] }
 0x581   :  { %8176 = vmatprep.subr.bf16.mxu1 %v7491_v9  ;;  %v7520_v9 = vunpack.c.h.s8.bf16 %v7024_v5  ;;  %v7525_v31 = vunpack.c.l.s8.bf16 %v7029_v52  ;;  %v7529_v60 = vunpack.c.h.s8.bf16 %v7029_v52  ;;  %v7553_v5 = vunpack.c.h.s8.bf16 %v7041_v59  ;;  %v9693_v52 = vld [vmem:[#allocation12 + $0x48] sm:$0xff]  }
 0x583   :  { %7849 = vmatpush1.bf16.msra.mxu0 %v7488_v0  ;;  %v7527_v0 = vunpack.c.l.s8.bf16 %v7031_v55 }
 0x584   :  { %8177 = vmatpush1.bf16.msra.mxu1 %v7490_v21  ;;  %7859 = vmatprep.subr.bf16.mxu0 %v7493_v20  ;;  %v7524_v21 = vunpack.c.l.s8.bf16 %v7028_v11  ;;  %v7526_v20 = vunpack.c.l.s8.bf16 %v7030_v15 }
 0x585   :  { %8187 = vmatprep.subr.bf16.mxu1 %v7495_v33  ;;  %v7531_v33 = vunpack.c.h.s8.bf16 %v7031_v55  ;;  %v9694_v55 = vld [vmem:[#allocation12 + $0xc8] sm:$0xff]  }
 0x586   :  { %7851 = vmatmul.mubr.bf16.vlgmr.msra.gmra.mrb[16].mxu0 %v7568_v43 }
 0x587   :  { %8179 = vmatmul.mubr.bf16.vlgmr.msra.gmra.mrb[16].mxu1 %v7568_v43  ;;  %7860 = vmatpush1.bf16.msra.mxu0 %v7492_v63  ;;  %v7528_v63 = vunpack.c.h.s8.bf16 %v7028_v11  ;;  %v7530_v43 = vunpack.c.h.s8.bf16 %v7030_v15  ;;  %v9698_v11 = vld [vmem:[#allocation12 + $0xd0] sm:$0xff]  }
 0x588   :  { %7891 = vmatprep.mubr.bf16.mxu0 %v7571_v26  ;;  %8188 = vmatpush1.bf16.msra.mxu1 %v7494_v23  ;;  %v7533_v23 = vunpack.c.l.s8.bf16 %v7033_v51  ;;  %v9700_v15 = vld [vmem:[#allocation12 + $0x90] sm:$0xff]  }
 0x589   :  { %8219 = vmatprep.mubr.bf16.mxu1 %v7571_v26  ;;  %7861 = vmatprep.subr.bf16.mxu0 %v7497_v35  ;;  %v7032_v35 = vld [vmem:[#allocation7 + $0x7a0] sm:$0xff]  ;;  %v7034_v26 = vld [vmem:[#allocation7 + $0x7b0] sm:$0xff] }
 0x58a   :  { %8189 = vmatprep.subr.bf16.mxu1 %v7499_v28  ;;  %v7532_v28 = vunpack.c.l.s8.bf16 %v7032_v35  ;;  %v7534_v30 = vunpack.c.l.s8.bf16 %v7034_v26  ;;  %v7538_v45 = vunpack.c.h.s8.bf16 %v7034_v26  ;;  %v9712_v26 = vld [vmem:[#allocation12 + $0xa8] sm:$0xff]  }
 0x58b   :  { %7862 = vmatpush1.bf16.msra.mxu0 %v7496_v40  ;;  %v7537_v40 = vunpack.c.h.s8.bf16 %v7033_v51  ;;  %v9705_v51 = vld [vmem:[#allocation12 + $0x60] sm:$0xff]  }
 0x58c   :  { %8190 = vmatpush1.bf16.msra.mxu1 %v7498_v36  ;;  %7863 = vmatprep.subr.bf16.mxu0 %v7501_v37  ;;  %v7539_v36 = vunpack.c.h.s8.bf16 %v7035_v27  ;;  %v7037_v37 = vld [vmem:[#allocation7 + $0x7c8] sm:$0xff] }
 0x58d   :  { %8191 = vmatprep.subr.bf16.mxu1 %v7503_v39  ;;  %v7536_v39 = vunpack.c.h.s8.bf16 %v7032_v35  ;;  %v9706_v27 = vld [vmem:[#allocation12 + $0xe0] sm:$0xff]   ;;  %v9710_v35 = vld [vmem:[#allocation12 + $0xe8] sm:$0xff]  }
 0x58f   :  { %7864 = vmatpush1.bf16.msra.mxu0 %v7500_v46  ;;  %v7541_v46 = vunpack.c.l.s8.bf16 %v7037_v37 }
 0x590   :  { %8192 = vmatpush1.bf16.msra.mxu1 %v7502_v48  ;;  %7865 = vmatprep.subr.bf16.mxu0 %v7505_v49  ;;  %v7036_v48 = vld [vmem:[#allocation7 + $0x7c0] sm:$0xff]  ;;  %v7543_v49 = vunpack.c.l.s8.bf16 %v7039_v38 }
 0x591   :  { %8193 = vmatprep.subr.bf16.mxu1 %v7507_v50  ;;  %v7038_v50 = vld [vmem:[#allocation7 + $0x7d0] sm:$0xff]  ;;  %v7540_v1 = vunpack.c.l.s8.bf16 %v7036_v48  ;;  %v7544_v17 = vunpack.c.h.s8.bf16 %v7036_v48  ;;  %v8254_v48 = vld [vmem:[#allocation10] sm:$0xf] }
 0x593   :  { %7866 = vmatpush1.bf16.msra.mxu0 %v7504_v54  ;;  %v7542_v54 = vunpack.c.l.s8.bf16 %v7038_v50 }
 0x594   :  { %8194 = vmatpush1.bf16.msra.mxu1 %v7506_v56  ;;  %7867 = vmatprep.subr.bf16.mxu0 %v7509_v57  ;;  %v7545_v56 = vunpack.c.h.s8.bf16 %v7037_v37  ;;  %v7547_v57 = vunpack.c.h.s8.bf16 %v7039_v38  ;;  %v9717_v37 = vld [vmem:[#allocation12 + $0x78] sm:$0xff]  }
 0x595   :  { %8195 = vmatprep.subr.bf16.mxu1 %v7511_v42  ;;  %v7043_v42 = vld [vmem:[#allocation7 + $0x7f8] sm:$0xff]  ;;  %v9718_v38 = vld [vmem:[#allocation12 + $0xf8] sm:$0xff]  }
 0x596   :  { %v7551_v4 = vunpack.c.l.s8.bf16 %v7043_v42 }
 0x597   :  { %7868 = vmatpush1.bf16.msra.mxu0 %v7508_v61  ;;  %v6670_v61 = vmul.f32 %v6635_v6, %v10286_v16  ;;  %v7555_v16 = vunpack.c.h.s8.bf16 %v7043_v42  ;;  %v8259_v6 = vrot.slane %v8254_v48, %v10233_v24 }
 0x598   :  { %8196 = vmatpush1.bf16.msra.mxu1 %v7510_v62  ;;  %7869 = vmatprep.subr.bf16.mxu0 %v7513_v22  ;;  %v6735_v62 = vrot.slane %v10336_v14, %v10293_v8  ;;  %v7546_v22 = vunpack.c.h.s8.bf16 %v7038_v50  ;;  %v7554_v14 = vunpack.c.h.s8.bf16 %v7042_v12 }
 0x599   :  { %8197 = vmatprep.subr.bf16.mxu1 %v7515_v3  ;;  %v7549_v3 = vunpack.c.l.s8.bf16 %v7041_v59  ;;  %v8263_v59 = vrot.slane %v8254_v48, %v10204_v32 }
 0x59b   :  { %7870 = vmatpush1.bf16.msra.mxu0 %v7512_v19  ;;  %v7548_v19 = vunpack.c.l.s8.bf16 %v7040_v58 }
 0x59c   :  { %8198 = vmatpush1.bf16.msra.mxu1 %v7514_v53  ;;  %7871 = vmatprep.subr.bf16.mxu0 %v7517_v34  ;;  %v6770_v53 = vadd.f32 %v6735_v62, %v6670_v61  ;;  %v7550_v34 = vunpack.c.l.s8.bf16 %v7042_v12  ;;  %v8271_v62 = vrot.slane %v8254_v48, %v10236_v29 }
 0x59d   :  { %8199 = vmatprep.subr.bf16.mxu1 %v7519_v41  ;;  %v7552_v41 = vunpack.c.h.s8.bf16 %v7040_v58 }
 0x59e   :  { %v6786_v8 = vmax.f32 %v6770_v53, 0.0 }
 0x59f   :  { %7872 = vmatpush1.bf16.msra.mxu0 %v7516_v7  ;;  %v9690_v7 = vld [vmem:[#allocation12 + $0xc0] sm:$0xff]  }
 0x5a0   :  { %8200 = vmatpush1.bf16.msra.mxu1 %v7518_v18  ;;  %7873 = vmatprep.subr.bf16.mxu0 %v7521_v47  ;;  %v9691_v18 = vld [vmem:[#allocation12] sm:$0xff]   ;;  %v7570_v47 = vpack.c.bf16 %v6786_v8, %v6786_v8 }
 0x5a1   :  { %8201 = vmatprep.subr.bf16.mxu1 %v7523_v13  ;;  %v9692_v13 = vld [vmem:[#allocation12 + $0x80] sm:$0xff]  }
 0x5a3   :  { %7874 = vmatpush1.bf16.msra.mxu0 %v7520_v9  ;;  %v9695_v9 = vld [vmem:[#allocation12 + $0x8] sm:$0xff]  }
 0x5a4   :  { %8202 = vmatpush1.bf16.msra.mxu1 %v7522_v10  ;;  %7875 = vmatprep.subr.bf16.mxu0 %v7525_v31  ;;  %v9696_v10 = vld [vmem:[#allocation12 + $0x88] sm:$0xff]   ;;  %v9697_v31 = vld [vmem:[#allocation12 + $0x50] sm:$0xff]  }
 0x5a5   :  { %8203 = vmatprep.subr.bf16.mxu1 %v7527_v0  ;;  %v9699_v0 = vld [vmem:[#allocation12 + $0x10] sm:$0xff]  }
 0x5a7   :  { %7876 = vmatpush1.bf16.msra.mxu0 %v7524_v21  ;;  %v9701_v21 = vld [vmem:[#allocation12 + $0x58] sm:$0xff]  }
 0x5a8   :  { %8204 = vmatpush1.bf16.msra.mxu1 %v7526_v20  ;;  %7877 = vmatprep.subr.bf16.mxu0 %v7529_v60  ;;  %v9702_v20 = vld [vmem:[#allocation12 + $0xd8] sm:$0xff]  }
 0x5a9   :  { %8205 = vmatprep.subr.bf16.mxu1 %v7531_v33  ;;  %v9703_v60 = vld [vmem:[#allocation12 + $0x18] sm:$0xff]  }
 0x5aa   :  { %v9704_v33 = vld [vmem:[#allocation12 + $0x98] sm:$0xff]  }
 0x5ab   :  { %7878 = vmatpush1.bf16.msra.mxu0 %v7528_v63  ;;  %v9707_v63 = vld [vmem:[#allocation12 + $0x20] sm:$0xff]  }
 0x5ac   :  { %8206 = vmatpush1.bf16.msra.mxu1 %v7530_v43  ;;  %7879 = vmatprep.subr.bf16.mxu0 %v7533_v23  ;;  %v9708_v43 = vld [vmem:[#allocation12 + $0xa0] sm:$0xff]   ;;  %v9709_v23 = vld [vmem:[#allocation12 + $0x68] sm:$0xff]  }
 0x5ad   :  { %8207 = vmatprep.subr.bf16.mxu1 %v7535_v25  ;;  %v9711_v25 = vld [vmem:[#allocation12 + $0x28] sm:$0xff]  }
 0x5af   :  { %7880 = vmatpush1.bf16.msra.mxu0 %v7532_v28  ;;  %v9713_v28 = vld [vmem:[#allocation12 + $0x70] sm:$0xff]  }
 0x5b0   :  { %8208 = vmatpush1.bf16.msra.mxu1 %v7534_v30  ;;  %7881 = vmatprep.subr.bf16.mxu0 %v7537_v40  ;;  %v9714_v30 = vld [vmem:[#allocation12 + $0xf0] sm:$0xff]  }
 0x5b1   :  { %8209 = vmatprep.subr.bf16.mxu1 %v7539_v36  ;;  %v9715_v40 = vld [vmem:[#allocation12 + $0x30] sm:$0xff]  }
 0x5b2   :  { %v9716_v36 = vld [vmem:[#allocation12 + $0xb0] sm:$0xff]  }
 0x5b3   :  { %7882 = vmatpush1.bf16.msra.mxu0 %v7536_v39  ;;  %v9719_v39 = vld [vmem:[#allocation12 + $0x38] sm:$0xff]  }
 0x5b4   :  { %8210 = vmatpush1.bf16.msra.mxu1 %v7538_v45  ;;  %7883 = vmatprep.subr.bf16.mxu0 %v7541_v46  ;;  %v9720_v45 = vld [vmem:[#allocation12 + $0xb8] sm:$0xff]  }
 0x5b5   :  { %8211 = vmatprep.subr.bf16.mxu1 %v7543_v49  ;;  %v8228_v46 = vld [vmem:[#allocation9] sm:$0xf] }
 0x5b6   :  { %v8233_v49 = vrot.slane %v8228_v46, %v10233_v24  ;;  %v8241_v50 = vrot.slane %v8228_v46, %v10249_v44 }
 0x5b7   :  { %7884 = vmatpush1.bf16.msra.mxu0 %v7540_v1  ;;  %v8237_v1 = vrot.slane %v8228_v46, %v10204_v32 }
 0x5b8   :  { %8212 = vmatpush1.bf16.msra.mxu1 %v7542_v54  ;;  %7885 = vmatprep.subr.bf16.mxu0 %v7545_v56  ;;  %v8245_v54 = vrot.slane %v8228_v46, %v10236_v29 }
 0x5b9   :  { %8213 = vmatprep.subr.bf16.mxu1 %v7547_v57  ;;  %v8267_v57 = vrot.slane %v8254_v48, %v10249_v44 }
 0x5bb   :  { %7886 = vmatpush1.bf16.msra.mxu0 %v7544_v17 }
 0x5bc   :  { %8214 = vmatpush1.bf16.msra.mxu1 %v7546_v22  ;;  %7887 = vmatprep.subr.bf16.mxu0 %v7549_v3 }
 0x5bd   :  { %8215 = vmatprep.subr.bf16.mxu1 %v7551_v4 }
 0x5bf   :  { %7888 = vmatpush1.bf16.msra.mxu0 %v7548_v19 }
 0x5c0   :  { %8216 = vmatpush1.bf16.msra.mxu1 %v7550_v34  ;;  %7889 = vmatprep.subr.bf16.mxu0 %v7553_v5 }
 0x5c1   :  { %8217 = vmatprep.subr.bf16.mxu1 %v7555_v16 }
 0x5c3   :  { %7890 = vmatpush1.bf16.msra.mxu0 %v7552_v41 }
 0x5c4   :  { %8218 = vmatpush1.bf16.msra.mxu1 %v7554_v14  ;;  %9473 = vmatprep.subr.bf16.mxu0 %v9689_v2 }
 0x5c5   :  { %9495 = vmatprep.subr.bf16.mxu1 %v9690_v7 }
 0x5c6   :  { %7892 = vmatmul.mubr.bf16.vlgmr.msra.gmra.mrb[16].mxu0 %v7570_v47 }
 0x5c7   :  { %8220 = vmatmul.mubr.bf16.vlgmr.msra.gmra.mrb[16].mxu1 %v7570_v47  ;;  %9474 = vmatpush3.bf16.msra.mxu0 %v9691_v18 }
 0x5c8   :  { %9496 = vmatpush3.bf16.msra.mxu1 %v9692_v13  ;;  %9475 = vmatprep.subr.bf16.mxu0 %v9693_v52  ;;  %v9440_v52 = vld [vmem:[#allocation13] ss:$0 sm:$0xff] }
 0x5c9   :  { %9497 = vmatprep.subr.bf16.mxu1 %v9694_v55 }
 0x5cb   :  { %9476 = vmatpush3.bf16.msra.mxu0 %v9695_v9 }
 0x5cc   :  { %9498 = vmatpush3.bf16.msra.mxu1 %v9696_v10  ;;  %9477 = vmatprep.subr.bf16.mxu0 %v9697_v31 }
 0x5cd   :  { %9499 = vmatprep.subr.bf16.mxu1 %v9698_v11 }
 0x5cf   :  { %9478 = vmatpush3.bf16.msra.mxu0 %v9699_v0 }
 0x5d0   :  { %9500 = vmatpush3.bf16.msra.mxu1 %v9700_v15  ;;  %9479 = vmatprep.subr.bf16.mxu0 %v9701_v21 }
 0x5d1   :  { %9501 = vmatprep.subr.bf16.mxu1 %v9702_v20 }
 0x5d3   :  { %9480 = vmatpush3.bf16.msra.mxu0 %v9703_v60 }
 0x5d4   :  { %9502 = vmatpush3.bf16.msra.mxu1 %v9704_v33  ;;  %9481 = vmatprep.subr.bf16.mxu0 %v9705_v51 }
 0x5d5   :  { %9503 = vmatprep.subr.bf16.mxu1 %v9706_v27 }
 0x5d7   :  { %9482 = vmatpush3.bf16.msra.mxu0 %v9707_v63 }
 0x5d8   :  { %9504 = vmatpush3.bf16.msra.mxu1 %v9708_v43  ;;  %9483 = vmatprep.subr.bf16.mxu0 %v9709_v23 }
 0x5d9   :  { %9505 = vmatprep.subr.bf16.mxu1 %v9710_v35 }
 0x5db   :  { %9484 = vmatpush3.bf16.msra.mxu0 %v9711_v25 }
 0x5dc   :  { %9506 = vmatpush3.bf16.msra.mxu1 %v9712_v26  ;;  %9485 = vmatprep.subr.bf16.mxu0 %v9713_v28 }
 0x5dd   :  { %9507 = vmatprep.subr.bf16.mxu1 %v9714_v30 }
 0x5df   :  { %9486 = vmatpush3.bf16.msra.mxu0 %v9715_v40 }
 0x5e0   :  { %9508 = vmatpush3.bf16.msra.mxu1 %v9716_v36  ;;  %9487 = vmatprep.subr.bf16.mxu0 %v9717_v37 }
 0x5e1   :  { %9509 = vmatprep.subr.bf16.mxu1 %v9718_v38 }
 0x5e3   :  { %9488 = vmatpush3.bf16.msra.mxu0 %v9719_v39 }
 0x5e4   :  { %9510 = vmatpush3.bf16.msra.mxu1 %v9720_v45 }
 0x699   :  { %v7893_v56 = vpop.f32.mrb[16].mxu0 }
 0x69a   :  { %v8250_v42 = vmul.f32 %v8233_v49, %v7893_v56  ;;  %v8221_v17 = vpop.f32.mrb[16].mxu1  ;;  %v7895_v61 = vpop.f32.mrb[17].mxu0 }
 0x69b   :  { %v8252_v22 = vmul.f32 %v8241_v50, %v8221_v17  ;;  %v8251_v3 = vmul.f32 %v8237_v1, %v7895_v61  ;;  %v8223_v58 = vpop.f32.mrb[17].mxu1  ;;  %v7897_v4 = vpop.f32.mrb[18].mxu0 }
 0x69c   :  { %v8276_v12 = vadd.f32 %v8259_v6, %v8250_v42  ;;  %v8253_v19 = vmul.f32 %v8245_v54, %v8223_v58  ;;  %v8225_v53 = vpop.f32.mrb[18].mxu1  ;;  %v7898_v24 = vpop.f32.mrb[19].mxu0 }
 0x69d   :  { %v8278_v34 = vadd.f32 %v8267_v57, %v8252_v22  ;;  %v8277_v5 = vadd.f32 %v8263_v59, %v8251_v3  ;;  %v8226_v16 = vpop.f32.mrb[19].mxu1 }
 0x69e   :  { %v8280_v41 = vmax.f32 %v8276_v12, 0.0  ;;  %v8279_v44 = vadd.f32 %v8271_v62, %v8253_v19 }
 0x69f   :  { %v8282_v8 = vmax.f32 %v8278_v34, 0.0  ;;  %v8281_v32 = vmax.f32 %v8277_v5, 0.0 }
 0x6a0   :  { %v8283_v14 = vmax.f32 %v8279_v44, 0.0  ;;  %v8284_v7 = vpack.c.bf16 %v8280_v41, %v8280_v41 }
 0x6a1   :  { %v8285_v2 = vpack.c.bf16 %v8281_v32, %v8281_v32  ;;  %v8286_v29 = vpack.c.bf16 %v8282_v8, %v8282_v8 }
 0x6a2   :  { %v8287_v18 = vpack.c.bf16 %v8283_v14, %v8283_v14 }
 0x6a3   :  { %8583 = vmatprep.mubr.bf16.mxu0 %v8285_v2 }
 0x6a4   :  { %8623 = vmatprep.mubr.bf16.mxu1 %v8287_v18  ;;  %8584 = vmatmul.mubr.bf16.vlgmr.msra.gmra.mrb[20].mxu0 %v8284_v7 }
 0x6a5   :  { %8624 = vmatmul.mubr.bf16.vlgmr.msra.gmra.mrb[20].mxu1 %v8286_v29 }
 0x777   :  { %v9489_v47 = vpop.f32.mrb[20].mxu0 }
 0x778   :  { %v9511_v13 = vpop.f32.mrb[20].mxu1  ;;  %v9490_v55 = vpop.f32.mrb[21].mxu0 }
 0x779   :  { %v9491_v9 = vadd.f32 %v9490_v55, %v9489_v47  ;;  %v9512_v10 = vpop.f32.mrb[21].mxu1  ;;  %v9492_v31 = vpop.f32.mrb[22].mxu0 }
 0x77a   :  { %v9513_v11 = vadd.f32 %v9512_v10, %v9511_v13  ;;  %v9514_v0 = vpop.f32.mrb[22].mxu1  ;;  %v9493_v15 = vpop.f32.mrb[23].mxu0 }
 0x77b   :  { %v8586_v21 = vadd.f32 %v9491_v9, %v9440_v52  ;;  %v9515_v20 = vpop.f32.mrb[23].mxu1 }
 0x77d   :  { %v8626_v60 = vadd.f32 %v9513_v11, %v8586_v21 }
 0x77f   :  { %8631 = vst [vmem:[%s10368_s9] sm:$0xff] %v8626_v60 }
 0x780   :  { %8636 = vsyncpa [#allocation3], 1 }
 0x781   :  { %8637 = vsyncpa [#allocation5], 1 }
 0x782   :  { %8638 = vsyncpa [#allocation8], 1 }
 0x783   :  { %8639 = vsyncpa [#allocation11], 1 }
 0x784   :  { %8640 = vsyncpa [#allocation14], 1 }

</bundles_post_ra>
